<compile_context>
chip_gen: v7x
topology: tpu7x:2x2x1
jax: 0.10.0
libtpu: 0.0.40
codegen_flags: <defaults>
</compile_context>

<pallas_src>
import numpy as np
import jax
import jax.numpy as jnp
from jax.experimental import pallas as pl
from jax.experimental.pallas import tpu as pltpu


# ---------------------------------------------------------------------------
# Generic single-block pallas_call helper.
# Every operand / result at these shapes is a few-hundred KiB at most, so each
# fused kernel runs as one grid step with full-array VMEM blocks.
# ---------------------------------------------------------------------------

def _pallas_full(kernel, out_shape, *arrays):
    return pl.pallas_call(
        kernel,
        out_shape=out_shape,
        grid=(1,),
        in_specs=[pl.BlockSpec(a.shape, lambda i, nd=a.ndim: (0,) * nd)
                  for a in arrays],
        out_specs=pl.BlockSpec(out_shape.shape,
                               lambda i, nd=len(out_shape.shape): (0,) * nd),
        compiler_params=pltpu.CompilerParams(
            dimension_semantics=("arbitrary",)),
    )(*arrays)


# ---------------------------------------------------------------------------
# Kernels
# ---------------------------------------------------------------------------

def _conv_pool_kernel(a_ref, w_ref, s_ref, sh_ref, o_ref):
    """im2col matmul + folded BN + ReLU + fused MaxPool1d(2).

    a_ref rows [0 : half)  = im2col rows of EVEN output positions,
    a_ref rows [half : 2h) = im2col rows of ODD  output positions,
    so the pool is an aligned half/half elementwise max (no strided stores).
    """
    y = jnp.dot(a_ref[...], w_ref[...], preferred_element_type=jnp.float32)
    y = jnp.maximum(y * s_ref[...] + sh_ref[...], 0.0)
    half = o_ref.shape[0]
    o_ref[...] = jnp.maximum(y[:half, :], y[half:, :])


def _conv_kernel(a_ref, w_ref, s_ref, sh_ref, o_ref):
    """im2col matmul + folded BN + ReLU (no pooling)."""
    y = jnp.dot(a_ref[...], w_ref[...], preferred_element_type=jnp.float32)
    o_ref[...] = jnp.maximum(y * s_ref[...] + sh_ref[...], 0.0)


def _encoder_layer_kernel(x_ref, mask_ref,
                          wq_ref, bq_ref, wk_ref, bk_ref, wv_ref, bv_ref,
                          wo_ref, bo_ref, ln1g_ref, ln1b_ref,
                          w1_ref, b1_ref, w2_ref, b2_ref,
                          ln2g_ref, ln2b_ref, o_ref):
    """One full post-norm nn.TransformerEncoderLayer (nhead=1, relu FFN)."""
    x = x_ref[...]                                   # (N*L, D) f32
    xb = x.astype(jnp.bfloat16)

    # ---- single-head self-attention ----
    q = jnp.dot(xb, wq_ref[...], preferred_element_type=jnp.float32) + bq_ref[...]
    k = jnp.dot(xb, wk_ref[...], preferred_element_type=jnp.float32) + bk_ref[...]
    v = jnp.dot(xb, wv_ref[...], preferred_element_type=jnp.float32) + bv_ref[...]

    scale = 1.0 / float(np.sqrt(q.shape[-1]))
    s = jax.lax.dot_general(q, k, (((1,), (1,)), ((), ())),
                            preferred_element_type=jnp.float32) * scale
    s = s + mask_ref[...]          # block-diagonal mask keeps the 2 samples apart
    m = jnp.max(s, axis=-1, keepdims=True)
    p = jnp.exp(s - m)
    p = p * pl.reciprocal(jnp.sum(p, axis=-1, keepdims=True), approx=True)
    attn = jnp.dot(p, v, preferred_element_type=jnp.float32)
    attn = jnp.dot(attn.astype(jnp.bfloat16), wo_ref[...],
                   preferred_element_type=jnp.float32) + bo_ref[...]

    # ---- add + LayerNorm (post-norm) ----
    h = x + attn
    mu = jnp.mean(h, axis=-1, keepdims=True)
    var = jnp.mean((h - mu) ** 2, axis=-1, keepdims=True)
    h = (h - mu) * jax.lax.rsqrt(var + 1e-5) * ln1g_ref[...] + ln1b_ref[...]

    # ---- feed-forward 64 -> 128 -> 64 with ReLU ----
    hb = h.astype(jnp.bfloat16)
    f = jnp.maximum(
        jnp.dot(hb, w1_ref[...], preferred_element_type=jnp.float32) + b1_ref[...],
        0.0)
    f = jnp.dot(f.astype(jnp.bfloat16), w2_ref[...],
                preferred_element_type=jnp.float32) + b2_ref[...]

    # ---- add + LayerNorm ----
    h2 = h + f
    mu2 = jnp.mean(h2, axis=-1, keepdims=True)
    var2 = jnp.mean((h2 - mu2) ** 2, axis=-1, keepdims=True)
    o_ref[...] = (h2 - mu2) * jax.lax.rsqrt(var2 + 1e-5) * ln2g_ref[...] + ln2b_ref[...]


def _head_kernel(h_ref, pm_ref, g_ref, b_ref,
                 w1_ref, b1_ref, w2_ref, b2_ref, w3_ref, b3_ref, o_ref):
    """Final encoder LayerNorm + per-sample mean pool + 3-layer MLP head."""
    h = h_ref[...]                                   # (N*L, D) f32
    mu = jnp.mean(h, axis=-1, keepdims=True)
    var = jnp.mean((h - mu) ** 2, axis=-1, keepdims=True)
    hn = (h - mu) * jax.lax.rsqrt(var + 1e-5) * g_ref[...] + b_ref[...]

    # avg_pool1d over the full sequence, expressed as (N, N*L) @ (N*L, D)
    pooled = jnp.dot(pm_ref[...], hn, preferred_element_type=jnp.float32)

    y = jnp.maximum(jnp.dot(pooled, w1_ref[...],
                            preferred_element_type=jnp.float32) + b1_ref[...], 0.0)
    y = jnp.maximum(jnp.dot(y, w2_ref[...],
                            preferred_element_type=jnp.float32) + b2_ref[...], 0.0)
    o_ref[...] = jnp.dot(y, w3_ref[...],
                         preferred_element_type=jnp.float32) + b3_ref[...]


# ---------------------------------------------------------------------------
# Wrappers (layout plumbing in plain JAX, hot path in Pallas)
# ---------------------------------------------------------------------------

def conv_block(x_nlc, w_flat, scale, shift, pool):
    """Conv1d(k=32, pad=16) + folded eval BatchNorm + ReLU (+ MaxPool1d(2)).

    x_nlc  : (N, L_in, C_in) f32 (NLC layout)
    w_flat : (K*C_in, C_out) bf16, tap-major im2col weight
    scale, shift : (1, C_out) f32 folded BN parameters
    """
    N, L_in, C_in = x_nlc.shape
    K, pad = 32, 16
    C_out = w_flat.shape[1]
    L_out = L_in + 2 * pad - K + 1          # = L_in + 1

    xp = jnp.pad(x_nlc.astype(jnp.bfloat16), ((0, 0), (pad, pad), (0, 0)))
    # im2col (built by XLA): cols[n, l, k*C_in + c] = xp[n, l + k, c]
    cols = jnp.concatenate([xp[:, k:k + L_out, :] for k in range(K)], axis=-1)
    KC = K * C_in

    if pool:
        Lp = L_out // 2                      # MaxPool1d(2) drops the odd tail row
        a = jnp.concatenate([cols[:, 0:2 * Lp:2, :],     # even output positions
                             cols[:, 1:2 * Lp:2, :]],    # odd  output positions
                            axis=0).reshape(2 * N * Lp, KC)
        out_rows, L_ret, kern = N * Lp, Lp, _conv_pool_kernel
    else:
        a = cols.reshape(N * L_out, KC)
        out_rows, L_ret, kern = N * L_out, L_out, _conv_kernel

    y = _pallas_full(kern,
                     jax.ShapeDtypeStruct((out_rows, C_out), jnp.float32),
                     a, w_flat, scale, shift)
    return y.reshape(N, L_ret, C_out)


def encoder_layer(h_flat, attn_mask, p):
    NL, D = h_flat.shape
    return _pallas_full(
        _encoder_layer_kernel,
        jax.ShapeDtypeStruct((NL, D), jnp.float32),
        h_flat, attn_mask,
        p["wq"], p["bq"], p["wk"], p["bk"], p["wv"], p["bv"],
        p["wo"], p["bo"], p["ln1_g"], p["ln1_b"],
        p["w1"], p["b1"], p["w2"], p["b2"], p["ln2_g"], p["ln2_b"])


def head(h_flat, pool_mat, params):
    n_out = params["p_w3"].shape[1]
    return _pallas_full(
        _head_kernel,
        jax.ShapeDtypeStruct((pool_mat.shape[0], n_out), jnp.float32),
        h_flat, pool_mat,
        params["final_ln_g"], params["final_ln_b"],
        params["p_w1"], params["p_b1"],
        params["p_w2"], params["p_b2"],
        params["p_w3"], params["p_b3"])


# ---------------------------------------------------------------------------
# Parameter initialization (deterministic, synthetic)
# ---------------------------------------------------------------------------

def init_params(key):
    keys = iter(jax.random.split(key, 128))

    def nrm(shape, s):
        return jax.random.normal(next(keys), shape, jnp.float32) * s

    eps = 1e-5
    K = 32
    convs = []
    for i in range(10):
        c_in = 1 if i == 0 else 64
        fan_in = c_in * K
        w = nrm((K, c_in, 64), 1.0 / np.sqrt(fan_in))          # (K, C_in, C_out)
        b = nrm((64,), 0.02)
        gamma = 1.0 + nrm((64,), 0.1)
        beta = nrm((64,), 0.1)
        # eval-mode BatchNorm (running_mean=0, running_var=1) folded with bias
        scale = gamma / jnp.sqrt(1.0 + eps)
        shift = beta + scale * b
        convs.append(dict(
            w=w.reshape(K * c_in, 64).astype(jnp.bfloat16),    # im2col weight
            scale=scale.reshape(1, 64),
            shift=shift.reshape(1, 64)))

    d = 64
    enc_layers = []
    for _ in range(2):
        enc_layers.append(dict(
            wq=nrm((d, d), 1 / np.sqrt(d)).astype(jnp.bfloat16), bq=nrm((1, d), 0.02),
            wk=nrm((d, d), 1 / np.sqrt(d)).astype(jnp.bfloat16), bk=nrm((1, d), 0.02),
            wv=nrm((d, d), 1 / np.sqrt(d)).astype(jnp.bfloat16), bv=nrm((1, d), 0.02),
            wo=nrm((d, d), 1 / np.sqrt(d)).astype(jnp.bfloat16), bo=nrm((1, d), 0.02),
            w1=nrm((d, 128), 1 / np.sqrt(d)).astype(jnp.bfloat16), b1=nrm((1, 128), 0.02),
            w2=nrm((128, d), 1 / np.sqrt(128)).astype(jnp.bfloat16), b2=nrm((1, d), 0.02),
            ln1_g=1.0 + nrm((1, d), 0.1), ln1_b=nrm((1, d), 0.1),
            ln2_g=1.0 + nrm((1, d), 0.1), ln2_b=nrm((1, d), 0.1),
        ))

    return dict(
        convs=convs,
        enc_layers=enc_layers,
        final_ln_g=1.0 + nrm((1, d), 0.1), final_ln_b=nrm((1, d), 0.1),
        p_w1=nrm((64, 64), 1 / 8.0), p_b1=nrm((1, 64), 0.02),
        p_w2=nrm((64, 32), 1 / 8.0), p_b2=nrm((1, 32), 0.02),
        p_w3=nrm((32, 2), 1 / np.sqrt(32)), p_b3=nrm((1, 2), 0.02),
    )


# ---------------------------------------------------------------------------
# Full forward pass
# ---------------------------------------------------------------------------

def transformer_forward(params, x_ncl):
    # x_ncl: (N, 1, L) PyTorch NCL -> NLC for the kernels.
    x = jnp.transpose(x_ncl, (0, 2, 1)).astype(jnp.float32)    # (N, L, 1)

    # ----- CNN front-end: 10 x [Conv1d + BN + ReLU (+ MaxPool1d(2) for 1..4)] --
    # Dropout(p=0.3): identity in inference mode.
    for i, cp in enumerate(params["convs"]):
        x = conv_block(x, cp["w"], cp["scale"], cp["shift"], pool=(i < 4))

    N, L, D = x.shape                                          # (2, 10, 64)
    h = x.reshape(N * L, D)

    # Block-diagonal additive attention mask: 0 within a sample, -1e30 across,
    # so both samples' attention runs in one (N*L, N*L) score matrix.
    sid = np.arange(N * L) // L
    attn_mask = jnp.asarray(
        np.where(sid[:, None] == sid[None, :], 0.0, -1e30).astype(np.float32))
    # Per-sample mean pooling expressed as a (N, N*L) matmul.
    pool_mat = jnp.asarray(
        np.repeat(np.eye(N, dtype=np.float32), L, axis=1) / float(L))

    # ----- TransformerEncoder: 2 post-norm layers, each one fused kernel -----
    for lp in params["enc_layers"]:
        h = encoder_layer(h, attn_mask, lp)

    # ----- final LayerNorm + avg_pool1d + MLP head, one fused kernel ---------
    # Dropout(p=0.5): identity in inference mode.
    return head(h, pool_mat, params)                           # (N, 2)


# ---------------------------------------------------------------------------

if __name__ == "__main__":
    key = jax.random.PRNGKey(0)
    k_params, k_x = jax.random.split(key)
    params = init_params(k_params)

    # input matches PyTorch Conv1d(in_channels=1): (batch=2, channels=1, length=64)
    x = jax.random.normal(k_x, (2, 1, 64), jnp.float32)

    fwd = jax.jit(transformer_forward)
    out = jax.block_until_ready(fwd(params, x))

    assert out.shape == (2, 2), out.shape
    assert bool(jnp.all(jnp.isfinite(out)))
    print("KERNEL_OK")
</pallas_src>

<mosaic_0001>
module attributes {stable_mosaic.version = 11 : i64} {
  func.func @_conv_pool_kernel(%arg0: i32, %arg1: memref<128x32xbf16, #tpu.memory_space<vmem>>, %arg2: memref<32x64xbf16, #tpu.memory_space<vmem>>, %arg3: memref<1x64xf32, #tpu.memory_space<vmem>>, %arg4: memref<1x64xf32, #tpu.memory_space<vmem>>, %arg5: memref<64x64xf32, #tpu.memory_space<vmem>>) attributes {dimension_semantics = [#tpu.dimension_semantics<arbitrary>], iteration_bounds = array<i64: 1>, scalar_prefetch = 0 : i64, scratch_operands = 0 : i64, tpu.core_type = #tpu.core_type<tc>, window_params = [{pipeline_mode = #tpu.pipeline_mode<synchronous>, transform_indices = @transform_0, window_bounds = array<i64: 128, 32>}, {pipeline_mode = #tpu.pipeline_mode<synchronous>, transform_indices = @transform_1, window_bounds = array<i64: 32, 64>}, {pipeline_mode = #tpu.pipeline_mode<synchronous>, transform_indices = @transform_2, window_bounds = array<i64: 1, 64>}, {pipeline_mode = #tpu.pipeline_mode<synchronous>, transform_indices = @transform_3, window_bounds = array<i64: 1, 64>}, {pipeline_mode = #tpu.pipeline_mode<synchronous>, transform_indices = @transform_4, window_bounds = array<i64: 64, 64>}]} {
    %c0 = arith.constant 0 : index
    %c0_0 = arith.constant 0 : index
    %0 = vector.load %arg1[%c0, %c0_0] : memref<128x32xbf16, #tpu.memory_space<vmem>>, vector<128x32xbf16>
    %c0_1 = arith.constant 0 : index
    %c0_2 = arith.constant 0 : index
    %1 = vector.load %arg2[%c0_1, %c0_2] : memref<32x64xbf16, #tpu.memory_space<vmem>>, vector<32x64xbf16>
    %cst = arith.constant dense<0.000000e+00> : vector<128x64xf32>
    %2 = tpu.matmul %0, %1, %cst {dimension_numbers = #tpu.dot_dimension_numbers<[1], [0], [0], [1], [0, 0, 1, 1], [], []>} : vector<128x32xbf16>, vector<32x64xbf16>, vector<128x64xf32> -> vector<128x64xf32>
    %c0_3 = arith.constant 0 : index
    %c0_4 = arith.constant 0 : index
    %3 = vector.load %arg3[%c0_3, %c0_4] : memref<1x64xf32, #tpu.memory_space<vmem>>, vector<1x64xf32>
    %4 = vector.broadcast %3 : vector<1x64xf32> to vector<128x64xf32>
    %5 = arith.mulf %2, %4 : vector<128x64xf32>
    %c0_5 = arith.constant 0 : index
    %c0_6 = arith.constant 0 : index
    %6 = vector.load %arg4[%c0_5, %c0_6] : memref<1x64xf32, #tpu.memory_space<vmem>>, vector<1x64xf32>
    %7 = vector.broadcast %6 : vector<1x64xf32> to vector<128x64xf32>
    %8 = arith.addf %5, %7 : vector<128x64xf32>
    %cst_7 = arith.constant 0.000000e+00 : f32
    %9 = vector.broadcast %cst_7 : f32 to vector<128x64xf32>
    %10 = arith.maximumf %8, %9 : vector<128x64xf32>
    %11 = vector.extract_strided_slice %10 {offsets = [0, 0], sizes = [64, 64], strides = [1, 1]} : vector<128x64xf32> to vector<64x64xf32>
    %12 = vector.extract_strided_slice %10 {offsets = [64, 0], sizes = [64, 64], strides = [1, 1]} : vector<128x64xf32> to vector<64x64xf32>
    %13 = arith.maximumf %11, %12 : vector<64x64xf32>
    %c0_8 = arith.constant 0 : index
    %c0_9 = arith.constant 0 : index
    %14 = vector.load %arg5[%c0_8, %c0_9] : memref<64x64xf32, #tpu.memory_space<vmem>>, vector<64x64xf32>
    tpu.vector_store %arg5[%c0_8, %c0_9], %13 {strides = array<i32>} : memref<64x64xf32, #tpu.memory_space<vmem>>, vector<64x64xf32>,
    return
  }
  func.func @transform_0(%arg0: i32) -> (i32, i32) {
    %c0_i32 = arith.constant 0 : i32
    %c0_i32_0 = arith.constant 0 : i32
    %c0_i32_1 = arith.constant 0 : i32
    return %c0_i32, %c0_i32_0 : i32, i32
  }
  func.func @transform_1(%arg0: i32) -> (i32, i32) {
    %c0_i32 = arith.constant 0 : i32
    %c0_i32_0 = arith.constant 0 : i32
    %c0_i32_1 = arith.constant 0 : i32
    return %c0_i32, %c0_i32_0 : i32, i32
  }
  func.func @transform_2(%arg0: i32) -> (i32, i32) {
    %c0_i32 = arith.constant 0 : i32
    %c0_i32_0 = arith.constant 0 : i32
    %c0_i32_1 = arith.constant 0 : i32
    return %c0_i32, %c0_i32_0 : i32, i32
  }
  func.func @transform_3(%arg0: i32) -> (i32, i32) {
    %c0_i32 = arith.constant 0 : i32
    %c0_i32_0 = arith.constant 0 : i32
    %c0_i32_1 = arith.constant 0 : i32
    return %c0_i32, %c0_i32_0 : i32, i32
  }
  func.func @transform_4(%arg0: i32) -> (i32, i32) {
    %c0_i32 = arith.constant 0 : i32
    %c0_i32_0 = arith.constant 0 : i32
    %c0_i32_1 = arith.constant 0 : i32
    return %c0_i32, %c0_i32_0 : i32, i32
  }
}

module attributes {stable_mosaic.version = 11 : i64} {
  func.func @_conv_pool_kernel(%arg0: i32, %arg1: memref<64x2048xbf16, #tpu.memory_space<vmem>>, %arg2: memref<2048x64xbf16, #tpu.memory_space<vmem>>, %arg3: memref<1x64xf32, #tpu.memory_space<vmem>>, %arg4: memref<1x64xf32, #tpu.memory_space<vmem>>, %arg5: memref<32x64xf32, #tpu.memory_space<vmem>>) attributes {dimension_semantics = [#tpu.dimension_semantics<arbitrary>], iteration_bounds = array<i64: 1>, scalar_prefetch = 0 : i64, scratch_operands = 0 : i64, tpu.core_type = #tpu.core_type<tc>, window_params = [{pipeline_mode = #tpu.pipeline_mode<synchronous>, transform_indices = @transform_0, window_bounds = array<i64: 64, 2048>}, {pipeline_mode = #tpu.pipeline_mode<synchronous>, transform_indices = @transform_1, window_bounds = array<i64: 2048, 64>}, {pipeline_mode = #tpu.pipeline_mode<synchronous>, transform_indices = @transform_2, window_bounds = array<i64: 1, 64>}, {pipeline_mode = #tpu.pipeline_mode<synchronous>, transform_indices = @transform_3, window_bounds = array<i64: 1, 64>}, {pipeline_mode = #tpu.pipeline_mode<synchronous>, transform_indices = @transform_4, window_bounds = array<i64: 32, 64>}]} {
    %c0 = arith.constant 0 : index
    %c0_0 = arith.constant 0 : index
    %0 = vector.load %arg1[%c0, %c0_0] : memref<64x2048xbf16, #tpu.memory_space<vmem>>, vector<64x2048xbf16>
    %c0_1 = arith.constant 0 : index
    %c0_2 = arith.constant 0 : index
    %1 = vector.load %arg2[%c0_1, %c0_2] : memref<2048x64xbf16, #tpu.memory_space<vmem>>, vector<2048x64xbf16>
    %cst = arith.constant dense<0.000000e+00> : vector<64x64xf32>
    %2 = tpu.matmul %0, %1, %cst {dimension_numbers = #tpu.dot_dimension_numbers<[1], [0], [0], [1], [0, 0, 1, 1], [], []>} : vector<64x2048xbf16>, vector<2048x64xbf16>, vector<64x64xf32> -> vector<64x64xf32>
    %c0_3 = arith.constant 0 : index
    %c0_4 = arith.constant 0 : index
    %3 = vector.load %arg3[%c0_3, %c0_4] : memref<1x64xf32, #tpu.memory_space<vmem>>, vector<1x64xf32>
    %4 = vector.broadcast %3 : vector<1x64xf32> to vector<64x64xf32>
    %5 = arith.mulf %2, %4 : vector<64x64xf32>
    %c0_5 = arith.constant 0 : index
    %c0_6 = arith.constant 0 : index
    %6 = vector.load %arg4[%c0_5, %c0_6] : memref<1x64xf32, #tpu.memory_space<vmem>>, vector<1x64xf32>
    %7 = vector.broadcast %6 : vector<1x64xf32> to vector<64x64xf32>
    %8 = arith.addf %5, %7 : vector<64x64xf32>
    %cst_7 = arith.constant 0.000000e+00 : f32
    %9 = vector.broadcast %cst_7 : f32 to vector<64x64xf32>
    %10 = arith.maximumf %8, %9 : vector<64x64xf32>
    %11 = vector.extract_strided_slice %10 {offsets = [0, 0], sizes = [32, 64], strides = [1, 1]} : vector<64x64xf32> to vector<32x64xf32>
    %12 = vector.extract_strided_slice %10 {offsets = [32, 0], sizes = [32, 64], strides = [1, 1]} : vector<64x64xf32> to vector<32x64xf32>
    %13 = arith.maximumf %11, %12 : vector<32x64xf32>
    %c0_8 = arith.constant 0 : index
    %c0_9 = arith.constant 0 : index
    %14 = vector.load %arg5[%c0_8, %c0_9] : memref<32x64xf32, #tpu.memory_space<vmem>>, vector<32x64xf32>
    tpu.vector_store %arg5[%c0_8, %c0_9], %13 {strides = array<i32>} : memref<32x64xf32, #tpu.memory_space<vmem>>, vector<32x64xf32>,
    return
  }
  func.func @transform_0(%arg0: i32) -> (i32, i32) {
    %c0_i32 = arith.constant 0 : i32
    %c0_i32_0 = arith.constant 0 : i32
    %c0_i32_1 = arith.constant 0 : i32
    return %c0_i32, %c0_i32_0 : i32, i32
  }
  func.func @transform_1(%arg0: i32) -> (i32, i32) {
    %c0_i32 = arith.constant 0 : i32
    %c0_i32_0 = arith.constant 0 : i32
    %c0_i32_1 = arith.constant 0 : i32
    return %c0_i32, %c0_i32_0 : i32, i32
  }
  func.func @transform_2(%arg0: i32) -> (i32, i32) {
    %c0_i32 = arith.constant 0 : i32
    %c0_i32_0 = arith.constant 0 : i32
    %c0_i32_1 = arith.constant 0 : i32
    return %c0_i32, %c0_i32_0 : i32, i32
  }
  func.func @transform_3(%arg0: i32) -> (i32, i32) {
    %c0_i32 = arith.constant 0 : i32
    %c0_i32_0 = arith.constant 0 : i32
    %c0_i32_1 = arith.constant 0 : i32
    return %c0_i32, %c0_i32_0 : i32, i32
  }
  func.func @transform_4(%arg0: i32) -> (i32, i32) {
    %c0_i32 = arith.constant 0 : i32
    %c0_i32_0 = arith.constant 0 : i32
    %c0_i32_1 = arith.constant 0 : i32
    return %c0_i32, %c0_i32_0 : i32, i32
  }
}

module attributes {stable_mosaic.version = 11 : i64} {
  func.func @_conv_pool_kernel(%arg0: i32, %arg1: memref<32x2048xbf16, #tpu.memory_space<vmem>>, %arg2: memref<2048x64xbf16, #tpu.memory_space<vmem>>, %arg3: memref<1x64xf32, #tpu.memory_space<vmem>>, %arg4: memref<1x64xf32, #tpu.memory_space<vmem>>, %arg5: memref<16x64xf32, #tpu.memory_space<vmem>>) attributes {dimension_semantics = [#tpu.dimension_semantics<arbitrary>], iteration_bounds = array<i64: 1>, scalar_prefetch = 0 : i64, scratch_operands = 0 : i64, tpu.core_type = #tpu.core_type<tc>, window_params = [{pipeline_mode = #tpu.pipeline_mode<synchronous>, transform_indices = @transform_0, window_bounds = array<i64: 32, 2048>}, {pipeline_mode = #tpu.pipeline_mode<synchronous>, transform_indices = @transform_1, window_bounds = array<i64: 2048, 64>}, {pipeline_mode = #tpu.pipeline_mode<synchronous>, transform_indices = @transform_2, window_bounds = array<i64: 1, 64>}, {pipeline_mode = #tpu.pipeline_mode<synchronous>, transform_indices = @transform_3, window_bounds = array<i64: 1, 64>}, {pipeline_mode = #tpu.pipeline_mode<synchronous>, transform_indices = @transform_4, window_bounds = array<i64: 16, 64>}]} {
    %c0 = arith.constant 0 : index
    %c0_0 = arith.constant 0 : index
    %0 = vector.load %arg1[%c0, %c0_0] : memref<32x2048xbf16, #tpu.memory_space<vmem>>, vector<32x2048xbf16>
    %c0_1 = arith.constant 0 : index
    %c0_2 = arith.constant 0 : index
    %1 = vector.load %arg2[%c0_1, %c0_2] : memref<2048x64xbf16, #tpu.memory_space<vmem>>, vector<2048x64xbf16>
    %cst = arith.constant dense<0.000000e+00> : vector<32x64xf32>
    %2 = tpu.matmul %0, %1, %cst {dimension_numbers = #tpu.dot_dimension_numbers<[1], [0], [0], [1], [0, 0, 1, 1], [], []>} : vector<32x2048xbf16>, vector<2048x64xbf16>, vector<32x64xf32> -> vector<32x64xf32>
    %c0_3 = arith.constant 0 : index
    %c0_4 = arith.constant 0 : index
    %3 = vector.load %arg3[%c0_3, %c0_4] : memref<1x64xf32, #tpu.memory_space<vmem>>, vector<1x64xf32>
    %4 = vector.broadcast %3 : vector<1x64xf32> to vector<32x64xf32>
    %5 = arith.mulf %2, %4 : vector<32x64xf32>
    %c0_5 = arith.constant 0 : index
    %c0_6 = arith.constant 0 : index
    %6 = vector.load %arg4[%c0_5, %c0_6] : memref<1x64xf32, #tpu.memory_space<vmem>>, vector<1x64xf32>
    %7 = vector.broadcast %6 : vector<1x64xf32> to vector<32x64xf32>
    %8 = arith.addf %5, %7 : vector<32x64xf32>
    %cst_7 = arith.constant 0.000000e+00 : f32
    %9 = vector.broadcast %cst_7 : f32 to vector<32x64xf32>
    %10 = arith.maximumf %8, %9 : vector<32x64xf32>
    %11 = vector.extract_strided_slice %10 {offsets = [0, 0], sizes = [16, 64], strides = [1, 1]} : vector<32x64xf32> to vector<16x64xf32>
    %12 = vector.extract_strided_slice %10 {offsets = [16, 0], sizes = [16, 64], strides = [1, 1]} : vector<32x64xf32> to vector<16x64xf32>
    %13 = arith.maximumf %11, %12 : vector<16x64xf32>
    %c0_8 = arith.constant 0 : index
    %c0_9 = arith.constant 0 : index
    %14 = vector.load %arg5[%c0_8, %c0_9] : memref<16x64xf32, #tpu.memory_space<vmem>>, vector<16x64xf32>
    tpu.vector_store %arg5[%c0_8, %c0_9], %13 {strides = array<i32>} : memref<16x64xf32, #tpu.memory_space<vmem>>, vector<16x64xf32>,
    return
  }
  func.func @transform_0(%arg0: i32) -> (i32, i32) {
    %c0_i32 = arith.constant 0 : i32
    %c0_i32_0 = arith.constant 0 : i32
    %c0_i32_1 = arith.constant 0 : i32
    return %c0_i32, %c0_i32_0 : i32, i32
  }
  func.func @transform_1(%arg0: i32) -> (i32, i32) {
    %c0_i32 = arith.constant 0 : i32
    %c0_i32_0 = arith.constant 0 : i32
    %c0_i32_1 = arith.constant 0 : i32
    return %c0_i32, %c0_i32_0 : i32, i32
  }
  func.func @transform_2(%arg0: i32) -> (i32, i32) {
    %c0_i32 = arith.constant 0 : i32
    %c0_i32_0 = arith.constant 0 : i32
    %c0_i32_1 = arith.constant 0 : i32
    return %c0_i32, %c0_i32_0 : i32, i32
  }
  func.func @transform_3(%arg0: i32) -> (i32, i32) {
    %c0_i32 = arith.constant 0 : i32
    %c0_i32_0 = arith.constant 0 : i32
    %c0_i32_1 = arith.constant 0 : i32
    return %c0_i32, %c0_i32_0 : i32, i32
  }
  func.func @transform_4(%arg0: i32) -> (i32, i32) {
    %c0_i32 = arith.constant 0 : i32
    %c0_i32_0 = arith.constant 0 : i32
    %c0_i32_1 = arith.constant 0 : i32
    return %c0_i32, %c0_i32_0 : i32, i32
  }
}

module attributes {stable_mosaic.version = 11 : i64} {
  func.func @_conv_pool_kernel(%arg0: i32, %arg1: memref<16x2048xbf16, #tpu.memory_space<vmem>>, %arg2: memref<2048x64xbf16, #tpu.memory_space<vmem>>, %arg3: memref<1x64xf32, #tpu.memory_space<vmem>>, %arg4: memref<1x64xf32, #tpu.memory_space<vmem>>, %arg5: memref<8x64xf32, #tpu.memory_space<vmem>>) attributes {dimension_semantics = [#tpu.dimension_semantics<arbitrary>], iteration_bounds = array<i64: 1>, scalar_prefetch = 0 : i64, scratch_operands = 0 : i64, tpu.core_type = #tpu.core_type<tc>, window_params = [{pipeline_mode = #tpu.pipeline_mode<synchronous>, transform_indices = @transform_0, window_bounds = array<i64: 16, 2048>}, {pipeline_mode = #tpu.pipeline_mode<synchronous>, transform_indices = @transform_1, window_bounds = array<i64: 2048, 64>}, {pipeline_mode = #tpu.pipeline_mode<synchronous>, transform_indices = @transform_2, window_bounds = array<i64: 1, 64>}, {pipeline_mode = #tpu.pipeline_mode<synchronous>, transform_indices = @transform_3, window_bounds = array<i64: 1, 64>}, {pipeline_mode = #tpu.pipeline_mode<synchronous>, transform_indices = @transform_4, window_bounds = array<i64: 8, 64>}]} {
    %c0 = arith.constant 0 : index
    %c0_0 = arith.constant 0 : index
    %0 = vector.load %arg1[%c0, %c0_0] : memref<16x2048xbf16, #tpu.memory_space<vmem>>, vector<16x2048xbf16>
    %c0_1 = arith.constant 0 : index
    %c0_2 = arith.constant 0 : index
    %1 = vector.load %arg2[%c0_1, %c0_2] : memref<2048x64xbf16, #tpu.memory_space<vmem>>, vector<2048x64xbf16>
    %cst = arith.constant dense<0.000000e+00> : vector<16x64xf32>
    %2 = tpu.matmul %0, %1, %cst {dimension_numbers = #tpu.dot_dimension_numbers<[1], [0], [0], [1], [0, 0, 1, 1], [], []>} : vector<16x2048xbf16>, vector<2048x64xbf16>, vector<16x64xf32> -> vector<16x64xf32>
    %c0_3 = arith.constant 0 : index
    %c0_4 = arith.constant 0 : index
    %3 = vector.load %arg3[%c0_3, %c0_4] : memref<1x64xf32, #tpu.memory_space<vmem>>, vector<1x64xf32>
    %4 = vector.broadcast %3 : vector<1x64xf32> to vector<16x64xf32>
    %5 = arith.mulf %2, %4 : vector<16x64xf32>
    %c0_5 = arith.constant 0 : index
    %c0_6 = arith.constant 0 : index
    %6 = vector.load %arg4[%c0_5, %c0_6] : memref<1x64xf32, #tpu.memory_space<vmem>>, vector<1x64xf32>
    %7 = vector.broadcast %6 : vector<1x64xf32> to vector<16x64xf32>
    %8 = arith.addf %5, %7 : vector<16x64xf32>
    %cst_7 = arith.constant 0.000000e+00 : f32
    %9 = vector.broadcast %cst_7 : f32 to vector<16x64xf32>
    %10 = arith.maximumf %8, %9 : vector<16x64xf32>
    %11 = vector.extract_strided_slice %10 {offsets = [0, 0], sizes = [8, 64], strides = [1, 1]} : vector<16x64xf32> to vector<8x64xf32>
    %12 = vector.extract_strided_slice %10 {offsets = [8, 0], sizes = [8, 64], strides = [1, 1]} : vector<16x64xf32> to vector<8x64xf32>
    %13 = arith.maximumf %11, %12 : vector<8x64xf32>
    %c0_8 = arith.constant 0 : index
    %c0_9 = arith.constant 0 : index
    %14 = vector.load %arg5[%c0_8, %c0_9] : memref<8x64xf32, #tpu.memory_space<vmem>>, vector<8x64xf32>
    tpu.vector_store %arg5[%c0_8, %c0_9], %13 {strides = array<i32>} : memref<8x64xf32, #tpu.memory_space<vmem>>, vector<8x64xf32>,
    return
  }
  func.func @transform_0(%arg0: i32) -> (i32, i32) {
    %c0_i32 = arith.constant 0 : i32
    %c0_i32_0 = arith.constant 0 : i32
    %c0_i32_1 = arith.constant 0 : i32
    return %c0_i32, %c0_i32_0 : i32, i32
  }
  func.func @transform_1(%arg0: i32) -> (i32, i32) {
    %c0_i32 = arith.constant 0 : i32
    %c0_i32_0 = arith.constant 0 : i32
    %c0_i32_1 = arith.constant 0 : i32
    return %c0_i32, %c0_i32_0 : i32, i32
  }
  func.func @transform_2(%arg0: i32) -> (i32, i32) {
    %c0_i32 = arith.constant 0 : i32
    %c0_i32_0 = arith.constant 0 : i32
    %c0_i32_1 = arith.constant 0 : i32
    return %c0_i32, %c0_i32_0 : i32, i32
  }
  func.func @transform_3(%arg0: i32) -> (i32, i32) {
    %c0_i32 = arith.constant 0 : i32
    %c0_i32_0 = arith.constant 0 : i32
    %c0_i32_1 = arith.constant 0 : i32
    return %c0_i32, %c0_i32_0 : i32, i32
  }
  func.func @transform_4(%arg0: i32) -> (i32, i32) {
    %c0_i32 = arith.constant 0 : i32
    %c0_i32_0 = arith.constant 0 : i32
    %c0_i32_1 = arith.constant 0 : i32
    return %c0_i32, %c0_i32_0 : i32, i32
  }
}

module attributes {stable_mosaic.version = 11 : i64} {
  func.func @_conv_kernel(%arg0: i32, %arg1: memref<10x2048xbf16, #tpu.memory_space<vmem>>, %arg2: memref<2048x64xbf16, #tpu.memory_space<vmem>>, %arg3: memref<1x64xf32, #tpu.memory_space<vmem>>, %arg4: memref<1x64xf32, #tpu.memory_space<vmem>>, %arg5: memref<10x64xf32, #tpu.memory_space<vmem>>) attributes {dimension_semantics = [#tpu.dimension_semantics<arbitrary>], iteration_bounds = array<i64: 1>, scalar_prefetch = 0 : i64, scratch_operands = 0 : i64, tpu.core_type = #tpu.core_type<tc>, window_params = [{pipeline_mode = #tpu.pipeline_mode<synchronous>, transform_indices = @transform_0, window_bounds = array<i64: 10, 2048>}, {pipeline_mode = #tpu.pipeline_mode<synchronous>, transform_indices = @transform_1, window_bounds = array<i64: 2048, 64>}, {pipeline_mode = #tpu.pipeline_mode<synchronous>, transform_indices = @transform_2, window_bounds = array<i64: 1, 64>}, {pipeline_mode = #tpu.pipeline_mode<synchronous>, transform_indices = @transform_3, window_bounds = array<i64: 1, 64>}, {pipeline_mode = #tpu.pipeline_mode<synchronous>, transform_indices = @transform_4, window_bounds = array<i64: 10, 64>}]} {
    %c0 = arith.constant 0 : index
    %c0_0 = arith.constant 0 : index
    %0 = vector.load %arg1[%c0, %c0_0] : memref<10x2048xbf16, #tpu.memory_space<vmem>>, vector<10x2048xbf16>
    %c0_1 = arith.constant 0 : index
    %c0_2 = arith.constant 0 : index
    %1 = vector.load %arg2[%c0_1, %c0_2] : memref<2048x64xbf16, #tpu.memory_space<vmem>>, vector<2048x64xbf16>
    %cst = arith.constant dense<0.000000e+00> : vector<10x64xf32>
    %2 = tpu.matmul %0, %1, %cst {dimension_numbers = #tpu.dot_dimension_numbers<[1], [0], [0], [1], [0, 0, 1, 1], [], []>} : vector<10x2048xbf16>, vector<2048x64xbf16>, vector<10x64xf32> -> vector<10x64xf32>
    %c0_3 = arith.constant 0 : index
    %c0_4 = arith.constant 0 : index
    %3 = vector.load %arg3[%c0_3, %c0_4] : memref<1x64xf32, #tpu.memory_space<vmem>>, vector<1x64xf32>
    %4 = vector.broadcast %3 : vector<1x64xf32> to vector<10x64xf32>
    %5 = arith.mulf %2, %4 : vector<10x64xf32>
    %c0_5 = arith.constant 0 : index
    %c0_6 = arith.constant 0 : index
    %6 = vector.load %arg4[%c0_5, %c0_6] : memref<1x64xf32, #tpu.memory_space<vmem>>, vector<1x64xf32>
    %7 = vector.broadcast %6 : vector<1x64xf32> to vector<10x64xf32>
    %8 = arith.addf %5, %7 : vector<10x64xf32>
    %cst_7 = arith.constant 0.000000e+00 : f32
    %9 = vector.broadcast %cst_7 : f32 to vector<10x64xf32>
    %10 = arith.maximumf %8, %9 : vector<10x64xf32>
    %c0_8 = arith.constant 0 : index
    %c0_9 = arith.constant 0 : index
    %11 = vector.load %arg5[%c0_8, %c0_9] : memref<10x64xf32, #tpu.memory_space<vmem>>, vector<10x64xf32>
    tpu.vector_store %arg5[%c0_8, %c0_9], %10 {strides = array<i32>} : memref<10x64xf32, #tpu.memory_space<vmem>>, vector<10x64xf32>,
    return
  }
  func.func @transform_0(%arg0: i32) -> (i32, i32) {
    %c0_i32 = arith.constant 0 : i32
    %c0_i32_0 = arith.constant 0 : i32
    %c0_i32_1 = arith.constant 0 : i32
    return %c0_i32, %c0_i32_0 : i32, i32
  }
  func.func @transform_1(%arg0: i32) -> (i32, i32) {
    %c0_i32 = arith.constant 0 : i32
    %c0_i32_0 = arith.constant 0 : i32
    %c0_i32_1 = arith.constant 0 : i32
    return %c0_i32, %c0_i32_0 : i32, i32
  }
  func.func @transform_2(%arg0: i32) -> (i32, i32) {
    %c0_i32 = arith.constant 0 : i32
    %c0_i32_0 = arith.constant 0 : i32
    %c0_i32_1 = arith.constant 0 : i32
    return %c0_i32, %c0_i32_0 : i32, i32
  }
  func.func @transform_3(%arg0: i32) -> (i32, i32) {
    %c0_i32 = arith.constant 0 : i32
    %c0_i32_0 = arith.constant 0 : i32
    %c0_i32_1 = arith.constant 0 : i32
    return %c0_i32, %c0_i32_0 : i32, i32
  }
  func.func @transform_4(%arg0: i32) -> (i32, i32) {
    %c0_i32 = arith.constant 0 : i32
    %c0_i32_0 = arith.constant 0 : i32
    %c0_i32_1 = arith.constant 0 : i32
    return %c0_i32, %c0_i32_0 : i32, i32
  }
}

module attributes {stable_mosaic.version = 11 : i64} {
  func.func @_conv_kernel(%arg0: i32, %arg1: memref<12x2048xbf16, #tpu.memory_space<vmem>>, %arg2: memref<2048x64xbf16, #tpu.memory_space<vmem>>, %arg3: memref<1x64xf32, #tpu.memory_space<vmem>>, %arg4: memref<1x64xf32, #tpu.memory_space<vmem>>, %arg5: memref<12x64xf32, #tpu.memory_space<vmem>>) attributes {dimension_semantics = [#tpu.dimension_semantics<arbitrary>], iteration_bounds = array<i64: 1>, scalar_prefetch = 0 : i64, scratch_operands = 0 : i64, tpu.core_type = #tpu.core_type<tc>, window_params = [{pipeline_mode = #tpu.pipeline_mode<synchronous>, transform_indices = @transform_0, window_bounds = array<i64: 12, 2048>}, {pipeline_mode = #tpu.pipeline_mode<synchronous>, transform_indices = @transform_1, window_bounds = array<i64: 2048, 64>}, {pipeline_mode = #tpu.pipeline_mode<synchronous>, transform_indices = @transform_2, window_bounds = array<i64: 1, 64>}, {pipeline_mode = #tpu.pipeline_mode<synchronous>, transform_indices = @transform_3, window_bounds = array<i64: 1, 64>}, {pipeline_mode = #tpu.pipeline_mode<synchronous>, transform_indices = @transform_4, window_bounds = array<i64: 12, 64>}]} {
    %c0 = arith.constant 0 : index
    %c0_0 = arith.constant 0 : index
    %0 = vector.load %arg1[%c0, %c0_0] : memref<12x2048xbf16, #tpu.memory_space<vmem>>, vector<12x2048xbf16>
    %c0_1 = arith.constant 0 : index
    %c0_2 = arith.constant 0 : index
    %1 = vector.load %arg2[%c0_1, %c0_2] : memref<2048x64xbf16, #tpu.memory_space<vmem>>, vector<2048x64xbf16>
    %cst = arith.constant dense<0.000000e+00> : vector<12x64xf32>
    %2 = tpu.matmul %0, %1, %cst {dimension_numbers = #tpu.dot_dimension_numbers<[1], [0], [0], [1], [0, 0, 1, 1], [], []>} : vector<12x2048xbf16>, vector<2048x64xbf16>, vector<12x64xf32> -> vector<12x64xf32>
    %c0_3 = arith.constant 0 : index
    %c0_4 = arith.constant 0 : index
    %3 = vector.load %arg3[%c0_3, %c0_4] : memref<1x64xf32, #tpu.memory_space<vmem>>, vector<1x64xf32>
    %4 = vector.broadcast %3 : vector<1x64xf32> to vector<12x64xf32>
    %5 = arith.mulf %2, %4 : vector<12x64xf32>
    %c0_5 = arith.constant 0 : index
    %c0_6 = arith.constant 0 : index
    %6 = vector.load %arg4[%c0_5, %c0_6] : memref<1x64xf32, #tpu.memory_space<vmem>>, vector<1x64xf32>
    %7 = vector.broadcast %6 : vector<1x64xf32> to vector<12x64xf32>
    %8 = arith.addf %5, %7 : vector<12x64xf32>
    %cst_7 = arith.constant 0.000000e+00 : f32
    %9 = vector.broadcast %cst_7 : f32 to vector<12x64xf32>
    %10 = arith.maximumf %8, %9 : vector<12x64xf32>
    %c0_8 = arith.constant 0 : index
    %c0_9 = arith.constant 0 : index
    %11 = vector.load %arg5[%c0_8, %c0_9] : memref<12x64xf32, #tpu.memory_space<vmem>>, vector<12x64xf32>
    tpu.vector_store %arg5[%c0_8, %c0_9], %10 {strides = array<i32>} : memref<12x64xf32, #tpu.memory_space<vmem>>, vector<12x64xf32>,
    return
  }
  func.func @transform_0(%arg0: i32) -> (i32, i32) {
    %c0_i32 = arith.constant 0 : i32
    %c0_i32_0 = arith.constant 0 : i32
    %c0_i32_1 = arith.constant 0 : i32
    return %c0_i32, %c0_i32_0 : i32, i32
  }
  func.func @transform_1(%arg0: i32) -> (i32, i32) {
    %c0_i32 = arith.constant 0 : i32
    %c0_i32_0 = arith.constant 0 : i32
    %c0_i32_1 = arith.constant 0 : i32
    return %c0_i32, %c0_i32_0 : i32, i32
  }
  func.func @transform_2(%arg0: i32) -> (i32, i32) {
    %c0_i32 = arith.constant 0 : i32
    %c0_i32_0 = arith.constant 0 : i32
    %c0_i32_1 = arith.constant 0 : i32
    return %c0_i32, %c0_i32_0 : i32, i32
  }
  func.func @transform_3(%arg0: i32) -> (i32, i32) {
    %c0_i32 = arith.constant 0 : i32
    %c0_i32_0 = arith.constant 0 : i32
    %c0_i32_1 = arith.constant 0 : i32
    return %c0_i32, %c0_i32_0 : i32, i32
  }
  func.func @transform_4(%arg0: i32) -> (i32, i32) {
    %c0_i32 = arith.constant 0 : i32
    %c0_i32_0 = arith.constant 0 : i32
    %c0_i32_1 = arith.constant 0 : i32
    return %c0_i32, %c0_i32_0 : i32, i32
  }
}

module attributes {stable_mosaic.version = 11 : i64} {
  func.func @_conv_kernel(%arg0: i32, %arg1: memref<14x2048xbf16, #tpu.memory_space<vmem>>, %arg2: memref<2048x64xbf16, #tpu.memory_space<vmem>>, %arg3: memref<1x64xf32, #tpu.memory_space<vmem>>, %arg4: memref<1x64xf32, #tpu.memory_space<vmem>>, %arg5: memref<14x64xf32, #tpu.memory_space<vmem>>) attributes {dimension_semantics = [#tpu.dimension_semantics<arbitrary>], iteration_bounds = array<i64: 1>, scalar_prefetch = 0 : i64, scratch_operands = 0 : i64, tpu.core_type = #tpu.core_type<tc>, window_params = [{pipeline_mode = #tpu.pipeline_mode<synchronous>, transform_indices = @transform_0, window_bounds = array<i64: 14, 2048>}, {pipeline_mode = #tpu.pipeline_mode<synchronous>, transform_indices = @transform_1, window_bounds = array<i64: 2048, 64>}, {pipeline_mode = #tpu.pipeline_mode<synchronous>, transform_indices = @transform_2, window_bounds = array<i64: 1, 64>}, {pipeline_mode = #tpu.pipeline_mode<synchronous>, transform_indices = @transform_3, window_bounds = array<i64: 1, 64>}, {pipeline_mode = #tpu.pipeline_mode<synchronous>, transform_indices = @transform_4, window_bounds = array<i64: 14, 64>}]} {
    %c0 = arith.constant 0 : index
    %c0_0 = arith.constant 0 : index
    %0 = vector.load %arg1[%c0, %c0_0] : memref<14x2048xbf16, #tpu.memory_space<vmem>>, vector<14x2048xbf16>
    %c0_1 = arith.constant 0 : index
    %c0_2 = arith.constant 0 : index
    %1 = vector.load %arg2[%c0_1, %c0_2] : memref<2048x64xbf16, #tpu.memory_space<vmem>>, vector<2048x64xbf16>
    %cst = arith.constant dense<0.000000e+00> : vector<14x64xf32>
    %2 = tpu.matmul %0, %1, %cst {dimension_numbers = #tpu.dot_dimension_numbers<[1], [0], [0], [1], [0, 0, 1, 1], [], []>} : vector<14x2048xbf16>, vector<2048x64xbf16>, vector<14x64xf32> -> vector<14x64xf32>
    %c0_3 = arith.constant 0 : index
    %c0_4 = arith.constant 0 : index
    %3 = vector.load %arg3[%c0_3, %c0_4] : memref<1x64xf32, #tpu.memory_space<vmem>>, vector<1x64xf32>
    %4 = vector.broadcast %3 : vector<1x64xf32> to vector<14x64xf32>
    %5 = arith.mulf %2, %4 : vector<14x64xf32>
    %c0_5 = arith.constant 0 : index
    %c0_6 = arith.constant 0 : index
    %6 = vector.load %arg4[%c0_5, %c0_6] : memref<1x64xf32, #tpu.memory_space<vmem>>, vector<1x64xf32>
    %7 = vector.broadcast %6 : vector<1x64xf32> to vector<14x64xf32>
    %8 = arith.addf %5, %7 : vector<14x64xf32>
    %cst_7 = arith.constant 0.000000e+00 : f32
    %9 = vector.broadcast %cst_7 : f32 to vector<14x64xf32>
    %10 = arith.maximumf %8, %9 : vector<14x64xf32>
    %c0_8 = arith.constant 0 : index
    %c0_9 = arith.constant 0 : index
    %11 = vector.load %arg5[%c0_8, %c0_9] : memref<14x64xf32, #tpu.memory_space<vmem>>, vector<14x64xf32>
    tpu.vector_store %arg5[%c0_8, %c0_9], %10 {strides = array<i32>} : memref<14x64xf32, #tpu.memory_space<vmem>>, vector<14x64xf32>,
    return
  }
  func.func @transform_0(%arg0: i32) -> (i32, i32) {
    %c0_i32 = arith.constant 0 : i32
    %c0_i32_0 = arith.constant 0 : i32
    %c0_i32_1 = arith.constant 0 : i32
    return %c0_i32, %c0_i32_0 : i32, i32
  }
  func.func @transform_1(%arg0: i32) -> (i32, i32) {
    %c0_i32 = arith.constant 0 : i32
    %c0_i32_0 = arith.constant 0 : i32
    %c0_i32_1 = arith.constant 0 : i32
    return %c0_i32, %c0_i32_0 : i32, i32
  }
  func.func @transform_2(%arg0: i32) -> (i32, i32) {
    %c0_i32 = arith.constant 0 : i32
    %c0_i32_0 = arith.constant 0 : i32
    %c0_i32_1 = arith.constant 0 : i32
    return %c0_i32, %c0_i32_0 : i32, i32
  }
  func.func @transform_3(%arg0: i32) -> (i32, i32) {
    %c0_i32 = arith.constant 0 : i32
    %c0_i32_0 = arith.constant 0 : i32
    %c0_i32_1 = arith.constant 0 : i32
    return %c0_i32, %c0_i32_0 : i32, i32
  }
  func.func @transform_4(%arg0: i32) -> (i32, i32) {
    %c0_i32 = arith.constant 0 : i32
    %c0_i32_0 = arith.constant 0 : i32
    %c0_i32_1 = arith.constant 0 : i32
    return %c0_i32, %c0_i32_0 : i32, i32
  }
}

module attributes {stable_mosaic.version = 11 : i64} {
  func.func @_conv_kernel(%arg0: i32, %arg1: memref<16x2048xbf16, #tpu.memory_space<vmem>>, %arg2: memref<2048x64xbf16, #tpu.memory_space<vmem>>, %arg3: memref<1x64xf32, #tpu.memory_space<vmem>>, %arg4: memref<1x64xf32, #tpu.memory_space<vmem>>, %arg5: memref<16x64xf32, #tpu.memory_space<vmem>>) attributes {dimension_semantics = [#tpu.dimension_semantics<arbitrary>], iteration_bounds = array<i64: 1>, scalar_prefetch = 0 : i64, scratch_operands = 0 : i64, tpu.core_type = #tpu.core_type<tc>, window_params = [{pipeline_mode = #tpu.pipeline_mode<synchronous>, transform_indices = @transform_0, window_bounds = array<i64: 16, 2048>}, {pipeline_mode = #tpu.pipeline_mode<synchronous>, transform_indices = @transform_1, window_bounds = array<i64: 2048, 64>}, {pipeline_mode = #tpu.pipeline_mode<synchronous>, transform_indices = @transform_2, window_bounds = array<i64: 1, 64>}, {pipeline_mode = #tpu.pipeline_mode<synchronous>, transform_indices = @transform_3, window_bounds = array<i64: 1, 64>}, {pipeline_mode = #tpu.pipeline_mode<synchronous>, transform_indices = @transform_4, window_bounds = array<i64: 16, 64>}]} {
    %c0 = arith.constant 0 : index
    %c0_0 = arith.constant 0 : index
    %0 = vector.load %arg1[%c0, %c0_0] : memref<16x2048xbf16, #tpu.memory_space<vmem>>, vector<16x2048xbf16>
    %c0_1 = arith.constant 0 : index
    %c0_2 = arith.constant 0 : index
    %1 = vector.load %arg2[%c0_1, %c0_2] : memref<2048x64xbf16, #tpu.memory_space<vmem>>, vector<2048x64xbf16>
    %cst = arith.constant dense<0.000000e+00> : vector<16x64xf32>
    %2 = tpu.matmul %0, %1, %cst {dimension_numbers = #tpu.dot_dimension_numbers<[1], [0], [0], [1], [0, 0, 1, 1], [], []>} : vector<16x2048xbf16>, vector<2048x64xbf16>, vector<16x64xf32> -> vector<16x64xf32>
    %c0_3 = arith.constant 0 : index
    %c0_4 = arith.constant 0 : index
    %3 = vector.load %arg3[%c0_3, %c0_4] : memref<1x64xf32, #tpu.memory_space<vmem>>, vector<1x64xf32>
    %4 = vector.broadcast %3 : vector<1x64xf32> to vector<16x64xf32>
    %5 = arith.mulf %2, %4 : vector<16x64xf32>
    %c0_5 = arith.constant 0 : index
    %c0_6 = arith.constant 0 : index
    %6 = vector.load %arg4[%c0_5, %c0_6] : memref<1x64xf32, #tpu.memory_space<vmem>>, vector<1x64xf32>
    %7 = vector.broadcast %6 : vector<1x64xf32> to vector<16x64xf32>
    %8 = arith.addf %5, %7 : vector<16x64xf32>
    %cst_7 = arith.constant 0.000000e+00 : f32
    %9 = vector.broadcast %cst_7 : f32 to vector<16x64xf32>
    %10 = arith.maximumf %8, %9 : vector<16x64xf32>
    %c0_8 = arith.constant 0 : index
    %c0_9 = arith.constant 0 : index
    %11 = vector.load %arg5[%c0_8, %c0_9] : memref<16x64xf32, #tpu.memory_space<vmem>>, vector<16x64xf32>
    tpu.vector_store %arg5[%c0_8, %c0_9], %10 {strides = array<i32>} : memref<16x64xf32, #tpu.memory_space<vmem>>, vector<16x64xf32>,
    return
  }
  func.func @transform_0(%arg0: i32) -> (i32, i32) {
    %c0_i32 = arith.constant 0 : i32
    %c0_i32_0 = arith.constant 0 : i32
    %c0_i32_1 = arith.constant 0 : i32
    return %c0_i32, %c0_i32_0 : i32, i32
  }
  func.func @transform_1(%arg0: i32) -> (i32, i32) {
    %c0_i32 = arith.constant 0 : i32
    %c0_i32_0 = arith.constant 0 : i32
    %c0_i32_1 = arith.constant 0 : i32
    return %c0_i32, %c0_i32_0 : i32, i32
  }
  func.func @transform_2(%arg0: i32) -> (i32, i32) {
    %c0_i32 = arith.constant 0 : i32
    %c0_i32_0 = arith.constant 0 : i32
    %c0_i32_1 = arith.constant 0 : i32
    return %c0_i32, %c0_i32_0 : i32, i32
  }
  func.func @transform_3(%arg0: i32) -> (i32, i32) {
    %c0_i32 = arith.constant 0 : i32
    %c0_i32_0 = arith.constant 0 : i32
    %c0_i32_1 = arith.constant 0 : i32
    return %c0_i32, %c0_i32_0 : i32, i32
  }
  func.func @transform_4(%arg0: i32) -> (i32, i32) {
    %c0_i32 = arith.constant 0 : i32
    %c0_i32_0 = arith.constant 0 : i32
    %c0_i32_1 = arith.constant 0 : i32
    return %c0_i32, %c0_i32_0 : i32, i32
  }
}

module attributes {stable_mosaic.version = 11 : i64} {
  func.func @_conv_kernel(%arg0: i32, %arg1: memref<18x2048xbf16, #tpu.memory_space<vmem>>, %arg2: memref<2048x64xbf16, #tpu.memory_space<vmem>>, %arg3: memref<1x64xf32, #tpu.memory_space<vmem>>, %arg4: memref<1x64xf32, #tpu.memory_space<vmem>>, %arg5: memref<18x64xf32, #tpu.memory_space<vmem>>) attributes {dimension_semantics = [#tpu.dimension_semantics<arbitrary>], iteration_bounds = array<i64: 1>, scalar_prefetch = 0 : i64, scratch_operands = 0 : i64, tpu.core_type = #tpu.core_type<tc>, window_params = [{pipeline_mode = #tpu.pipeline_mode<synchronous>, transform_indices = @transform_0, window_bounds = array<i64: 18, 2048>}, {pipeline_mode = #tpu.pipeline_mode<synchronous>, transform_indices = @transform_1, window_bounds = array<i64: 2048, 64>}, {pipeline_mode = #tpu.pipeline_mode<synchronous>, transform_indices = @transform_2, window_bounds = array<i64: 1, 64>}, {pipeline_mode = #tpu.pipeline_mode<synchronous>, transform_indices = @transform_3, window_bounds = array<i64: 1, 64>}, {pipeline_mode = #tpu.pipeline_mode<synchronous>, transform_indices = @transform_4, window_bounds = array<i64: 18, 64>}]} {
    %c0 = arith.constant 0 : index
    %c0_0 = arith.constant 0 : index
    %0 = vector.load %arg1[%c0, %c0_0] : memref<18x2048xbf16, #tpu.memory_space<vmem>>, vector<18x2048xbf16>
    %c0_1 = arith.constant 0 : index
    %c0_2 = arith.constant 0 : index
    %1 = vector.load %arg2[%c0_1, %c0_2] : memref<2048x64xbf16, #tpu.memory_space<vmem>>, vector<2048x64xbf16>
    %cst = arith.constant dense<0.000000e+00> : vector<18x64xf32>
    %2 = tpu.matmul %0, %1, %cst {dimension_numbers = #tpu.dot_dimension_numbers<[1], [0], [0], [1], [0, 0, 1, 1], [], []>} : vector<18x2048xbf16>, vector<2048x64xbf16>, vector<18x64xf32> -> vector<18x64xf32>
    %c0_3 = arith.constant 0 : index
    %c0_4 = arith.constant 0 : index
    %3 = vector.load %arg3[%c0_3, %c0_4] : memref<1x64xf32, #tpu.memory_space<vmem>>, vector<1x64xf32>
    %4 = vector.broadcast %3 : vector<1x64xf32> to vector<18x64xf32>
    %5 = arith.mulf %2, %4 : vector<18x64xf32>
    %c0_5 = arith.constant 0 : index
    %c0_6 = arith.constant 0 : index
    %6 = vector.load %arg4[%c0_5, %c0_6] : memref<1x64xf32, #tpu.memory_space<vmem>>, vector<1x64xf32>
    %7 = vector.broadcast %6 : vector<1x64xf32> to vector<18x64xf32>
    %8 = arith.addf %5, %7 : vector<18x64xf32>
    %cst_7 = arith.constant 0.000000e+00 : f32
    %9 = vector.broadcast %cst_7 : f32 to vector<18x64xf32>
    %10 = arith.maximumf %8, %9 : vector<18x64xf32>
    %c0_8 = arith.constant 0 : index
    %c0_9 = arith.constant 0 : index
    %11 = vector.load %arg5[%c0_8, %c0_9] : memref<18x64xf32, #tpu.memory_space<vmem>>, vector<18x64xf32>
    tpu.vector_store %arg5[%c0_8, %c0_9], %10 {strides = array<i32>} : memref<18x64xf32, #tpu.memory_space<vmem>>, vector<18x64xf32>,
    return
  }
  func.func @transform_0(%arg0: i32) -> (i32, i32) {
    %c0_i32 = arith.constant 0 : i32
    %c0_i32_0 = arith.constant 0 : i32
    %c0_i32_1 = arith.constant 0 : i32
    return %c0_i32, %c0_i32_0 : i32, i32
  }
  func.func @transform_1(%arg0: i32) -> (i32, i32) {
    %c0_i32 = arith.constant 0 : i32
    %c0_i32_0 = arith.constant 0 : i32
    %c0_i32_1 = arith.constant 0 : i32
    return %c0_i32, %c0_i32_0 : i32, i32
  }
  func.func @transform_2(%arg0: i32) -> (i32, i32) {
    %c0_i32 = arith.constant 0 : i32
    %c0_i32_0 = arith.constant 0 : i32
    %c0_i32_1 = arith.constant 0 : i32
    return %c0_i32, %c0_i32_0 : i32, i32
  }
  func.func @transform_3(%arg0: i32) -> (i32, i32) {
    %c0_i32 = arith.constant 0 : i32
    %c0_i32_0 = arith.constant 0 : i32
    %c0_i32_1 = arith.constant 0 : i32
    return %c0_i32, %c0_i32_0 : i32, i32
  }
  func.func @transform_4(%arg0: i32) -> (i32, i32) {
    %c0_i32 = arith.constant 0 : i32
    %c0_i32_0 = arith.constant 0 : i32
    %c0_i32_1 = arith.constant 0 : i32
    return %c0_i32, %c0_i32_0 : i32, i32
  }
}

module attributes {stable_mosaic.version = 11 : i64} {
  func.func @_conv_kernel(%arg0: i32, %arg1: memref<20x2048xbf16, #tpu.memory_space<vmem>>, %arg2: memref<2048x64xbf16, #tpu.memory_space<vmem>>, %arg3: memref<1x64xf32, #tpu.memory_space<vmem>>, %arg4: memref<1x64xf32, #tpu.memory_space<vmem>>, %arg5: memref<20x64xf32, #tpu.memory_space<vmem>>) attributes {dimension_semantics = [#tpu.dimension_semantics<arbitrary>], iteration_bounds = array<i64: 1>, scalar_prefetch = 0 : i64, scratch_operands = 0 : i64, tpu.core_type = #tpu.core_type<tc>, window_params = [{pipeline_mode = #tpu.pipeline_mode<synchronous>, transform_indices = @transform_0, window_bounds = array<i64: 20, 2048>}, {pipeline_mode = #tpu.pipeline_mode<synchronous>, transform_indices = @transform_1, window_bounds = array<i64: 2048, 64>}, {pipeline_mode = #tpu.pipeline_mode<synchronous>, transform_indices = @transform_2, window_bounds = array<i64: 1, 64>}, {pipeline_mode = #tpu.pipeline_mode<synchronous>, transform_indices = @transform_3, window_bounds = array<i64: 1, 64>}, {pipeline_mode = #tpu.pipeline_mode<synchronous>, transform_indices = @transform_4, window_bounds = array<i64: 20, 64>}]} {
    %c0 = arith.constant 0 : index
    %c0_0 = arith.constant 0 : index
    %0 = vector.load %arg1[%c0, %c0_0] : memref<20x2048xbf16, #tpu.memory_space<vmem>>, vector<20x2048xbf16>
    %c0_1 = arith.constant 0 : index
    %c0_2 = arith.constant 0 : index
    %1 = vector.load %arg2[%c0_1, %c0_2] : memref<2048x64xbf16, #tpu.memory_space<vmem>>, vector<2048x64xbf16>
    %cst = arith.constant dense<0.000000e+00> : vector<20x64xf32>
    %2 = tpu.matmul %0, %1, %cst {dimension_numbers = #tpu.dot_dimension_numbers<[1], [0], [0], [1], [0, 0, 1, 1], [], []>} : vector<20x2048xbf16>, vector<2048x64xbf16>, vector<20x64xf32> -> vector<20x64xf32>
    %c0_3 = arith.constant 0 : index
    %c0_4 = arith.constant 0 : index
    %3 = vector.load %arg3[%c0_3, %c0_4] : memref<1x64xf32, #tpu.memory_space<vmem>>, vector<1x64xf32>
    %4 = vector.broadcast %3 : vector<1x64xf32> to vector<20x64xf32>
    %5 = arith.mulf %2, %4 : vector<20x64xf32>
    %c0_5 = arith.constant 0 : index
    %c0_6 = arith.constant 0 : index
    %6 = vector.load %arg4[%c0_5, %c0_6] : memref<1x64xf32, #tpu.memory_space<vmem>>, vector<1x64xf32>
    %7 = vector.broadcast %6 : vector<1x64xf32> to vector<20x64xf32>
    %8 = arith.addf %5, %7 : vector<20x64xf32>
    %cst_7 = arith.constant 0.000000e+00 : f32
    %9 = vector.broadcast %cst_7 : f32 to vector<20x64xf32>
    %10 = arith.maximumf %8, %9 : vector<20x64xf32>
    %c0_8 = arith.constant 0 : index
    %c0_9 = arith.constant 0 : index
    %11 = vector.load %arg5[%c0_8, %c0_9] : memref<20x64xf32, #tpu.memory_space<vmem>>, vector<20x64xf32>
    tpu.vector_store %arg5[%c0_8, %c0_9], %10 {strides = array<i32>} : memref<20x64xf32, #tpu.memory_space<vmem>>, vector<20x64xf32>,
    return
  }
  func.func @transform_0(%arg0: i32) -> (i32, i32) {
    %c0_i32 = arith.constant 0 : i32
    %c0_i32_0 = arith.constant 0 : i32
    %c0_i32_1 = arith.constant 0 : i32
    return %c0_i32, %c0_i32_0 : i32, i32
  }
  func.func @transform_1(%arg0: i32) -> (i32, i32) {
    %c0_i32 = arith.constant 0 : i32
    %c0_i32_0 = arith.constant 0 : i32
    %c0_i32_1 = arith.constant 0 : i32
    return %c0_i32, %c0_i32_0 : i32, i32
  }
  func.func @transform_2(%arg0: i32) -> (i32, i32) {
    %c0_i32 = arith.constant 0 : i32
    %c0_i32_0 = arith.constant 0 : i32
    %c0_i32_1 = arith.constant 0 : i32
    return %c0_i32, %c0_i32_0 : i32, i32
  }
  func.func @transform_3(%arg0: i32) -> (i32, i32) {
    %c0_i32 = arith.constant 0 : i32
    %c0_i32_0 = arith.constant 0 : i32
    %c0_i32_1 = arith.constant 0 : i32
    return %c0_i32, %c0_i32_0 : i32, i32
  }
  func.func @transform_4(%arg0: i32) -> (i32, i32) {
    %c0_i32 = arith.constant 0 : i32
    %c0_i32_0 = arith.constant 0 : i32
    %c0_i32_1 = arith.constant 0 : i32
    return %c0_i32, %c0_i32_0 : i32, i32
  }
}

module attributes {stable_mosaic.version = 11 : i64} {
  func.func @_encoder_layer_kernel(%arg0: i32, %arg1: memref<20x64xf32, #tpu.memory_space<vmem>>, %arg2: memref<20x20xf32, #tpu.memory_space<vmem>>, %arg3: memref<64x64xbf16, #tpu.memory_space<vmem>>, %arg4: memref<1x64xf32, #tpu.memory_space<vmem>>, %arg5: memref<64x64xbf16, #tpu.memory_space<vmem>>, %arg6: memref<1x64xf32, #tpu.memory_space<vmem>>, %arg7: memref<64x64xbf16, #tpu.memory_space<vmem>>, %arg8: memref<1x64xf32, #tpu.memory_space<vmem>>, %arg9: memref<64x64xbf16, #tpu.memory_space<vmem>>, %arg10: memref<1x64xf32, #tpu.memory_space<vmem>>, %arg11: memref<1x64xf32, #tpu.memory_space<vmem>>, %arg12: memref<1x64xf32, #tpu.memory_space<vmem>>, %arg13: memref<64x128xbf16, #tpu.memory_space<vmem>>, %arg14: memref<1x128xf32, #tpu.memory_space<vmem>>, %arg15: memref<128x64xbf16, #tpu.memory_space<vmem>>, %arg16: memref<1x64xf32, #tpu.memory_space<vmem>>, %arg17: memref<1x64xf32, #tpu.memory_space<vmem>>, %arg18: memref<1x64xf32, #tpu.memory_space<vmem>>, %arg19: memref<20x64xf32, #tpu.memory_space<vmem>>) attributes {dimension_semantics = [#tpu.dimension_semantics<arbitrary>], iteration_bounds = array<i64: 1>, scalar_prefetch = 0 : i64, scratch_operands = 0 : i64, tpu.core_type = #tpu.core_type<tc>, window_params = [{pipeline_mode = #tpu.pipeline_mode<synchronous>, transform_indices = @transform_0, window_bounds = array<i64: 20, 64>}, {pipeline_mode = #tpu.pipeline_mode<synchronous>, transform_indices = @transform_1, window_bounds = array<i64: 20, 20>}, {pipeline_mode = #tpu.pipeline_mode<synchronous>, transform_indices = @transform_2, window_bounds = array<i64: 64, 64>}, {pipeline_mode = #tpu.pipeline_mode<synchronous>, transform_indices = @transform_3, window_bounds = array<i64: 1, 64>}, {pipeline_mode = #tpu.pipeline_mode<synchronous>, transform_indices = @transform_4, window_bounds = array<i64: 64, 64>}, {pipeline_mode = #tpu.pipeline_mode<synchronous>, transform_indices = @transform_5, window_bounds = array<i64: 1, 64>}, {pipeline_mode = #tpu.pipeline_mode<synchronous>, transform_indices = @transform_6, window_bounds = array<i64: 64, 64>}, {pipeline_mode = #tpu.pipeline_mode<synchronous>, transform_indices = @transform_7, window_bounds = array<i64: 1, 64>}, {pipeline_mode = #tpu.pipeline_mode<synchronous>, transform_indices = @transform_8, window_bounds = array<i64: 64, 64>}, {pipeline_mode = #tpu.pipeline_mode<synchronous>, transform_indices = @transform_9, window_bounds = array<i64: 1, 64>}, {pipeline_mode = #tpu.pipeline_mode<synchronous>, transform_indices = @transform_10, window_bounds = array<i64: 1, 64>}, {pipeline_mode = #tpu.pipeline_mode<synchronous>, transform_indices = @transform_11, window_bounds = array<i64: 1, 64>}, {pipeline_mode = #tpu.pipeline_mode<synchronous>, transform_indices = @transform_12, window_bounds = array<i64: 64, 128>}, {pipeline_mode = #tpu.pipeline_mode<synchronous>, transform_indices = @transform_13, window_bounds = array<i64: 1, 128>}, {pipeline_mode = #tpu.pipeline_mode<synchronous>, transform_indices = @transform_14, window_bounds = array<i64: 128, 64>}, {pipeline_mode = #tpu.pipeline_mode<synchronous>, transform_indices = @transform_15, window_bounds = array<i64: 1, 64>}, {pipeline_mode = #tpu.pipeline_mode<synchronous>, transform_indices = @transform_16, window_bounds = array<i64: 1, 64>}, {pipeline_mode = #tpu.pipeline_mode<synchronous>, transform_indices = @transform_17, window_bounds = array<i64: 1, 64>}, {pipeline_mode = #tpu.pipeline_mode<synchronous>, transform_indices = @transform_18, window_bounds = array<i64: 20, 64>}]} {
    %c0 = arith.constant 0 : index
    %c0_0 = arith.constant 0 : index
    %0 = vector.load %arg1[%c0, %c0_0] : memref<20x64xf32, #tpu.memory_space<vmem>>, vector<20x64xf32>
    %1 = arith.truncf %0 : vector<20x64xf32> to vector<20x64xbf16>
    %c0_1 = arith.constant 0 : index
    %c0_2 = arith.constant 0 : index
    %2 = vector.load %arg3[%c0_1, %c0_2] : memref<64x64xbf16, #tpu.memory_space<vmem>>, vector<64x64xbf16>
    %cst = arith.constant dense<0.000000e+00> : vector<20x64xf32>
    %3 = tpu.matmul %1, %2, %cst {dimension_numbers = #tpu.dot_dimension_numbers<[1], [0], [0], [1], [0, 0, 1, 1], [], []>} : vector<20x64xbf16>, vector<64x64xbf16>, vector<20x64xf32> -> vector<20x64xf32>
    %c0_3 = arith.constant 0 : index
    %c0_4 = arith.constant 0 : index
    %4 = vector.load %arg4[%c0_3, %c0_4] : memref<1x64xf32, #tpu.memory_space<vmem>>, vector<1x64xf32>
    %5 = vector.broadcast %4 : vector<1x64xf32> to vector<20x64xf32>
    %6 = arith.addf %3, %5 : vector<20x64xf32>
    %c0_5 = arith.constant 0 : index
    %c0_6 = arith.constant 0 : index
    %7 = vector.load %arg5[%c0_5, %c0_6] : memref<64x64xbf16, #tpu.memory_space<vmem>>, vector<64x64xbf16>
    %cst_7 = arith.constant dense<0.000000e+00> : vector<20x64xf32>
    %8 = tpu.matmul %1, %7, %cst_7 {dimension_numbers = #tpu.dot_dimension_numbers<[1], [0], [0], [1], [0, 0, 1, 1], [], []>} : vector<20x64xbf16>, vector<64x64xbf16>, vector<20x64xf32> -> vector<20x64xf32>
    %c0_8 = arith.constant 0 : index
    %c0_9 = arith.constant 0 : index
    %9 = vector.load %arg6[%c0_8, %c0_9] : memref<1x64xf32, #tpu.memory_space<vmem>>, vector<1x64xf32>
    %10 = vector.broadcast %9 : vector<1x64xf32> to vector<20x64xf32>
    %11 = arith.addf %8, %10 : vector<20x64xf32>
    %c0_10 = arith.constant 0 : index
    %c0_11 = arith.constant 0 : index
    %12 = vector.load %arg7[%c0_10, %c0_11] : memref<64x64xbf16, #tpu.memory_space<vmem>>, vector<64x64xbf16>
    %cst_12 = arith.constant dense<0.000000e+00> : vector<20x64xf32>
    %13 = tpu.matmul %1, %12, %cst_12 {dimension_numbers = #tpu.dot_dimension_numbers<[1], [0], [0], [1], [0, 0, 1, 1], [], []>} : vector<20x64xbf16>, vector<64x64xbf16>, vector<20x64xf32> -> vector<20x64xf32>
    %c0_13 = arith.constant 0 : index
    %c0_14 = arith.constant 0 : index
    %14 = vector.load %arg8[%c0_13, %c0_14] : memref<1x64xf32, #tpu.memory_space<vmem>>, vector<1x64xf32>
    %15 = vector.broadcast %14 : vector<1x64xf32> to vector<20x64xf32>
    %16 = arith.addf %13, %15 : vector<20x64xf32>
    %cst_15 = arith.constant dense<0.000000e+00> : vector<20x20xf32>
    %17 = tpu.matmul %6, %11, %cst_15 {dimension_numbers = #tpu.dot_dimension_numbers<[1], [1], [0], [0], [0, 0, 1, 0], [], []>} : vector<20x64xf32>, vector<20x64xf32>, vector<20x20xf32> -> vector<20x20xf32>
    %cst_16 = arith.constant 1.250000e-01 : f32
    %18 = vector.broadcast %cst_16 : f32 to vector<20x20xf32>
    %19 = arith.mulf %17, %18 : vector<20x20xf32>
    %c0_17 = arith.constant 0 : index
    %c0_18 = arith.constant 0 : index
    %20 = vector.load %arg2[%c0_17, %c0_18] : memref<20x20xf32, #tpu.memory_space<vmem>>, vector<20x20xf32>
    %21 = arith.addf %19, %20 : vector<20x20xf32>
    %cst_19 = arith.constant dense<0xFF800000> : vector<20xf32>
    %22 = vector.multi_reduction <maximumf>, %21, %cst_19 [1] : vector<20x20xf32> to vector<20xf32>
    %23 = vector.shape_cast %22 : vector<20xf32> to vector<20x1xf32>
    %24 = vector.broadcast %23 : vector<20x1xf32> to vector<20x20xf32>
    %25 = arith.subf %21, %24 : vector<20x20xf32>
    %26 = math.exp %25 : vector<20x20xf32>
    %cst_20 = arith.constant dense<0.000000e+00> : vector<20xf32>
    %27 = vector.multi_reduction <add>, %26, %cst_20 [1] : vector<20x20xf32> to vector<20xf32>
    %28 = vector.shape_cast %27 : vector<20xf32> to vector<20x1xf32>
    %29 = tpu.reciprocal %28 {approx = true} : vector<20x1xf32> -> vector<20x1xf32>
    %30 = vector.broadcast %29 : vector<20x1xf32> to vector<20x20xf32>
    %31 = arith.mulf %26, %30 : vector<20x20xf32>
    %cst_21 = arith.constant dense<0.000000e+00> : vector<20x64xf32>
    %32 = tpu.matmul %31, %16, %cst_21 {dimension_numbers = #tpu.dot_dimension_numbers<[1], [0], [0], [1], [0, 0, 1, 1], [], []>} : vector<20x20xf32>, vector<20x64xf32>, vector<20x64xf32> -> vector<20x64xf32>
    %33 = arith.truncf %32 : vector<20x64xf32> to vector<20x64xbf16>
    %c0_22 = arith.constant 0 : index
    %c0_23 = arith.constant 0 : index
    %34 = vector.load %arg9[%c0_22, %c0_23] : memref<64x64xbf16, #tpu.memory_space<vmem>>, vector<64x64xbf16>
    %cst_24 = arith.constant dense<0.000000e+00> : vector<20x64xf32>
    %35 = tpu.matmul %33, %34, %cst_24 {dimension_numbers = #tpu.dot_dimension_numbers<[1], [0], [0], [1], [0, 0, 1, 1], [], []>} : vector<20x64xbf16>, vector<64x64xbf16>, vector<20x64xf32> -> vector<20x64xf32>
    %c0_25 = arith.constant 0 : index
    %c0_26 = arith.constant 0 : index
    %36 = vector.load %arg10[%c0_25, %c0_26] : memref<1x64xf32, #tpu.memory_space<vmem>>, vector<1x64xf32>
    %37 = vector.broadcast %36 : vector<1x64xf32> to vector<20x64xf32>
    %38 = arith.addf %35, %37 : vector<20x64xf32>
    %39 = arith.addf %0, %38 : vector<20x64xf32>
    %cst_27 = arith.constant dense<0.000000e+00> : vector<20xf32>
    %40 = vector.multi_reduction <add>, %39, %cst_27 [1] : vector<20x64xf32> to vector<20xf32>
    %41 = vector.shape_cast %40 : vector<20xf32> to vector<20x1xf32>
    %cst_28 = arith.constant 6.400000e+01 : f32
    %42 = vector.broadcast %cst_28 : f32 to vector<20x1xf32>
    %43 = arith.divf %41, %42 : vector<20x1xf32>
    %44 = vector.broadcast %43 : vector<20x1xf32> to vector<20x64xf32>
    %45 = arith.subf %39, %44 : vector<20x64xf32>
    %46 = arith.mulf %45, %45 : vector<20x64xf32>
    %cst_29 = arith.constant dense<0.000000e+00> : vector<20xf32>
    %47 = vector.multi_reduction <add>, %46, %cst_29 [1] : vector<20x64xf32> to vector<20xf32>
    %48 = vector.shape_cast %47 : vector<20xf32> to vector<20x1xf32>
    %cst_30 = arith.constant 6.400000e+01 : f32
    %49 = vector.broadcast %cst_30 : f32 to vector<20x1xf32>
    %50 = arith.divf %48, %49 : vector<20x1xf32>
    %51 = vector.broadcast %43 : vector<20x1xf32> to vector<20x64xf32>
    %52 = arith.subf %39, %51 : vector<20x64xf32>
    %cst_31 = arith.constant 9.99999974E-6 : f32
    %53 = vector.broadcast %cst_31 : f32 to vector<20x1xf32>
    %54 = arith.addf %50, %53 : vector<20x1xf32>
    %55 = math.rsqrt %54 : vector<20x1xf32>
    %56 = vector.broadcast %55 : vector<20x1xf32> to vector<20x64xf32>
    %57 = arith.mulf %52, %56 : vector<20x64xf32>
    %c0_32 = arith.constant 0 : index
    %c0_33 = arith.constant 0 : index
    %58 = vector.load %arg11[%c0_32, %c0_33] : memref<1x64xf32, #tpu.memory_space<vmem>>, vector<1x64xf32>
    %59 = vector.broadcast %58 : vector<1x64xf32> to vector<20x64xf32>
    %60 = arith.mulf %57, %59 : vector<20x64xf32>
    %c0_34 = arith.constant 0 : index
    %c0_35 = arith.constant 0 : index
    %61 = vector.load %arg12[%c0_34, %c0_35] : memref<1x64xf32, #tpu.memory_space<vmem>>, vector<1x64xf32>
    %62 = vector.broadcast %61 : vector<1x64xf32> to vector<20x64xf32>
    %63 = arith.addf %60, %62 : vector<20x64xf32>
    %64 = arith.truncf %63 : vector<20x64xf32> to vector<20x64xbf16>
    %c0_36 = arith.constant 0 : index
    %c0_37 = arith.constant 0 : index
    %65 = vector.load %arg13[%c0_36, %c0_37] : memref<64x128xbf16, #tpu.memory_space<vmem>>, vector<64x128xbf16>
    %cst_38 = arith.constant dense<0.000000e+00> : vector<20x128xf32>
    %66 = tpu.matmul %64, %65, %cst_38 {dimension_numbers = #tpu.dot_dimension_numbers<[1], [0], [0], [1], [0, 0, 1, 1], [], []>} : vector<20x64xbf16>, vector<64x128xbf16>, vector<20x128xf32> -> vector<20x128xf32>
    %c0_39 = arith.constant 0 : index
    %c0_40 = arith.constant 0 : index
    %67 = vector.load %arg14[%c0_39, %c0_40] : memref<1x128xf32, #tpu.memory_space<vmem>>, vector<1x128xf32>
    %68 = vector.broadcast %67 : vector<1x128xf32> to vector<20x128xf32>
    %69 = arith.addf %66, %68 : vector<20x128xf32>
    %cst_41 = arith.constant 0.000000e+00 : f32
    %70 = vector.broadcast %cst_41 : f32 to vector<20x128xf32>
    %71 = arith.maximumf %69, %70 : vector<20x128xf32>
    %72 = arith.truncf %71 : vector<20x128xf32> to vector<20x128xbf16>
    %c0_42 = arith.constant 0 : index
    %c0_43 = arith.constant 0 : index
    %73 = vector.load %arg15[%c0_42, %c0_43] : memref<128x64xbf16, #tpu.memory_space<vmem>>, vector<128x64xbf16>
    %cst_44 = arith.constant dense<0.000000e+00> : vector<20x64xf32>
    %74 = tpu.matmul %72, %73, %cst_44 {dimension_numbers = #tpu.dot_dimension_numbers<[1], [0], [0], [1], [0, 0, 1, 1], [], []>} : vector<20x128xbf16>, vector<128x64xbf16>, vector<20x64xf32> -> vector<20x64xf32>
    %c0_45 = arith.constant 0 : index
    %c0_46 = arith.constant 0 : index
    %75 = vector.load %arg16[%c0_45, %c0_46] : memref<1x64xf32, #tpu.memory_space<vmem>>, vector<1x64xf32>
    %76 = vector.broadcast %75 : vector<1x64xf32> to vector<20x64xf32>
    %77 = arith.addf %74, %76 : vector<20x64xf32>
    %78 = arith.addf %63, %77 : vector<20x64xf32>
    %cst_47 = arith.constant dense<0.000000e+00> : vector<20xf32>
    %79 = vector.multi_reduction <add>, %78, %cst_47 [1] : vector<20x64xf32> to vector<20xf32>
    %80 = vector.shape_cast %79 : vector<20xf32> to vector<20x1xf32>
    %cst_48 = arith.constant 6.400000e+01 : f32
    %81 = vector.broadcast %cst_48 : f32 to vector<20x1xf32>
    %82 = arith.divf %80, %81 : vector<20x1xf32>
    %83 = vector.broadcast %82 : vector<20x1xf32> to vector<20x64xf32>
    %84 = arith.subf %78, %83 : vector<20x64xf32>
    %85 = arith.mulf %84, %84 : vector<20x64xf32>
    %cst_49 = arith.constant dense<0.000000e+00> : vector<20xf32>
    %86 = vector.multi_reduction <add>, %85, %cst_49 [1] : vector<20x64xf32> to vector<20xf32>
    %87 = vector.shape_cast %86 : vector<20xf32> to vector<20x1xf32>
    %cst_50 = arith.constant 6.400000e+01 : f32
    %88 = vector.broadcast %cst_50 : f32 to vector<20x1xf32>
    %89 = arith.divf %87, %88 : vector<20x1xf32>
    %90 = vector.broadcast %82 : vector<20x1xf32> to vector<20x64xf32>
    %91 = arith.subf %78, %90 : vector<20x64xf32>
    %cst_51 = arith.constant 9.99999974E-6 : f32
    %92 = vector.broadcast %cst_51 : f32 to vector<20x1xf32>
    %93 = arith.addf %89, %92 : vector<20x1xf32>
    %94 = math.rsqrt %93 : vector<20x1xf32>
    %95 = vector.broadcast %94 : vector<20x1xf32> to vector<20x64xf32>
    %96 = arith.mulf %91, %95 : vector<20x64xf32>
    %c0_52 = arith.constant 0 : index
    %c0_53 = arith.constant 0 : index
    %97 = vector.load %arg17[%c0_52, %c0_53] : memref<1x64xf32, #tpu.memory_space<vmem>>, vector<1x64xf32>
    %98 = vector.broadcast %97 : vector<1x64xf32> to vector<20x64xf32>
    %99 = arith.mulf %96, %98 : vector<20x64xf32>
    %c0_54 = arith.constant 0 : index
    %c0_55 = arith.constant 0 : index
    %100 = vector.load %arg18[%c0_54, %c0_55] : memref<1x64xf32, #tpu.memory_space<vmem>>, vector<1x64xf32>
    %101 = vector.broadcast %100 : vector<1x64xf32> to vector<20x64xf32>
    %102 = arith.addf %99, %101 : vector<20x64xf32>
    %c0_56 = arith.constant 0 : index
    %c0_57 = arith.constant 0 : index
    %103 = vector.load %arg19[%c0_56, %c0_57] : memref<20x64xf32, #tpu.memory_space<vmem>>, vector<20x64xf32>
    tpu.vector_store %arg19[%c0_56, %c0_57], %102 {strides = array<i32>} : memref<20x64xf32, #tpu.memory_space<vmem>>, vector<20x64xf32>,
    return
  }
  func.func @transform_0(%arg0: i32) -> (i32, i32) {
    %c0_i32 = arith.constant 0 : i32
    %c0_i32_0 = arith.constant 0 : i32
    %c0_i32_1 = arith.constant 0 : i32
    return %c0_i32, %c0_i32_0 : i32, i32
  }
  func.func @transform_1(%arg0: i32) -> (i32, i32) {
    %c0_i32 = arith.constant 0 : i32
    %c0_i32_0 = arith.constant 0 : i32
    %c0_i32_1 = arith.constant 0 : i32
    return %c0_i32, %c0_i32_0 : i32, i32
  }
  func.func @transform_2(%arg0: i32) -> (i32, i32) {
    %c0_i32 = arith.constant 0 : i32
    %c0_i32_0 = arith.constant 0 : i32
    %c0_i32_1 = arith.constant 0 : i32
    return %c0_i32, %c0_i32_0 : i32, i32
  }
  func.func @transform_3(%arg0: i32) -> (i32, i32) {
    %c0_i32 = arith.constant 0 : i32
    %c0_i32_0 = arith.constant 0 : i32
    %c0_i32_1 = arith.constant 0 : i32
    return %c0_i32, %c0_i32_0 : i32, i32
  }
  func.func @transform_4(%arg0: i32) -> (i32, i32) {
    %c0_i32 = arith.constant 0 : i32
    %c0_i32_0 = arith.constant 0 : i32
    %c0_i32_1 = arith.constant 0 : i32
    return %c0_i32, %c0_i32_0 : i32, i32
  }
  func.func @transform_5(%arg0: i32) -> (i32, i32) {
    %c0_i32 = arith.constant 0 : i32
    %c0_i32_0 = arith.constant 0 : i32
    %c0_i32_1 = arith.constant 0 : i32
    return %c0_i32, %c0_i32_0 : i32, i32
  }
  func.func @transform_6(%arg0: i32) -> (i32, i32) {
    %c0_i32 = arith.constant 0 : i32
    %c0_i32_0 = arith.constant 0 : i32
    %c0_i32_1 = arith.constant 0 : i32
    return %c0_i32, %c0_i32_0 : i32, i32
  }
  func.func @transform_7(%arg0: i32) -> (i32, i32) {
    %c0_i32 = arith.constant 0 : i32
    %c0_i32_0 = arith.constant 0 : i32
    %c0_i32_1 = arith.constant 0 : i32
    return %c0_i32, %c0_i32_0 : i32, i32
  }
  func.func @transform_8(%arg0: i32) -> (i32, i32) {
    %c0_i32 = arith.constant 0 : i32
    %c0_i32_0 = arith.constant 0 : i32
    %c0_i32_1 = arith.constant 0 : i32
    return %c0_i32, %c0_i32_0 : i32, i32
  }
  func.func @transform_9(%arg0: i32) -> (i32, i32) {
    %c0_i32 = arith.constant 0 : i32
    %c0_i32_0 = arith.constant 0 : i32
    %c0_i32_1 = arith.constant 0 : i32
    return %c0_i32, %c0_i32_0 : i32, i32
  }
  func.func @transform_10(%arg0: i32) -> (i32, i32) {
    %c0_i32 = arith.constant 0 : i32
    %c0_i32_0 = arith.constant 0 : i32
    %c0_i32_1 = arith.constant 0 : i32
    return %c0_i32, %c0_i32_0 : i32, i32
  }
  func.func @transform_11(%arg0: i32) -> (i32, i32) {
    %c0_i32 = arith.constant 0 : i32
    %c0_i32_0 = arith.constant 0 : i32
    %c0_i32_1 = arith.constant 0 : i32
    return %c0_i32, %c0_i32_0 : i32, i32
  }
  func.func @transform_12(%arg0: i32) -> (i32, i32) {
    %c0_i32 = arith.constant 0 : i32
    %c0_i32_0 = arith.constant 0 : i32
    %c0_i32_1 = arith.constant 0 : i32
    return %c0_i32, %c0_i32_0 : i32, i32
  }
  func.func @transform_13(%arg0: i32) -> (i32, i32) {
    %c0_i32 = arith.constant 0 : i32
    %c0_i32_0 = arith.constant 0 : i32
    %c0_i32_1 = arith.constant 0 : i32
    return %c0_i32, %c0_i32_0 : i32, i32
  }
  func.func @transform_14(%arg0: i32) -> (i32, i32) {
    %c0_i32 = arith.constant 0 : i32
    %c0_i32_0 = arith.constant 0 : i32
    %c0_i32_1 = arith.constant 0 : i32
    return %c0_i32, %c0_i32_0 : i32, i32
  }
  func.func @transform_15(%arg0: i32) -> (i32, i32) {
    %c0_i32 = arith.constant 0 : i32
    %c0_i32_0 = arith.constant 0 : i32
    %c0_i32_1 = arith.constant 0 : i32
    return %c0_i32, %c0_i32_0 : i32, i32
  }
  func.func @transform_16(%arg0: i32) -> (i32, i32) {
    %c0_i32 = arith.constant 0 : i32
    %c0_i32_0 = arith.constant 0 : i32
    %c0_i32_1 = arith.constant 0 : i32
    return %c0_i32, %c0_i32_0 : i32, i32
  }
  func.func @transform_17(%arg0: i32) -> (i32, i32) {
    %c0_i32 = arith.constant 0 : i32
    %c0_i32_0 = arith.constant 0 : i32
    %c0_i32_1 = arith.constant 0 : i32
    return %c0_i32, %c0_i32_0 : i32, i32
  }
  func.func @transform_18(%arg0: i32) -> (i32, i32) {
    %c0_i32 = arith.constant 0 : i32
    %c0_i32_0 = arith.constant 0 : i32
    %c0_i32_1 = arith.constant 0 : i32
    return %c0_i32, %c0_i32_0 : i32, i32
  }
}

module attributes {stable_mosaic.version = 11 : i64} {
  func.func @_head_kernel(%arg0: i32, %arg1: memref<20x64xf32, #tpu.memory_space<vmem>>, %arg2: memref<2x20xf32, #tpu.memory_space<vmem>>, %arg3: memref<1x64xf32, #tpu.memory_space<vmem>>, %arg4: memref<1x64xf32, #tpu.memory_space<vmem>>, %arg5: memref<64x64xf32, #tpu.memory_space<vmem>>, %arg6: memref<1x64xf32, #tpu.memory_space<vmem>>, %arg7: memref<64x32xf32, #tpu.memory_space<vmem>>, %arg8: memref<1x32xf32, #tpu.memory_space<vmem>>, %arg9: memref<32x2xf32, #tpu.memory_space<vmem>>, %arg10: memref<1x2xf32, #tpu.memory_space<vmem>>, %arg11: memref<2x2xf32, #tpu.memory_space<vmem>>) attributes {dimension_semantics = [#tpu.dimension_semantics<arbitrary>], iteration_bounds = array<i64: 1>, scalar_prefetch = 0 : i64, scratch_operands = 0 : i64, tpu.core_type = #tpu.core_type<tc>, window_params = [{pipeline_mode = #tpu.pipeline_mode<synchronous>, transform_indices = @transform_0, window_bounds = array<i64: 20, 64>}, {pipeline_mode = #tpu.pipeline_mode<synchronous>, transform_indices = @transform_1, window_bounds = array<i64: 2, 20>}, {pipeline_mode = #tpu.pipeline_mode<synchronous>, transform_indices = @transform_2, window_bounds = array<i64: 1, 64>}, {pipeline_mode = #tpu.pipeline_mode<synchronous>, transform_indices = @transform_3, window_bounds = array<i64: 1, 64>}, {pipeline_mode = #tpu.pipeline_mode<synchronous>, transform_indices = @transform_4, window_bounds = array<i64: 64, 64>}, {pipeline_mode = #tpu.pipeline_mode<synchronous>, transform_indices = @transform_5, window_bounds = array<i64: 1, 64>}, {pipeline_mode = #tpu.pipeline_mode<synchronous>, transform_indices = @transform_6, window_bounds = array<i64: 64, 32>}, {pipeline_mode = #tpu.pipeline_mode<synchronous>, transform_indices = @transform_7, window_bounds = array<i64: 1, 32>}, {pipeline_mode = #tpu.pipeline_mode<synchronous>, transform_indices = @transform_8, window_bounds = array<i64: 32, 2>}, {pipeline_mode = #tpu.pipeline_mode<synchronous>, transform_indices = @transform_9, window_bounds = array<i64: 1, 2>}, {pipeline_mode = #tpu.pipeline_mode<synchronous>, transform_indices = @transform_10, window_bounds = array<i64: 2, 2>}]} {
    %c0 = arith.constant 0 : index
    %c0_0 = arith.constant 0 : index
    %0 = vector.load %arg1[%c0, %c0_0] : memref<20x64xf32, #tpu.memory_space<vmem>>, vector<20x64xf32>
    %cst = arith.constant dense<0.000000e+00> : vector<20xf32>
    %1 = vector.multi_reduction <add>, %0, %cst [1] : vector<20x64xf32> to vector<20xf32>
    %2 = vector.shape_cast %1 : vector<20xf32> to vector<20x1xf32>
    %cst_1 = arith.constant 6.400000e+01 : f32
    %3 = vector.broadcast %cst_1 : f32 to vector<20x1xf32>
    %4 = arith.divf %2, %3 : vector<20x1xf32>
    %5 = vector.broadcast %4 : vector<20x1xf32> to vector<20x64xf32>
    %6 = arith.subf %0, %5 : vector<20x64xf32>
    %7 = arith.mulf %6, %6 : vector<20x64xf32>
    %cst_2 = arith.constant dense<0.000000e+00> : vector<20xf32>
    %8 = vector.multi_reduction <add>, %7, %cst_2 [1] : vector<20x64xf32> to vector<20xf32>
    %9 = vector.shape_cast %8 : vector<20xf32> to vector<20x1xf32>
    %cst_3 = arith.constant 6.400000e+01 : f32
    %10 = vector.broadcast %cst_3 : f32 to vector<20x1xf32>
    %11 = arith.divf %9, %10 : vector<20x1xf32>
    %12 = vector.broadcast %4 : vector<20x1xf32> to vector<20x64xf32>
    %13 = arith.subf %0, %12 : vector<20x64xf32>
    %cst_4 = arith.constant 9.99999974E-6 : f32
    %14 = vector.broadcast %cst_4 : f32 to vector<20x1xf32>
    %15 = arith.addf %11, %14 : vector<20x1xf32>
    %16 = math.rsqrt %15 : vector<20x1xf32>
    %17 = vector.broadcast %16 : vector<20x1xf32> to vector<20x64xf32>
    %18 = arith.mulf %13, %17 : vector<20x64xf32>
    %c0_5 = arith.constant 0 : index
    %c0_6 = arith.constant 0 : index
    %19 = vector.load %arg3[%c0_5, %c0_6] : memref<1x64xf32, #tpu.memory_space<vmem>>, vector<1x64xf32>
    %20 = vector.broadcast %19 : vector<1x64xf32> to vector<20x64xf32>
    %21 = arith.mulf %18, %20 : vector<20x64xf32>
    %c0_7 = arith.constant 0 : index
    %c0_8 = arith.constant 0 : index
    %22 = vector.load %arg4[%c0_7, %c0_8] : memref<1x64xf32, #tpu.memory_space<vmem>>, vector<1x64xf32>
    %23 = vector.broadcast %22 : vector<1x64xf32> to vector<20x64xf32>
    %24 = arith.addf %21, %23 : vector<20x64xf32>
    %c0_9 = arith.constant 0 : index
    %c0_10 = arith.constant 0 : index
    %25 = vector.load %arg2[%c0_9, %c0_10] : memref<2x20xf32, #tpu.memory_space<vmem>>, vector<2x20xf32>
    %cst_11 = arith.constant dense<0.000000e+00> : vector<2x64xf32>
    %26 = tpu.matmul %25, %24, %cst_11 {dimension_numbers = #tpu.dot_dimension_numbers<[1], [0], [0], [1], [0, 0, 1, 1], [], []>} : vector<2x20xf32>, vector<20x64xf32>, vector<2x64xf32> -> vector<2x64xf32>
    %c0_12 = arith.constant 0 : index
    %c0_13 = arith.constant 0 : index
    %27 = vector.load %arg5[%c0_12, %c0_13] : memref<64x64xf32, #tpu.memory_space<vmem>>, vector<64x64xf32>
    %cst_14 = arith.constant dense<0.000000e+00> : vector<2x64xf32>
    %28 = tpu.matmul %26, %27, %cst_14 {dimension_numbers = #tpu.dot_dimension_numbers<[1], [0], [0], [1], [0, 0, 1, 1], [], []>} : vector<2x64xf32>, vector<64x64xf32>, vector<2x64xf32> -> vector<2x64xf32>
    %c0_15 = arith.constant 0 : index
    %c0_16 = arith.constant 0 : index
    %29 = vector.load %arg6[%c0_15, %c0_16] : memref<1x64xf32, #tpu.memory_space<vmem>>, vector<1x64xf32>
    %30 = vector.broadcast %29 : vector<1x64xf32> to vector<2x64xf32>
    %31 = arith.addf %28, %30 : vector<2x64xf32>
    %cst_17 = arith.constant 0.000000e+00 : f32
    %32 = vector.broadcast %cst_17 : f32 to vector<2x64xf32>
    %33 = arith.maximumf %31, %32 : vector<2x64xf32>
    %c0_18 = arith.constant 0 : index
    %c0_19 = arith.constant 0 : index
    %34 = vector.load %arg7[%c0_18, %c0_19] : memref<64x32xf32, #tpu.memory_space<vmem>>, vector<64x32xf32>
    %cst_20 = arith.constant dense<0.000000e+00> : vector<2x32xf32>
    %35 = tpu.matmul %33, %34, %cst_20 {dimension_numbers = #tpu.dot_dimension_numbers<[1], [0], [0], [1], [0, 0, 1, 1], [], []>} : vector<2x64xf32>, vector<64x32xf32>, vector<2x32xf32> -> vector<2x32xf32>
    %c0_21 = arith.constant 0 : index
    %c0_22 = arith.constant 0 : index
    %36 = vector.load %arg8[%c0_21, %c0_22] : memref<1x32xf32, #tpu.memory_space<vmem>>, vector<1x32xf32>
    %37 = vector.broadcast %36 : vector<1x32xf32> to vector<2x32xf32>
    %38 = arith.addf %35, %37 : vector<2x32xf32>
    %cst_23 = arith.constant 0.000000e+00 : f32
    %39 = vector.broadcast %cst_23 : f32 to vector<2x32xf32>
    %40 = arith.maximumf %38, %39 : vector<2x32xf32>
    %c0_24 = arith.constant 0 : index
    %c0_25 = arith.constant 0 : index
    %41 = vector.load %arg9[%c0_24, %c0_25] : memref<32x2xf32, #tpu.memory_space<vmem>>, vector<32x2xf32>
    %cst_26 = arith.constant dense<0.000000e+00> : vector<2x2xf32>
    %42 = tpu.matmul %40, %41, %cst_26 {dimension_numbers = #tpu.dot_dimension_numbers<[1], [0], [0], [1], [0, 0, 1, 1], [], []>} : vector<2x32xf32>, vector<32x2xf32>, vector<2x2xf32> -> vector<2x2xf32>
    %c0_27 = arith.constant 0 : index
    %c0_28 = arith.constant 0 : index
    %43 = vector.load %arg10[%c0_27, %c0_28] : memref<1x2xf32, #tpu.memory_space<vmem>>, vector<1x2xf32>
    %44 = vector.broadcast %43 : vector<1x2xf32> to vector<2x2xf32>
    %45 = arith.addf %42, %44 : vector<2x2xf32>
    %c0_29 = arith.constant 0 : index
    %c0_30 = arith.constant 0 : index
    %46 = vector.load %arg11[%c0_29, %c0_30] : memref<2x2xf32, #tpu.memory_space<vmem>>, vector<2x2xf32>
    tpu.vector_store %arg11[%c0_29, %c0_30], %45 {strides = array<i32>} : memref<2x2xf32, #tpu.memory_space<vmem>>, vector<2x2xf32>,
    return
  }
  func.func @transform_0(%arg0: i32) -> (i32, i32) {
    %c0_i32 = arith.constant 0 : i32
    %c0_i32_0 = arith.constant 0 : i32
    %c0_i32_1 = arith.constant 0 : i32
    return %c0_i32, %c0_i32_0 : i32, i32
  }
  func.func @transform_1(%arg0: i32) -> (i32, i32) {
    %c0_i32 = arith.constant 0 : i32
    %c0_i32_0 = arith.constant 0 : i32
    %c0_i32_1 = arith.constant 0 : i32
    return %c0_i32, %c0_i32_0 : i32, i32
  }
  func.func @transform_2(%arg0: i32) -> (i32, i32) {
    %c0_i32 = arith.constant 0 : i32
    %c0_i32_0 = arith.constant 0 : i32
    %c0_i32_1 = arith.constant 0 : i32
    return %c0_i32, %c0_i32_0 : i32, i32
  }
  func.func @transform_3(%arg0: i32) -> (i32, i32) {
    %c0_i32 = arith.constant 0 : i32
    %c0_i32_0 = arith.constant 0 : i32
    %c0_i32_1 = arith.constant 0 : i32
    return %c0_i32, %c0_i32_0 : i32, i32
  }
  func.func @transform_4(%arg0: i32) -> (i32, i32) {
    %c0_i32 = arith.constant 0 : i32
    %c0_i32_0 = arith.constant 0 : i32
    %c0_i32_1 = arith.constant 0 : i32
    return %c0_i32, %c0_i32_0 : i32, i32
  }
  func.func @transform_5(%arg0: i32) -> (i32, i32) {
    %c0_i32 = arith.constant 0 : i32
    %c0_i32_0 = arith.constant 0 : i32
    %c0_i32_1 = arith.constant 0 : i32
    return %c0_i32, %c0_i32_0 : i32, i32
  }
  func.func @transform_6(%arg0: i32) -> (i32, i32) {
    %c0_i32 = arith.constant 0 : i32
    %c0_i32_0 = arith.constant 0 : i32
    %c0_i32_1 = arith.constant 0 : i32
    return %c0_i32, %c0_i32_0 : i32, i32
  }
  func.func @transform_7(%arg0: i32) -> (i32, i32) {
    %c0_i32 = arith.constant 0 : i32
    %c0_i32_0 = arith.constant 0 : i32
    %c0_i32_1 = arith.constant 0 : i32
    return %c0_i32, %c0_i32_0 : i32, i32
  }
  func.func @transform_8(%arg0: i32) -> (i32, i32) {
    %c0_i32 = arith.constant 0 : i32
    %c0_i32_0 = arith.constant 0 : i32
    %c0_i32_1 = arith.constant 0 : i32
    return %c0_i32, %c0_i32_0 : i32, i32
  }
  func.func @transform_9(%arg0: i32) -> (i32, i32) {
    %c0_i32 = arith.constant 0 : i32
    %c0_i32_0 = arith.constant 0 : i32
    %c0_i32_1 = arith.constant 0 : i32
    return %c0_i32, %c0_i32_0 : i32, i32
  }
  func.func @transform_10(%arg0: i32) -> (i32, i32) {
    %c0_i32 = arith.constant 0 : i32
    %c0_i32_0 = arith.constant 0 : i32
    %c0_i32_1 = arith.constant 0 : i32
    return %c0_i32, %c0_i32_0 : i32, i32
  }
}

</mosaic_0001>

<bundles_post_ra>
// kernel: transformer_forward.13
= control target key start
LH: loop header
LB: loop body
LE: loop exit
PB: predicated region body
PF: predicated region fallthrough
CT: control target
= control target key end

     0   :  { %vm90_vm0 = vcmask 261120   ;;  %vm282_vm1 = vcmask 523264   ;;  %s496_s1 = inlined_call_operand.vmem [shape: bf16[32,64], index: 1, kind: input, shape index: {}]   ;;  %s497_s0 = inlined_call_operand.vmem [shape: bf16[128,32], index: 0, kind: input, shape index: {}]   ;;  %s498_s2 = inlined_call_operand.vmem [shape: f32[1,64], index: 2, kind: input, shape index: {}]   ;;  %s499_s3 = inlined_call_operand.vmem [shape: f32[1,64], index: 3, kind: input, shape index: {}]   ;;  %s500_s4 = inlined_call_operand.vmem [shape: f32[64,64], index: 4, kind: output, shape index: {}]  }
   0x1   :  { %v349_v0 = vld [vmem:[%s496_s1] sm:$0xff]   ;;  %v350_v1 = vld [vmem:[%s496_s1 + $0x8] sm:$0xff]   ;;  %v355_v6 = vld [vmem:[%s497_s0 + $0x10] sm:$0xff]  }
   0x2   :  { %325 = vmatprep.subr.bf16.mxu0 %v349_v0  ;;  %345 = vmatprep.subr.bf16.mxu1 %v349_v0  ;;  %v351_v2 = vld [vmem:[%s497_s0] sm:$0xff]   ;;  %v353_v4 = vld [vmem:[%s497_s0 + $0x8] sm:$0xff]   ;;  %v356_v7 = vld [vmem:[%s497_s0 + $0x30] sm:$0xff]  }
   0x3   :  { %326 = vmatpush3.bf16.msra.mxu0 %v349_v0  ;;  %347 = vmatpush3.bf16.msra.mxu1 %v349_v0  ;;  %v352_v3 = vld [vmem:[%s497_s0 + $0x20] sm:$0xff]   ;;  %v354_v5 = vld [vmem:[%s497_s0 + $0x28] sm:$0xff]   ;;  %v357_v8 = vld [vmem:[%s497_s0 + $0x18] sm:$0xff]  }
   0x4   :  { %327 = vmatprep.subr.bf16.mxu0 %v350_v1  ;;  %346 = vmatprep.subr.bf16.mxu1 %v350_v1  ;;  %v358_v9 = vld [vmem:[%s497_s0 + $0x38] sm:$0xff]   ;;  %v425_v10 = vld [vmem:[%s498_s2] ss:$0 sm:$0xff] }
   0x5   :  { %329 = vmatprep.mubr.msk.bf16.mxu0 %vm90_vm0, %v351_v2  ;;  %337 = vmatprep.mubr.msk.bf16.mxu1 %vm90_vm0, %v352_v3  ;;  %v430_v12 = vld [vmem:[%s499_s3] ss:$0 sm:$0xff] }
   0x7   :  { %328 = vmatpush3.bf16.msra.mxu0 %v350_v1  ;;  %348 = vmatpush3.bf16.msra.mxu1 %v350_v1 }
   0xa   :  { %330 = vmatmul.mubr.msk.bf16.vlgmr.msra.gmra.mrb[0].mxu0 %vm90_vm0, %v353_v4  ;;  %338 = vmatmul.mubr.msk.bf16.vlgmr.msra.gmra.mrb[0].mxu1 %vm90_vm0, %v354_v5 }
   0xb   :  { %333 = vmatprep.mubr.msk.bf16.mxu0 %vm90_vm0, %v355_v6  ;;  %341 = vmatprep.mubr.msk.bf16.mxu1 %vm90_vm0, %v356_v7 }
  0x12   :  { %334 = vmatmul.mubr.msk.bf16.gmra.mrb[4].mxu0 %vm90_vm0, %v357_v8  ;;  %342 = vmatmul.mubr.msk.bf16.gmra.mrb[4].mxu1 %vm90_vm0, %v358_v9 }
  0xdd   :  { %v331_v11 = vpop.f32.mrb[0].mxu0  ;;  %v339_v13 = vpop.f32.mrb[0].mxu1 }
  0xde   :  { %v221_v14 = vmul.f32 %v331_v11, %v425_v10  ;;  %v229_v15 = vmul.f32 %v339_v13, %v425_v10  ;;  %v149_v16 = vpop.f32.mrb[1].mxu0  ;;  %v181_v17 = vpop.f32.mrb[1].mxu1 }
  0xdf   :  { %v219_v18 = vmul.f32 %v425_v10, %v149_v16  ;;  %v227_v19 = vmul.f32 %v425_v10, %v181_v17  ;;  %v332_v20 = vpop.f32.mrb[2].mxu0  ;;  %v340_v21 = vpop.f32.mrb[2].mxu1 }
  0xe0   :  { %v244_v22 = vadd.f32 %v430_v12, %v221_v14  ;;  %v252_v23 = vadd.f32 %v430_v12, %v229_v15  ;;  %v222_v24 = vmul.f32 %v332_v20, %v425_v10  ;;  %v230_v25 = vmul.f32 %v340_v21, %v425_v10  ;;  %v152_v26 = vpop.f32.mrb[3].mxu0  ;;  %v184_v27 = vpop.f32.mrb[3].mxu1 }
  0xe1   :  { %v242_v28 = vadd.f32 %v430_v12, %v219_v18  ;;  %v250_v29 = vadd.f32 %v430_v12, %v227_v19  ;;  %v220_v30 = vmul.f32 %v425_v10, %v152_v26  ;;  %v228_v31 = vmul.f32 %v425_v10, %v184_v27 }
  0xe2   :  { %v260_v32 = vmax.f32 %v244_v22, 0.0  ;;  %v268_v33 = vmax.f32 %v252_v23, 0.0  ;;  %v245_v34 = vadd.f32 %v430_v12, %v222_v24  ;;  %v253_v35 = vadd.f32 %v430_v12, %v230_v25 }
  0xe3   :  { %v258_v36 = vmax.f32 %v242_v28, 0.0  ;;  %v266_v37 = vmax.f32 %v250_v29, 0.0  ;;  %v243_v38 = vadd.f32 %v430_v12, %v220_v30  ;;  %v251_v39 = vadd.f32 %v430_v12, %v228_v31 }
  0xe4   :  { %v276_v40 = vmax.f32 %v260_v32, %v268_v33  ;;  %v261_v41 = vmax.f32 %v245_v34, 0.0  ;;  %v269_v42 = vmax.f32 %v253_v35, 0.0 }
  0xe5   :  { %v274_v43 = vmax.f32 %v258_v36, %v266_v37  ;;  %v259_v44 = vmax.f32 %v243_v38, 0.0  ;;  %v267_v45 = vmax.f32 %v251_v39, 0.0  ;;  %v335_v46 = vpop.f32.mrb[4].mxu0  ;;  %v343_v47 = vpop.f32.mrb[4].mxu1 }
  0xe6   :  { %285 = vst.msk [vmem:[%s500_s4 + $0x10] sm:$0xff] %vm282_vm1, %v276_v40  ;;  %v277_v48 = vmax.f32 %v261_v41, %v269_v42  ;;  %v225_v49 = vmul.f32 %v335_v46, %v425_v10  ;;  %v233_v50 = vmul.f32 %v343_v47, %v425_v10  ;;  %v165_v51 = vpop.f32.mrb[5].mxu0  ;;  %v197_v52 = vpop.f32.mrb[5].mxu1 }
  0xe7   :  { %283 = vst.msk [vmem:[%s500_s4] sm:$0xff] %vm282_vm1, %v274_v43  ;;  %v275_v53 = vmax.f32 %v259_v44, %v267_v45  ;;  %v223_v54 = vmul.f32 %v425_v10, %v165_v51  ;;  %v231_v55 = vmul.f32 %v425_v10, %v197_v52  ;;  %v336_v56 = vpop.f32.mrb[6].mxu0  ;;  %v344_v57 = vpop.f32.mrb[6].mxu1 }
  0xe8   :  { %286 = vst.msk [vmem:[%s500_s4 + $0x18] sm:$0xff] %vm282_vm1, %v277_v48  ;;  %v248_v58 = vadd.f32 %v430_v12, %v225_v49  ;;  %v256_v59 = vadd.f32 %v430_v12, %v233_v50  ;;  %v226_v60 = vmul.f32 %v336_v56, %v425_v10  ;;  %v234_v61 = vmul.f32 %v344_v57, %v425_v10  ;;  %v168_v62 = vpop.f32.mrb[7].mxu0  ;;  %v200_v63 = vpop.f32.mrb[7].mxu1 }
  0xe9   :  { %284 = vst.msk [vmem:[%s500_s4 + $0x8] sm:$0xff] %vm282_vm1, %v275_v53  ;;  %v246_v0 = vadd.f32 %v430_v12, %v223_v54  ;;  %v254_v1 = vadd.f32 %v430_v12, %v231_v55  ;;  %v224_v2 = vmul.f32 %v425_v10, %v168_v62  ;;  %v232_v3 = vmul.f32 %v425_v10, %v200_v63 }
  0xea   :  { %v264_v4 = vmax.f32 %v248_v58, 0.0  ;;  %v272_v5 = vmax.f32 %v256_v59, 0.0  ;;  %v249_v6 = vadd.f32 %v430_v12, %v226_v60  ;;  %v257_v7 = vadd.f32 %v430_v12, %v234_v61 }
  0xeb   :  { %v262_v8 = vmax.f32 %v246_v0, 0.0  ;;  %v270_v9 = vmax.f32 %v254_v1, 0.0  ;;  %v247_v11 = vadd.f32 %v430_v12, %v224_v2  ;;  %v255_v13 = vadd.f32 %v430_v12, %v232_v3 }
  0xec   :  { %v280_v14 = vmax.f32 %v264_v4, %v272_v5  ;;  %v265_v15 = vmax.f32 %v249_v6, 0.0  ;;  %v273_v16 = vmax.f32 %v257_v7, 0.0 }
  0xed   :  { %v278_v17 = vmax.f32 %v262_v8, %v270_v9  ;;  %v263_v18 = vmax.f32 %v247_v11, 0.0  ;;  %v271_v19 = vmax.f32 %v255_v13, 0.0 }
  0xee   :  { %289 = vst.msk [vmem:[%s500_s4 + $0x30] sm:$0xff] %vm282_vm1, %v280_v14  ;;  %v281_v10 = vmax.f32 %v265_v15, %v273_v16 }
  0xef   :  { %287 = vst.msk [vmem:[%s500_s4 + $0x20] sm:$0xff] %vm282_vm1, %v278_v17  ;;  %v279_v20 = vmax.f32 %v263_v18, %v271_v19 }
  0xf0   :  { %290 = vst.msk [vmem:[%s500_s4 + $0x38] sm:$0xff] %vm282_vm1, %v281_v10 }
  0xf1   :  { %288 = vst.msk [vmem:[%s500_s4 + $0x28] sm:$0xff] %vm282_vm1, %v279_v20 }

// kernel: transformer_forward.14
= control target key start
LH: loop header
LB: loop body
LE: loop exit
PB: predicated region body
PF: predicated region fallthrough
CT: control target
= control target key end

     0   :  { %vm1988_vm0 = vcmask 523264   ;;  %s3295_s1 = inlined_call_operand.vmem [shape: bf16[2048,64], index: 1, kind: input, shape index: {}]   ;;  %s3296_s0 = inlined_call_operand.vmem [shape: bf16[64,2048], index: 0, kind: input, shape index: {}]   ;;  %s3297_s2 = inlined_call_operand.vmem [shape: f32[1,64], index: 2, kind: input, shape index: {}]   ;;  %s3298_s3 = inlined_call_operand.vmem [shape: f32[1,64], index: 3, kind: input, shape index: {}]   ;;  %s3299_s4 = inlined_call_operand.vmem [shape: f32[32,64], index: 4, kind: output, shape index: {}]  }
   0x1   :  { %v2511_v0 = vld [vmem:[%s3295_s1 + $0x40] sm:$0xff]   ;;  %v2515_v4 = vld [vmem:[%s3295_s1 + $0x48] sm:$0xff]   ;;  %v2519_v8 = vld [vmem:[%s3295_s1 + $0x50] sm:$0xff]  }
   0x2   :  { %v2512_v1 = vld [vmem:[%s3295_s1 + $0xc0] sm:$0xff]   ;;  %2191 = vmatprep.subr.bf16.mxu0 %v2511_v0  ;;  %v2516_v5 = vld [vmem:[%s3295_s1 + $0xc8] sm:$0xff]   ;;  %v2520_v9 = vld [vmem:[%s3295_s1 + $0xd0] sm:$0xff]  }
   0x3   :  { %v2513_v2 = vld [vmem:[%s3295_s1] sm:$0xff]   ;;  %2231 = vmatprep.subr.bf16.mxu1 %v2512_v1  ;;  %v2517_v6 = vld [vmem:[%s3295_s1 + $0x8] sm:$0xff]   ;;  %v2521_v10 = vld [vmem:[%s3295_s1 + $0x10] sm:$0xff]  }
   0x4   :  { %v2514_v3 = vld [vmem:[%s3295_s1 + $0x80] sm:$0xff]   ;;  %2192 = vmatpush3.bf16.msra.mxu0 %v2513_v2  ;;  %v2518_v7 = vld [vmem:[%s3295_s1 + $0x88] sm:$0xff]   ;;  %v2522_v11 = vld [vmem:[%s3295_s1 + $0x90] sm:$0xff]  }
   0x5   :  { %2232 = vmatpush3.bf16.msra.mxu1 %v2514_v3  ;;  %2193 = vmatprep.subr.bf16.mxu0 %v2515_v4  ;;  %v2523_v12 = vld [vmem:[%s3295_s1 + $0x58] sm:$0xff]   ;;  %v2527_v16 = vld [vmem:[%s3295_s1 + $0x60] sm:$0xff]   ;;  %v2531_v20 = vld [vmem:[%s3295_s1 + $0x68] sm:$0xff]  }
   0x6   :  { %2233 = vmatprep.subr.bf16.mxu1 %v2516_v5  ;;  %v2524_v13 = vld [vmem:[%s3295_s1 + $0xd8] sm:$0xff]   ;;  %v2528_v17 = vld [vmem:[%s3295_s1 + $0xe0] sm:$0xff]   ;;  %v2532_v21 = vld [vmem:[%s3295_s1 + $0xe8] sm:$0xff]  }
   0x7   :  { %v2525_v14 = vld [vmem:[%s3295_s1 + $0x18] sm:$0xff]   ;;  %v2529_v18 = vld [vmem:[%s3295_s1 + $0x20] sm:$0xff]   ;;  %v2533_v22 = vld [vmem:[%s3295_s1 + $0x28] sm:$0xff]  }
   0x8   :  { %2194 = vmatpush3.bf16.msra.mxu0 %v2517_v6  ;;  %v2526_v15 = vld [vmem:[%s3295_s1 + $0x98] sm:$0xff]   ;;  %v2530_v19 = vld [vmem:[%s3295_s1 + $0xa0] sm:$0xff]   ;;  %v2534_v23 = vld [vmem:[%s3295_s1 + $0xa8] sm:$0xff]  }
   0x9   :  { %2234 = vmatpush3.bf16.msra.mxu1 %v2518_v7  ;;  %2195 = vmatprep.subr.bf16.mxu0 %v2519_v8  ;;  %v2535_v24 = vld [vmem:[%s3295_s1 + $0x70] sm:$0xff]   ;;  %v2539_v28 = vld [vmem:[%s3295_s1 + $0x78] sm:$0xff]   ;;  %v18_v32 = vld [vmem:[%s3296_s0] sm:$0xff] }
   0xa   :  { %2235 = vmatprep.subr.bf16.mxu1 %v2520_v9  ;;  %v2536_v25 = vld [vmem:[%s3295_s1 + $0xf0] sm:$0xff]   ;;  %v2540_v29 = vld [vmem:[%s3295_s1 + $0xf8] sm:$0xff]   ;;  %v26_v33 = vld [vmem:[%s3296_s0 + $0x40] sm:$0xff] }
   0xb   :  { %v2537_v26 = vld [vmem:[%s3295_s1 + $0x30] sm:$0xff]   ;;  %v2541_v30 = vld [vmem:[%s3295_s1 + $0x38] sm:$0xff]   ;;  %v19_v34 = vld [vmem:[%s3296_s0 + $0x8] sm:$0xff]  ;;  %v1997_v35 = vcombine.low %v18_v32, %v26_v33  ;;  %v1998_v36 = vcombine.high %v18_v32, %v26_v33 }
   0xc   :  { %2196 = vmatpush3.bf16.msra.mxu0 %v2521_v10  ;;  %v2538_v27 = vld [vmem:[%s3295_s1 + $0xb0] sm:$0xff]   ;;  %v2542_v31 = vld [vmem:[%s3295_s1 + $0xb8] sm:$0xff]   ;;  %v27_v37 = vld [vmem:[%s3296_s0 + $0x48] sm:$0xff] }
   0xd   :  { %2236 = vmatpush3.bf16.msra.mxu1 %v2522_v11  ;;  %2197 = vmatprep.subr.bf16.mxu0 %v2523_v12  ;;  %v1999_v38 = vcombine.low %v19_v34, %v27_v37  ;;  %v2000_v39 = vcombine.high %v19_v34, %v27_v37  ;;  %v2543_v40 = vld [vmem:[%s3295_s1 + $0x140] sm:$0xff]   ;;  %v2547_v44 = vld [vmem:[%s3295_s1 + $0x148] sm:$0xff]   ;;  %v2551_v56 = vld [vmem:[%s3295_s1 + $0x150] sm:$0xff]  }
   0xe   :  { %2237 = vmatprep.subr.bf16.mxu1 %v2524_v13  ;;  %1458 = vmatprep.mubr.bf16.mxu0 %v1998_v36  ;;  %v2544_v41 = vld [vmem:[%s3295_s1 + $0x1c0] sm:$0xff]   ;;  %v2548_v45 = vld [vmem:[%s3295_s1 + $0x1c8] sm:$0xff]   ;;  %v2552_v57 = vld [vmem:[%s3295_s1 + $0x1d0] sm:$0xff]  }
   0xf   :  { %1523 = vmatprep.mubr.bf16.mxu1 %v2000_v39  ;;  %v2545_v42 = vld [vmem:[%s3295_s1 + $0x100] sm:$0xff]   ;;  %v2549_v46 = vld [vmem:[%s3295_s1 + $0x108] sm:$0xff]   ;;  %v2553_v58 = vld [vmem:[%s3295_s1 + $0x110] sm:$0xff]  }
  0x10   :  { %2198 = vmatpush3.bf16.msra.mxu0 %v2525_v14  ;;  %v2546_v43 = vld [vmem:[%s3295_s1 + $0x180] sm:$0xff]   ;;  %v2550_v47 = vld [vmem:[%s3295_s1 + $0x188] sm:$0xff]   ;;  %v2554_v59 = vld [vmem:[%s3295_s1 + $0x190] sm:$0xff]  }
  0x11   :  { %2238 = vmatpush3.bf16.msra.mxu1 %v2526_v15  ;;  %2199 = vmatprep.subr.bf16.mxu0 %v2527_v16  ;;  %v34_v48 = vld [vmem:[%s3296_s0 + $0x80] sm:$0xff]  ;;  %v35_v51 = vld [vmem:[%s3296_s0 + $0x88] sm:$0xff]  ;;  %v2555_v60 = vld [vmem:[%s3295_s1 + $0x158] sm:$0xff]  }
  0x12   :  { %2239 = vmatprep.subr.bf16.mxu1 %v2528_v17  ;;  %v42_v49 = vld [vmem:[%s3296_s0 + $0xc0] sm:$0xff]  ;;  %v43_v52 = vld [vmem:[%s3296_s0 + $0xc8] sm:$0xff]  ;;  %v2556_v61 = vld [vmem:[%s3295_s1 + $0x1d8] sm:$0xff]  }
  0x13   :  { %v2014_v50 = vcombine.high %v34_v48, %v42_v49  ;;  %v2013_v53 = vcombine.low %v34_v48, %v42_v49  ;;  %v2016_v54 = vcombine.high %v35_v51, %v43_v52  ;;  %v2015_v55 = vcombine.low %v35_v51, %v43_v52  ;;  %v2557_v62 = vld [vmem:[%s3295_s1 + $0x118] sm:$0xff]   ;;  %v50_v0 = vld [vmem:[%s3296_s0 + $0x100] sm:$0xff]  ;;  %v51_v2 = vld [vmem:[%s3296_s0 + $0x108] sm:$0xff] }
  0x14   :  { %2200 = vmatpush3.bf16.msra.mxu0 %v2529_v18  ;;  %v2558_v63 = vld [vmem:[%s3295_s1 + $0x198] sm:$0xff]   ;;  %v58_v1 = vld [vmem:[%s3296_s0 + $0x140] sm:$0xff]  ;;  %v59_v3 = vld [vmem:[%s3296_s0 + $0x148] sm:$0xff] }
  0x15   :  { %2240 = vmatpush3.bf16.msra.mxu1 %v2530_v19  ;;  %2201 = vmatprep.subr.bf16.mxu0 %v2531_v20  ;;  %v2030_v4 = vcombine.high %v50_v0, %v58_v1  ;;  %v2032_v5 = vcombine.high %v51_v2, %v59_v3  ;;  %v2029_v6 = vcombine.low %v50_v0, %v58_v1  ;;  %v2559_v8 = vld [vmem:[%s3295_s1 + $0x160] sm:$0xff]   ;;  %v2563_v12 = vld [vmem:[%s3295_s1 + $0x168] sm:$0xff]   ;;  %v20_v32 = vld [vmem:[%s3296_s0 + $0x10] sm:$0xff] }
  0x16   :  { %2241 = vmatprep.subr.bf16.mxu1 %v2532_v21  ;;  %v2031_v7 = vcombine.low %v51_v2, %v59_v3  ;;  %v2560_v9 = vld [vmem:[%s3295_s1 + $0x1e0] sm:$0xff]   ;;  %v2564_v13 = vld [vmem:[%s3295_s1 + $0x1e8] sm:$0xff]   ;;  %v28_v33 = vld [vmem:[%s3296_s0 + $0x50] sm:$0xff] }
  0x17   :  { %v2561_v10 = vld [vmem:[%s3295_s1 + $0x120] sm:$0xff]   ;;  %v2565_v14 = vld [vmem:[%s3295_s1 + $0x128] sm:$0xff]   ;;  %v2001_v34 = vcombine.low %v20_v32, %v28_v33  ;;  %v21_v36 = vld [vmem:[%s3296_s0 + $0x18] sm:$0xff] }
  0x18   :  { %2202 = vmatpush3.bf16.msra.mxu0 %v2533_v22  ;;  %v2562_v11 = vld [vmem:[%s3295_s1 + $0x1a0] sm:$0xff]   ;;  %v2566_v15 = vld [vmem:[%s3295_s1 + $0x1a8] sm:$0xff]   ;;  %v29_v37 = vld [vmem:[%s3296_s0 + $0x58] sm:$0xff] }
  0x19   :  { %2242 = vmatpush3.bf16.msra.mxu1 %v2534_v23  ;;  %2203 = vmatprep.subr.bf16.mxu0 %v2535_v24  ;;  %v66_v16 = vld [vmem:[%s3296_s0 + $0x180] sm:$0xff]  ;;  %v67_v18 = vld [vmem:[%s3296_s0 + $0x188] sm:$0xff]  ;;  %v2567_v24 = vld [vmem:[%s3295_s1 + $0x170] sm:$0xff]   ;;  %v2004_v39 = vcombine.high %v21_v36, %v29_v37 }
  0x1a   :  { %2243 = vmatprep.subr.bf16.mxu1 %v2536_v25  ;;  %v74_v17 = vld [vmem:[%s3296_s0 + $0x1c0] sm:$0xff]  ;;  %v75_v20 = vld [vmem:[%s3296_s0 + $0x1c8] sm:$0xff]  ;;  %v2568_v25 = vld [vmem:[%s3295_s1 + $0x1f0] sm:$0xff]  }
  0x1b   :  { %v2046_v19 = vcombine.high %v66_v16, %v74_v17  ;;  %v2045_v21 = vcombine.low %v66_v16, %v74_v17  ;;  %v2048_v22 = vcombine.high %v67_v18, %v75_v20  ;;  %v2047_v23 = vcombine.low %v67_v18, %v75_v20  ;;  %v36_v48 = vld [vmem:[%s3296_s0 + $0x90] sm:$0xff]  ;;  %v45_v51 = vld [vmem:[%s3296_s0 + $0xd8] sm:$0xff] }
  0x1c   :  { %2204 = vmatpush3.bf16.msra.mxu0 %v2537_v26  ;;  %v2569_v26 = vld [vmem:[%s3295_s1 + $0x130] sm:$0xff]   ;;  %v53_v2 = vld [vmem:[%s3296_s0 + $0x118] sm:$0xff] }
  0x1d   :  { %2244 = vmatpush3.bf16.msra.mxu1 %v2538_v27  ;;  %2205 = vmatprep.subr.bf16.mxu0 %v2539_v28  ;;  %v2570_v27 = vld [vmem:[%s3295_s1 + $0x1b0] sm:$0xff]   ;;  %v2571_v28 = vld [vmem:[%s3295_s1 + $0x178] sm:$0xff]  }
  0x1e   :  { %2245 = vmatprep.subr.bf16.mxu1 %v2540_v29  ;;  %v2572_v29 = vld [vmem:[%s3295_s1 + $0x1f8] sm:$0xff]   ;;  %v44_v49 = vld [vmem:[%s3296_s0 + $0xd0] sm:$0xff] }
  0x1f   :  { %v2018_v52 = vcombine.high %v36_v48, %v44_v49  ;;  %v52_v0 = vld [vmem:[%s3296_s0 + $0x110] sm:$0xff]  ;;  %v77_v20 = vld [vmem:[%s3296_s0 + $0x1d8] sm:$0xff] }
  0x20   :  { %2206 = vmatpush3.bf16.msra.mxu0 %v2541_v30  ;;  %v2573_v30 = vld [vmem:[%s3295_s1 + $0x138] sm:$0xff]   ;;  %v60_v1 = vld [vmem:[%s3296_s0 + $0x150] sm:$0xff] }
  0x21   :  { %2246 = vmatpush3.bf16.msra.mxu1 %v2542_v31  ;;  %2271 = vmatprep.subr.bf16.mxu0 %v2543_v40  ;;  %v2574_v31 = vld [vmem:[%s3295_s1 + $0x1b8] sm:$0xff]   ;;  %v2575_v40 = vld [vmem:[%s3295_s1 + $0x240] sm:$0xff]   ;;  %v2034_v3 = vcombine.high %v52_v0, %v60_v1  ;;  %v68_v16 = vld [vmem:[%s3296_s0 + $0x190] sm:$0xff] }
  0x22   :  { %2311 = vmatprep.subr.bf16.mxu1 %v2544_v41  ;;  %v2576_v41 = vld [vmem:[%s3295_s1 + $0x2c0] sm:$0xff]   ;;  %v76_v17 = vld [vmem:[%s3296_s0 + $0x1d0] sm:$0xff] }
  0x23   :  { %1459 = vmatmul.mubr.bf16.vlgmr.msra.gmra.mrb[0].mxu0 %v1997_v35  ;;  %v2002_v35 = vcombine.high %v20_v32, %v28_v33  ;;  %v2050_v18 = vcombine.high %v68_v16, %v76_v17  ;;  %v22_v32 = vld [vmem:[%s3296_s0 + $0x20] sm:$0xff] }
  0x24   :  { %1524 = vmatmul.mubr.bf16.vlgmr.msra.gmra.mrb[0].mxu1 %v1999_v38  ;;  %2272 = vmatpush3.bf16.msra.mxu0 %v2545_v42  ;;  %v2003_v38 = vcombine.low %v21_v36, %v29_v37  ;;  %v2577_v42 = vld [vmem:[%s3295_s1 + $0x200] sm:$0xff]  }
  0x25   :  { %2312 = vmatpush3.bf16.msra.mxu1 %v2546_v43  ;;  %2273 = vmatprep.subr.bf16.mxu0 %v2547_v44  ;;  %v2578_v43 = vld [vmem:[%s3295_s1 + $0x280] sm:$0xff]   ;;  %v2579_v44 = vld [vmem:[%s3295_s1 + $0x248] sm:$0xff]  }
  0x26   :  { %2313 = vmatprep.subr.bf16.mxu1 %v2548_v45  ;;  %1466 = vmatprep.mubr.bf16.mxu0 %v2014_v50  ;;  %v2580_v45 = vld [vmem:[%s3295_s1 + $0x2c8] sm:$0xff]   ;;  %v37_v50 = vld [vmem:[%s3296_s0 + $0x98] sm:$0xff]  ;;  %v30_v33 = vld [vmem:[%s3296_s0 + $0x60] sm:$0xff] }
  0x27   :  { %1531 = vmatprep.mubr.bf16.mxu1 %v2016_v54  ;;  %v2017_v54 = vcombine.low %v36_v48, %v44_v49  ;;  %v2005_v36 = vcombine.low %v22_v32, %v30_v33  ;;  %v2006_v37 = vcombine.high %v22_v32, %v30_v33  ;;  %v38_v48 = vld [vmem:[%s3296_s0 + $0xa0] sm:$0xff]  ;;  %v24_v32 = vld [vmem:[%s3296_s0 + $0x30] sm:$0xff] }
  0x28   :  { %2274 = vmatpush3.bf16.msra.mxu0 %v2549_v46  ;;  %v2581_v46 = vld [vmem:[%s3295_s1 + $0x208] sm:$0xff]   ;;  %v46_v49 = vld [vmem:[%s3296_s0 + $0xe0] sm:$0xff]  ;;  %v32_v33 = vld [vmem:[%s3296_s0 + $0x70] sm:$0xff] }
  0x29   :  { %2314 = vmatpush3.bf16.msra.mxu1 %v2550_v47  ;;  %2275 = vmatprep.subr.bf16.mxu0 %v2551_v56  ;;  %v2582_v47 = vld [vmem:[%s3295_s1 + $0x288] sm:$0xff]   ;;  %v2583_v56 = vld [vmem:[%s3295_s1 + $0x250] sm:$0xff]  }
  0x2a   :  { %2315 = vmatprep.subr.bf16.mxu1 %v2552_v57  ;;  %v2584_v57 = vld [vmem:[%s3295_s1 + $0x2d0] sm:$0xff]  }
  0x2b   :  { %1467 = vmatmul.mubr.bf16.gmra.mrb[4].mxu0 %v2013_v53  ;;  %v2020_v53 = vcombine.high %v37_v50, %v45_v51 }
  0x2c   :  { %1532 = vmatmul.mubr.bf16.gmra.mrb[4].mxu1 %v2015_v55  ;;  %2276 = vmatpush3.bf16.msra.mxu0 %v2553_v58  ;;  %v2019_v55 = vcombine.low %v37_v50, %v45_v51  ;;  %v2585_v58 = vld [vmem:[%s3295_s1 + $0x210] sm:$0xff]   ;;  %v39_v50 = vld [vmem:[%s3296_s0 + $0xa8] sm:$0xff]  ;;  %v2022_v51 = vcombine.high %v38_v48, %v46_v49 }
  0x2d   :  { %2316 = vmatpush3.bf16.msra.mxu1 %v2554_v59  ;;  %2277 = vmatprep.subr.bf16.mxu0 %v2555_v60  ;;  %v2586_v59 = vld [vmem:[%s3295_s1 + $0x290] sm:$0xff]   ;;  %v2587_v60 = vld [vmem:[%s3295_s1 + $0x258] sm:$0xff]  }
  0x2e   :  { %2317 = vmatprep.subr.bf16.mxu1 %v2556_v61  ;;  %1474 = vmatprep.mubr.bf16.mxu0 %v2030_v4  ;;  %v2588_v61 = vld [vmem:[%s3295_s1 + $0x2d8] sm:$0xff]  }
  0x2f   :  { %1539 = vmatprep.mubr.bf16.mxu1 %v2032_v5  ;;  %v61_v4 = vld [vmem:[%s3296_s0 + $0x158] sm:$0xff]  ;;  %v2033_v5 = vcombine.low %v52_v0, %v60_v1  ;;  %v54_v0 = vld [vmem:[%s3296_s0 + $0x120] sm:$0xff] }
  0x30   :  { %2278 = vmatpush3.bf16.msra.mxu0 %v2557_v62  ;;  %v2589_v62 = vld [vmem:[%s3295_s1 + $0x218] sm:$0xff]   ;;  %v62_v1 = vld [vmem:[%s3296_s0 + $0x160] sm:$0xff] }
  0x31   :  { %2318 = vmatpush3.bf16.msra.mxu1 %v2558_v63  ;;  %2279 = vmatprep.subr.bf16.mxu0 %v2559_v8  ;;  %v2590_v63 = vld [vmem:[%s3295_s1 + $0x298] sm:$0xff]   ;;  %v2591_v8 = vld [vmem:[%s3295_s1 + $0x260] sm:$0xff]  }
  0x32   :  { %2319 = vmatprep.subr.bf16.mxu1 %v2560_v9  ;;  %v2592_v9 = vld [vmem:[%s3295_s1 + $0x2e0] sm:$0xff]  }
  0x33   :  { %1475 = vmatmul.mubr.bf16.gmra.mrb[8].mxu0 %v2029_v6  ;;  %v2036_v6 = vcombine.high %v53_v2, %v61_v4 }
  0x34   :  { %1540 = vmatmul.mubr.bf16.gmra.mrb[8].mxu1 %v2031_v7  ;;  %2280 = vmatpush3.bf16.msra.mxu0 %v2561_v10  ;;  %v2035_v7 = vcombine.low %v53_v2, %v61_v4  ;;  %v2593_v10 = vld [vmem:[%s3295_s1 + $0x220] sm:$0xff]   ;;  %v2038_v2 = vcombine.high %v54_v0, %v62_v1  ;;  %v63_v4 = vld [vmem:[%s3296_s0 + $0x168] sm:$0xff] }
  0x35   :  { %2320 = vmatpush3.bf16.msra.mxu1 %v2562_v11  ;;  %2281 = vmatprep.subr.bf16.mxu0 %v2563_v12  ;;  %v2594_v11 = vld [vmem:[%s3295_s1 + $0x2a0] sm:$0xff]   ;;  %v2595_v12 = vld [vmem:[%s3295_s1 + $0x268] sm:$0xff]  }
  0x36   :  { %2321 = vmatprep.subr.bf16.mxu1 %v2564_v13  ;;  %1482 = vmatprep.mubr.bf16.mxu0 %v2046_v19  ;;  %v2596_v13 = vld [vmem:[%s3295_s1 + $0x2e8] sm:$0xff]   ;;  %v69_v19 = vld [vmem:[%s3296_s0 + $0x198] sm:$0xff] }
  0x37   :  { %1547 = vmatprep.mubr.bf16.mxu1 %v2048_v22  ;;  %v2052_v22 = vcombine.high %v69_v19, %v77_v20 }
  0x38   :  { %2282 = vmatpush3.bf16.msra.mxu0 %v2565_v14  ;;  %v2597_v14 = vld [vmem:[%s3295_s1 + $0x228] sm:$0xff]  }
  0x39   :  { %2322 = vmatpush3.bf16.msra.mxu1 %v2566_v15  ;;  %2283 = vmatprep.subr.bf16.mxu0 %v2567_v24  ;;  %v2598_v15 = vld [vmem:[%s3295_s1 + $0x2a8] sm:$0xff]   ;;  %v2599_v24 = vld [vmem:[%s3295_s1 + $0x270] sm:$0xff]  }
  0x3a   :  { %2323 = vmatprep.subr.bf16.mxu1 %v2568_v25  ;;  %v2600_v25 = vld [vmem:[%s3295_s1 + $0x2f0] sm:$0xff]  }
  0x3b   :  { %1483 = vmatmul.mubr.bf16.gmra.mrb[12].mxu0 %v2045_v21  ;;  %v2049_v21 = vcombine.low %v68_v16, %v76_v17  ;;  %v70_v16 = vld [vmem:[%s3296_s0 + $0x1a0] sm:$0xff] }
  0x3c   :  { %1548 = vmatmul.mubr.bf16.gmra.mrb[12].mxu1 %v2047_v23  ;;  %2284 = vmatpush3.bf16.msra.mxu0 %v2569_v26  ;;  %v2051_v23 = vcombine.low %v69_v19, %v77_v20  ;;  %v2601_v26 = vld [vmem:[%s3295_s1 + $0x230] sm:$0xff]   ;;  %v78_v17 = vld [vmem:[%s3296_s0 + $0x1e0] sm:$0xff]  ;;  %v79_v19 = vld [vmem:[%s3296_s0 + $0x1e8] sm:$0xff] }
  0x3d   :  { %2324 = vmatpush3.bf16.msra.mxu1 %v2570_v27  ;;  %2285 = vmatprep.subr.bf16.mxu0 %v2571_v28  ;;  %v2602_v27 = vld [vmem:[%s3295_s1 + $0x2b0] sm:$0xff]   ;;  %v2603_v28 = vld [vmem:[%s3295_s1 + $0x278] sm:$0xff]   ;;  %v2054_v20 = vcombine.high %v70_v16, %v78_v17 }
  0x3e   :  { %2325 = vmatprep.subr.bf16.mxu1 %v2572_v29  ;;  %1588 = vmatprep.mubr.bf16.mxu0 %v2002_v35  ;;  %v2604_v29 = vld [vmem:[%s3295_s1 + $0x2f8] sm:$0xff]   ;;  %v31_v35 = vld [vmem:[%s3296_s0 + $0x68] sm:$0xff] }
  0x3f   :  { %1653 = vmatprep.mubr.bf16.mxu1 %v2004_v39 }
  0x40   :  { %2286 = vmatpush3.bf16.msra.mxu0 %v2573_v30  ;;  %v2605_v30 = vld [vmem:[%s3295_s1 + $0x238] sm:$0xff]  }
  0x41   :  { %2326 = vmatpush3.bf16.msra.mxu1 %v2574_v31  ;;  %2351 = vmatprep.subr.bf16.mxu0 %v2575_v40  ;;  %v2606_v31 = vld [vmem:[%s3295_s1 + $0x2b8] sm:$0xff]   ;;  %v2607_v40 = vld [vmem:[%s3295_s1 + $0x340] sm:$0xff]  }
  0x42   :  { %2391 = vmatprep.subr.bf16.mxu1 %v2576_v41  ;;  %v2608_v41 = vld [vmem:[%s3295_s1 + $0x3c0] sm:$0xff]  }
  0x43   :  { %1589 = vmatmul.mubr.bf16.vlgmr.msra.gmra.mrb[16].mxu0 %v2001_v34  ;;  %v23_v34 = vld [vmem:[%s3296_s0 + $0x28] sm:$0xff] }
  0x44   :  { %1654 = vmatmul.mubr.bf16.vlgmr.msra.gmra.mrb[16].mxu1 %v2003_v38  ;;  %2352 = vmatpush3.bf16.msra.mxu0 %v2577_v42  ;;  %v2007_v38 = vcombine.low %v23_v34, %v31_v35  ;;  %v2008_v39 = vcombine.high %v23_v34, %v31_v35  ;;  %v2609_v42 = vld [vmem:[%s3295_s1 + $0x300] sm:$0xff]   ;;  %v25_v34 = vld [vmem:[%s3296_s0 + $0x38] sm:$0xff]  ;;  %v2009_v35 = vcombine.low %v24_v32, %v32_v33 }
  0x45   :  { %2392 = vmatpush3.bf16.msra.mxu1 %v2578_v43  ;;  %2353 = vmatprep.subr.bf16.mxu0 %v2579_v44  ;;  %v2610_v43 = vld [vmem:[%s3295_s1 + $0x380] sm:$0xff]   ;;  %v2611_v44 = vld [vmem:[%s3295_s1 + $0x348] sm:$0xff]  }
  0x46   :  { %2393 = vmatprep.subr.bf16.mxu1 %v2580_v45  ;;  %1596 = vmatprep.mubr.bf16.mxu0 %v2018_v52  ;;  %v2612_v45 = vld [vmem:[%s3295_s1 + $0x3c8] sm:$0xff]  }
  0x47   :  { %1661 = vmatprep.mubr.bf16.mxu1 %v2020_v53  ;;  %v47_v52 = vld [vmem:[%s3296_s0 + $0xe8] sm:$0xff]  ;;  %v2021_v53 = vcombine.low %v38_v48, %v46_v49  ;;  %v57_v48 = vld [vmem:[%s3296_s0 + $0x138] sm:$0xff] }
  0x48   :  { %2354 = vmatpush3.bf16.msra.mxu0 %v2581_v46  ;;  %v2613_v46 = vld [vmem:[%s3295_s1 + $0x308] sm:$0xff]   ;;  %v65_v49 = vld [vmem:[%s3296_s0 + $0x178] sm:$0xff] }
  0x49   :  { %2394 = vmatpush3.bf16.msra.mxu1 %v2582_v47  ;;  %2355 = vmatprep.subr.bf16.mxu0 %v2583_v56  ;;  %v2614_v47 = vld [vmem:[%s3295_s1 + $0x388] sm:$0xff]   ;;  %v2615_v56 = vld [vmem:[%s3295_s1 + $0x350] sm:$0xff]  }
  0x4a   :  { %2395 = vmatprep.subr.bf16.mxu1 %v2584_v57  ;;  %v2616_v57 = vld [vmem:[%s3295_s1 + $0x3d0] sm:$0xff]  }
  0x4b   :  { %1597 = vmatmul.mubr.bf16.gmra.mrb[20].mxu0 %v2017_v54  ;;  %v2024_v54 = vcombine.high %v39_v50, %v47_v52 }
  0x4c   :  { %1662 = vmatmul.mubr.bf16.gmra.mrb[20].mxu1 %v2019_v55  ;;  %2356 = vmatpush3.bf16.msra.mxu0 %v2585_v58  ;;  %v2023_v55 = vcombine.low %v39_v50, %v47_v52  ;;  %v2617_v58 = vld [vmem:[%s3295_s1 + $0x310] sm:$0xff]  }
  0x4d   :  { %2396 = vmatpush3.bf16.msra.mxu1 %v2586_v59  ;;  %2357 = vmatprep.subr.bf16.mxu0 %v2587_v60  ;;  %v2618_v59 = vld [vmem:[%s3295_s1 + $0x390] sm:$0xff]   ;;  %v2619_v60 = vld [vmem:[%s3295_s1 + $0x358] sm:$0xff]  }
  0x4e   :  { %2397 = vmatprep.subr.bf16.mxu1 %v2588_v61  ;;  %1604 = vmatprep.mubr.bf16.mxu0 %v2034_v3  ;;  %v2620_v61 = vld [vmem:[%s3295_s1 + $0x3d8] sm:$0xff]   ;;  %v55_v3 = vld [vmem:[%s3296_s0 + $0x128] sm:$0xff] }
  0x4f   :  { %1669 = vmatprep.mubr.bf16.mxu1 %v2036_v6  ;;  %v2040_v6 = vcombine.high %v55_v3, %v63_v4 }
  0x50   :  { %2358 = vmatpush3.bf16.msra.mxu0 %v2589_v62  ;;  %v2621_v62 = vld [vmem:[%s3295_s1 + $0x318] sm:$0xff]  }
  0x51   :  { %2398 = vmatpush3.bf16.msra.mxu1 %v2590_v63  ;;  %2359 = vmatprep.subr.bf16.mxu0 %v2591_v8  ;;  %v2622_v63 = vld [vmem:[%s3295_s1 + $0x398] sm:$0xff]   ;;  %v2623_v8 = vld [vmem:[%s3295_s1 + $0x360] sm:$0xff]  }
  0x52   :  { %2399 = vmatprep.subr.bf16.mxu1 %v2592_v9  ;;  %v2624_v9 = vld [vmem:[%s3295_s1 + $0x3e0] sm:$0xff]  }
  0x53   :  { %1605 = vmatmul.mubr.bf16.gmra.mrb[24].mxu0 %v2033_v5  ;;  %v2037_v5 = vcombine.low %v54_v0, %v62_v1 }
  0x54   :  { %1670 = vmatmul.mubr.bf16.gmra.mrb[24].mxu1 %v2035_v7  ;;  %2360 = vmatpush3.bf16.msra.mxu0 %v2593_v10  ;;  %v2039_v7 = vcombine.low %v55_v3, %v63_v4  ;;  %v2625_v10 = vld [vmem:[%s3295_s1 + $0x320] sm:$0xff]  }
  0x55   :  { %2400 = vmatpush3.bf16.msra.mxu1 %v2594_v11  ;;  %2361 = vmatprep.subr.bf16.mxu0 %v2595_v12  ;;  %v2626_v11 = vld [vmem:[%s3295_s1 + $0x3a0] sm:$0xff]   ;;  %v2627_v12 = vld [vmem:[%s3295_s1 + $0x368] sm:$0xff]  }
  0x56   :  { %2401 = vmatprep.subr.bf16.mxu1 %v2596_v13  ;;  %1612 = vmatprep.mubr.bf16.mxu0 %v2050_v18  ;;  %v2628_v13 = vld [vmem:[%s3295_s1 + $0x3e8] sm:$0xff]  }
  0x57   :  { %1677 = vmatprep.mubr.bf16.mxu1 %v2052_v22  ;;  %v71_v18 = vld [vmem:[%s3296_s0 + $0x1a8] sm:$0xff]  ;;  %v2053_v22 = vcombine.low %v70_v16, %v78_v17 }
  0x58   :  { %2362 = vmatpush3.bf16.msra.mxu0 %v2597_v14  ;;  %v2629_v14 = vld [vmem:[%s3295_s1 + $0x328] sm:$0xff]  }
  0x59   :  { %2402 = vmatpush3.bf16.msra.mxu1 %v2598_v15  ;;  %2363 = vmatprep.subr.bf16.mxu0 %v2599_v24  ;;  %v2630_v15 = vld [vmem:[%s3295_s1 + $0x3a8] sm:$0xff]   ;;  %v2631_v24 = vld [vmem:[%s3295_s1 + $0x370] sm:$0xff]  }
  0x5a   :  { %2403 = vmatprep.subr.bf16.mxu1 %v2600_v25  ;;  %v2632_v25 = vld [vmem:[%s3295_s1 + $0x3f0] sm:$0xff]  }
  0x5b   :  { %1613 = vmatmul.mubr.bf16.gmra.mrb[28].mxu0 %v2049_v21  ;;  %v2056_v21 = vcombine.high %v71_v18, %v79_v19 }
  0x5c   :  { %1678 = vmatmul.mubr.bf16.gmra.mrb[28].mxu1 %v2051_v23  ;;  %2364 = vmatpush3.bf16.msra.mxu0 %v2601_v26  ;;  %v2055_v23 = vcombine.low %v71_v18, %v79_v19  ;;  %v2633_v26 = vld [vmem:[%s3295_s1 + $0x330] sm:$0xff]  }
  0x5d   :  { %2404 = vmatpush3.bf16.msra.mxu1 %v2602_v27  ;;  %2365 = vmatprep.subr.bf16.mxu0 %v2603_v28  ;;  %v2634_v27 = vld [vmem:[%s3295_s1 + $0x3b0] sm:$0xff]   ;;  %v2635_v28 = vld [vmem:[%s3295_s1 + $0x378] sm:$0xff]  }
  0x5e   :  { %2405 = vmatprep.subr.bf16.mxu1 %v2604_v29  ;;  %1718 = vmatprep.mubr.bf16.mxu0 %v2006_v37  ;;  %v2636_v29 = vld [vmem:[%s3295_s1 + $0x3f8] sm:$0xff]  }
  0x5f   :  { %1783 = vmatprep.mubr.bf16.mxu1 %v2008_v39  ;;  %v33_v37 = vld [vmem:[%s3296_s0 + $0x78] sm:$0xff]  ;;  %v48_v39 = vld [vmem:[%s3296_s0 + $0xf0] sm:$0xff] }
  0x60   :  { %2366 = vmatpush3.bf16.msra.mxu0 %v2605_v30  ;;  %v2637_v30 = vld [vmem:[%s3295_s1 + $0x338] sm:$0xff]  }
  0x61   :  { %2406 = vmatpush3.bf16.msra.mxu1 %v2606_v31  ;;  %2431 = vmatprep.subr.bf16.mxu0 %v2607_v40  ;;  %v2638_v31 = vld [vmem:[%s3295_s1 + $0x3b8] sm:$0xff]   ;;  %v2011_v40 = vcombine.low %v25_v34, %v33_v37 }
  0x62   :  { %2471 = vmatprep.subr.bf16.mxu1 %v2608_v41  ;;  %v2012_v41 = vcombine.high %v25_v34, %v33_v37 }
  0x63   :  { %1719 = vmatmul.mubr.bf16.vlgmr.msra.gmra.mrb[32].mxu0 %v2005_v36  ;;  %v2010_v36 = vcombine.high %v24_v32, %v32_v33 }
  0x64   :  { %1784 = vmatmul.mubr.bf16.vlgmr.msra.gmra.mrb[32].mxu1 %v2007_v38  ;;  %2432 = vmatpush3.bf16.msra.mxu0 %v2609_v42  ;;  %v40_v38 = vld [vmem:[%s3296_s0 + $0xb0] sm:$0xff] }
  0x65   :  { %2472 = vmatpush3.bf16.msra.mxu1 %v2610_v43  ;;  %2433 = vmatprep.subr.bf16.mxu0 %v2611_v44  ;;  %v2026_v42 = vcombine.high %v40_v38, %v48_v39  ;;  %v41_v43 = vld [vmem:[%s3296_s0 + $0xb8] sm:$0xff]  ;;  %v2025_v50 = vcombine.low %v40_v38, %v48_v39 }
  0x66   :  { %2473 = vmatprep.subr.bf16.mxu1 %v2612_v45  ;;  %1726 = vmatprep.mubr.bf16.mxu0 %v2022_v51  ;;  %v49_v44 = vld [vmem:[%s3296_s0 + $0xf8] sm:$0xff] }
  0x67   :  { %1791 = vmatprep.mubr.bf16.mxu1 %v2024_v54  ;;  %v2028_v45 = vcombine.high %v41_v43, %v49_v44  ;;  %v2027_v51 = vcombine.low %v41_v43, %v49_v44  ;;  %v72_v54 = vld [vmem:[%s3296_s0 + $0x1b0] sm:$0xff] }
  0x68   :  { %2434 = vmatpush3.bf16.msra.mxu0 %v2613_v46  ;;  %v56_v46 = vld [vmem:[%s3296_s0 + $0x130] sm:$0xff] }
  0x69   :  { %2474 = vmatpush3.bf16.msra.mxu1 %v2614_v47  ;;  %2435 = vmatprep.subr.bf16.mxu0 %v2615_v56  ;;  %v64_v47 = vld [vmem:[%s3296_s0 + $0x170] sm:$0xff]  ;;  %v73_v56 = vld [vmem:[%s3296_s0 + $0x1b8] sm:$0xff] }
  0x6a   :  { %2475 = vmatprep.subr.bf16.mxu1 %v2616_v57  ;;  %v2042_v52 = vcombine.high %v56_v46, %v64_v47  ;;  %v81_v57 = vld [vmem:[%s3296_s0 + $0x1f8] sm:$0xff] }
  0x6b   :  { %1727 = vmatmul.mubr.bf16.gmra.mrb[36].mxu0 %v2021_v53  ;;  %v2044_v53 = vcombine.high %v57_v48, %v65_v49 }
  0x6c   :  { %1792 = vmatmul.mubr.bf16.gmra.mrb[36].mxu1 %v2023_v55  ;;  %2436 = vmatpush3.bf16.msra.mxu0 %v2617_v58  ;;  %v80_v55 = vld [vmem:[%s3296_s0 + $0x1f0] sm:$0xff]  ;;  %v2041_v58 = vcombine.low %v56_v46, %v64_v47 }
  0x6d   :  { %2476 = vmatpush3.bf16.msra.mxu1 %v2618_v59  ;;  %2437 = vmatprep.subr.bf16.mxu0 %v2619_v60  ;;  %v2043_v59 = vcombine.low %v57_v48, %v65_v49  ;;  %v2058_v60 = vcombine.high %v72_v54, %v80_v55 }
  0x6e   :  { %2477 = vmatprep.subr.bf16.mxu1 %v2620_v61  ;;  %1734 = vmatprep.mubr.bf16.mxu0 %v2038_v2  ;;  %v2060_v61 = vcombine.high %v73_v56, %v81_v57 }
  0x6f   :  { %1799 = vmatprep.mubr.bf16.mxu1 %v2040_v6 }
  0x70   :  { %2438 = vmatpush3.bf16.msra.mxu0 %v2621_v62  ;;  %v2057_v62 = vcombine.low %v72_v54, %v80_v55 }
  0x71   :  { %2478 = vmatpush3.bf16.msra.mxu1 %v2622_v63  ;;  %2439 = vmatprep.subr.bf16.mxu0 %v2623_v8  ;;  %v2059_v63 = vcombine.low %v73_v56, %v81_v57 }
  0x72   :  { %2479 = vmatprep.subr.bf16.mxu1 %v2624_v9 }
  0x73   :  { %1735 = vmatmul.mubr.bf16.gmra.mrb[40].mxu0 %v2037_v5 }
  0x74   :  { %1800 = vmatmul.mubr.bf16.gmra.mrb[40].mxu1 %v2039_v7  ;;  %2440 = vmatpush3.bf16.msra.mxu0 %v2625_v10 }
  0x75   :  { %2480 = vmatpush3.bf16.msra.mxu1 %v2626_v11  ;;  %2441 = vmatprep.subr.bf16.mxu0 %v2627_v12 }
  0x76   :  { %2481 = vmatprep.subr.bf16.mxu1 %v2628_v13  ;;  %1742 = vmatprep.mubr.bf16.mxu0 %v2054_v20 }
  0x77   :  { %1807 = vmatprep.mubr.bf16.mxu1 %v2056_v21 }
  0x78   :  { %2442 = vmatpush3.bf16.msra.mxu0 %v2629_v14 }
  0x79   :  { %2482 = vmatpush3.bf16.msra.mxu1 %v2630_v15  ;;  %2443 = vmatprep.subr.bf16.mxu0 %v2631_v24 }
  0x7a   :  { %2483 = vmatprep.subr.bf16.mxu1 %v2632_v25 }
  0x7b   :  { %1743 = vmatmul.mubr.bf16.gmra.mrb[44].mxu0 %v2053_v22 }
  0x7c   :  { %1808 = vmatmul.mubr.bf16.gmra.mrb[44].mxu1 %v2055_v23  ;;  %2444 = vmatpush3.bf16.msra.mxu0 %v2633_v26 }
  0x7d   :  { %2484 = vmatpush3.bf16.msra.mxu1 %v2634_v27  ;;  %2445 = vmatprep.subr.bf16.mxu0 %v2635_v28 }
  0x7e   :  { %2485 = vmatprep.subr.bf16.mxu1 %v2636_v29  ;;  %1848 = vmatprep.mubr.bf16.mxu0 %v2010_v36 }
  0x7f   :  { %1913 = vmatprep.mubr.bf16.mxu1 %v2012_v41 }
  0x80   :  { %2446 = vmatpush3.bf16.msra.mxu0 %v2637_v30 }
  0x81   :  { %2486 = vmatpush3.bf16.msra.mxu1 %v2638_v31 }
  0x83   :  { %1849 = vmatmul.mubr.bf16.vlgmr.msra.gmra.mrb[48].mxu0 %v2009_v35 }
  0x84   :  { %1914 = vmatmul.mubr.bf16.vlgmr.msra.gmra.mrb[48].mxu1 %v2011_v40  ;;  %1856 = vmatprep.mubr.bf16.mxu0 %v2026_v42 }
  0x85   :  { %1921 = vmatprep.mubr.bf16.mxu1 %v2028_v45 }
  0x8b   :  { %1857 = vmatmul.mubr.bf16.gmra.mrb[52].mxu0 %v2025_v50 }
  0x8c   :  { %1922 = vmatmul.mubr.bf16.gmra.mrb[52].mxu1 %v2027_v51  ;;  %1864 = vmatprep.mubr.bf16.mxu0 %v2042_v52 }
  0x8d   :  { %1929 = vmatprep.mubr.bf16.mxu1 %v2044_v53 }
  0x93   :  { %1865 = vmatmul.mubr.bf16.gmra.mrb[56].mxu0 %v2041_v58 }
  0x94   :  { %1930 = vmatmul.mubr.bf16.gmra.mrb[56].mxu1 %v2043_v59  ;;  %1872 = vmatprep.mubr.bf16.mxu0 %v2058_v60 }
  0x95   :  { %1937 = vmatprep.mubr.bf16.mxu1 %v2060_v61 }
  0x9b   :  { %1873 = vmatmul.mubr.bf16.gmra.mrb[60].mxu0 %v2057_v62 }
  0x9c   :  { %1938 = vmatmul.mubr.bf16.gmra.mrb[60].mxu1 %v2059_v63 }
  0xf6   :  { %v2207_v0 = vpop.f32.mrb[0].mxu0 }
  0xf7   :  { %v2247_v1 = vpop.f32.mrb[0].mxu1  ;;  %v2208_v2 = vpop.f32.mrb[1].mxu0 }
  0xf8   :  { %v2209_v3 = vadd.f32 %v2208_v2, %v2207_v0  ;;  %v2248_v4 = vpop.f32.mrb[1].mxu1  ;;  %v2210_v5 = vpop.f32.mrb[2].mxu0 }
  0xf9   :  { %v2249_v6 = vadd.f32 %v2248_v4, %v2247_v1  ;;  %v2250_v7 = vpop.f32.mrb[2].mxu1  ;;  %v2211_v8 = vpop.f32.mrb[3].mxu0 }
  0xfa   :  { %v2212_v9 = vadd.f32 %v2211_v8, %v2210_v5  ;;  %v2251_v10 = vpop.f32.mrb[3].mxu1 }
  0xfb   :  { %v1526_v11 = vadd.f32 %v2249_v6, %v2209_v3  ;;  %v2252_v12 = vadd.f32 %v2251_v10, %v2250_v7 }
  0xfd   :  { %v1529_v13 = vadd.f32 %v2252_v12, %v2212_v9 }
  0xfe   :  { %v2213_v14 = vpop.f32.mrb[4].mxu0 }
  0xff   :  { %v2253_v15 = vpop.f32.mrb[4].mxu1  ;;  %v2214_v16 = vpop.f32.mrb[5].mxu0 }
 0x100   :  { %v2215_v17 = vadd.f32 %v2214_v16, %v2213_v14  ;;  %v2254_v18 = vpop.f32.mrb[5].mxu1  ;;  %v2216_v19 = vpop.f32.mrb[6].mxu0 }
 0x101   :  { %v2255_v20 = vadd.f32 %v2254_v18, %v2253_v15  ;;  %v2256_v21 = vpop.f32.mrb[6].mxu1  ;;  %v2217_v22 = vpop.f32.mrb[7].mxu0 }
 0x102   :  { %v2218_v23 = vadd.f32 %v2217_v22, %v2216_v19  ;;  %v2257_v24 = vpop.f32.mrb[7].mxu1 }
 0x103   :  { %v1534_v25 = vadd.f32 %v2255_v20, %v2215_v17  ;;  %v2258_v26 = vadd.f32 %v2257_v24, %v2256_v21 }
 0x105   :  { %v1537_v27 = vadd.f32 %v2258_v26, %v2218_v23 }
 0x106   :  { %v2219_v28 = vpop.f32.mrb[8].mxu0 }
 0x107   :  { %v2259_v29 = vpop.f32.mrb[8].mxu1  ;;  %v2220_v30 = vpop.f32.mrb[9].mxu0 }
 0x108   :  { %v2260_v31 = vpop.f32.mrb[9].mxu1  ;;  %v2221_v32 = vadd.f32 %v2220_v30, %v2219_v28  ;;  %v2222_v34 = vpop.f32.mrb[10].mxu0 }
 0x109   :  { %v2261_v33 = vadd.f32 %v2260_v31, %v2259_v29  ;;  %v2262_v35 = vpop.f32.mrb[10].mxu1  ;;  %v2223_v36 = vpop.f32.mrb[11].mxu0 }
 0x10a   :  { %v2263_v37 = vpop.f32.mrb[11].mxu1  ;;  %v2224_v39 = vadd.f32 %v2223_v36, %v2222_v34 }
 0x10b   :  { %v1542_v38 = vadd.f32 %v2261_v33, %v2221_v32  ;;  %v2264_v40 = vadd.f32 %v2263_v37, %v2262_v35 }
 0x10d   :  { %v1545_v41 = vadd.f32 %v2264_v40, %v2224_v39 }
 0x10e   :  { %v2225_v42 = vpop.f32.mrb[12].mxu0 }
 0x10f   :  { %v2265_v43 = vpop.f32.mrb[12].mxu1  ;;  %v2226_v44 = vpop.f32.mrb[13].mxu0 }
 0x110   :  { %v2227_v45 = vadd.f32 %v2226_v44, %v2225_v42  ;;  %v2266_v46 = vpop.f32.mrb[13].mxu1  ;;  %v2228_v47 = vpop.f32.mrb[14].mxu0 }
 0x111   :  { %v2267_v48 = vadd.f32 %v2266_v46, %v2265_v43  ;;  %v2268_v49 = vpop.f32.mrb[14].mxu1  ;;  %v2229_v50 = vpop.f32.mrb[15].mxu0 }
 0x112   :  { %v2230_v51 = vadd.f32 %v2229_v50, %v2228_v47  ;;  %v2269_v52 = vpop.f32.mrb[15].mxu1 }
 0x113   :  { %v1550_v53 = vadd.f32 %v2267_v48, %v2227_v45  ;;  %v2270_v54 = vadd.f32 %v2269_v52, %v2268_v49 }
 0x115   :  { %v3240_v55 = vadd.f32 %v2270_v54, %v2230_v51 }
 0x116   :  { %v2287_v56 = vpop.f32.mrb[16].mxu0 }
 0x117   :  { %v2327_v57 = vpop.f32.mrb[16].mxu1  ;;  %v2288_v58 = vpop.f32.mrb[17].mxu0 }
 0x118   :  { %v2289_v59 = vadd.f32 %v2288_v58, %v2287_v56  ;;  %v2328_v60 = vpop.f32.mrb[17].mxu1  ;;  %v2290_v61 = vpop.f32.mrb[18].mxu0 }
 0x119   :  { %v2329_v62 = vadd.f32 %v2328_v60, %v2327_v57  ;;  %v2330_v63 = vpop.f32.mrb[18].mxu1  ;;  %v2291_v0 = vpop.f32.mrb[19].mxu0 }
 0x11a   :  { %v1591_v1 = vadd.f32 %v2289_v59, %v1526_v11  ;;  %v2292_v2 = vadd.f32 %v2291_v0, %v2290_v61  ;;  %v2331_v3 = vpop.f32.mrb[19].mxu1 }
 0x11b   :  { %v2332_v4 = vadd.f32 %v2331_v3, %v2330_v63 }
 0x11c   :  { %v1656_v5 = vadd.f32 %v2329_v62, %v1591_v1  ;;  %v1594_v6 = vadd.f32 %v2292_v2, %v1529_v13 }
 0x11e   :  { %v3242_v7 = vadd.f32 %v2332_v4, %v1594_v6  ;;  %v2293_v8 = vpop.f32.mrb[20].mxu0 }
 0x11f   :  { %v2333_v9 = vpop.f32.mrb[20].mxu1  ;;  %v2294_v10 = vpop.f32.mrb[21].mxu0 }
 0x120   :  { %v2334_v12 = vpop.f32.mrb[21].mxu1  ;;  %v2295_v14 = vadd.f32 %v2294_v10, %v2293_v8  ;;  %v2296_v16 = vpop.f32.mrb[22].mxu0 }
 0x121   :  { %v2335_v15 = vadd.f32 %v2334_v12, %v2333_v9  ;;  %v2336_v17 = vpop.f32.mrb[22].mxu1  ;;  %v2297_v18 = vpop.f32.mrb[23].mxu0 }
 0x122   :  { %v2337_v19 = vpop.f32.mrb[23].mxu1  ;;  %v1599_v20 = vadd.f32 %v2295_v14, %v1534_v25  ;;  %v2298_v21 = vadd.f32 %v2297_v18, %v2296_v16 }
 0x123   :  { %v2338_v11 = vadd.f32 %v2337_v19, %v2336_v17 }
 0x124   :  { %v1664_v22 = vadd.f32 %v2335_v15, %v1599_v20  ;;  %v1602_v23 = vadd.f32 %v2298_v21, %v1537_v27 }
 0x126   :  { %v3244_v24 = vadd.f32 %v2338_v11, %v1602_v23  ;;  %v2299_v13 = vpop.f32.mrb[24].mxu0 }
 0x127   :  { %v2339_v26 = vpop.f32.mrb[24].mxu1  ;;  %v2300_v28 = vpop.f32.mrb[25].mxu0 }
 0x128   :  { %v2301_v29 = vadd.f32 %v2300_v28, %v2299_v13  ;;  %v2340_v30 = vpop.f32.mrb[25].mxu1  ;;  %v2302_v31 = vpop.f32.mrb[26].mxu0 }
 0x129   :  { %v2341_v32 = vadd.f32 %v2340_v30, %v2339_v26  ;;  %v2342_v33 = vpop.f32.mrb[26].mxu1  ;;  %v2303_v34 = vpop.f32.mrb[27].mxu0 }
 0x12a   :  { %v1607_v35 = vadd.f32 %v2301_v29, %v1542_v38  ;;  %v2304_v36 = vadd.f32 %v2303_v34, %v2302_v31  ;;  %v2343_v37 = vpop.f32.mrb[27].mxu1 }
 0x12b   :  { %v2344_v39 = vadd.f32 %v2343_v37, %v2342_v33 }
 0x12c   :  { %v1672_v25 = vadd.f32 %v2341_v32, %v1607_v35  ;;  %v1610_v40 = vadd.f32 %v2304_v36, %v1545_v41 }
 0x12e   :  { %v3246_v42 = vadd.f32 %v2344_v39, %v1610_v40  ;;  %v2305_v27 = vpop.f32.mrb[28].mxu0 }
 0x12f   :  { %v2345_v43 = vpop.f32.mrb[28].mxu1  ;;  %v2306_v44 = vpop.f32.mrb[29].mxu0 }
 0x130   :  { %v2307_v45 = vadd.f32 %v2306_v44, %v2305_v27  ;;  %v2346_v46 = vpop.f32.mrb[29].mxu1  ;;  %v2308_v47 = vpop.f32.mrb[30].mxu0 }
 0x131   :  { %v2347_v48 = vadd.f32 %v2346_v46, %v2345_v43  ;;  %v2348_v49 = vpop.f32.mrb[30].mxu1  ;;  %v2309_v50 = vpop.f32.mrb[31].mxu0 }
 0x132   :  { %v1615_v51 = vadd.f32 %v2307_v45, %v1550_v53  ;;  %v2310_v52 = vadd.f32 %v2309_v50, %v2308_v47  ;;  %v2349_v54 = vpop.f32.mrb[31].mxu1 }
 0x133   :  { %v2350_v38 = vadd.f32 %v2349_v54, %v2348_v49 }
 0x134   :  { %v1680_v56 = vadd.f32 %v2347_v48, %v1615_v51  ;;  %v1618_v57 = vadd.f32 %v2310_v52, %v3240_v55 }
 0x136   :  { %v3249_v58 = vadd.f32 %v2350_v38, %v1618_v57  ;;  %v2367_v41 = vpop.f32.mrb[32].mxu0 }
 0x137   :  { %v2407_v59 = vpop.f32.mrb[32].mxu1  ;;  %v2368_v60 = vpop.f32.mrb[33].mxu0 }
 0x138   :  { %v2408_v61 = vpop.f32.mrb[33].mxu1  ;;  %v2369_v62 = vadd.f32 %v2368_v60, %v2367_v41  ;;  %v2370_v0 = vpop.f32.mrb[34].mxu0 }
 0x139   :  { %v2409_v63 = vadd.f32 %v2408_v61, %v2407_v59  ;;  %v2410_v1 = vpop.f32.mrb[34].mxu1  ;;  %v2371_v2 = vpop.f32.mrb[35].mxu0 }
 0x13a   :  { %v2411_v3 = vpop.f32.mrb[35].mxu1  ;;  %v1721_v4 = vadd.f32 %v2369_v62, %v1656_v5  ;;  %v2372_v53 = vadd.f32 %v2371_v2, %v2370_v0 }
 0x13b   :  { %v2412_v6 = vadd.f32 %v2411_v3, %v2410_v1 }
 0x13c   :  { %v1786_v8 = vadd.f32 %v2409_v63, %v1721_v4  ;;  %v1724_v9 = vadd.f32 %v2372_v53, %v3242_v7 }
 0x13e   :  { %v3252_v10 = vadd.f32 %v2412_v6, %v1724_v9  ;;  %v2373_v55 = vpop.f32.mrb[36].mxu0 }
 0x13f   :  { %v2413_v12 = vpop.f32.mrb[36].mxu1  ;;  %v2374_v14 = vpop.f32.mrb[37].mxu0 }
 0x140   :  { %v2375_v15 = vadd.f32 %v2374_v14, %v2373_v55  ;;  %v2414_v16 = vpop.f32.mrb[37].mxu1  ;;  %v2376_v17 = vpop.f32.mrb[38].mxu0 }
 0x141   :  { %v2415_v18 = vadd.f32 %v2414_v16, %v2413_v12  ;;  %v2416_v19 = vpop.f32.mrb[38].mxu1  ;;  %v2377_v20 = vpop.f32.mrb[39].mxu0 }
 0x142   :  { %v1729_v21 = vadd.f32 %v2375_v15, %v1664_v22  ;;  %v2378_v11 = vadd.f32 %v2377_v20, %v2376_v17  ;;  %v2417_v23 = vpop.f32.mrb[39].mxu1 }
 0x143   :  { %v2418_v5 = vadd.f32 %v2417_v23, %v2416_v19 }
 0x144   :  { %v1794_v13 = vadd.f32 %v2415_v18, %v1729_v21  ;;  %v1732_v26 = vadd.f32 %v2378_v11, %v3244_v24 }
 0x146   :  { %v3255_v28 = vadd.f32 %v2418_v5, %v1732_v26  ;;  %v2379_v7 = vpop.f32.mrb[40].mxu0 }
 0x147   :  { %v2419_v29 = vpop.f32.mrb[40].mxu1  ;;  %v2380_v30 = vpop.f32.mrb[41].mxu0 }
 0x148   :  { %v2381_v31 = vadd.f32 %v2380_v30, %v2379_v7  ;;  %v2420_v32 = vpop.f32.mrb[41].mxu1  ;;  %v2382_v33 = vpop.f32.mrb[42].mxu0 }
 0x149   :  { %v2421_v34 = vadd.f32 %v2420_v32, %v2419_v29  ;;  %v2422_v35 = vpop.f32.mrb[42].mxu1  ;;  %v2383_v36 = vpop.f32.mrb[43].mxu0 }
 0x14a   :  { %v1737_v37 = vadd.f32 %v2381_v31, %v1672_v25  ;;  %v2384_v39 = vadd.f32 %v2383_v36, %v2382_v33  ;;  %v2423_v22 = vpop.f32.mrb[43].mxu1 }
 0x14b   :  { %v2424_v40 = vadd.f32 %v2423_v22, %v2422_v35 }
 0x14c   :  { %v3257_v27 = vadd.f32 %v2421_v34, %v1737_v37  ;;  %v1740_v43 = vadd.f32 %v2384_v39, %v3246_v42 }
 0x14e   :  { %v3260_v24 = vadd.f32 %v2424_v40, %v1740_v43  ;;  %v2385_v44 = vpop.f32.mrb[44].mxu0  ;;  %v2190_v40 = vld [vmem:[%s3298_s3] ss:$0 sm:$0xff] }
 0x14f   :  { %v2425_v45 = vpop.f32.mrb[44].mxu1  ;;  %v2386_v46 = vpop.f32.mrb[45].mxu0 }
 0x150   :  { %v2426_v47 = vpop.f32.mrb[45].mxu1  ;;  %v2387_v48 = vadd.f32 %v2386_v46, %v2385_v44  ;;  %v2388_v50 = vpop.f32.mrb[46].mxu0 }
 0x151   :  { %v2427_v49 = vadd.f32 %v2426_v47, %v2425_v45  ;;  %v2428_v51 = vpop.f32.mrb[46].mxu1  ;;  %v2389_v52 = vpop.f32.mrb[47].mxu0 }
 0x152   :  { %v2429_v54 = vpop.f32.mrb[47].mxu1  ;;  %v1745_v25 = vadd.f32 %v2387_v48, %v1680_v56  ;;  %v2390_v38 = vadd.f32 %v2389_v52, %v2388_v50 }
 0x153   :  { %v2430_v57 = vadd.f32 %v2429_v54, %v2428_v51 }
 0x154   :  { %v3262_v41 = vadd.f32 %v2427_v49, %v1745_v25  ;;  %v1748_v59 = vadd.f32 %v2390_v38, %v3249_v58 }
 0x156   :  { %v3265_v42 = vadd.f32 %v2430_v57, %v1748_v59  ;;  %v2447_v60 = vpop.f32.mrb[48].mxu0 }
 0x157   :  { %v2487_v61 = vpop.f32.mrb[48].mxu1  ;;  %v2448_v62 = vpop.f32.mrb[49].mxu0 }
 0x158   :  { %v2449_v63 = vadd.f32 %v2448_v62, %v2447_v60  ;;  %v2488_v0 = vpop.f32.mrb[49].mxu1  ;;  %v2450_v1 = vpop.f32.mrb[50].mxu0 }
 0x159   :  { %v2489_v2 = vadd.f32 %v2488_v0, %v2487_v61  ;;  %v2490_v3 = vpop.f32.mrb[50].mxu1  ;;  %v2451_v4 = vpop.f32.mrb[51].mxu0 }
 0x15a   :  { %v1851_v53 = vadd.f32 %v2449_v63, %v1786_v8  ;;  %v2452_v6 = vadd.f32 %v2451_v4, %v2450_v1  ;;  %v2491_v56 = vpop.f32.mrb[51].mxu1 }
 0x15b   :  { %v2492_v9 = vadd.f32 %v2491_v56, %v2490_v3 }
 0x15c   :  { %v1916_v55 = vadd.f32 %v2489_v2, %v1851_v53  ;;  %v1854_v12 = vadd.f32 %v2452_v6, %v3252_v10  ;;  %v2189_v10 = vld [vmem:[%s3297_s2] ss:$0 sm:$0xff] }
 0x15e   :  { %v1919_v14 = vadd.f32 %v2492_v9, %v1854_v12  ;;  %v2453_v58 = vpop.f32.mrb[52].mxu0  ;;  %v1953_v37 = vmul.f32 %v2189_v10, %v1916_v55 }
 0x15f   :  { %v2493_v15 = vpop.f32.mrb[52].mxu1  ;;  %v2454_v16 = vpop.f32.mrb[53].mxu0 }
 0x160   :  { %v2455_v17 = vadd.f32 %v2454_v16, %v2453_v58  ;;  %v2494_v18 = vpop.f32.mrb[53].mxu1  ;;  %v2456_v19 = vpop.f32.mrb[54].mxu0  ;;  %v1954_v45 = vmul.f32 %v2189_v10, %v1919_v14  ;;  %v1968_v49 = vadd.f32 %v2190_v40, %v1953_v37 }
 0x161   :  { %v2495_v20 = vadd.f32 %v2494_v18, %v2493_v15  ;;  %v2496_v21 = vpop.f32.mrb[54].mxu1  ;;  %v2457_v11 = vpop.f32.mrb[55].mxu0 }
 0x162   :  { %v1859_v23 = vadd.f32 %v2455_v17, %v1794_v13  ;;  %v2458_v5 = vadd.f32 %v2457_v11, %v2456_v19  ;;  %v2497_v26 = vpop.f32.mrb[55].mxu1  ;;  %v1969_v54 = vadd.f32 %v2190_v40, %v1954_v45 }
 0x163   :  { %v2498_v8 = vadd.f32 %v2497_v26, %v2496_v21 }
 0x164   :  { %v1924_v7 = vadd.f32 %v2495_v20, %v1859_v23  ;;  %v1862_v29 = vadd.f32 %v2458_v5, %v3255_v28  ;;  %v1977_v56 = vmax.f32 %v1969_v54, 0.0 }
 0x166   :  { %v1927_v30 = vadd.f32 %v2498_v8, %v1862_v29  ;;  %v2459_v31 = vpop.f32.mrb[56].mxu0  ;;  %v1955_v63 = vmul.f32 %v2189_v10, %v1924_v7 }
 0x167   :  { %v2499_v32 = vpop.f32.mrb[56].mxu1  ;;  %v2460_v33 = vpop.f32.mrb[57].mxu0 }
 0x168   :  { %v2461_v34 = vadd.f32 %v2460_v33, %v2459_v31  ;;  %v2500_v35 = vpop.f32.mrb[57].mxu1  ;;  %v2462_v36 = vpop.f32.mrb[58].mxu0  ;;  %v1956_v9 = vmul.f32 %v2189_v10, %v1927_v30  ;;  %v1970_v16 = vadd.f32 %v2190_v40, %v1955_v63 }
 0x169   :  { %v2501_v39 = vadd.f32 %v2500_v35, %v2499_v32  ;;  %v2502_v13 = vpop.f32.mrb[58].mxu1  ;;  %v2463_v22 = vpop.f32.mrb[59].mxu0 }
 0x16a   :  { %v1867_v28 = vadd.f32 %v2461_v34, %v3257_v27  ;;  %v2464_v43 = vadd.f32 %v2463_v22, %v2462_v36  ;;  %v2503_v44 = vpop.f32.mrb[59].mxu1  ;;  %v1976_v27 = vmax.f32 %v1968_v49, 0.0  ;;  %v1971_v19 = vadd.f32 %v2190_v40, %v1956_v9 }
 0x16b   :  { %v2504_v46 = vadd.f32 %v2503_v44, %v2502_v13  ;;  %v1978_v11 = vmax.f32 %v1970_v16, 0.0 }
 0x16c   :  { %v1932_v47 = vadd.f32 %v2501_v39, %v1867_v28  ;;  %v1870_v48 = vadd.f32 %v2464_v43, %v3260_v24  ;;  %v1979_v5 = vmax.f32 %v1971_v19, 0.0 }
 0x16e   :  { %v1957_v50 = vmul.f32 %v2189_v10, %v1932_v47  ;;  %v1935_v51 = vadd.f32 %v2504_v46, %v1870_v48  ;;  %v2465_v52 = vpop.f32.mrb[60].mxu0 }
 0x16f   :  { %v2505_v25 = vpop.f32.mrb[60].mxu1  ;;  %v2466_v38 = vpop.f32.mrb[61].mxu0 }
 0x170   :  { %v1972_v57 = vadd.f32 %v2190_v40, %v1957_v50  ;;  %v1958_v59 = vmul.f32 %v2189_v10, %v1935_v51  ;;  %v2467_v60 = vadd.f32 %v2466_v38, %v2465_v52  ;;  %v2506_v61 = vpop.f32.mrb[61].mxu1  ;;  %v2468_v62 = vpop.f32.mrb[62].mxu0 }
 0x171   :  { %v2507_v0 = vadd.f32 %v2506_v61, %v2505_v25  ;;  %v2508_v1 = vpop.f32.mrb[62].mxu1  ;;  %v2469_v2 = vpop.f32.mrb[63].mxu0 }
 0x172   :  { %v1980_v3 = vmax.f32 %v1972_v57, 0.0  ;;  %v1973_v4 = vadd.f32 %v2190_v40, %v1958_v59  ;;  %v1875_v24 = vadd.f32 %v2467_v60, %v3262_v41  ;;  %v2470_v53 = vadd.f32 %v2469_v2, %v2468_v62  ;;  %v2509_v6 = vpop.f32.mrb[63].mxu1 }
 0x173   :  { %v2510_v55 = vadd.f32 %v2509_v6, %v2508_v1 }
 0x174   :  { %v1984_v12 = vmax.f32 %v1976_v27, %v1980_v3  ;;  %v1981_v14 = vmax.f32 %v1973_v4, 0.0  ;;  %v1940_v58 = vadd.f32 %v2507_v0, %v1875_v24  ;;  %v1878_v15 = vadd.f32 %v2470_v53, %v3265_v42 }
 0x176   :  { %1989 = vst.msk [vmem:[%s3299_s4] sm:$0xff] %vm1988_vm0, %v1984_v12  ;;  %v1985_v17 = vmax.f32 %v1977_v56, %v1981_v14  ;;  %v1959_v18 = vmul.f32 %v2189_v10, %v1940_v58  ;;  %v1943_v41 = vadd.f32 %v2510_v55, %v1878_v15 }
 0x178   :  { %1990 = vst.msk [vmem:[%s3299_s4 + $0x8] sm:$0xff] %vm1988_vm0, %v1985_v17  ;;  %v1974_v20 = vadd.f32 %v2190_v40, %v1959_v18  ;;  %v1960_v21 = vmul.f32 %v2189_v10, %v1943_v41 }
 0x17a   :  { %v1982_v23 = vmax.f32 %v1974_v20, 0.0  ;;  %v1975_v42 = vadd.f32 %v2190_v40, %v1960_v21 }
 0x17c   :  { %v1986_v26 = vmax.f32 %v1978_v11, %v1982_v23  ;;  %v1983_v8 = vmax.f32 %v1975_v42, 0.0 }
 0x17e   :  { %1991 = vst.msk [vmem:[%s3299_s4 + $0x10] sm:$0xff] %vm1988_vm0, %v1986_v26  ;;  %v1987_v7 = vmax.f32 %v1979_v5, %v1983_v8 }
 0x180   :  { %1992 = vst.msk [vmem:[%s3299_s4 + $0x18] sm:$0xff] %vm1988_vm0, %v1987_v7 }

// kernel: transformer_forward.15
= control target key start
LH: loop header
LB: loop body
LE: loop exit
PB: predicated region body
PF: predicated region fallthrough
CT: control target
= control target key end

     0   :  { %vm1654_vm0 = vcmask 523264   ;;  %s2692_s1 = inlined_call_operand.vmem [shape: bf16[2048,64], index: 1, kind: input, shape index: {}]   ;;  %s2693_s0 = inlined_call_operand.vmem [shape: bf16[32,2048], index: 0, kind: input, shape index: {}]   ;;  %s2694_s2 = inlined_call_operand.vmem [shape: f32[1,64], index: 2, kind: input, shape index: {}]   ;;  %s2695_s3 = inlined_call_operand.vmem [shape: f32[1,64], index: 3, kind: input, shape index: {}]   ;;  %s2696_s4 = inlined_call_operand.vmem [shape: f32[16,64], index: 4, kind: output, shape index: {}]  }
   0x1   :  { %v2047_v0 = vld [vmem:[%s2692_s1 + $0x40] sm:$0xff]   ;;  %v2051_v4 = vld [vmem:[%s2692_s1 + $0x48] sm:$0xff]   ;;  %v2055_v8 = vld [vmem:[%s2692_s1 + $0x50] sm:$0xff]  }
   0x2   :  { %v2048_v1 = vld [vmem:[%s2692_s1 + $0xc0] sm:$0xff]   ;;  %1823 = vmatprep.subr.bf16.mxu0 %v2047_v0  ;;  %v2052_v5 = vld [vmem:[%s2692_s1 + $0xc8] sm:$0xff]   ;;  %v2056_v9 = vld [vmem:[%s2692_s1 + $0xd0] sm:$0xff]  }
   0x3   :  { %v2049_v2 = vld [vmem:[%s2692_s1] sm:$0xff]   ;;  %1851 = vmatprep.subr.bf16.mxu1 %v2048_v1  ;;  %v2053_v6 = vld [vmem:[%s2692_s1 + $0x8] sm:$0xff]   ;;  %v2057_v10 = vld [vmem:[%s2692_s1 + $0x10] sm:$0xff]  }
   0x4   :  { %v2050_v3 = vld [vmem:[%s2692_s1 + $0x80] sm:$0xff]   ;;  %1824 = vmatpush3.bf16.msra.mxu0 %v2049_v2  ;;  %v2054_v7 = vld [vmem:[%s2692_s1 + $0x88] sm:$0xff]   ;;  %v2058_v11 = vld [vmem:[%s2692_s1 + $0x90] sm:$0xff]  }
   0x5   :  { %1852 = vmatpush3.bf16.msra.mxu1 %v2050_v3  ;;  %1825 = vmatprep.subr.bf16.mxu0 %v2051_v4  ;;  %v2059_v12 = vld [vmem:[%s2692_s1 + $0x58] sm:$0xff]   ;;  %v2063_v16 = vld [vmem:[%s2692_s1 + $0x60] sm:$0xff]   ;;  %v2067_v20 = vld [vmem:[%s2692_s1 + $0x68] sm:$0xff]  }
   0x6   :  { %1853 = vmatprep.subr.bf16.mxu1 %v2052_v5  ;;  %v2060_v13 = vld [vmem:[%s2692_s1 + $0xd8] sm:$0xff]   ;;  %v2064_v17 = vld [vmem:[%s2692_s1 + $0xe0] sm:$0xff]   ;;  %v2068_v21 = vld [vmem:[%s2692_s1 + $0xe8] sm:$0xff]  }
   0x7   :  { %v2061_v14 = vld [vmem:[%s2692_s1 + $0x18] sm:$0xff]   ;;  %v2065_v18 = vld [vmem:[%s2692_s1 + $0x20] sm:$0xff]   ;;  %v2069_v22 = vld [vmem:[%s2692_s1 + $0x28] sm:$0xff]  }
   0x8   :  { %1826 = vmatpush3.bf16.msra.mxu0 %v2053_v6  ;;  %v2062_v15 = vld [vmem:[%s2692_s1 + $0x98] sm:$0xff]   ;;  %v2066_v19 = vld [vmem:[%s2692_s1 + $0xa0] sm:$0xff]   ;;  %v2070_v23 = vld [vmem:[%s2692_s1 + $0xa8] sm:$0xff]  }
   0x9   :  { %1854 = vmatpush3.bf16.msra.mxu1 %v2054_v7  ;;  %1827 = vmatprep.subr.bf16.mxu0 %v2055_v8  ;;  %v2071_v24 = vld [vmem:[%s2692_s1 + $0x70] sm:$0xff]   ;;  %v2075_v28 = vld [vmem:[%s2692_s1 + $0x78] sm:$0xff]   ;;  %v18_v32 = vld [vmem:[%s2693_s0] sm:$0xff] }
   0xa   :  { %1855 = vmatprep.subr.bf16.mxu1 %v2056_v9  ;;  %v2072_v25 = vld [vmem:[%s2692_s1 + $0xf0] sm:$0xff]   ;;  %v2076_v29 = vld [vmem:[%s2692_s1 + $0xf8] sm:$0xff]   ;;  %v26_v33 = vld [vmem:[%s2693_s0 + $0x40] sm:$0xff] }
   0xb   :  { %v2073_v26 = vld [vmem:[%s2692_s1 + $0x30] sm:$0xff]   ;;  %v2077_v30 = vld [vmem:[%s2692_s1 + $0x38] sm:$0xff]   ;;  %v19_v34 = vld [vmem:[%s2693_s0 + $0x8] sm:$0xff]  ;;  %v1661_v35 = vcombine.low %v18_v32, %v26_v33  ;;  %v1662_v36 = vcombine.high %v18_v32, %v26_v33 }
   0xc   :  { %1828 = vmatpush3.bf16.msra.mxu0 %v2057_v10  ;;  %v2074_v27 = vld [vmem:[%s2692_s1 + $0xb0] sm:$0xff]   ;;  %v2078_v31 = vld [vmem:[%s2692_s1 + $0xb8] sm:$0xff]   ;;  %v27_v37 = vld [vmem:[%s2693_s0 + $0x48] sm:$0xff] }
   0xd   :  { %1856 = vmatpush3.bf16.msra.mxu1 %v2058_v11  ;;  %1829 = vmatprep.subr.bf16.mxu0 %v2059_v12  ;;  %v1663_v38 = vcombine.low %v19_v34, %v27_v37  ;;  %v1664_v39 = vcombine.high %v19_v34, %v27_v37  ;;  %v2079_v40 = vld [vmem:[%s2692_s1 + $0x140] sm:$0xff]   ;;  %v2083_v44 = vld [vmem:[%s2692_s1 + $0x148] sm:$0xff]   ;;  %v2087_v48 = vld [vmem:[%s2692_s1 + $0x150] sm:$0xff]  }
   0xe   :  { %1857 = vmatprep.subr.bf16.mxu1 %v2060_v13  ;;  %1266 = vmatprep.mubr.bf16.mxu0 %v1662_v36  ;;  %v2080_v41 = vld [vmem:[%s2692_s1 + $0x1c0] sm:$0xff]   ;;  %v2084_v45 = vld [vmem:[%s2692_s1 + $0x1c8] sm:$0xff]   ;;  %v2088_v49 = vld [vmem:[%s2692_s1 + $0x1d0] sm:$0xff]  }
   0xf   :  { %1315 = vmatprep.mubr.bf16.mxu1 %v1664_v39  ;;  %v2081_v42 = vld [vmem:[%s2692_s1 + $0x100] sm:$0xff]   ;;  %v2085_v46 = vld [vmem:[%s2692_s1 + $0x108] sm:$0xff]   ;;  %v2089_v50 = vld [vmem:[%s2692_s1 + $0x110] sm:$0xff]  }
  0x10   :  { %1830 = vmatpush3.bf16.msra.mxu0 %v2061_v14  ;;  %v2082_v43 = vld [vmem:[%s2692_s1 + $0x180] sm:$0xff]   ;;  %v2086_v47 = vld [vmem:[%s2692_s1 + $0x188] sm:$0xff]   ;;  %v2090_v51 = vld [vmem:[%s2692_s1 + $0x190] sm:$0xff]  }
  0x11   :  { %1858 = vmatpush3.bf16.msra.mxu1 %v2062_v15  ;;  %1831 = vmatprep.subr.bf16.mxu0 %v2063_v16  ;;  %v2091_v52 = vld [vmem:[%s2692_s1 + $0x158] sm:$0xff]   ;;  %v2095_v56 = vld [vmem:[%s2692_s1 + $0x160] sm:$0xff]   ;;  %v2099_v60 = vld [vmem:[%s2692_s1 + $0x168] sm:$0xff]  }
  0x12   :  { %1859 = vmatprep.subr.bf16.mxu1 %v2064_v17  ;;  %v2092_v53 = vld [vmem:[%s2692_s1 + $0x1d8] sm:$0xff]   ;;  %v2096_v57 = vld [vmem:[%s2692_s1 + $0x1e0] sm:$0xff]   ;;  %v2100_v61 = vld [vmem:[%s2692_s1 + $0x1e8] sm:$0xff]  }
  0x13   :  { %v2093_v54 = vld [vmem:[%s2692_s1 + $0x118] sm:$0xff]   ;;  %v2097_v58 = vld [vmem:[%s2692_s1 + $0x120] sm:$0xff]   ;;  %v35_v1 = vld [vmem:[%s2693_s0 + $0x88] sm:$0xff] }
  0x14   :  { %1832 = vmatpush3.bf16.msra.mxu0 %v2065_v18  ;;  %v2094_v55 = vld [vmem:[%s2692_s1 + $0x198] sm:$0xff]   ;;  %v2098_v59 = vld [vmem:[%s2692_s1 + $0x1a0] sm:$0xff]   ;;  %v43_v2 = vld [vmem:[%s2693_s0 + $0xc8] sm:$0xff] }
  0x15   :  { %1860 = vmatpush3.bf16.msra.mxu1 %v2066_v19  ;;  %1833 = vmatprep.subr.bf16.mxu0 %v2067_v20  ;;  %v34_v62 = vld [vmem:[%s2693_s0 + $0x80] sm:$0xff]  ;;  %v1680_v4 = vcombine.high %v35_v1, %v43_v2  ;;  %v2101_v5 = vld [vmem:[%s2692_s1 + $0x128] sm:$0xff]   ;;  %v1679_v6 = vcombine.low %v35_v1, %v43_v2  ;;  %v2103_v8 = vld [vmem:[%s2692_s1 + $0x170] sm:$0xff]  }
  0x16   :  { %1861 = vmatprep.subr.bf16.mxu1 %v2068_v21  ;;  %v42_v63 = vld [vmem:[%s2693_s0 + $0xc0] sm:$0xff]  ;;  %v2102_v7 = vld [vmem:[%s2692_s1 + $0x1a8] sm:$0xff]   ;;  %v2104_v9 = vld [vmem:[%s2692_s1 + $0x1f0] sm:$0xff]  }
  0x17   :  { %v1678_v0 = vcombine.high %v34_v62, %v42_v63  ;;  %v1677_v3 = vcombine.low %v34_v62, %v42_v63  ;;  %v2105_v10 = vld [vmem:[%s2692_s1 + $0x130] sm:$0xff]   ;;  %v2107_v12 = vld [vmem:[%s2692_s1 + $0x178] sm:$0xff]   ;;  %v30_v1 = vld [vmem:[%s2693_s0 + $0x60] sm:$0xff] }
  0x18   :  { %1834 = vmatpush3.bf16.msra.mxu0 %v2069_v22  ;;  %v2106_v11 = vld [vmem:[%s2692_s1 + $0x1b0] sm:$0xff]   ;;  %v2108_v13 = vld [vmem:[%s2692_s1 + $0x1f8] sm:$0xff]  }
  0x19   :  { %1862 = vmatpush3.bf16.msra.mxu1 %v2070_v23  ;;  %1835 = vmatprep.subr.bf16.mxu0 %v2071_v24  ;;  %v2109_v14 = vld [vmem:[%s2692_s1 + $0x138] sm:$0xff]   ;;  %v20_v16 = vld [vmem:[%s2693_s0 + $0x10] sm:$0xff]  ;;  %v2111_v24 = vld [vmem:[%s2692_s1 + $0x240] sm:$0xff]  }
  0x1a   :  { %1863 = vmatprep.subr.bf16.mxu1 %v2072_v25  ;;  %v2110_v15 = vld [vmem:[%s2692_s1 + $0x1b8] sm:$0xff]   ;;  %v28_v17 = vld [vmem:[%s2693_s0 + $0x50] sm:$0xff]  ;;  %v2112_v25 = vld [vmem:[%s2692_s1 + $0x2c0] sm:$0xff]  }
  0x1b   :  { %v21_v18 = vld [vmem:[%s2693_s0 + $0x18] sm:$0xff]  ;;  %v1665_v20 = vcombine.low %v20_v16, %v28_v17  ;;  %v1666_v21 = vcombine.high %v20_v16, %v28_v17  ;;  %v36_v32 = vld [vmem:[%s2693_s0 + $0x90] sm:$0xff]  ;;  %v38_v16 = vld [vmem:[%s2693_s0 + $0xa0] sm:$0xff] }
  0x1c   :  { %1836 = vmatpush3.bf16.msra.mxu0 %v2073_v26  ;;  %v29_v19 = vld [vmem:[%s2693_s0 + $0x58] sm:$0xff]  ;;  %v2113_v26 = vld [vmem:[%s2692_s1 + $0x200] sm:$0xff]   ;;  %v44_v33 = vld [vmem:[%s2693_s0 + $0xd0] sm:$0xff] }
  0x1d   :  { %1864 = vmatpush3.bf16.msra.mxu1 %v2074_v27  ;;  %1837 = vmatprep.subr.bf16.mxu0 %v2075_v28  ;;  %v1667_v22 = vcombine.low %v21_v18, %v29_v19  ;;  %v1668_v23 = vcombine.high %v21_v18, %v29_v19  ;;  %v2114_v27 = vld [vmem:[%s2692_s1 + $0x280] sm:$0xff]   ;;  %v2115_v28 = vld [vmem:[%s2692_s1 + $0x248] sm:$0xff]   ;;  %v1682_v34 = vcombine.high %v36_v32, %v44_v33  ;;  %v2119_v36 = vld [vmem:[%s2692_s1 + $0x250] sm:$0xff]  }
  0x1e   :  { %1865 = vmatprep.subr.bf16.mxu1 %v2076_v29  ;;  %v2116_v29 = vld [vmem:[%s2692_s1 + $0x2c8] sm:$0xff]   ;;  %v2120_v37 = vld [vmem:[%s2692_s1 + $0x2d0] sm:$0xff]   ;;  %v45_v39 = vld [vmem:[%s2693_s0 + $0xd8] sm:$0xff] }
  0x1f   :  { %v2141_v62 = vld [vmem:[%s2692_s1 + $0x238] sm:$0xff]   ;;  %v46_v17 = vld [vmem:[%s2693_s0 + $0xe0] sm:$0xff] }
  0x20   :  { %1838 = vmatpush3.bf16.msra.mxu0 %v2077_v30  ;;  %v2117_v30 = vld [vmem:[%s2692_s1 + $0x208] sm:$0xff]   ;;  %v2142_v63 = vld [vmem:[%s2692_s1 + $0x2b8] sm:$0xff]   ;;  %v1686_v18 = vcombine.high %v38_v16, %v46_v17  ;;  %v1685_v19 = vcombine.low %v38_v16, %v46_v17 }
  0x21   :  { %1866 = vmatpush3.bf16.msra.mxu1 %v2078_v31  ;;  %1879 = vmatprep.subr.bf16.mxu0 %v2079_v40  ;;  %v2118_v31 = vld [vmem:[%s2692_s1 + $0x288] sm:$0xff]  }
  0x22   :  { %1907 = vmatprep.subr.bf16.mxu1 %v2080_v41  ;;  %v2121_v41 = vld [vmem:[%s2692_s1 + $0x210] sm:$0xff]  }
  0x23   :  { %1267 = vmatmul.mubr.bf16.vlgmr.msra.gmra.mrb[0].mxu0 %v1661_v35  ;;  %v1681_v35 = vcombine.low %v36_v32, %v44_v33  ;;  %v2159_v32 = vld [vmem:[%s2692_s1 + $0x360] sm:$0xff]  }
  0x24   :  { %1316 = vmatmul.mubr.bf16.vlgmr.msra.gmra.mrb[0].mxu1 %v1663_v38  ;;  %1880 = vmatpush3.bf16.msra.mxu0 %v2081_v42  ;;  %v37_v38 = vld [vmem:[%s2693_s0 + $0x98] sm:$0xff]  ;;  %v2160_v33 = vld [vmem:[%s2692_s1 + $0x3e0] sm:$0xff]  }
  0x25   :  { %1908 = vmatpush3.bf16.msra.mxu1 %v2082_v43  ;;  %1881 = vmatprep.subr.bf16.mxu0 %v2083_v44  ;;  %v1684_v40 = vcombine.high %v37_v38, %v45_v39  ;;  %v1683_v42 = vcombine.low %v37_v38, %v45_v39  ;;  %v2122_v43 = vld [vmem:[%s2692_s1 + $0x290] sm:$0xff]   ;;  %v2123_v44 = vld [vmem:[%s2692_s1 + $0x258] sm:$0xff]   ;;  %v2165_v38 = vld [vmem:[%s2692_s1 + $0x328] sm:$0xff]  }
  0x26   :  { %1909 = vmatprep.subr.bf16.mxu1 %v2084_v45  ;;  %1274 = vmatprep.mubr.bf16.mxu0 %v1678_v0  ;;  %v2124_v45 = vld [vmem:[%s2692_s1 + $0x2d8] sm:$0xff]   ;;  %v22_v0 = vld [vmem:[%s2693_s0 + $0x20] sm:$0xff]  ;;  %v2166_v39 = vld [vmem:[%s2692_s1 + $0x3a8] sm:$0xff]  }
  0x27   :  { %1323 = vmatprep.mubr.bf16.mxu1 %v1680_v4  ;;  %v1669_v2 = vcombine.low %v22_v0, %v30_v1  ;;  %v23_v4 = vld [vmem:[%s2693_s0 + $0x28] sm:$0xff] }
  0x28   :  { %1882 = vmatpush3.bf16.msra.mxu0 %v2085_v46  ;;  %v2125_v46 = vld [vmem:[%s2692_s1 + $0x218] sm:$0xff]  }
  0x29   :  { %1910 = vmatpush3.bf16.msra.mxu1 %v2086_v47  ;;  %1883 = vmatprep.subr.bf16.mxu0 %v2087_v48  ;;  %v2126_v47 = vld [vmem:[%s2692_s1 + $0x298] sm:$0xff]   ;;  %v2127_v48 = vld [vmem:[%s2692_s1 + $0x260] sm:$0xff]  }
  0x2a   :  { %1911 = vmatprep.subr.bf16.mxu1 %v2088_v49  ;;  %v2128_v49 = vld [vmem:[%s2692_s1 + $0x2e0] sm:$0xff]  }
  0x2b   :  { %1275 = vmatmul.mubr.bf16.gmra.mrb[4].mxu0 %v1677_v3  ;;  %v1670_v3 = vcombine.high %v22_v0, %v30_v1 }
  0x2c   :  { %1884 = vmatpush3.bf16.msra.mxu0 %v2089_v50  ;;  %1324 = vmatmul.mubr.bf16.gmra.mrb[4].mxu1 %v1679_v6  ;;  %v2129_v50 = vld [vmem:[%s2692_s1 + $0x220] sm:$0xff]  }
  0x2d   :  { %1912 = vmatpush3.bf16.msra.mxu1 %v2090_v51  ;;  %1885 = vmatprep.subr.bf16.mxu0 %v2091_v52  ;;  %v2130_v51 = vld [vmem:[%s2692_s1 + $0x2a0] sm:$0xff]   ;;  %v2131_v52 = vld [vmem:[%s2692_s1 + $0x268] sm:$0xff]  }
  0x2e   :  { %1913 = vmatprep.subr.bf16.mxu1 %v2092_v53  ;;  %1364 = vmatprep.mubr.bf16.mxu0 %v1666_v21  ;;  %v2132_v53 = vld [vmem:[%s2692_s1 + $0x2e8] sm:$0xff]   ;;  %v2152_v21 = vld [vmem:[%s2692_s1 + $0x3d0] sm:$0xff]  }
  0x2f   :  { %1413 = vmatprep.mubr.bf16.mxu1 %v1668_v23  ;;  %v47_v23 = vld [vmem:[%s2693_s0 + $0xe8] sm:$0xff] }
  0x30   :  { %1886 = vmatpush3.bf16.msra.mxu0 %v2093_v54  ;;  %v2133_v54 = vld [vmem:[%s2692_s1 + $0x228] sm:$0xff]  }
  0x31   :  { %1914 = vmatpush3.bf16.msra.mxu1 %v2094_v55  ;;  %1887 = vmatprep.subr.bf16.mxu0 %v2095_v56  ;;  %v2134_v55 = vld [vmem:[%s2692_s1 + $0x2a8] sm:$0xff]   ;;  %v2135_v56 = vld [vmem:[%s2692_s1 + $0x270] sm:$0xff]  }
  0x32   :  { %1915 = vmatprep.subr.bf16.mxu1 %v2096_v57  ;;  %v2136_v57 = vld [vmem:[%s2692_s1 + $0x2f0] sm:$0xff]  }
  0x34   :  { %1888 = vmatpush3.bf16.msra.mxu0 %v2097_v58  ;;  %v2137_v58 = vld [vmem:[%s2692_s1 + $0x230] sm:$0xff]  }
  0x35   :  { %1916 = vmatpush3.bf16.msra.mxu1 %v2098_v59  ;;  %1889 = vmatprep.subr.bf16.mxu0 %v2099_v60  ;;  %v2138_v59 = vld [vmem:[%s2692_s1 + $0x2b0] sm:$0xff]   ;;  %v2139_v60 = vld [vmem:[%s2692_s1 + $0x278] sm:$0xff]  }
  0x36   :  { %1917 = vmatprep.subr.bf16.mxu1 %v2100_v61  ;;  %v2140_v61 = vld [vmem:[%s2692_s1 + $0x2f8] sm:$0xff]  }
  0x38   :  { %1890 = vmatpush3.bf16.msra.mxu0 %v2101_v5  ;;  %v31_v5 = vld [vmem:[%s2693_s0 + $0x68] sm:$0xff] }
  0x39   :  { %1918 = vmatpush3.bf16.msra.mxu1 %v2102_v7  ;;  %1891 = vmatprep.subr.bf16.mxu0 %v2103_v8  ;;  %v1671_v6 = vcombine.low %v23_v4, %v31_v5  ;;  %v1672_v7 = vcombine.high %v23_v4, %v31_v5  ;;  %v2143_v8 = vld [vmem:[%s2692_s1 + $0x340] sm:$0xff]  }
  0x3a   :  { %1919 = vmatprep.subr.bf16.mxu1 %v2104_v9  ;;  %v2144_v9 = vld [vmem:[%s2692_s1 + $0x3c0] sm:$0xff]  }
  0x3c   :  { %1892 = vmatpush3.bf16.msra.mxu0 %v2105_v10  ;;  %v2145_v10 = vld [vmem:[%s2692_s1 + $0x300] sm:$0xff]  }
  0x3d   :  { %1920 = vmatpush3.bf16.msra.mxu1 %v2106_v11  ;;  %1893 = vmatprep.subr.bf16.mxu0 %v2107_v12  ;;  %v2146_v11 = vld [vmem:[%s2692_s1 + $0x380] sm:$0xff]   ;;  %v2147_v12 = vld [vmem:[%s2692_s1 + $0x348] sm:$0xff]  }
  0x3e   :  { %1921 = vmatprep.subr.bf16.mxu1 %v2108_v13  ;;  %v2148_v13 = vld [vmem:[%s2692_s1 + $0x3c8] sm:$0xff]  }
  0x40   :  { %1894 = vmatpush3.bf16.msra.mxu0 %v2109_v14  ;;  %v2149_v14 = vld [vmem:[%s2692_s1 + $0x308] sm:$0xff]  }
  0x41   :  { %1922 = vmatpush3.bf16.msra.mxu1 %v2110_v15  ;;  %1935 = vmatprep.subr.bf16.mxu0 %v2111_v24  ;;  %v2150_v15 = vld [vmem:[%s2692_s1 + $0x388] sm:$0xff]  }
  0x42   :  { %1963 = vmatprep.subr.bf16.mxu1 %v2112_v25  ;;  %v2153_v25 = vld [vmem:[%s2692_s1 + $0x310] sm:$0xff]  }
  0x43   :  { %1365 = vmatmul.mubr.bf16.vlgmr.msra.gmra.mrb[8].mxu0 %v1665_v20  ;;  %v2151_v20 = vld [vmem:[%s2692_s1 + $0x350] sm:$0xff]  }
  0x44   :  { %1414 = vmatmul.mubr.bf16.vlgmr.msra.gmra.mrb[8].mxu1 %v1667_v22  ;;  %1936 = vmatpush3.bf16.msra.mxu0 %v2113_v26  ;;  %v39_v22 = vld [vmem:[%s2693_s0 + $0xa8] sm:$0xff] }
  0x45   :  { %1964 = vmatpush3.bf16.msra.mxu1 %v2114_v27  ;;  %1937 = vmatprep.subr.bf16.mxu0 %v2115_v28  ;;  %v1688_v24 = vcombine.high %v39_v22, %v47_v23  ;;  %v1687_v26 = vcombine.low %v39_v22, %v47_v23  ;;  %v2154_v27 = vld [vmem:[%s2692_s1 + $0x390] sm:$0xff]   ;;  %v2155_v28 = vld [vmem:[%s2692_s1 + $0x358] sm:$0xff]  }
  0x46   :  { %1965 = vmatprep.subr.bf16.mxu1 %v2116_v29  ;;  %1372 = vmatprep.mubr.bf16.mxu0 %v1682_v34  ;;  %v2156_v29 = vld [vmem:[%s2692_s1 + $0x3d8] sm:$0xff]   ;;  %v2161_v34 = vld [vmem:[%s2692_s1 + $0x320] sm:$0xff]  }
  0x47   :  { %1421 = vmatprep.mubr.bf16.mxu1 %v1684_v40  ;;  %v2167_v40 = vld [vmem:[%s2692_s1 + $0x370] sm:$0xff]  }
  0x48   :  { %1938 = vmatpush3.bf16.msra.mxu0 %v2117_v30  ;;  %v2157_v30 = vld [vmem:[%s2692_s1 + $0x318] sm:$0xff]  }
  0x49   :  { %1966 = vmatpush3.bf16.msra.mxu1 %v2118_v31  ;;  %1939 = vmatprep.subr.bf16.mxu0 %v2119_v36  ;;  %v2158_v31 = vld [vmem:[%s2692_s1 + $0x398] sm:$0xff]   ;;  %v2163_v36 = vld [vmem:[%s2692_s1 + $0x368] sm:$0xff]  }
  0x4a   :  { %1967 = vmatprep.subr.bf16.mxu1 %v2120_v37  ;;  %v2164_v37 = vld [vmem:[%s2692_s1 + $0x3e8] sm:$0xff]  }
  0x4b   :  { %1373 = vmatmul.mubr.bf16.gmra.mrb[12].mxu0 %v1681_v35  ;;  %v2162_v35 = vld [vmem:[%s2692_s1 + $0x3a0] sm:$0xff]  }
  0x4c   :  { %1940 = vmatpush3.bf16.msra.mxu0 %v2121_v41  ;;  %1422 = vmatmul.mubr.bf16.gmra.mrb[12].mxu1 %v1683_v42  ;;  %v2168_v41 = vld [vmem:[%s2692_s1 + $0x3f0] sm:$0xff]  }
  0x4d   :  { %1968 = vmatpush3.bf16.msra.mxu1 %v2122_v43  ;;  %1941 = vmatprep.subr.bf16.mxu0 %v2123_v44  ;;  %v2169_v42 = vld [vmem:[%s2692_s1 + $0x330] sm:$0xff]   ;;  %v2171_v44 = vld [vmem:[%s2692_s1 + $0x378] sm:$0xff]  }
  0x4e   :  { %1969 = vmatprep.subr.bf16.mxu1 %v2124_v45  ;;  %1462 = vmatprep.mubr.bf16.mxu0 %v1670_v3  ;;  %v2170_v43 = vld [vmem:[%s2692_s1 + $0x3b0] sm:$0xff]   ;;  %v2172_v45 = vld [vmem:[%s2692_s1 + $0x3f8] sm:$0xff]  }
  0x4f   :  { %1511 = vmatprep.mubr.bf16.mxu1 %v1672_v7 }
  0x50   :  { %1942 = vmatpush3.bf16.msra.mxu0 %v2125_v46  ;;  %v2173_v46 = vld [vmem:[%s2692_s1 + $0x338] sm:$0xff]  }
  0x51   :  { %1970 = vmatpush3.bf16.msra.mxu1 %v2126_v47  ;;  %1943 = vmatprep.subr.bf16.mxu0 %v2127_v48  ;;  %v2174_v47 = vld [vmem:[%s2692_s1 + $0x3b8] sm:$0xff]   ;;  %v24_v48 = vld [vmem:[%s2693_s0 + $0x30] sm:$0xff] }
  0x52   :  { %1971 = vmatprep.subr.bf16.mxu1 %v2128_v49  ;;  %v32_v49 = vld [vmem:[%s2693_s0 + $0x70] sm:$0xff] }
  0x54   :  { %1944 = vmatpush3.bf16.msra.mxu0 %v2129_v50  ;;  %v25_v50 = vld [vmem:[%s2693_s0 + $0x38] sm:$0xff] }
  0x55   :  { %1972 = vmatpush3.bf16.msra.mxu1 %v2130_v51  ;;  %1945 = vmatprep.subr.bf16.mxu0 %v2131_v52  ;;  %v1673_v51 = vcombine.low %v24_v48, %v32_v49  ;;  %v1674_v52 = vcombine.high %v24_v48, %v32_v49 }
  0x56   :  { %1973 = vmatprep.subr.bf16.mxu1 %v2132_v53  ;;  %v33_v53 = vld [vmem:[%s2693_s0 + $0x78] sm:$0xff] }
  0x58   :  { %1946 = vmatpush3.bf16.msra.mxu0 %v2133_v54  ;;  %v40_v54 = vld [vmem:[%s2693_s0 + $0xb0] sm:$0xff] }
  0x59   :  { %1974 = vmatpush3.bf16.msra.mxu1 %v2134_v55  ;;  %1947 = vmatprep.subr.bf16.mxu0 %v2135_v56  ;;  %v48_v55 = vld [vmem:[%s2693_s0 + $0xf0] sm:$0xff]  ;;  %v1675_v56 = vcombine.low %v25_v50, %v33_v53 }
  0x5a   :  { %1975 = vmatprep.subr.bf16.mxu1 %v2136_v57  ;;  %v1676_v57 = vcombine.high %v25_v50, %v33_v53 }
  0x5c   :  { %1948 = vmatpush3.bf16.msra.mxu0 %v2137_v58  ;;  %v1690_v58 = vcombine.high %v40_v54, %v48_v55 }
  0x5d   :  { %1976 = vmatpush3.bf16.msra.mxu1 %v2138_v59  ;;  %1949 = vmatprep.subr.bf16.mxu0 %v2139_v60  ;;  %v41_v59 = vld [vmem:[%s2693_s0 + $0xb8] sm:$0xff] }
  0x5e   :  { %1977 = vmatprep.subr.bf16.mxu1 %v2140_v61  ;;  %v49_v60 = vld [vmem:[%s2693_s0 + $0xf8] sm:$0xff] }
  0x5f   :  { %v1692_v61 = vcombine.high %v41_v59, %v49_v60 }
  0x60   :  { %1950 = vmatpush3.bf16.msra.mxu0 %v2141_v62  ;;  %v1689_v62 = vcombine.low %v40_v54, %v48_v55 }
  0x61   :  { %1978 = vmatpush3.bf16.msra.mxu1 %v2142_v63  ;;  %1991 = vmatprep.subr.bf16.mxu0 %v2143_v8  ;;  %v1691_v63 = vcombine.low %v41_v59, %v49_v60 }
  0x62   :  { %2019 = vmatprep.subr.bf16.mxu1 %v2144_v9 }
  0x63   :  { %1463 = vmatmul.mubr.bf16.vlgmr.msra.gmra.mrb[16].mxu0 %v1669_v2 }
  0x64   :  { %1512 = vmatmul.mubr.bf16.vlgmr.msra.gmra.mrb[16].mxu1 %v1671_v6  ;;  %1992 = vmatpush3.bf16.msra.mxu0 %v2145_v10 }
  0x65   :  { %2020 = vmatpush3.bf16.msra.mxu1 %v2146_v11  ;;  %1993 = vmatprep.subr.bf16.mxu0 %v2147_v12 }
  0x66   :  { %2021 = vmatprep.subr.bf16.mxu1 %v2148_v13  ;;  %1470 = vmatprep.mubr.bf16.mxu0 %v1686_v18 }
  0x67   :  { %1519 = vmatprep.mubr.bf16.mxu1 %v1688_v24 }
  0x68   :  { %1994 = vmatpush3.bf16.msra.mxu0 %v2149_v14 }
  0x69   :  { %2022 = vmatpush3.bf16.msra.mxu1 %v2150_v15  ;;  %1995 = vmatprep.subr.bf16.mxu0 %v2151_v20 }
  0x6a   :  { %2023 = vmatprep.subr.bf16.mxu1 %v2152_v21 }
  0x6b   :  { %1471 = vmatmul.mubr.bf16.gmra.mrb[20].mxu0 %v1685_v19 }
  0x6c   :  { %1996 = vmatpush3.bf16.msra.mxu0 %v2153_v25  ;;  %1520 = vmatmul.mubr.bf16.gmra.mrb[20].mxu1 %v1687_v26 }
  0x6d   :  { %2024 = vmatpush3.bf16.msra.mxu1 %v2154_v27  ;;  %1997 = vmatprep.subr.bf16.mxu0 %v2155_v28 }
  0x6e   :  { %2025 = vmatprep.subr.bf16.mxu1 %v2156_v29  ;;  %1560 = vmatprep.mubr.bf16.mxu0 %v1674_v52 }
  0x6f   :  { %1609 = vmatprep.mubr.bf16.mxu1 %v1676_v57 }
  0x70   :  { %1998 = vmatpush3.bf16.msra.mxu0 %v2157_v30 }
  0x71   :  { %2026 = vmatpush3.bf16.msra.mxu1 %v2158_v31  ;;  %1999 = vmatprep.subr.bf16.mxu0 %v2159_v32 }
  0x72   :  { %2027 = vmatprep.subr.bf16.mxu1 %v2160_v33 }
  0x74   :  { %2000 = vmatpush3.bf16.msra.mxu0 %v2161_v34 }
  0x75   :  { %2028 = vmatpush3.bf16.msra.mxu1 %v2162_v35  ;;  %2001 = vmatprep.subr.bf16.mxu0 %v2163_v36 }
  0x76   :  { %2029 = vmatprep.subr.bf16.mxu1 %v2164_v37 }
  0x78   :  { %2002 = vmatpush3.bf16.msra.mxu0 %v2165_v38 }
  0x79   :  { %2030 = vmatpush3.bf16.msra.mxu1 %v2166_v39  ;;  %2003 = vmatprep.subr.bf16.mxu0 %v2167_v40 }
  0x7a   :  { %2031 = vmatprep.subr.bf16.mxu1 %v2168_v41 }
  0x7c   :  { %2004 = vmatpush3.bf16.msra.mxu0 %v2169_v42 }
  0x7d   :  { %2032 = vmatpush3.bf16.msra.mxu1 %v2170_v43  ;;  %2005 = vmatprep.subr.bf16.mxu0 %v2171_v44 }
  0x7e   :  { %2033 = vmatprep.subr.bf16.mxu1 %v2172_v45 }
  0x80   :  { %2006 = vmatpush3.bf16.msra.mxu0 %v2173_v46 }
  0x81   :  { %2034 = vmatpush3.bf16.msra.mxu1 %v2174_v47 }
  0x83   :  { %1561 = vmatmul.mubr.bf16.vlgmr.msra.gmra.mrb[24].mxu0 %v1673_v51 }
  0x84   :  { %1610 = vmatmul.mubr.bf16.vlgmr.msra.gmra.mrb[24].mxu1 %v1675_v56  ;;  %1568 = vmatprep.mubr.bf16.mxu0 %v1690_v58 }
  0x85   :  { %1617 = vmatprep.mubr.bf16.mxu1 %v1692_v61 }
  0x8b   :  { %1569 = vmatmul.mubr.bf16.gmra.mrb[28].mxu0 %v1689_v62 }
  0x8c   :  { %1618 = vmatmul.mubr.bf16.gmra.mrb[28].mxu1 %v1691_v63 }
  0xf6   :  { %v1839_v0 = vpop.f32.mrb[0].mxu0 }
  0xf7   :  { %v1867_v1 = vpop.f32.mrb[0].mxu1  ;;  %v1840_v2 = vpop.f32.mrb[1].mxu0 }
  0xf8   :  { %v1841_v3 = vadd.f32 %v1840_v2, %v1839_v0  ;;  %v1868_v4 = vpop.f32.mrb[1].mxu1  ;;  %v1842_v5 = vpop.f32.mrb[2].mxu0 }
  0xf9   :  { %v1869_v6 = vadd.f32 %v1868_v4, %v1867_v1  ;;  %v1870_v7 = vpop.f32.mrb[2].mxu1  ;;  %v1843_v8 = vpop.f32.mrb[3].mxu0 }
  0xfa   :  { %v1844_v9 = vadd.f32 %v1843_v8, %v1842_v5  ;;  %v1871_v10 = vpop.f32.mrb[3].mxu1 }
  0xfb   :  { %v1318_v11 = vadd.f32 %v1869_v6, %v1841_v3  ;;  %v1872_v12 = vadd.f32 %v1871_v10, %v1870_v7 }
  0xfd   :  { %v1321_v13 = vadd.f32 %v1872_v12, %v1844_v9 }
  0xfe   :  { %v1845_v14 = vpop.f32.mrb[4].mxu0 }
  0xff   :  { %v1873_v15 = vpop.f32.mrb[4].mxu1  ;;  %v1846_v16 = vpop.f32.mrb[5].mxu0 }
 0x100   :  { %v1847_v17 = vadd.f32 %v1846_v16, %v1845_v14  ;;  %v1874_v18 = vpop.f32.mrb[5].mxu1  ;;  %v1848_v19 = vpop.f32.mrb[6].mxu0 }
 0x101   :  { %v1875_v20 = vadd.f32 %v1874_v18, %v1873_v15  ;;  %v1876_v21 = vpop.f32.mrb[6].mxu1  ;;  %v1849_v22 = vpop.f32.mrb[7].mxu0 }
 0x102   :  { %v1850_v23 = vadd.f32 %v1849_v22, %v1848_v19  ;;  %v1877_v24 = vpop.f32.mrb[7].mxu1 }
 0x103   :  { %v1326_v25 = vadd.f32 %v1875_v20, %v1847_v17  ;;  %v1878_v26 = vadd.f32 %v1877_v24, %v1876_v21 }
 0x105   :  { %v1329_v27 = vadd.f32 %v1878_v26, %v1850_v23 }
 0x116   :  { %v1895_v28 = vpop.f32.mrb[8].mxu0 }
 0x117   :  { %v1923_v29 = vpop.f32.mrb[8].mxu1  ;;  %v1896_v30 = vpop.f32.mrb[9].mxu0 }
 0x118   :  { %v1924_v31 = vpop.f32.mrb[9].mxu1  ;;  %v1897_v32 = vadd.f32 %v1896_v30, %v1895_v28  ;;  %v1898_v34 = vpop.f32.mrb[10].mxu0 }
 0x119   :  { %v1925_v33 = vadd.f32 %v1924_v31, %v1923_v29  ;;  %v1926_v35 = vpop.f32.mrb[10].mxu1  ;;  %v1899_v36 = vpop.f32.mrb[11].mxu0 }
 0x11a   :  { %v1927_v37 = vpop.f32.mrb[11].mxu1  ;;  %v1367_v38 = vadd.f32 %v1897_v32, %v1318_v11  ;;  %v1900_v39 = vadd.f32 %v1899_v36, %v1898_v34 }
 0x11b   :  { %v1928_v40 = vadd.f32 %v1927_v37, %v1926_v35 }
 0x11c   :  { %v1416_v41 = vadd.f32 %v1925_v33, %v1367_v38  ;;  %v1370_v42 = vadd.f32 %v1900_v39, %v1321_v13 }
 0x11e   :  { %v1419_v43 = vadd.f32 %v1928_v40, %v1370_v42  ;;  %v1901_v44 = vpop.f32.mrb[12].mxu0 }
 0x11f   :  { %v1902_v45 = vpop.f32.mrb[13].mxu0  ;;  %v1929_v50 = vpop.f32.mrb[12].mxu1 }
 0x120   :  { %v1903_v46 = vadd.f32 %v1902_v45, %v1901_v44  ;;  %v1904_v47 = vpop.f32.mrb[14].mxu0  ;;  %v1930_v52 = vpop.f32.mrb[13].mxu1  ;;  %v1821_v45 = vld [vmem:[%s2694_s2] ss:$0 sm:$0xff] }
 0x121   :  { %v1905_v48 = vpop.f32.mrb[15].mxu0  ;;  %v1931_v54 = vadd.f32 %v1930_v52, %v1929_v50  ;;  %v1932_v55 = vpop.f32.mrb[14].mxu1 }
 0x122   :  { %v1375_v49 = vadd.f32 %v1903_v46, %v1326_v25  ;;  %v1906_v51 = vadd.f32 %v1905_v48, %v1904_v47  ;;  %v1933_v56 = vpop.f32.mrb[15].mxu1 }
 0x123   :  { %v1934_v58 = vadd.f32 %v1933_v56, %v1932_v55 }
 0x124   :  { %v1378_v53 = vadd.f32 %v1906_v51, %v1329_v27  ;;  %v1424_v57 = vadd.f32 %v1931_v54, %v1375_v49 }
 0x126   :  { %v1427_v59 = vadd.f32 %v1934_v58, %v1378_v53  ;;  %v1822_v58 = vld [vmem:[%s2695_s3] ss:$0 sm:$0xff] }
 0x136   :  { %v1951_v60 = vpop.f32.mrb[16].mxu0 }
 0x137   :  { %v1979_v61 = vpop.f32.mrb[16].mxu1  ;;  %v1952_v62 = vpop.f32.mrb[17].mxu0 }
 0x138   :  { %v1953_v63 = vadd.f32 %v1952_v62, %v1951_v60  ;;  %v1980_v0 = vpop.f32.mrb[17].mxu1  ;;  %v1954_v1 = vpop.f32.mrb[18].mxu0 }
 0x139   :  { %v1981_v2 = vadd.f32 %v1980_v0, %v1979_v61  ;;  %v1982_v3 = vpop.f32.mrb[18].mxu1  ;;  %v1955_v4 = vpop.f32.mrb[19].mxu0 }
 0x13a   :  { %v1465_v5 = vadd.f32 %v1953_v63, %v1416_v41  ;;  %v1956_v6 = vadd.f32 %v1955_v4, %v1954_v1  ;;  %v1983_v7 = vpop.f32.mrb[19].mxu1 }
 0x13b   :  { %v1984_v8 = vadd.f32 %v1983_v7, %v1982_v3 }
 0x13c   :  { %v1514_v9 = vadd.f32 %v1981_v2, %v1465_v5  ;;  %v1468_v10 = vadd.f32 %v1956_v6, %v1419_v43 }
 0x13e   :  { %v1517_v11 = vadd.f32 %v1984_v8, %v1468_v10  ;;  %v1957_v12 = vpop.f32.mrb[20].mxu0 }
 0x13f   :  { %v1958_v13 = vpop.f32.mrb[21].mxu0  ;;  %v1985_v16 = vpop.f32.mrb[20].mxu1 }
 0x140   :  { %v1959_v14 = vadd.f32 %v1958_v13, %v1957_v12  ;;  %v1960_v15 = vpop.f32.mrb[22].mxu0  ;;  %v1986_v20 = vpop.f32.mrb[21].mxu1 }
 0x141   :  { %v1961_v17 = vpop.f32.mrb[23].mxu0  ;;  %v1987_v21 = vadd.f32 %v1986_v20, %v1985_v16  ;;  %v1988_v22 = vpop.f32.mrb[22].mxu1 }
 0x142   :  { %v1473_v18 = vadd.f32 %v1959_v14, %v1424_v57  ;;  %v1962_v19 = vadd.f32 %v1961_v17, %v1960_v15  ;;  %v1989_v24 = vpop.f32.mrb[23].mxu1 }
 0x143   :  { %v1990_v26 = vadd.f32 %v1989_v24, %v1988_v22 }
 0x144   :  { %v1476_v23 = vadd.f32 %v1962_v19, %v1427_v59  ;;  %v1522_v25 = vadd.f32 %v1987_v21, %v1473_v18 }
 0x146   :  { %v1525_v27 = vadd.f32 %v1990_v26, %v1476_v23 }
 0x156   :  { %v2007_v28 = vpop.f32.mrb[24].mxu0 }
 0x157   :  { %v2035_v29 = vpop.f32.mrb[24].mxu1  ;;  %v2008_v30 = vpop.f32.mrb[25].mxu0 }
 0x158   :  { %v2009_v31 = vadd.f32 %v2008_v30, %v2007_v28  ;;  %v2036_v32 = vpop.f32.mrb[25].mxu1  ;;  %v2010_v33 = vpop.f32.mrb[26].mxu0 }
 0x159   :  { %v2037_v34 = vadd.f32 %v2036_v32, %v2035_v29  ;;  %v2038_v35 = vpop.f32.mrb[26].mxu1  ;;  %v2011_v36 = vpop.f32.mrb[27].mxu0 }
 0x15a   :  { %v1563_v37 = vadd.f32 %v2009_v31, %v1514_v9  ;;  %v2012_v38 = vadd.f32 %v2011_v36, %v2010_v33  ;;  %v2039_v39 = vpop.f32.mrb[27].mxu1 }
 0x15b   :  { %v2040_v40 = vadd.f32 %v2039_v39, %v2038_v35 }
 0x15c   :  { %v1612_v41 = vadd.f32 %v2037_v34, %v1563_v37  ;;  %v1566_v42 = vadd.f32 %v2012_v38, %v1517_v11 }
 0x15e   :  { %v1615_v43 = vadd.f32 %v2040_v40, %v1566_v42  ;;  %v2013_v44 = vpop.f32.mrb[28].mxu0  ;;  %v1633_v54 = vmul.f32 %v1821_v45, %v1612_v41 }
 0x15f   :  { %v2041_v46 = vpop.f32.mrb[28].mxu1  ;;  %v2014_v47 = vpop.f32.mrb[29].mxu0 }
 0x160   :  { %v2015_v48 = vadd.f32 %v2014_v47, %v2013_v44  ;;  %v2042_v49 = vpop.f32.mrb[29].mxu1  ;;  %v2016_v50 = vpop.f32.mrb[30].mxu0  ;;  %v1634_v60 = vmul.f32 %v1821_v45, %v1615_v43  ;;  %v1644_v63 = vadd.f32 %v1822_v58, %v1633_v54 }
 0x161   :  { %v2043_v51 = vadd.f32 %v2042_v49, %v2041_v46  ;;  %v2044_v52 = vpop.f32.mrb[30].mxu1  ;;  %v2017_v53 = vpop.f32.mrb[31].mxu0 }
 0x162   :  { %v1571_v55 = vadd.f32 %v2015_v48, %v1522_v25  ;;  %v2018_v56 = vadd.f32 %v2017_v53, %v2016_v50  ;;  %v2045_v57 = vpop.f32.mrb[31].mxu1  ;;  %v1645_v2 = vadd.f32 %v1822_v58, %v1634_v60  ;;  %v1648_v5 = vmax.f32 %v1644_v63, 0.0 }
 0x163   :  { %v2046_v59 = vadd.f32 %v2045_v57, %v2044_v52 }
 0x164   :  { %v1620_v61 = vadd.f32 %v2043_v51, %v1571_v55  ;;  %v1574_v62 = vadd.f32 %v2018_v56, %v1525_v27  ;;  %v1649_v8 = vmax.f32 %v1645_v2, 0.0 }
 0x166   :  { %v1635_v0 = vmul.f32 %v1821_v45, %v1620_v61  ;;  %v1623_v1 = vadd.f32 %v2046_v59, %v1574_v62 }
 0x168   :  { %v1646_v3 = vadd.f32 %v1822_v58, %v1635_v0  ;;  %v1636_v4 = vmul.f32 %v1821_v45, %v1623_v1 }
 0x16a   :  { %v1650_v6 = vmax.f32 %v1646_v3, 0.0  ;;  %v1647_v7 = vadd.f32 %v1822_v58, %v1636_v4 }
 0x16c   :  { %v1652_v9 = vmax.f32 %v1648_v5, %v1650_v6  ;;  %v1651_v10 = vmax.f32 %v1647_v7, 0.0 }
 0x16e   :  { %1655 = vst.msk [vmem:[%s2696_s4] sm:$0xff] %vm1654_vm0, %v1652_v9  ;;  %v1653_v11 = vmax.f32 %v1649_v8, %v1651_v10 }
 0x170   :  { %1656 = vst.msk [vmem:[%s2696_s4 + $0x8] sm:$0xff] %vm1654_vm0, %v1653_v11 }

// kernel: transformer_forward.16
= control target key start
LH: loop header
LB: loop body
LE: loop exit
PB: predicated region body
PF: predicated region fallthrough
CT: control target
= control target key end

     0   :  { %vm1487_vm0 = vcmask 523264   ;;  %s2409_s1 = inlined_call_operand.vmem [shape: bf16[2048,64], index: 1, kind: input, shape index: {}]   ;;  %s2410_s0 = inlined_call_operand.vmem [shape: bf16[16,2048], index: 0, kind: input, shape index: {}]   ;;  %s2411_s2 = inlined_call_operand.vmem [shape: f32[1,64], index: 2, kind: input, shape index: {}]   ;;  %s2412_s3 = inlined_call_operand.vmem [shape: f32[1,64], index: 3, kind: input, shape index: {}]   ;;  %s2413_s4 = inlined_call_operand.vmem [shape: f32[8,64], index: 4, kind: output, shape index: {}]  }
   0x1   :  { %v1815_v0 = vld [vmem:[%s2409_s1 + $0x40] sm:$0xff]   ;;  %v1819_v4 = vld [vmem:[%s2409_s1 + $0x48] sm:$0xff]   ;;  %v1823_v8 = vld [vmem:[%s2409_s1 + $0x50] sm:$0xff]  }
   0x2   :  { %v1816_v1 = vld [vmem:[%s2409_s1 + $0xc0] sm:$0xff]   ;;  %1639 = vmatprep.subr.bf16.mxu0 %v1815_v0  ;;  %v1820_v5 = vld [vmem:[%s2409_s1 + $0xc8] sm:$0xff]   ;;  %v1824_v9 = vld [vmem:[%s2409_s1 + $0xd0] sm:$0xff]  }
   0x3   :  { %v1817_v2 = vld [vmem:[%s2409_s1] sm:$0xff]   ;;  %1661 = vmatprep.subr.bf16.mxu1 %v1816_v1  ;;  %v1821_v6 = vld [vmem:[%s2409_s1 + $0x8] sm:$0xff]   ;;  %v1825_v10 = vld [vmem:[%s2409_s1 + $0x10] sm:$0xff]  }
   0x4   :  { %v1818_v3 = vld [vmem:[%s2409_s1 + $0x80] sm:$0xff]   ;;  %1640 = vmatpush3.bf16.msra.mxu0 %v1817_v2  ;;  %v1822_v7 = vld [vmem:[%s2409_s1 + $0x88] sm:$0xff]   ;;  %v1826_v11 = vld [vmem:[%s2409_s1 + $0x90] sm:$0xff]  }
   0x5   :  { %1662 = vmatpush3.bf16.msra.mxu1 %v1818_v3  ;;  %1641 = vmatprep.subr.bf16.mxu0 %v1819_v4  ;;  %v1827_v12 = vld [vmem:[%s2409_s1 + $0x58] sm:$0xff]   ;;  %v1831_v16 = vld [vmem:[%s2409_s1 + $0x60] sm:$0xff]   ;;  %v1835_v20 = vld [vmem:[%s2409_s1 + $0x68] sm:$0xff]  }
   0x6   :  { %1663 = vmatprep.subr.bf16.mxu1 %v1820_v5  ;;  %v1828_v13 = vld [vmem:[%s2409_s1 + $0xd8] sm:$0xff]   ;;  %v1832_v17 = vld [vmem:[%s2409_s1 + $0xe0] sm:$0xff]   ;;  %v1836_v21 = vld [vmem:[%s2409_s1 + $0xe8] sm:$0xff]  }
   0x7   :  { %v1829_v14 = vld [vmem:[%s2409_s1 + $0x18] sm:$0xff]   ;;  %v1833_v18 = vld [vmem:[%s2409_s1 + $0x20] sm:$0xff]   ;;  %v1837_v22 = vld [vmem:[%s2409_s1 + $0x28] sm:$0xff]  }
   0x8   :  { %1642 = vmatpush3.bf16.msra.mxu0 %v1821_v6  ;;  %v1830_v15 = vld [vmem:[%s2409_s1 + $0x98] sm:$0xff]   ;;  %v1834_v19 = vld [vmem:[%s2409_s1 + $0xa0] sm:$0xff]   ;;  %v1838_v23 = vld [vmem:[%s2409_s1 + $0xa8] sm:$0xff]  }
   0x9   :  { %1664 = vmatpush3.bf16.msra.mxu1 %v1822_v7  ;;  %1643 = vmatprep.subr.bf16.mxu0 %v1823_v8  ;;  %v1839_v24 = vld [vmem:[%s2409_s1 + $0x70] sm:$0xff]   ;;  %v1843_v28 = vld [vmem:[%s2409_s1 + $0x78] sm:$0xff]   ;;  %v18_v32 = vld [vmem:[%s2410_s0] sm:$0xff] }
   0xa   :  { %1665 = vmatprep.subr.bf16.mxu1 %v1824_v9  ;;  %v1840_v25 = vld [vmem:[%s2409_s1 + $0xf0] sm:$0xff]   ;;  %v1844_v29 = vld [vmem:[%s2409_s1 + $0xf8] sm:$0xff]   ;;  %v26_v33 = vld [vmem:[%s2410_s0 + $0x40] sm:$0xff] }
   0xb   :  { %v1841_v26 = vld [vmem:[%s2409_s1 + $0x30] sm:$0xff]   ;;  %v1845_v30 = vld [vmem:[%s2409_s1 + $0x38] sm:$0xff]   ;;  %v19_v34 = vld [vmem:[%s2410_s0 + $0x8] sm:$0xff]  ;;  %v1493_v35 = vcombine.low %v18_v32, %v26_v33  ;;  %v1494_v36 = vcombine.high %v18_v32, %v26_v33 }
   0xc   :  { %1644 = vmatpush3.bf16.msra.mxu0 %v1825_v10  ;;  %v1842_v27 = vld [vmem:[%s2409_s1 + $0xb0] sm:$0xff]   ;;  %v1846_v31 = vld [vmem:[%s2409_s1 + $0xb8] sm:$0xff]   ;;  %v27_v37 = vld [vmem:[%s2410_s0 + $0x48] sm:$0xff] }
   0xd   :  { %1666 = vmatpush3.bf16.msra.mxu1 %v1826_v11  ;;  %1645 = vmatprep.subr.bf16.mxu0 %v1827_v12  ;;  %v1495_v38 = vcombine.low %v19_v34, %v27_v37  ;;  %v1496_v39 = vcombine.high %v19_v34, %v27_v37  ;;  %v1847_v40 = vld [vmem:[%s2409_s1 + $0x140] sm:$0xff]   ;;  %v1851_v44 = vld [vmem:[%s2409_s1 + $0x148] sm:$0xff]   ;;  %v1855_v48 = vld [vmem:[%s2409_s1 + $0x150] sm:$0xff]  }
   0xe   :  { %1667 = vmatprep.subr.bf16.mxu1 %v1828_v13  ;;  %1170 = vmatprep.mubr.bf16.mxu0 %v1494_v36  ;;  %v1848_v41 = vld [vmem:[%s2409_s1 + $0x1c0] sm:$0xff]   ;;  %v1852_v45 = vld [vmem:[%s2409_s1 + $0x1c8] sm:$0xff]   ;;  %v1856_v49 = vld [vmem:[%s2409_s1 + $0x1d0] sm:$0xff]  }
   0xf   :  { %1211 = vmatprep.mubr.bf16.mxu1 %v1496_v39  ;;  %v1849_v42 = vld [vmem:[%s2409_s1 + $0x100] sm:$0xff]   ;;  %v1853_v46 = vld [vmem:[%s2409_s1 + $0x108] sm:$0xff]   ;;  %v1857_v50 = vld [vmem:[%s2409_s1 + $0x110] sm:$0xff]  }
  0x10   :  { %1646 = vmatpush3.bf16.msra.mxu0 %v1829_v14  ;;  %v1850_v43 = vld [vmem:[%s2409_s1 + $0x180] sm:$0xff]   ;;  %v1854_v47 = vld [vmem:[%s2409_s1 + $0x188] sm:$0xff]   ;;  %v1858_v51 = vld [vmem:[%s2409_s1 + $0x190] sm:$0xff]  }
  0x11   :  { %1668 = vmatpush3.bf16.msra.mxu1 %v1830_v15  ;;  %1647 = vmatprep.subr.bf16.mxu0 %v1831_v16  ;;  %v1859_v52 = vld [vmem:[%s2409_s1 + $0x158] sm:$0xff]   ;;  %v1863_v56 = vld [vmem:[%s2409_s1 + $0x160] sm:$0xff]   ;;  %v1867_v60 = vld [vmem:[%s2409_s1 + $0x168] sm:$0xff]  }
  0x12   :  { %1669 = vmatprep.subr.bf16.mxu1 %v1832_v17  ;;  %v1860_v53 = vld [vmem:[%s2409_s1 + $0x1d8] sm:$0xff]   ;;  %v1864_v57 = vld [vmem:[%s2409_s1 + $0x1e0] sm:$0xff]   ;;  %v1868_v61 = vld [vmem:[%s2409_s1 + $0x1e8] sm:$0xff]  }
  0x13   :  { %v1861_v54 = vld [vmem:[%s2409_s1 + $0x118] sm:$0xff]   ;;  %v1865_v58 = vld [vmem:[%s2409_s1 + $0x120] sm:$0xff]   ;;  %v1869_v62 = vld [vmem:[%s2409_s1 + $0x128] sm:$0xff]  }
  0x14   :  { %1648 = vmatpush3.bf16.msra.mxu0 %v1833_v18  ;;  %v1862_v55 = vld [vmem:[%s2409_s1 + $0x198] sm:$0xff]   ;;  %v1866_v59 = vld [vmem:[%s2409_s1 + $0x1a0] sm:$0xff]   ;;  %v1870_v63 = vld [vmem:[%s2409_s1 + $0x1a8] sm:$0xff]  }
  0x15   :  { %1670 = vmatpush3.bf16.msra.mxu1 %v1834_v19  ;;  %1649 = vmatprep.subr.bf16.mxu0 %v1835_v20  ;;  %v1871_v0 = vld [vmem:[%s2409_s1 + $0x170] sm:$0xff]   ;;  %v1875_v4 = vld [vmem:[%s2409_s1 + $0x178] sm:$0xff]   ;;  %v1879_v16 = vld [vmem:[%s2409_s1 + $0x240] sm:$0xff]  }
  0x16   :  { %1671 = vmatprep.subr.bf16.mxu1 %v1836_v21  ;;  %v1872_v1 = vld [vmem:[%s2409_s1 + $0x1f0] sm:$0xff]   ;;  %v1876_v5 = vld [vmem:[%s2409_s1 + $0x1f8] sm:$0xff]   ;;  %v1880_v17 = vld [vmem:[%s2409_s1 + $0x2c0] sm:$0xff]  }
  0x17   :  { %v1873_v2 = vld [vmem:[%s2409_s1 + $0x130] sm:$0xff]   ;;  %v1877_v6 = vld [vmem:[%s2409_s1 + $0x138] sm:$0xff]   ;;  %v1881_v18 = vld [vmem:[%s2409_s1 + $0x200] sm:$0xff]  }
  0x18   :  { %1650 = vmatpush3.bf16.msra.mxu0 %v1837_v22  ;;  %v1874_v3 = vld [vmem:[%s2409_s1 + $0x1b0] sm:$0xff]   ;;  %v1878_v7 = vld [vmem:[%s2409_s1 + $0x1b8] sm:$0xff]   ;;  %v1882_v19 = vld [vmem:[%s2409_s1 + $0x280] sm:$0xff]  }
  0x19   :  { %1672 = vmatpush3.bf16.msra.mxu1 %v1838_v23  ;;  %1651 = vmatprep.subr.bf16.mxu0 %v1839_v24  ;;  %v20_v8 = vld [vmem:[%s2410_s0 + $0x10] sm:$0xff]  ;;  %v21_v12 = vld [vmem:[%s2410_s0 + $0x18] sm:$0xff]  ;;  %v1883_v20 = vld [vmem:[%s2409_s1 + $0x248] sm:$0xff]  }
  0x1a   :  { %1673 = vmatprep.subr.bf16.mxu1 %v1840_v25  ;;  %v28_v9 = vld [vmem:[%s2410_s0 + $0x50] sm:$0xff]  ;;  %v29_v13 = vld [vmem:[%s2410_s0 + $0x58] sm:$0xff]  ;;  %v1884_v21 = vld [vmem:[%s2409_s1 + $0x2c8] sm:$0xff]  }
  0x1b   :  { %v1497_v10 = vcombine.low %v20_v8, %v28_v9  ;;  %v1498_v11 = vcombine.high %v20_v8, %v28_v9  ;;  %v1499_v14 = vcombine.low %v21_v12, %v29_v13  ;;  %v1500_v15 = vcombine.high %v21_v12, %v29_v13  ;;  %v1885_v22 = vld [vmem:[%s2409_s1 + $0x208] sm:$0xff]   ;;  %v1887_v24 = vld [vmem:[%s2409_s1 + $0x250] sm:$0xff]   ;;  %v1895_v32 = vld [vmem:[%s2409_s1 + $0x260] sm:$0xff]  }
  0x1c   :  { %1652 = vmatpush3.bf16.msra.mxu0 %v1841_v26  ;;  %v1886_v23 = vld [vmem:[%s2409_s1 + $0x288] sm:$0xff]   ;;  %v1888_v25 = vld [vmem:[%s2409_s1 + $0x2d0] sm:$0xff]   ;;  %v1896_v33 = vld [vmem:[%s2409_s1 + $0x2e0] sm:$0xff]  }
  0x1d   :  { %1674 = vmatpush3.bf16.msra.mxu1 %v1842_v27  ;;  %1653 = vmatprep.subr.bf16.mxu0 %v1843_v28  ;;  %v1889_v26 = vld [vmem:[%s2409_s1 + $0x210] sm:$0xff]   ;;  %v1891_v28 = vld [vmem:[%s2409_s1 + $0x258] sm:$0xff]   ;;  %v1897_v34 = vld [vmem:[%s2409_s1 + $0x220] sm:$0xff]  }
  0x1e   :  { %1675 = vmatprep.subr.bf16.mxu1 %v1844_v29  ;;  %v1890_v27 = vld [vmem:[%s2409_s1 + $0x290] sm:$0xff]   ;;  %v1892_v29 = vld [vmem:[%s2409_s1 + $0x2d8] sm:$0xff]   ;;  %v1899_v36 = vld [vmem:[%s2409_s1 + $0x268] sm:$0xff]  }
  0x1f   :  { %v1900_v37 = vld [vmem:[%s2409_s1 + $0x2e8] sm:$0xff]   ;;  %v1927_v8 = vld [vmem:[%s2409_s1 + $0x360] sm:$0xff]  }
  0x20   :  { %1654 = vmatpush3.bf16.msra.mxu0 %v1845_v30  ;;  %v1893_v30 = vld [vmem:[%s2409_s1 + $0x218] sm:$0xff]   ;;  %v1902_v39 = vld [vmem:[%s2409_s1 + $0x2a8] sm:$0xff]   ;;  %v1928_v9 = vld [vmem:[%s2409_s1 + $0x3e0] sm:$0xff]  }
  0x21   :  { %1676 = vmatpush3.bf16.msra.mxu1 %v1846_v31  ;;  %1683 = vmatprep.subr.bf16.mxu0 %v1847_v40  ;;  %v1894_v31 = vld [vmem:[%s2409_s1 + $0x298] sm:$0xff]   ;;  %v1903_v40 = vld [vmem:[%s2409_s1 + $0x270] sm:$0xff]   ;;  %v1931_v12 = vld [vmem:[%s2409_s1 + $0x368] sm:$0xff]  }
  0x22   :  { %1705 = vmatprep.subr.bf16.mxu1 %v1848_v41  ;;  %v1904_v41 = vld [vmem:[%s2409_s1 + $0x2f0] sm:$0xff]   ;;  %v1932_v13 = vld [vmem:[%s2409_s1 + $0x3e8] sm:$0xff]  }
  0x23   :  { %1171 = vmatmul.mubr.bf16.vlgmr.msra.gmra.mrb[0].mxu0 %v1493_v35  ;;  %v1898_v35 = vld [vmem:[%s2409_s1 + $0x2a0] sm:$0xff]  }
  0x24   :  { %1212 = vmatmul.mubr.bf16.vlgmr.msra.gmra.mrb[0].mxu1 %v1495_v38  ;;  %1684 = vmatpush3.bf16.msra.mxu0 %v1849_v42  ;;  %v1901_v38 = vld [vmem:[%s2409_s1 + $0x228] sm:$0xff]   ;;  %v1905_v42 = vld [vmem:[%s2409_s1 + $0x230] sm:$0xff]  }
  0x25   :  { %1706 = vmatpush3.bf16.msra.mxu1 %v1850_v43  ;;  %1685 = vmatprep.subr.bf16.mxu0 %v1851_v44  ;;  %v1906_v43 = vld [vmem:[%s2409_s1 + $0x2b0] sm:$0xff]   ;;  %v1907_v44 = vld [vmem:[%s2409_s1 + $0x278] sm:$0xff]  }
  0x26   :  { %1707 = vmatprep.subr.bf16.mxu1 %v1852_v45  ;;  %1252 = vmatprep.mubr.bf16.mxu0 %v1498_v11  ;;  %v1908_v45 = vld [vmem:[%s2409_s1 + $0x2f8] sm:$0xff]   ;;  %v1930_v11 = vld [vmem:[%s2409_s1 + $0x3a0] sm:$0xff]  }
  0x27   :  { %1293 = vmatprep.mubr.bf16.mxu1 %v1500_v15  ;;  %v1934_v15 = vld [vmem:[%s2409_s1 + $0x3a8] sm:$0xff]  }
  0x28   :  { %1686 = vmatpush3.bf16.msra.mxu0 %v1853_v46  ;;  %v1909_v46 = vld [vmem:[%s2409_s1 + $0x238] sm:$0xff]  }
  0x29   :  { %1708 = vmatpush3.bf16.msra.mxu1 %v1854_v47  ;;  %1687 = vmatprep.subr.bf16.mxu0 %v1855_v48  ;;  %v1910_v47 = vld [vmem:[%s2409_s1 + $0x2b8] sm:$0xff]   ;;  %v22_v48 = vld [vmem:[%s2410_s0 + $0x20] sm:$0xff] }
  0x2a   :  { %1709 = vmatprep.subr.bf16.mxu1 %v1856_v49  ;;  %v30_v49 = vld [vmem:[%s2410_s0 + $0x60] sm:$0xff] }
  0x2c   :  { %1688 = vmatpush3.bf16.msra.mxu0 %v1857_v50  ;;  %v23_v50 = vld [vmem:[%s2410_s0 + $0x28] sm:$0xff] }
  0x2d   :  { %1710 = vmatpush3.bf16.msra.mxu1 %v1858_v51  ;;  %1689 = vmatprep.subr.bf16.mxu0 %v1859_v52  ;;  %v31_v51 = vld [vmem:[%s2410_s0 + $0x68] sm:$0xff]  ;;  %v1501_v52 = vcombine.low %v22_v48, %v30_v49 }
  0x2e   :  { %1711 = vmatprep.subr.bf16.mxu1 %v1860_v53  ;;  %v1502_v53 = vcombine.high %v22_v48, %v30_v49 }
  0x30   :  { %1690 = vmatpush3.bf16.msra.mxu0 %v1861_v54  ;;  %v1503_v54 = vcombine.low %v23_v50, %v31_v51 }
  0x31   :  { %1712 = vmatpush3.bf16.msra.mxu1 %v1862_v55  ;;  %1691 = vmatprep.subr.bf16.mxu0 %v1863_v56  ;;  %v1504_v55 = vcombine.high %v23_v50, %v31_v51  ;;  %v1911_v56 = vld [vmem:[%s2409_s1 + $0x340] sm:$0xff]  }
  0x32   :  { %1713 = vmatprep.subr.bf16.mxu1 %v1864_v57  ;;  %v1912_v57 = vld [vmem:[%s2409_s1 + $0x3c0] sm:$0xff]  }
  0x34   :  { %1692 = vmatpush3.bf16.msra.mxu0 %v1865_v58  ;;  %v1913_v58 = vld [vmem:[%s2409_s1 + $0x300] sm:$0xff]  }
  0x35   :  { %1714 = vmatpush3.bf16.msra.mxu1 %v1866_v59  ;;  %1693 = vmatprep.subr.bf16.mxu0 %v1867_v60  ;;  %v1914_v59 = vld [vmem:[%s2409_s1 + $0x380] sm:$0xff]   ;;  %v1915_v60 = vld [vmem:[%s2409_s1 + $0x348] sm:$0xff]  }
  0x36   :  { %1715 = vmatprep.subr.bf16.mxu1 %v1868_v61  ;;  %v1916_v61 = vld [vmem:[%s2409_s1 + $0x3c8] sm:$0xff]  }
  0x38   :  { %1694 = vmatpush3.bf16.msra.mxu0 %v1869_v62  ;;  %v1917_v62 = vld [vmem:[%s2409_s1 + $0x308] sm:$0xff]  }
  0x39   :  { %1716 = vmatpush3.bf16.msra.mxu1 %v1870_v63  ;;  %1695 = vmatprep.subr.bf16.mxu0 %v1871_v0  ;;  %v1918_v63 = vld [vmem:[%s2409_s1 + $0x388] sm:$0xff]   ;;  %v1919_v0 = vld [vmem:[%s2409_s1 + $0x350] sm:$0xff]  }
  0x3a   :  { %1717 = vmatprep.subr.bf16.mxu1 %v1872_v1  ;;  %v1920_v1 = vld [vmem:[%s2409_s1 + $0x3d0] sm:$0xff]  }
  0x3c   :  { %1696 = vmatpush3.bf16.msra.mxu0 %v1873_v2  ;;  %v1921_v2 = vld [vmem:[%s2409_s1 + $0x310] sm:$0xff]  }
  0x3d   :  { %1718 = vmatpush3.bf16.msra.mxu1 %v1874_v3  ;;  %1697 = vmatprep.subr.bf16.mxu0 %v1875_v4  ;;  %v1922_v3 = vld [vmem:[%s2409_s1 + $0x390] sm:$0xff]   ;;  %v1923_v4 = vld [vmem:[%s2409_s1 + $0x358] sm:$0xff]  }
  0x3e   :  { %1719 = vmatprep.subr.bf16.mxu1 %v1876_v5  ;;  %v1924_v5 = vld [vmem:[%s2409_s1 + $0x3d8] sm:$0xff]  }
  0x40   :  { %1698 = vmatpush3.bf16.msra.mxu0 %v1877_v6  ;;  %v1925_v6 = vld [vmem:[%s2409_s1 + $0x318] sm:$0xff]  }
  0x41   :  { %1720 = vmatpush3.bf16.msra.mxu1 %v1878_v7  ;;  %1727 = vmatprep.subr.bf16.mxu0 %v1879_v16  ;;  %v1926_v7 = vld [vmem:[%s2409_s1 + $0x398] sm:$0xff]   ;;  %v1935_v16 = vld [vmem:[%s2409_s1 + $0x370] sm:$0xff]  }
  0x42   :  { %1749 = vmatprep.subr.bf16.mxu1 %v1880_v17  ;;  %v1936_v17 = vld [vmem:[%s2409_s1 + $0x3f0] sm:$0xff]  }
  0x43   :  { %1253 = vmatmul.mubr.bf16.vlgmr.msra.gmra.mrb[4].mxu0 %v1497_v10  ;;  %v1929_v10 = vld [vmem:[%s2409_s1 + $0x320] sm:$0xff]  }
  0x44   :  { %1294 = vmatmul.mubr.bf16.vlgmr.msra.gmra.mrb[4].mxu1 %v1499_v14  ;;  %1728 = vmatpush3.bf16.msra.mxu0 %v1881_v18  ;;  %v1933_v14 = vld [vmem:[%s2409_s1 + $0x328] sm:$0xff]   ;;  %v1937_v18 = vld [vmem:[%s2409_s1 + $0x330] sm:$0xff]  }
  0x45   :  { %1750 = vmatpush3.bf16.msra.mxu1 %v1882_v19  ;;  %1729 = vmatprep.subr.bf16.mxu0 %v1883_v20  ;;  %v1938_v19 = vld [vmem:[%s2409_s1 + $0x3b0] sm:$0xff]   ;;  %v1939_v20 = vld [vmem:[%s2409_s1 + $0x378] sm:$0xff]  }
  0x46   :  { %1751 = vmatprep.subr.bf16.mxu1 %v1884_v21  ;;  %1334 = vmatprep.mubr.bf16.mxu0 %v1502_v53  ;;  %v1940_v21 = vld [vmem:[%s2409_s1 + $0x3f8] sm:$0xff]  }
  0x47   :  { %1375 = vmatprep.mubr.bf16.mxu1 %v1504_v55 }
  0x48   :  { %1730 = vmatpush3.bf16.msra.mxu0 %v1885_v22  ;;  %v1941_v22 = vld [vmem:[%s2409_s1 + $0x338] sm:$0xff]  }
  0x49   :  { %1752 = vmatpush3.bf16.msra.mxu1 %v1886_v23  ;;  %1731 = vmatprep.subr.bf16.mxu0 %v1887_v24  ;;  %v1942_v23 = vld [vmem:[%s2409_s1 + $0x3b8] sm:$0xff]   ;;  %v24_v24 = vld [vmem:[%s2410_s0 + $0x30] sm:$0xff] }
  0x4a   :  { %1753 = vmatprep.subr.bf16.mxu1 %v1888_v25  ;;  %v32_v25 = vld [vmem:[%s2410_s0 + $0x70] sm:$0xff] }
  0x4c   :  { %1732 = vmatpush3.bf16.msra.mxu0 %v1889_v26  ;;  %v25_v26 = vld [vmem:[%s2410_s0 + $0x38] sm:$0xff] }
  0x4d   :  { %1754 = vmatpush3.bf16.msra.mxu1 %v1890_v27  ;;  %1733 = vmatprep.subr.bf16.mxu0 %v1891_v28  ;;  %v1505_v27 = vcombine.low %v24_v24, %v32_v25  ;;  %v1506_v28 = vcombine.high %v24_v24, %v32_v25 }
  0x4e   :  { %1755 = vmatprep.subr.bf16.mxu1 %v1892_v29  ;;  %v33_v29 = vld [vmem:[%s2410_s0 + $0x78] sm:$0xff] }
  0x50   :  { %1734 = vmatpush3.bf16.msra.mxu0 %v1893_v30  ;;  %v1507_v30 = vcombine.low %v25_v26, %v33_v29 }
  0x51   :  { %1756 = vmatpush3.bf16.msra.mxu1 %v1894_v31  ;;  %1735 = vmatprep.subr.bf16.mxu0 %v1895_v32  ;;  %v1508_v31 = vcombine.high %v25_v26, %v33_v29  ;;  %v1637_v26 = vld [vmem:[%s2411_s2] ss:$0 sm:$0xff] }
  0x52   :  { %1757 = vmatprep.subr.bf16.mxu1 %v1896_v33 }
  0x54   :  { %1736 = vmatpush3.bf16.msra.mxu0 %v1897_v34 }
  0x55   :  { %1758 = vmatpush3.bf16.msra.mxu1 %v1898_v35  ;;  %1737 = vmatprep.subr.bf16.mxu0 %v1899_v36 }
  0x56   :  { %1759 = vmatprep.subr.bf16.mxu1 %v1900_v37 }
  0x58   :  { %1738 = vmatpush3.bf16.msra.mxu0 %v1901_v38 }
  0x59   :  { %1760 = vmatpush3.bf16.msra.mxu1 %v1902_v39  ;;  %1739 = vmatprep.subr.bf16.mxu0 %v1903_v40 }
  0x5a   :  { %1761 = vmatprep.subr.bf16.mxu1 %v1904_v41 }
  0x5c   :  { %1740 = vmatpush3.bf16.msra.mxu0 %v1905_v42 }
  0x5d   :  { %1762 = vmatpush3.bf16.msra.mxu1 %v1906_v43  ;;  %1741 = vmatprep.subr.bf16.mxu0 %v1907_v44 }
  0x5e   :  { %1763 = vmatprep.subr.bf16.mxu1 %v1908_v45 }
  0x60   :  { %1742 = vmatpush3.bf16.msra.mxu0 %v1909_v46 }
  0x61   :  { %1764 = vmatpush3.bf16.msra.mxu1 %v1910_v47  ;;  %1771 = vmatprep.subr.bf16.mxu0 %v1911_v56 }
  0x62   :  { %1793 = vmatprep.subr.bf16.mxu1 %v1912_v57 }
  0x63   :  { %1335 = vmatmul.mubr.bf16.vlgmr.msra.gmra.mrb[8].mxu0 %v1501_v52 }
  0x64   :  { %1376 = vmatmul.mubr.bf16.vlgmr.msra.gmra.mrb[8].mxu1 %v1503_v54  ;;  %1772 = vmatpush3.bf16.msra.mxu0 %v1913_v58 }
  0x65   :  { %1794 = vmatpush3.bf16.msra.mxu1 %v1914_v59  ;;  %1773 = vmatprep.subr.bf16.mxu0 %v1915_v60 }
  0x66   :  { %1795 = vmatprep.subr.bf16.mxu1 %v1916_v61  ;;  %1416 = vmatprep.mubr.bf16.mxu0 %v1506_v28 }
  0x67   :  { %1457 = vmatprep.mubr.bf16.mxu1 %v1508_v31 }
  0x68   :  { %1774 = vmatpush3.bf16.msra.mxu0 %v1917_v62 }
  0x69   :  { %1796 = vmatpush3.bf16.msra.mxu1 %v1918_v63  ;;  %1775 = vmatprep.subr.bf16.mxu0 %v1919_v0 }
  0x6a   :  { %1797 = vmatprep.subr.bf16.mxu1 %v1920_v1 }
  0x6c   :  { %1776 = vmatpush3.bf16.msra.mxu0 %v1921_v2 }
  0x6d   :  { %1798 = vmatpush3.bf16.msra.mxu1 %v1922_v3  ;;  %1777 = vmatprep.subr.bf16.mxu0 %v1923_v4 }
  0x6e   :  { %1799 = vmatprep.subr.bf16.mxu1 %v1924_v5 }
  0x70   :  { %1778 = vmatpush3.bf16.msra.mxu0 %v1925_v6 }
  0x71   :  { %1800 = vmatpush3.bf16.msra.mxu1 %v1926_v7  ;;  %1779 = vmatprep.subr.bf16.mxu0 %v1927_v8 }
  0x72   :  { %1801 = vmatprep.subr.bf16.mxu1 %v1928_v9 }
  0x74   :  { %1780 = vmatpush3.bf16.msra.mxu0 %v1929_v10 }
  0x75   :  { %1802 = vmatpush3.bf16.msra.mxu1 %v1930_v11  ;;  %1781 = vmatprep.subr.bf16.mxu0 %v1931_v12 }
  0x76   :  { %1803 = vmatprep.subr.bf16.mxu1 %v1932_v13 }
  0x78   :  { %1782 = vmatpush3.bf16.msra.mxu0 %v1933_v14 }
  0x79   :  { %1804 = vmatpush3.bf16.msra.mxu1 %v1934_v15  ;;  %1783 = vmatprep.subr.bf16.mxu0 %v1935_v16 }
  0x7a   :  { %1805 = vmatprep.subr.bf16.mxu1 %v1936_v17 }
  0x7c   :  { %1784 = vmatpush3.bf16.msra.mxu0 %v1937_v18 }
  0x7d   :  { %1806 = vmatpush3.bf16.msra.mxu1 %v1938_v19  ;;  %1785 = vmatprep.subr.bf16.mxu0 %v1939_v20 }
  0x7e   :  { %1807 = vmatprep.subr.bf16.mxu1 %v1940_v21 }
  0x80   :  { %1786 = vmatpush3.bf16.msra.mxu0 %v1941_v22 }
  0x81   :  { %1808 = vmatpush3.bf16.msra.mxu1 %v1942_v23 }
  0x83   :  { %1417 = vmatmul.mubr.bf16.vlgmr.msra.gmra.mrb[12].mxu0 %v1505_v27 }
  0x84   :  { %1458 = vmatmul.mubr.bf16.vlgmr.msra.gmra.mrb[12].mxu1 %v1507_v30  ;;  %v1638_v30 = vld [vmem:[%s2412_s3] ss:$0 sm:$0xff] }
  0xf6   :  { %v1655_v32 = vpop.f32.mrb[0].mxu0 }
  0xf7   :  { %v1677_v33 = vpop.f32.mrb[0].mxu1  ;;  %v1656_v34 = vpop.f32.mrb[1].mxu0 }
  0xf8   :  { %v1657_v35 = vadd.f32 %v1656_v34, %v1655_v32  ;;  %v1678_v36 = vpop.f32.mrb[1].mxu1  ;;  %v1658_v37 = vpop.f32.mrb[2].mxu0 }
  0xf9   :  { %v1679_v38 = vadd.f32 %v1678_v36, %v1677_v33  ;;  %v1680_v39 = vpop.f32.mrb[2].mxu1  ;;  %v1659_v40 = vpop.f32.mrb[3].mxu0 }
  0xfa   :  { %v1660_v41 = vadd.f32 %v1659_v40, %v1658_v37  ;;  %v1681_v42 = vpop.f32.mrb[3].mxu1 }
  0xfb   :  { %v1214_v43 = vadd.f32 %v1679_v38, %v1657_v35  ;;  %v1682_v44 = vadd.f32 %v1681_v42, %v1680_v39 }
  0xfd   :  { %v1217_v45 = vadd.f32 %v1682_v44, %v1660_v41 }
 0x116   :  { %v1699_v46 = vpop.f32.mrb[4].mxu0 }
 0x117   :  { %v1721_v47 = vpop.f32.mrb[4].mxu1  ;;  %v1700_v48 = vpop.f32.mrb[5].mxu0 }
 0x118   :  { %v1701_v49 = vadd.f32 %v1700_v48, %v1699_v46  ;;  %v1722_v50 = vpop.f32.mrb[5].mxu1  ;;  %v1702_v51 = vpop.f32.mrb[6].mxu0 }
 0x119   :  { %v1723_v52 = vadd.f32 %v1722_v50, %v1721_v47  ;;  %v1724_v53 = vpop.f32.mrb[6].mxu1  ;;  %v1703_v54 = vpop.f32.mrb[7].mxu0 }
 0x11a   :  { %v1255_v55 = vadd.f32 %v1701_v49, %v1214_v43  ;;  %v1704_v56 = vadd.f32 %v1703_v54, %v1702_v51  ;;  %v1725_v57 = vpop.f32.mrb[7].mxu1 }
 0x11b   :  { %v1726_v58 = vadd.f32 %v1725_v57, %v1724_v53 }
 0x11c   :  { %v1296_v59 = vadd.f32 %v1723_v52, %v1255_v55  ;;  %v1258_v60 = vadd.f32 %v1704_v56, %v1217_v45 }
 0x11e   :  { %v1299_v61 = vadd.f32 %v1726_v58, %v1258_v60 }
 0x136   :  { %v1743_v62 = vpop.f32.mrb[8].mxu0 }
 0x137   :  { %v1765_v63 = vpop.f32.mrb[8].mxu1  ;;  %v1744_v0 = vpop.f32.mrb[9].mxu0 }
 0x138   :  { %v1766_v1 = vpop.f32.mrb[9].mxu1  ;;  %v1745_v2 = vadd.f32 %v1744_v0, %v1743_v62  ;;  %v1746_v4 = vpop.f32.mrb[10].mxu0 }
 0x139   :  { %v1767_v3 = vadd.f32 %v1766_v1, %v1765_v63  ;;  %v1768_v5 = vpop.f32.mrb[10].mxu1  ;;  %v1747_v6 = vpop.f32.mrb[11].mxu0 }
 0x13a   :  { %v1769_v7 = vpop.f32.mrb[11].mxu1  ;;  %v1337_v8 = vadd.f32 %v1745_v2, %v1296_v59  ;;  %v1748_v9 = vadd.f32 %v1747_v6, %v1746_v4 }
 0x13b   :  { %v1770_v10 = vadd.f32 %v1769_v7, %v1768_v5 }
 0x13c   :  { %v1378_v11 = vadd.f32 %v1767_v3, %v1337_v8  ;;  %v1340_v12 = vadd.f32 %v1748_v9, %v1299_v61 }
 0x13e   :  { %v1381_v13 = vadd.f32 %v1770_v10, %v1340_v12 }
 0x156   :  { %v1787_v14 = vpop.f32.mrb[12].mxu0 }
 0x157   :  { %v1809_v15 = vpop.f32.mrb[12].mxu1  ;;  %v1788_v16 = vpop.f32.mrb[13].mxu0 }
 0x158   :  { %v1789_v17 = vadd.f32 %v1788_v16, %v1787_v14  ;;  %v1810_v18 = vpop.f32.mrb[13].mxu1  ;;  %v1790_v19 = vpop.f32.mrb[14].mxu0 }
 0x159   :  { %v1811_v20 = vadd.f32 %v1810_v18, %v1809_v15  ;;  %v1812_v21 = vpop.f32.mrb[14].mxu1  ;;  %v1791_v22 = vpop.f32.mrb[15].mxu0 }
 0x15a   :  { %v1419_v23 = vadd.f32 %v1789_v17, %v1378_v11  ;;  %v1792_v24 = vadd.f32 %v1791_v22, %v1790_v19  ;;  %v1813_v25 = vpop.f32.mrb[15].mxu1 }
 0x15b   :  { %v1814_v27 = vadd.f32 %v1813_v25, %v1812_v21 }
 0x15c   :  { %v1460_v28 = vadd.f32 %v1811_v20, %v1419_v23  ;;  %v1422_v29 = vadd.f32 %v1792_v24, %v1381_v13 }
 0x15e   :  { %v1473_v31 = vmul.f32 %v1637_v26, %v1460_v28  ;;  %v1463_v32 = vadd.f32 %v1814_v27, %v1422_v29 }
 0x160   :  { %v1482_v33 = vadd.f32 %v1638_v30, %v1473_v31  ;;  %v1474_v34 = vmul.f32 %v1637_v26, %v1463_v32 }
 0x162   :  { %v1483_v35 = vadd.f32 %v1638_v30, %v1474_v34  ;;  %v1484_v36 = vmax.f32 %v1482_v33, 0.0 }
 0x164   :  { %v1485_v37 = vmax.f32 %v1483_v35, 0.0 }
 0x166   :  { %v1486_v38 = vmax.f32 %v1484_v36, %v1485_v37 }
 0x168   :  { %1488 = vst.msk [vmem:[%s2413_s4] sm:$0xff] %vm1487_vm0, %v1486_v38 }

// kernel: transformer_forward.18
= control target key start
LH: loop header
LB: loop body
LE: loop exit
PB: predicated region body
PF: predicated region fallthrough
CT: control target
= control target key end

     0   :  { %vm1486_vm0 = vcmask 523264   ;;  %vm1488_vm1 = vcmask 519168   ;;  %s2413_s1 = inlined_call_operand.vmem [shape: bf16[2048,64], index: 1, kind: input, shape index: {}]   ;;  %s2414_s0 = inlined_call_operand.vmem [shape: bf16[12,2048], index: 0, kind: input, shape index: {}]   ;;  %s2415_s2 = inlined_call_operand.vmem [shape: f32[1,64], index: 2, kind: input, shape index: {}]   ;;  %s2416_s3 = inlined_call_operand.vmem [shape: f32[1,64], index: 3, kind: input, shape index: {}]   ;;  %s2417_s4 = inlined_call_operand.vmem [shape: f32[12,64], index: 4, kind: output, shape index: {}]  }
   0x1   :  { %v1816_v0 = vld [vmem:[%s2413_s1 + $0x40] sm:$0xff]   ;;  %v1820_v4 = vld [vmem:[%s2413_s1 + $0x48] sm:$0xff]   ;;  %v1824_v8 = vld [vmem:[%s2413_s1 + $0x50] sm:$0xff]  }
   0x2   :  { %v1817_v1 = vld [vmem:[%s2413_s1 + $0xc0] sm:$0xff]   ;;  %1640 = vmatprep.subr.bf16.mxu0 %v1816_v0  ;;  %v1821_v5 = vld [vmem:[%s2413_s1 + $0xc8] sm:$0xff]   ;;  %v1825_v9 = vld [vmem:[%s2413_s1 + $0xd0] sm:$0xff]  }
   0x3   :  { %v1818_v2 = vld [vmem:[%s2413_s1] sm:$0xff]   ;;  %1662 = vmatprep.subr.bf16.mxu1 %v1817_v1  ;;  %v1822_v6 = vld [vmem:[%s2413_s1 + $0x8] sm:$0xff]   ;;  %v1826_v10 = vld [vmem:[%s2413_s1 + $0x10] sm:$0xff]  }
   0x4   :  { %v1819_v3 = vld [vmem:[%s2413_s1 + $0x80] sm:$0xff]   ;;  %1641 = vmatpush3.bf16.msra.mxu0 %v1818_v2  ;;  %v1823_v7 = vld [vmem:[%s2413_s1 + $0x88] sm:$0xff]   ;;  %v1827_v11 = vld [vmem:[%s2413_s1 + $0x90] sm:$0xff]  }
   0x5   :  { %1663 = vmatpush3.bf16.msra.mxu1 %v1819_v3  ;;  %1642 = vmatprep.subr.bf16.mxu0 %v1820_v4  ;;  %v1828_v12 = vld [vmem:[%s2413_s1 + $0x58] sm:$0xff]   ;;  %v1832_v16 = vld [vmem:[%s2413_s1 + $0x60] sm:$0xff]   ;;  %v1836_v20 = vld [vmem:[%s2413_s1 + $0x68] sm:$0xff]  }
   0x6   :  { %1664 = vmatprep.subr.bf16.mxu1 %v1821_v5  ;;  %v1829_v13 = vld [vmem:[%s2413_s1 + $0xd8] sm:$0xff]   ;;  %v1833_v17 = vld [vmem:[%s2413_s1 + $0xe0] sm:$0xff]   ;;  %v1837_v21 = vld [vmem:[%s2413_s1 + $0xe8] sm:$0xff]  }
   0x7   :  { %v1830_v14 = vld [vmem:[%s2413_s1 + $0x18] sm:$0xff]   ;;  %v1834_v18 = vld [vmem:[%s2413_s1 + $0x20] sm:$0xff]   ;;  %v1838_v22 = vld [vmem:[%s2413_s1 + $0x28] sm:$0xff]  }
   0x8   :  { %1643 = vmatpush3.bf16.msra.mxu0 %v1822_v6  ;;  %v1831_v15 = vld [vmem:[%s2413_s1 + $0x98] sm:$0xff]   ;;  %v1835_v19 = vld [vmem:[%s2413_s1 + $0xa0] sm:$0xff]   ;;  %v1839_v23 = vld [vmem:[%s2413_s1 + $0xa8] sm:$0xff]  }
   0x9   :  { %1665 = vmatpush3.bf16.msra.mxu1 %v1823_v7  ;;  %1644 = vmatprep.subr.bf16.mxu0 %v1824_v8  ;;  %v1840_v24 = vld [vmem:[%s2413_s1 + $0x70] sm:$0xff]   ;;  %v1844_v28 = vld [vmem:[%s2413_s1 + $0x78] sm:$0xff]   ;;  %v18_v32 = vld [vmem:[%s2414_s0] sm:$0xff] }
   0xa   :  { %1666 = vmatprep.subr.bf16.mxu1 %v1825_v9  ;;  %v1841_v25 = vld [vmem:[%s2413_s1 + $0xf0] sm:$0xff]   ;;  %v1845_v29 = vld [vmem:[%s2413_s1 + $0xf8] sm:$0xff]   ;;  %v26_v33 = vld [vmem:[%s2414_s0 + $0x40] sm:$0x33] }
   0xb   :  { %v1842_v26 = vld [vmem:[%s2413_s1 + $0x30] sm:$0xff]   ;;  %v1846_v30 = vld [vmem:[%s2413_s1 + $0x38] sm:$0xff]   ;;  %v19_v34 = vld [vmem:[%s2414_s0 + $0x8] sm:$0xff]  ;;  %v1494_v35 = vcombine.low %v18_v32, %v26_v33  ;;  %v1495_v36 = vcombine.high %v18_v32, %v26_v33 }
   0xc   :  { %1645 = vmatpush3.bf16.msra.mxu0 %v1826_v10  ;;  %v1843_v27 = vld [vmem:[%s2413_s1 + $0xb0] sm:$0xff]   ;;  %v1847_v31 = vld [vmem:[%s2413_s1 + $0xb8] sm:$0xff]   ;;  %v27_v37 = vld [vmem:[%s2414_s0 + $0x48] sm:$0x33] }
   0xd   :  { %1667 = vmatpush3.bf16.msra.mxu1 %v1827_v11  ;;  %1646 = vmatprep.subr.bf16.mxu0 %v1828_v12  ;;  %v1496_v38 = vcombine.low %v19_v34, %v27_v37  ;;  %v1497_v39 = vcombine.high %v19_v34, %v27_v37  ;;  %v1848_v40 = vld [vmem:[%s2413_s1 + $0x140] sm:$0xff]   ;;  %v1852_v44 = vld [vmem:[%s2413_s1 + $0x148] sm:$0xff]   ;;  %v1856_v48 = vld [vmem:[%s2413_s1 + $0x150] sm:$0xff]  }
   0xe   :  { %1668 = vmatprep.subr.bf16.mxu1 %v1829_v13  ;;  %1170 = vmatprep.mubr.bf16.mxu0 %v1495_v36  ;;  %v1849_v41 = vld [vmem:[%s2413_s1 + $0x1c0] sm:$0xff]   ;;  %v1853_v45 = vld [vmem:[%s2413_s1 + $0x1c8] sm:$0xff]   ;;  %v1857_v49 = vld [vmem:[%s2413_s1 + $0x1d0] sm:$0xff]  }
   0xf   :  { %1211 = vmatprep.mubr.bf16.mxu1 %v1497_v39  ;;  %v1850_v42 = vld [vmem:[%s2413_s1 + $0x100] sm:$0xff]   ;;  %v1854_v46 = vld [vmem:[%s2413_s1 + $0x108] sm:$0xff]   ;;  %v1858_v50 = vld [vmem:[%s2413_s1 + $0x110] sm:$0xff]  }
  0x10   :  { %1647 = vmatpush3.bf16.msra.mxu0 %v1830_v14  ;;  %v1851_v43 = vld [vmem:[%s2413_s1 + $0x180] sm:$0xff]   ;;  %v1855_v47 = vld [vmem:[%s2413_s1 + $0x188] sm:$0xff]   ;;  %v1859_v51 = vld [vmem:[%s2413_s1 + $0x190] sm:$0xff]  }
  0x11   :  { %1669 = vmatpush3.bf16.msra.mxu1 %v1831_v15  ;;  %1648 = vmatprep.subr.bf16.mxu0 %v1832_v16  ;;  %v1860_v52 = vld [vmem:[%s2413_s1 + $0x158] sm:$0xff]   ;;  %v1864_v56 = vld [vmem:[%s2413_s1 + $0x160] sm:$0xff]   ;;  %v1868_v60 = vld [vmem:[%s2413_s1 + $0x168] sm:$0xff]  }
  0x12   :  { %1670 = vmatprep.subr.bf16.mxu1 %v1833_v17  ;;  %v1861_v53 = vld [vmem:[%s2413_s1 + $0x1d8] sm:$0xff]   ;;  %v1865_v57 = vld [vmem:[%s2413_s1 + $0x1e0] sm:$0xff]   ;;  %v1869_v61 = vld [vmem:[%s2413_s1 + $0x1e8] sm:$0xff]  }
  0x13   :  { %v1862_v54 = vld [vmem:[%s2413_s1 + $0x118] sm:$0xff]   ;;  %v1866_v58 = vld [vmem:[%s2413_s1 + $0x120] sm:$0xff]   ;;  %v1870_v62 = vld [vmem:[%s2413_s1 + $0x128] sm:$0xff]  }
  0x14   :  { %1649 = vmatpush3.bf16.msra.mxu0 %v1834_v18  ;;  %v1863_v55 = vld [vmem:[%s2413_s1 + $0x198] sm:$0xff]   ;;  %v1867_v59 = vld [vmem:[%s2413_s1 + $0x1a0] sm:$0xff]   ;;  %v1871_v63 = vld [vmem:[%s2413_s1 + $0x1a8] sm:$0xff]  }
  0x15   :  { %1671 = vmatpush3.bf16.msra.mxu1 %v1835_v19  ;;  %1650 = vmatprep.subr.bf16.mxu0 %v1836_v20  ;;  %v1872_v0 = vld [vmem:[%s2413_s1 + $0x170] sm:$0xff]   ;;  %v1876_v4 = vld [vmem:[%s2413_s1 + $0x178] sm:$0xff]   ;;  %v1880_v16 = vld [vmem:[%s2413_s1 + $0x240] sm:$0xff]  }
  0x16   :  { %1672 = vmatprep.subr.bf16.mxu1 %v1837_v21  ;;  %v1873_v1 = vld [vmem:[%s2413_s1 + $0x1f0] sm:$0xff]   ;;  %v1877_v5 = vld [vmem:[%s2413_s1 + $0x1f8] sm:$0xff]   ;;  %v1881_v17 = vld [vmem:[%s2413_s1 + $0x2c0] sm:$0xff]  }
  0x17   :  { %v1874_v2 = vld [vmem:[%s2413_s1 + $0x130] sm:$0xff]   ;;  %v1878_v6 = vld [vmem:[%s2413_s1 + $0x138] sm:$0xff]   ;;  %v1882_v18 = vld [vmem:[%s2413_s1 + $0x200] sm:$0xff]  }
  0x18   :  { %1651 = vmatpush3.bf16.msra.mxu0 %v1838_v22  ;;  %v1875_v3 = vld [vmem:[%s2413_s1 + $0x1b0] sm:$0xff]   ;;  %v1879_v7 = vld [vmem:[%s2413_s1 + $0x1b8] sm:$0xff]   ;;  %v1883_v19 = vld [vmem:[%s2413_s1 + $0x280] sm:$0xff]  }
  0x19   :  { %1673 = vmatpush3.bf16.msra.mxu1 %v1839_v23  ;;  %1652 = vmatprep.subr.bf16.mxu0 %v1840_v24  ;;  %v20_v8 = vld [vmem:[%s2414_s0 + $0x10] sm:$0xff]  ;;  %v21_v12 = vld [vmem:[%s2414_s0 + $0x18] sm:$0xff]  ;;  %v1884_v20 = vld [vmem:[%s2413_s1 + $0x248] sm:$0xff]  }
  0x1a   :  { %1674 = vmatprep.subr.bf16.mxu1 %v1841_v25  ;;  %v28_v9 = vld [vmem:[%s2414_s0 + $0x50] sm:$0x33]  ;;  %v29_v13 = vld [vmem:[%s2414_s0 + $0x58] sm:$0x33]  ;;  %v1885_v21 = vld [vmem:[%s2413_s1 + $0x2c8] sm:$0xff]  }
  0x1b   :  { %v1498_v10 = vcombine.low %v20_v8, %v28_v9  ;;  %v1499_v11 = vcombine.high %v20_v8, %v28_v9  ;;  %v1500_v14 = vcombine.low %v21_v12, %v29_v13  ;;  %v1501_v15 = vcombine.high %v21_v12, %v29_v13  ;;  %v1886_v22 = vld [vmem:[%s2413_s1 + $0x208] sm:$0xff]   ;;  %v1888_v24 = vld [vmem:[%s2413_s1 + $0x250] sm:$0xff]   ;;  %v1896_v32 = vld [vmem:[%s2413_s1 + $0x260] sm:$0xff]  }
  0x1c   :  { %1653 = vmatpush3.bf16.msra.mxu0 %v1842_v26  ;;  %v1887_v23 = vld [vmem:[%s2413_s1 + $0x288] sm:$0xff]   ;;  %v1889_v25 = vld [vmem:[%s2413_s1 + $0x2d0] sm:$0xff]   ;;  %v1897_v33 = vld [vmem:[%s2413_s1 + $0x2e0] sm:$0xff]  }
  0x1d   :  { %1675 = vmatpush3.bf16.msra.mxu1 %v1843_v27  ;;  %1654 = vmatprep.subr.bf16.mxu0 %v1844_v28  ;;  %v1890_v26 = vld [vmem:[%s2413_s1 + $0x210] sm:$0xff]   ;;  %v1892_v28 = vld [vmem:[%s2413_s1 + $0x258] sm:$0xff]   ;;  %v1898_v34 = vld [vmem:[%s2413_s1 + $0x220] sm:$0xff]  }
  0x1e   :  { %1676 = vmatprep.subr.bf16.mxu1 %v1845_v29  ;;  %v1891_v27 = vld [vmem:[%s2413_s1 + $0x290] sm:$0xff]   ;;  %v1893_v29 = vld [vmem:[%s2413_s1 + $0x2d8] sm:$0xff]   ;;  %v1900_v36 = vld [vmem:[%s2413_s1 + $0x268] sm:$0xff]  }
  0x1f   :  { %v1901_v37 = vld [vmem:[%s2413_s1 + $0x2e8] sm:$0xff]   ;;  %v1928_v8 = vld [vmem:[%s2413_s1 + $0x360] sm:$0xff]  }
  0x20   :  { %1655 = vmatpush3.bf16.msra.mxu0 %v1846_v30  ;;  %v1894_v30 = vld [vmem:[%s2413_s1 + $0x218] sm:$0xff]   ;;  %v1903_v39 = vld [vmem:[%s2413_s1 + $0x2a8] sm:$0xff]   ;;  %v1929_v9 = vld [vmem:[%s2413_s1 + $0x3e0] sm:$0xff]  }
  0x21   :  { %1677 = vmatpush3.bf16.msra.mxu1 %v1847_v31  ;;  %1684 = vmatprep.subr.bf16.mxu0 %v1848_v40  ;;  %v1895_v31 = vld [vmem:[%s2413_s1 + $0x298] sm:$0xff]   ;;  %v1904_v40 = vld [vmem:[%s2413_s1 + $0x270] sm:$0xff]   ;;  %v1932_v12 = vld [vmem:[%s2413_s1 + $0x368] sm:$0xff]  }
  0x22   :  { %1706 = vmatprep.subr.bf16.mxu1 %v1849_v41  ;;  %v1905_v41 = vld [vmem:[%s2413_s1 + $0x2f0] sm:$0xff]   ;;  %v1933_v13 = vld [vmem:[%s2413_s1 + $0x3e8] sm:$0xff]  }
  0x23   :  { %1171 = vmatmul.mubr.bf16.vlgmr.msra.gmra.mrb[0].mxu0 %v1494_v35  ;;  %v1899_v35 = vld [vmem:[%s2413_s1 + $0x2a0] sm:$0xff]  }
  0x24   :  { %1212 = vmatmul.mubr.bf16.vlgmr.msra.gmra.mrb[0].mxu1 %v1496_v38  ;;  %1685 = vmatpush3.bf16.msra.mxu0 %v1850_v42  ;;  %v1902_v38 = vld [vmem:[%s2413_s1 + $0x228] sm:$0xff]   ;;  %v1906_v42 = vld [vmem:[%s2413_s1 + $0x230] sm:$0xff]  }
  0x25   :  { %1707 = vmatpush3.bf16.msra.mxu1 %v1851_v43  ;;  %1686 = vmatprep.subr.bf16.mxu0 %v1852_v44  ;;  %v1907_v43 = vld [vmem:[%s2413_s1 + $0x2b0] sm:$0xff]   ;;  %v1908_v44 = vld [vmem:[%s2413_s1 + $0x278] sm:$0xff]  }
  0x26   :  { %1708 = vmatprep.subr.bf16.mxu1 %v1853_v45  ;;  %1252 = vmatprep.mubr.bf16.mxu0 %v1499_v11  ;;  %v1909_v45 = vld [vmem:[%s2413_s1 + $0x2f8] sm:$0xff]   ;;  %v1931_v11 = vld [vmem:[%s2413_s1 + $0x3a0] sm:$0xff]  }
  0x27   :  { %1293 = vmatprep.mubr.bf16.mxu1 %v1501_v15  ;;  %v1935_v15 = vld [vmem:[%s2413_s1 + $0x3a8] sm:$0xff]  }
  0x28   :  { %1687 = vmatpush3.bf16.msra.mxu0 %v1854_v46  ;;  %v1910_v46 = vld [vmem:[%s2413_s1 + $0x238] sm:$0xff]  }
  0x29   :  { %1709 = vmatpush3.bf16.msra.mxu1 %v1855_v47  ;;  %1688 = vmatprep.subr.bf16.mxu0 %v1856_v48  ;;  %v1911_v47 = vld [vmem:[%s2413_s1 + $0x2b8] sm:$0xff]   ;;  %v22_v48 = vld [vmem:[%s2414_s0 + $0x20] sm:$0xff] }
  0x2a   :  { %1710 = vmatprep.subr.bf16.mxu1 %v1857_v49  ;;  %v30_v49 = vld [vmem:[%s2414_s0 + $0x60] sm:$0x33] }
  0x2c   :  { %1689 = vmatpush3.bf16.msra.mxu0 %v1858_v50  ;;  %v23_v50 = vld [vmem:[%s2414_s0 + $0x28] sm:$0xff] }
  0x2d   :  { %1711 = vmatpush3.bf16.msra.mxu1 %v1859_v51  ;;  %1690 = vmatprep.subr.bf16.mxu0 %v1860_v52  ;;  %v31_v51 = vld [vmem:[%s2414_s0 + $0x68] sm:$0x33]  ;;  %v1502_v52 = vcombine.low %v22_v48, %v30_v49 }
  0x2e   :  { %1712 = vmatprep.subr.bf16.mxu1 %v1861_v53  ;;  %v1503_v53 = vcombine.high %v22_v48, %v30_v49 }
  0x30   :  { %1691 = vmatpush3.bf16.msra.mxu0 %v1862_v54  ;;  %v1504_v54 = vcombine.low %v23_v50, %v31_v51 }
  0x31   :  { %1713 = vmatpush3.bf16.msra.mxu1 %v1863_v55  ;;  %1692 = vmatprep.subr.bf16.mxu0 %v1864_v56  ;;  %v1505_v55 = vcombine.high %v23_v50, %v31_v51  ;;  %v1912_v56 = vld [vmem:[%s2413_s1 + $0x340] sm:$0xff]  }
  0x32   :  { %1714 = vmatprep.subr.bf16.mxu1 %v1865_v57  ;;  %v1913_v57 = vld [vmem:[%s2413_s1 + $0x3c0] sm:$0xff]  }
  0x34   :  { %1693 = vmatpush3.bf16.msra.mxu0 %v1866_v58  ;;  %v1914_v58 = vld [vmem:[%s2413_s1 + $0x300] sm:$0xff]  }
  0x35   :  { %1715 = vmatpush3.bf16.msra.mxu1 %v1867_v59  ;;  %1694 = vmatprep.subr.bf16.mxu0 %v1868_v60  ;;  %v1915_v59 = vld [vmem:[%s2413_s1 + $0x380] sm:$0xff]   ;;  %v1916_v60 = vld [vmem:[%s2413_s1 + $0x348] sm:$0xff]  }
  0x36   :  { %1716 = vmatprep.subr.bf16.mxu1 %v1869_v61  ;;  %v1917_v61 = vld [vmem:[%s2413_s1 + $0x3c8] sm:$0xff]  }
  0x38   :  { %1695 = vmatpush3.bf16.msra.mxu0 %v1870_v62  ;;  %v1918_v62 = vld [vmem:[%s2413_s1 + $0x308] sm:$0xff]  }
  0x39   :  { %1717 = vmatpush3.bf16.msra.mxu1 %v1871_v63  ;;  %1696 = vmatprep.subr.bf16.mxu0 %v1872_v0  ;;  %v1919_v63 = vld [vmem:[%s2413_s1 + $0x388] sm:$0xff]   ;;  %v1920_v0 = vld [vmem:[%s2413_s1 + $0x350] sm:$0xff]  }
  0x3a   :  { %1718 = vmatprep.subr.bf16.mxu1 %v1873_v1  ;;  %v1921_v1 = vld [vmem:[%s2413_s1 + $0x3d0] sm:$0xff]  }
  0x3c   :  { %1697 = vmatpush3.bf16.msra.mxu0 %v1874_v2  ;;  %v1922_v2 = vld [vmem:[%s2413_s1 + $0x310] sm:$0xff]  }
  0x3d   :  { %1719 = vmatpush3.bf16.msra.mxu1 %v1875_v3  ;;  %1698 = vmatprep.subr.bf16.mxu0 %v1876_v4  ;;  %v1923_v3 = vld [vmem:[%s2413_s1 + $0x390] sm:$0xff]   ;;  %v1924_v4 = vld [vmem:[%s2413_s1 + $0x358] sm:$0xff]  }
  0x3e   :  { %1720 = vmatprep.subr.bf16.mxu1 %v1877_v5  ;;  %v1925_v5 = vld [vmem:[%s2413_s1 + $0x3d8] sm:$0xff]  }
  0x40   :  { %1699 = vmatpush3.bf16.msra.mxu0 %v1878_v6  ;;  %v1926_v6 = vld [vmem:[%s2413_s1 + $0x318] sm:$0xff]  }
  0x41   :  { %1721 = vmatpush3.bf16.msra.mxu1 %v1879_v7  ;;  %1728 = vmatprep.subr.bf16.mxu0 %v1880_v16  ;;  %v1927_v7 = vld [vmem:[%s2413_s1 + $0x398] sm:$0xff]   ;;  %v1936_v16 = vld [vmem:[%s2413_s1 + $0x370] sm:$0xff]  }
  0x42   :  { %1750 = vmatprep.subr.bf16.mxu1 %v1881_v17  ;;  %v1937_v17 = vld [vmem:[%s2413_s1 + $0x3f0] sm:$0xff]  }
  0x43   :  { %1253 = vmatmul.mubr.bf16.vlgmr.msra.gmra.mrb[4].mxu0 %v1498_v10  ;;  %v1930_v10 = vld [vmem:[%s2413_s1 + $0x320] sm:$0xff]  }
  0x44   :  { %1294 = vmatmul.mubr.bf16.vlgmr.msra.gmra.mrb[4].mxu1 %v1500_v14  ;;  %1729 = vmatpush3.bf16.msra.mxu0 %v1882_v18  ;;  %v1934_v14 = vld [vmem:[%s2413_s1 + $0x328] sm:$0xff]   ;;  %v1938_v18 = vld [vmem:[%s2413_s1 + $0x330] sm:$0xff]  }
  0x45   :  { %1751 = vmatpush3.bf16.msra.mxu1 %v1883_v19  ;;  %1730 = vmatprep.subr.bf16.mxu0 %v1884_v20  ;;  %v1939_v19 = vld [vmem:[%s2413_s1 + $0x3b0] sm:$0xff]   ;;  %v1940_v20 = vld [vmem:[%s2413_s1 + $0x378] sm:$0xff]  }
  0x46   :  { %1752 = vmatprep.subr.bf16.mxu1 %v1885_v21  ;;  %1334 = vmatprep.mubr.bf16.mxu0 %v1503_v53  ;;  %v1941_v21 = vld [vmem:[%s2413_s1 + $0x3f8] sm:$0xff]  }
  0x47   :  { %1375 = vmatprep.mubr.bf16.mxu1 %v1505_v55 }
  0x48   :  { %1731 = vmatpush3.bf16.msra.mxu0 %v1886_v22  ;;  %v1942_v22 = vld [vmem:[%s2413_s1 + $0x338] sm:$0xff]  }
  0x49   :  { %1753 = vmatpush3.bf16.msra.mxu1 %v1887_v23  ;;  %1732 = vmatprep.subr.bf16.mxu0 %v1888_v24  ;;  %v1943_v23 = vld [vmem:[%s2413_s1 + $0x3b8] sm:$0xff]   ;;  %v24_v24 = vld [vmem:[%s2414_s0 + $0x30] sm:$0xff] }
  0x4a   :  { %1754 = vmatprep.subr.bf16.mxu1 %v1889_v25  ;;  %v32_v25 = vld [vmem:[%s2414_s0 + $0x70] sm:$0x33] }
  0x4c   :  { %1733 = vmatpush3.bf16.msra.mxu0 %v1890_v26  ;;  %v25_v26 = vld [vmem:[%s2414_s0 + $0x38] sm:$0xff] }
  0x4d   :  { %1755 = vmatpush3.bf16.msra.mxu1 %v1891_v27  ;;  %1734 = vmatprep.subr.bf16.mxu0 %v1892_v28  ;;  %v1506_v27 = vcombine.low %v24_v24, %v32_v25  ;;  %v1507_v28 = vcombine.high %v24_v24, %v32_v25 }
  0x4e   :  { %1756 = vmatprep.subr.bf16.mxu1 %v1893_v29  ;;  %v33_v29 = vld [vmem:[%s2414_s0 + $0x78] sm:$0x33] }
  0x50   :  { %1735 = vmatpush3.bf16.msra.mxu0 %v1894_v30  ;;  %v1508_v30 = vcombine.low %v25_v26, %v33_v29 }
  0x51   :  { %1757 = vmatpush3.bf16.msra.mxu1 %v1895_v31  ;;  %1736 = vmatprep.subr.bf16.mxu0 %v1896_v32  ;;  %v1509_v31 = vcombine.high %v25_v26, %v33_v29  ;;  %v1638_v26 = vld [vmem:[%s2415_s2] ss:$0 sm:$0xff] }
  0x52   :  { %1758 = vmatprep.subr.bf16.mxu1 %v1897_v33 }
  0x54   :  { %1737 = vmatpush3.bf16.msra.mxu0 %v1898_v34 }
  0x55   :  { %1759 = vmatpush3.bf16.msra.mxu1 %v1899_v35  ;;  %1738 = vmatprep.subr.bf16.mxu0 %v1900_v36 }
  0x56   :  { %1760 = vmatprep.subr.bf16.mxu1 %v1901_v37 }
  0x58   :  { %1739 = vmatpush3.bf16.msra.mxu0 %v1902_v38 }
  0x59   :  { %1761 = vmatpush3.bf16.msra.mxu1 %v1903_v39  ;;  %1740 = vmatprep.subr.bf16.mxu0 %v1904_v40 }
  0x5a   :  { %1762 = vmatprep.subr.bf16.mxu1 %v1905_v41 }
  0x5c   :  { %1741 = vmatpush3.bf16.msra.mxu0 %v1906_v42 }
  0x5d   :  { %1763 = vmatpush3.bf16.msra.mxu1 %v1907_v43  ;;  %1742 = vmatprep.subr.bf16.mxu0 %v1908_v44 }
  0x5e   :  { %1764 = vmatprep.subr.bf16.mxu1 %v1909_v45 }
  0x60   :  { %1743 = vmatpush3.bf16.msra.mxu0 %v1910_v46 }
  0x61   :  { %1765 = vmatpush3.bf16.msra.mxu1 %v1911_v47  ;;  %1772 = vmatprep.subr.bf16.mxu0 %v1912_v56 }
  0x62   :  { %1794 = vmatprep.subr.bf16.mxu1 %v1913_v57 }
  0x63   :  { %1335 = vmatmul.mubr.bf16.vlgmr.msra.gmra.mrb[8].mxu0 %v1502_v52 }
  0x64   :  { %1376 = vmatmul.mubr.bf16.vlgmr.msra.gmra.mrb[8].mxu1 %v1504_v54  ;;  %1773 = vmatpush3.bf16.msra.mxu0 %v1914_v58 }
  0x65   :  { %1795 = vmatpush3.bf16.msra.mxu1 %v1915_v59  ;;  %1774 = vmatprep.subr.bf16.mxu0 %v1916_v60 }
  0x66   :  { %1796 = vmatprep.subr.bf16.mxu1 %v1917_v61  ;;  %1416 = vmatprep.mubr.bf16.mxu0 %v1507_v28 }
  0x67   :  { %1457 = vmatprep.mubr.bf16.mxu1 %v1509_v31 }
  0x68   :  { %1775 = vmatpush3.bf16.msra.mxu0 %v1918_v62 }
  0x69   :  { %1797 = vmatpush3.bf16.msra.mxu1 %v1919_v63  ;;  %1776 = vmatprep.subr.bf16.mxu0 %v1920_v0 }
  0x6a   :  { %1798 = vmatprep.subr.bf16.mxu1 %v1921_v1 }
  0x6c   :  { %1777 = vmatpush3.bf16.msra.mxu0 %v1922_v2 }
  0x6d   :  { %1799 = vmatpush3.bf16.msra.mxu1 %v1923_v3  ;;  %1778 = vmatprep.subr.bf16.mxu0 %v1924_v4 }
  0x6e   :  { %1800 = vmatprep.subr.bf16.mxu1 %v1925_v5 }
  0x70   :  { %1779 = vmatpush3.bf16.msra.mxu0 %v1926_v6 }
  0x71   :  { %1801 = vmatpush3.bf16.msra.mxu1 %v1927_v7  ;;  %1780 = vmatprep.subr.bf16.mxu0 %v1928_v8 }
  0x72   :  { %1802 = vmatprep.subr.bf16.mxu1 %v1929_v9 }
  0x74   :  { %1781 = vmatpush3.bf16.msra.mxu0 %v1930_v10 }
  0x75   :  { %1803 = vmatpush3.bf16.msra.mxu1 %v1931_v11  ;;  %1782 = vmatprep.subr.bf16.mxu0 %v1932_v12 }
  0x76   :  { %1804 = vmatprep.subr.bf16.mxu1 %v1933_v13 }
  0x78   :  { %1783 = vmatpush3.bf16.msra.mxu0 %v1934_v14 }
  0x79   :  { %1805 = vmatpush3.bf16.msra.mxu1 %v1935_v15  ;;  %1784 = vmatprep.subr.bf16.mxu0 %v1936_v16 }
  0x7a   :  { %1806 = vmatprep.subr.bf16.mxu1 %v1937_v17 }
  0x7c   :  { %1785 = vmatpush3.bf16.msra.mxu0 %v1938_v18 }
  0x7d   :  { %1807 = vmatpush3.bf16.msra.mxu1 %v1939_v19  ;;  %1786 = vmatprep.subr.bf16.mxu0 %v1940_v20 }
  0x7e   :  { %1808 = vmatprep.subr.bf16.mxu1 %v1941_v21 }
  0x80   :  { %1787 = vmatpush3.bf16.msra.mxu0 %v1942_v22 }
  0x81   :  { %1809 = vmatpush3.bf16.msra.mxu1 %v1943_v23 }
  0x83   :  { %1417 = vmatmul.mubr.bf16.vlgmr.msra.gmra.mrb[12].mxu0 %v1506_v27 }
  0x84   :  { %1458 = vmatmul.mubr.bf16.vlgmr.msra.gmra.mrb[12].mxu1 %v1508_v30  ;;  %v1639_v30 = vld [vmem:[%s2416_s3] ss:$0 sm:$0xff] }
  0xf6   :  { %v1656_v32 = vpop.f32.mrb[0].mxu0 }
  0xf7   :  { %v1678_v33 = vpop.f32.mrb[0].mxu1  ;;  %v1657_v34 = vpop.f32.mrb[1].mxu0 }
  0xf8   :  { %v1658_v35 = vadd.f32 %v1657_v34, %v1656_v32  ;;  %v1679_v36 = vpop.f32.mrb[1].mxu1  ;;  %v1659_v37 = vpop.f32.mrb[2].mxu0 }
  0xf9   :  { %v1680_v38 = vadd.f32 %v1679_v36, %v1678_v33  ;;  %v1681_v39 = vpop.f32.mrb[2].mxu1  ;;  %v1660_v40 = vpop.f32.mrb[3].mxu0 }
  0xfa   :  { %v1661_v41 = vadd.f32 %v1660_v40, %v1659_v37  ;;  %v1682_v42 = vpop.f32.mrb[3].mxu1 }
  0xfb   :  { %v1214_v43 = vadd.f32 %v1680_v38, %v1658_v35  ;;  %v1683_v44 = vadd.f32 %v1682_v42, %v1681_v39 }
  0xfd   :  { %v1217_v45 = vadd.f32 %v1683_v44, %v1661_v41 }
 0x116   :  { %v1700_v46 = vpop.f32.mrb[4].mxu0 }
 0x117   :  { %v1722_v47 = vpop.f32.mrb[4].mxu1  ;;  %v1701_v48 = vpop.f32.mrb[5].mxu0 }
 0x118   :  { %v1702_v49 = vadd.f32 %v1701_v48, %v1700_v46  ;;  %v1723_v50 = vpop.f32.mrb[5].mxu1  ;;  %v1703_v51 = vpop.f32.mrb[6].mxu0 }
 0x119   :  { %v1724_v52 = vadd.f32 %v1723_v50, %v1722_v47  ;;  %v1725_v53 = vpop.f32.mrb[6].mxu1  ;;  %v1704_v54 = vpop.f32.mrb[7].mxu0 }
 0x11a   :  { %v1255_v55 = vadd.f32 %v1702_v49, %v1214_v43  ;;  %v1705_v56 = vadd.f32 %v1704_v54, %v1703_v51  ;;  %v1726_v57 = vpop.f32.mrb[7].mxu1 }
 0x11b   :  { %v1727_v58 = vadd.f32 %v1726_v57, %v1725_v53 }
 0x11c   :  { %v1296_v59 = vadd.f32 %v1724_v52, %v1255_v55  ;;  %v1258_v60 = vadd.f32 %v1705_v56, %v1217_v45 }
 0x11e   :  { %v1299_v61 = vadd.f32 %v1727_v58, %v1258_v60 }
 0x136   :  { %v1744_v62 = vpop.f32.mrb[8].mxu0 }
 0x137   :  { %v1766_v63 = vpop.f32.mrb[8].mxu1  ;;  %v1745_v0 = vpop.f32.mrb[9].mxu0 }
 0x138   :  { %v1767_v1 = vpop.f32.mrb[9].mxu1  ;;  %v1746_v2 = vadd.f32 %v1745_v0, %v1744_v62  ;;  %v1747_v4 = vpop.f32.mrb[10].mxu0 }
 0x139   :  { %v1768_v3 = vadd.f32 %v1767_v1, %v1766_v63  ;;  %v1769_v5 = vpop.f32.mrb[10].mxu1  ;;  %v1748_v6 = vpop.f32.mrb[11].mxu0 }
 0x13a   :  { %v1770_v7 = vpop.f32.mrb[11].mxu1  ;;  %v1337_v8 = vadd.f32 %v1746_v2, %v1296_v59  ;;  %v1749_v9 = vadd.f32 %v1748_v6, %v1747_v4 }
 0x13b   :  { %v1771_v10 = vadd.f32 %v1770_v7, %v1769_v5 }
 0x13c   :  { %v1378_v11 = vadd.f32 %v1768_v3, %v1337_v8  ;;  %v1340_v12 = vadd.f32 %v1749_v9, %v1299_v61 }
 0x13e   :  { %v1381_v13 = vadd.f32 %v1771_v10, %v1340_v12 }
 0x156   :  { %v1788_v14 = vpop.f32.mrb[12].mxu0 }
 0x157   :  { %v1810_v15 = vpop.f32.mrb[12].mxu1  ;;  %v1789_v16 = vpop.f32.mrb[13].mxu0 }
 0x158   :  { %v1790_v17 = vadd.f32 %v1789_v16, %v1788_v14  ;;  %v1811_v18 = vpop.f32.mrb[13].mxu1  ;;  %v1791_v19 = vpop.f32.mrb[14].mxu0 }
 0x159   :  { %v1812_v20 = vadd.f32 %v1811_v18, %v1810_v15  ;;  %v1813_v21 = vpop.f32.mrb[14].mxu1  ;;  %v1792_v22 = vpop.f32.mrb[15].mxu0 }
 0x15a   :  { %v1419_v23 = vadd.f32 %v1790_v17, %v1378_v11  ;;  %v1793_v24 = vadd.f32 %v1792_v22, %v1791_v19  ;;  %v1814_v25 = vpop.f32.mrb[15].mxu1 }
 0x15b   :  { %v1815_v27 = vadd.f32 %v1814_v25, %v1813_v21 }
 0x15c   :  { %v1460_v28 = vadd.f32 %v1812_v20, %v1419_v23  ;;  %v1422_v29 = vadd.f32 %v1793_v24, %v1381_v13 }
 0x15e   :  { %v1473_v31 = vmul.f32 %v1638_v26, %v1460_v28  ;;  %v1463_v32 = vadd.f32 %v1815_v27, %v1422_v29 }
 0x160   :  { %v1482_v33 = vadd.f32 %v1639_v30, %v1473_v31  ;;  %v1474_v34 = vmul.f32 %v1638_v26, %v1463_v32 }
 0x162   :  { %v1484_v35 = vmax.f32 %v1482_v33, 0.0  ;;  %v1483_v36 = vadd.f32 %v1639_v30, %v1474_v34 }
 0x164   :  { %1487 = vst.msk [vmem:[%s2417_s4] sm:$0xff] %vm1486_vm0, %v1484_v35  ;;  %v1485_v37 = vmax.f32 %v1483_v36, 0.0 }
 0x166   :  { %1489 = vst.msk [vmem:[%s2417_s4 + $0x8] sm:$0xf] %vm1488_vm1, %v1485_v37 }

// kernel: transformer_forward.17
= control target key start
LH: loop header
LB: loop body
LE: loop exit
PB: predicated region body
PF: predicated region fallthrough
CT: control target
= control target key end

     0   :  { %vm1486_vm0 = vcmask 523264   ;;  %vm1488_vm1 = vcmask 517120   ;;  %s2413_s1 = inlined_call_operand.vmem [shape: bf16[2048,64], index: 1, kind: input, shape index: {}]   ;;  %s2414_s0 = inlined_call_operand.vmem [shape: bf16[10,2048], index: 0, kind: input, shape index: {}]   ;;  %s2415_s2 = inlined_call_operand.vmem [shape: f32[1,64], index: 2, kind: input, shape index: {}]   ;;  %s2416_s3 = inlined_call_operand.vmem [shape: f32[1,64], index: 3, kind: input, shape index: {}]   ;;  %s2417_s4 = inlined_call_operand.vmem [shape: f32[10,64], index: 4, kind: output, shape index: {}]  }
   0x1   :  { %v1816_v0 = vld [vmem:[%s2413_s1 + $0x40] sm:$0xff]   ;;  %v1820_v4 = vld [vmem:[%s2413_s1 + $0x48] sm:$0xff]   ;;  %v1824_v8 = vld [vmem:[%s2413_s1 + $0x50] sm:$0xff]  }
   0x2   :  { %v1817_v1 = vld [vmem:[%s2413_s1 + $0xc0] sm:$0xff]   ;;  %1640 = vmatprep.subr.bf16.mxu0 %v1816_v0  ;;  %v1821_v5 = vld [vmem:[%s2413_s1 + $0xc8] sm:$0xff]   ;;  %v1825_v9 = vld [vmem:[%s2413_s1 + $0xd0] sm:$0xff]  }
   0x3   :  { %v1818_v2 = vld [vmem:[%s2413_s1] sm:$0xff]   ;;  %1662 = vmatprep.subr.bf16.mxu1 %v1817_v1  ;;  %v1822_v6 = vld [vmem:[%s2413_s1 + $0x8] sm:$0xff]   ;;  %v1826_v10 = vld [vmem:[%s2413_s1 + $0x10] sm:$0xff]  }
   0x4   :  { %v1819_v3 = vld [vmem:[%s2413_s1 + $0x80] sm:$0xff]   ;;  %1641 = vmatpush3.bf16.msra.mxu0 %v1818_v2  ;;  %v1823_v7 = vld [vmem:[%s2413_s1 + $0x88] sm:$0xff]   ;;  %v1827_v11 = vld [vmem:[%s2413_s1 + $0x90] sm:$0xff]  }
   0x5   :  { %1663 = vmatpush3.bf16.msra.mxu1 %v1819_v3  ;;  %1642 = vmatprep.subr.bf16.mxu0 %v1820_v4  ;;  %v1828_v12 = vld [vmem:[%s2413_s1 + $0x58] sm:$0xff]   ;;  %v1832_v16 = vld [vmem:[%s2413_s1 + $0x60] sm:$0xff]   ;;  %v1836_v20 = vld [vmem:[%s2413_s1 + $0x68] sm:$0xff]  }
   0x6   :  { %1664 = vmatprep.subr.bf16.mxu1 %v1821_v5  ;;  %v1829_v13 = vld [vmem:[%s2413_s1 + $0xd8] sm:$0xff]   ;;  %v1833_v17 = vld [vmem:[%s2413_s1 + $0xe0] sm:$0xff]   ;;  %v1837_v21 = vld [vmem:[%s2413_s1 + $0xe8] sm:$0xff]  }
   0x7   :  { %v1830_v14 = vld [vmem:[%s2413_s1 + $0x18] sm:$0xff]   ;;  %v1834_v18 = vld [vmem:[%s2413_s1 + $0x20] sm:$0xff]   ;;  %v1838_v22 = vld [vmem:[%s2413_s1 + $0x28] sm:$0xff]  }
   0x8   :  { %1643 = vmatpush3.bf16.msra.mxu0 %v1822_v6  ;;  %v1831_v15 = vld [vmem:[%s2413_s1 + $0x98] sm:$0xff]   ;;  %v1835_v19 = vld [vmem:[%s2413_s1 + $0xa0] sm:$0xff]   ;;  %v1839_v23 = vld [vmem:[%s2413_s1 + $0xa8] sm:$0xff]  }
   0x9   :  { %1665 = vmatpush3.bf16.msra.mxu1 %v1823_v7  ;;  %1644 = vmatprep.subr.bf16.mxu0 %v1824_v8  ;;  %v1840_v24 = vld [vmem:[%s2413_s1 + $0x70] sm:$0xff]   ;;  %v1844_v28 = vld [vmem:[%s2413_s1 + $0x78] sm:$0xff]   ;;  %v18_v32 = vld [vmem:[%s2414_s0] sm:$0xff] }
   0xa   :  { %1666 = vmatprep.subr.bf16.mxu1 %v1825_v9  ;;  %v1841_v25 = vld [vmem:[%s2413_s1 + $0xf0] sm:$0xff]   ;;  %v1845_v29 = vld [vmem:[%s2413_s1 + $0xf8] sm:$0xff]   ;;  %v26_v33 = vld [vmem:[%s2414_s0 + $0x40] sm:$0x11] }
   0xb   :  { %v1842_v26 = vld [vmem:[%s2413_s1 + $0x30] sm:$0xff]   ;;  %v1846_v30 = vld [vmem:[%s2413_s1 + $0x38] sm:$0xff]   ;;  %v19_v34 = vld [vmem:[%s2414_s0 + $0x8] sm:$0xff]  ;;  %v1494_v35 = vcombine.low %v18_v32, %v26_v33  ;;  %v1495_v36 = vcombine.high %v18_v32, %v26_v33 }
   0xc   :  { %1645 = vmatpush3.bf16.msra.mxu0 %v1826_v10  ;;  %v1843_v27 = vld [vmem:[%s2413_s1 + $0xb0] sm:$0xff]   ;;  %v1847_v31 = vld [vmem:[%s2413_s1 + $0xb8] sm:$0xff]   ;;  %v27_v37 = vld [vmem:[%s2414_s0 + $0x48] sm:$0x11] }
   0xd   :  { %1667 = vmatpush3.bf16.msra.mxu1 %v1827_v11  ;;  %1646 = vmatprep.subr.bf16.mxu0 %v1828_v12  ;;  %v1496_v38 = vcombine.low %v19_v34, %v27_v37  ;;  %v1497_v39 = vcombine.high %v19_v34, %v27_v37  ;;  %v1848_v40 = vld [vmem:[%s2413_s1 + $0x140] sm:$0xff]   ;;  %v1852_v44 = vld [vmem:[%s2413_s1 + $0x148] sm:$0xff]   ;;  %v1856_v48 = vld [vmem:[%s2413_s1 + $0x150] sm:$0xff]  }
   0xe   :  { %1668 = vmatprep.subr.bf16.mxu1 %v1829_v13  ;;  %1170 = vmatprep.mubr.bf16.mxu0 %v1495_v36  ;;  %v1849_v41 = vld [vmem:[%s2413_s1 + $0x1c0] sm:$0xff]   ;;  %v1853_v45 = vld [vmem:[%s2413_s1 + $0x1c8] sm:$0xff]   ;;  %v1857_v49 = vld [vmem:[%s2413_s1 + $0x1d0] sm:$0xff]  }
   0xf   :  { %1211 = vmatprep.mubr.bf16.mxu1 %v1497_v39  ;;  %v1850_v42 = vld [vmem:[%s2413_s1 + $0x100] sm:$0xff]   ;;  %v1854_v46 = vld [vmem:[%s2413_s1 + $0x108] sm:$0xff]   ;;  %v1858_v50 = vld [vmem:[%s2413_s1 + $0x110] sm:$0xff]  }
  0x10   :  { %1647 = vmatpush3.bf16.msra.mxu0 %v1830_v14  ;;  %v1851_v43 = vld [vmem:[%s2413_s1 + $0x180] sm:$0xff]   ;;  %v1855_v47 = vld [vmem:[%s2413_s1 + $0x188] sm:$0xff]   ;;  %v1859_v51 = vld [vmem:[%s2413_s1 + $0x190] sm:$0xff]  }
  0x11   :  { %1669 = vmatpush3.bf16.msra.mxu1 %v1831_v15  ;;  %1648 = vmatprep.subr.bf16.mxu0 %v1832_v16  ;;  %v1860_v52 = vld [vmem:[%s2413_s1 + $0x158] sm:$0xff]   ;;  %v1864_v56 = vld [vmem:[%s2413_s1 + $0x160] sm:$0xff]   ;;  %v1868_v60 = vld [vmem:[%s2413_s1 + $0x168] sm:$0xff]  }
  0x12   :  { %1670 = vmatprep.subr.bf16.mxu1 %v1833_v17  ;;  %v1861_v53 = vld [vmem:[%s2413_s1 + $0x1d8] sm:$0xff]   ;;  %v1865_v57 = vld [vmem:[%s2413_s1 + $0x1e0] sm:$0xff]   ;;  %v1869_v61 = vld [vmem:[%s2413_s1 + $0x1e8] sm:$0xff]  }
  0x13   :  { %v1862_v54 = vld [vmem:[%s2413_s1 + $0x118] sm:$0xff]   ;;  %v1866_v58 = vld [vmem:[%s2413_s1 + $0x120] sm:$0xff]   ;;  %v1870_v62 = vld [vmem:[%s2413_s1 + $0x128] sm:$0xff]  }
  0x14   :  { %1649 = vmatpush3.bf16.msra.mxu0 %v1834_v18  ;;  %v1863_v55 = vld [vmem:[%s2413_s1 + $0x198] sm:$0xff]   ;;  %v1867_v59 = vld [vmem:[%s2413_s1 + $0x1a0] sm:$0xff]   ;;  %v1871_v63 = vld [vmem:[%s2413_s1 + $0x1a8] sm:$0xff]  }
  0x15   :  { %1671 = vmatpush3.bf16.msra.mxu1 %v1835_v19  ;;  %1650 = vmatprep.subr.bf16.mxu0 %v1836_v20  ;;  %v1872_v0 = vld [vmem:[%s2413_s1 + $0x170] sm:$0xff]   ;;  %v1876_v4 = vld [vmem:[%s2413_s1 + $0x178] sm:$0xff]   ;;  %v1880_v16 = vld [vmem:[%s2413_s1 + $0x240] sm:$0xff]  }
  0x16   :  { %1672 = vmatprep.subr.bf16.mxu1 %v1837_v21  ;;  %v1873_v1 = vld [vmem:[%s2413_s1 + $0x1f0] sm:$0xff]   ;;  %v1877_v5 = vld [vmem:[%s2413_s1 + $0x1f8] sm:$0xff]   ;;  %v1881_v17 = vld [vmem:[%s2413_s1 + $0x2c0] sm:$0xff]  }
  0x17   :  { %v1874_v2 = vld [vmem:[%s2413_s1 + $0x130] sm:$0xff]   ;;  %v1878_v6 = vld [vmem:[%s2413_s1 + $0x138] sm:$0xff]   ;;  %v1882_v18 = vld [vmem:[%s2413_s1 + $0x200] sm:$0xff]  }
  0x18   :  { %1651 = vmatpush3.bf16.msra.mxu0 %v1838_v22  ;;  %v1875_v3 = vld [vmem:[%s2413_s1 + $0x1b0] sm:$0xff]   ;;  %v1879_v7 = vld [vmem:[%s2413_s1 + $0x1b8] sm:$0xff]   ;;  %v1883_v19 = vld [vmem:[%s2413_s1 + $0x280] sm:$0xff]  }
  0x19   :  { %1673 = vmatpush3.bf16.msra.mxu1 %v1839_v23  ;;  %1652 = vmatprep.subr.bf16.mxu0 %v1840_v24  ;;  %v20_v8 = vld [vmem:[%s2414_s0 + $0x10] sm:$0xff]  ;;  %v21_v12 = vld [vmem:[%s2414_s0 + $0x18] sm:$0xff]  ;;  %v1884_v20 = vld [vmem:[%s2413_s1 + $0x248] sm:$0xff]  }
  0x1a   :  { %1674 = vmatprep.subr.bf16.mxu1 %v1841_v25  ;;  %v28_v9 = vld [vmem:[%s2414_s0 + $0x50] sm:$0x11]  ;;  %v29_v13 = vld [vmem:[%s2414_s0 + $0x58] sm:$0x11]  ;;  %v1885_v21 = vld [vmem:[%s2413_s1 + $0x2c8] sm:$0xff]  }
  0x1b   :  { %v1498_v10 = vcombine.low %v20_v8, %v28_v9  ;;  %v1499_v11 = vcombine.high %v20_v8, %v28_v9  ;;  %v1500_v14 = vcombine.low %v21_v12, %v29_v13  ;;  %v1501_v15 = vcombine.high %v21_v12, %v29_v13  ;;  %v1886_v22 = vld [vmem:[%s2413_s1 + $0x208] sm:$0xff]   ;;  %v1888_v24 = vld [vmem:[%s2413_s1 + $0x250] sm:$0xff]   ;;  %v1896_v32 = vld [vmem:[%s2413_s1 + $0x260] sm:$0xff]  }
  0x1c   :  { %1653 = vmatpush3.bf16.msra.mxu0 %v1842_v26  ;;  %v1887_v23 = vld [vmem:[%s2413_s1 + $0x288] sm:$0xff]   ;;  %v1889_v25 = vld [vmem:[%s2413_s1 + $0x2d0] sm:$0xff]   ;;  %v1897_v33 = vld [vmem:[%s2413_s1 + $0x2e0] sm:$0xff]  }
  0x1d   :  { %1675 = vmatpush3.bf16.msra.mxu1 %v1843_v27  ;;  %1654 = vmatprep.subr.bf16.mxu0 %v1844_v28  ;;  %v1890_v26 = vld [vmem:[%s2413_s1 + $0x210] sm:$0xff]   ;;  %v1892_v28 = vld [vmem:[%s2413_s1 + $0x258] sm:$0xff]   ;;  %v1898_v34 = vld [vmem:[%s2413_s1 + $0x220] sm:$0xff]  }
  0x1e   :  { %1676 = vmatprep.subr.bf16.mxu1 %v1845_v29  ;;  %v1891_v27 = vld [vmem:[%s2413_s1 + $0x290] sm:$0xff]   ;;  %v1893_v29 = vld [vmem:[%s2413_s1 + $0x2d8] sm:$0xff]   ;;  %v1900_v36 = vld [vmem:[%s2413_s1 + $0x268] sm:$0xff]  }
  0x1f   :  { %v1901_v37 = vld [vmem:[%s2413_s1 + $0x2e8] sm:$0xff]   ;;  %v1928_v8 = vld [vmem:[%s2413_s1 + $0x360] sm:$0xff]  }
  0x20   :  { %1655 = vmatpush3.bf16.msra.mxu0 %v1846_v30  ;;  %v1894_v30 = vld [vmem:[%s2413_s1 + $0x218] sm:$0xff]   ;;  %v1903_v39 = vld [vmem:[%s2413_s1 + $0x2a8] sm:$0xff]   ;;  %v1929_v9 = vld [vmem:[%s2413_s1 + $0x3e0] sm:$0xff]  }
  0x21   :  { %1677 = vmatpush3.bf16.msra.mxu1 %v1847_v31  ;;  %1684 = vmatprep.subr.bf16.mxu0 %v1848_v40  ;;  %v1895_v31 = vld [vmem:[%s2413_s1 + $0x298] sm:$0xff]   ;;  %v1904_v40 = vld [vmem:[%s2413_s1 + $0x270] sm:$0xff]   ;;  %v1932_v12 = vld [vmem:[%s2413_s1 + $0x368] sm:$0xff]  }
  0x22   :  { %1706 = vmatprep.subr.bf16.mxu1 %v1849_v41  ;;  %v1905_v41 = vld [vmem:[%s2413_s1 + $0x2f0] sm:$0xff]   ;;  %v1933_v13 = vld [vmem:[%s2413_s1 + $0x3e8] sm:$0xff]  }
  0x23   :  { %1171 = vmatmul.mubr.bf16.vlgmr.msra.gmra.mrb[0].mxu0 %v1494_v35  ;;  %v1899_v35 = vld [vmem:[%s2413_s1 + $0x2a0] sm:$0xff]  }
  0x24   :  { %1212 = vmatmul.mubr.bf16.vlgmr.msra.gmra.mrb[0].mxu1 %v1496_v38  ;;  %1685 = vmatpush3.bf16.msra.mxu0 %v1850_v42  ;;  %v1902_v38 = vld [vmem:[%s2413_s1 + $0x228] sm:$0xff]   ;;  %v1906_v42 = vld [vmem:[%s2413_s1 + $0x230] sm:$0xff]  }
  0x25   :  { %1707 = vmatpush3.bf16.msra.mxu1 %v1851_v43  ;;  %1686 = vmatprep.subr.bf16.mxu0 %v1852_v44  ;;  %v1907_v43 = vld [vmem:[%s2413_s1 + $0x2b0] sm:$0xff]   ;;  %v1908_v44 = vld [vmem:[%s2413_s1 + $0x278] sm:$0xff]  }
  0x26   :  { %1708 = vmatprep.subr.bf16.mxu1 %v1853_v45  ;;  %1252 = vmatprep.mubr.bf16.mxu0 %v1499_v11  ;;  %v1909_v45 = vld [vmem:[%s2413_s1 + $0x2f8] sm:$0xff]   ;;  %v1931_v11 = vld [vmem:[%s2413_s1 + $0x3a0] sm:$0xff]  }
  0x27   :  { %1293 = vmatprep.mubr.bf16.mxu1 %v1501_v15  ;;  %v1935_v15 = vld [vmem:[%s2413_s1 + $0x3a8] sm:$0xff]  }
  0x28   :  { %1687 = vmatpush3.bf16.msra.mxu0 %v1854_v46  ;;  %v1910_v46 = vld [vmem:[%s2413_s1 + $0x238] sm:$0xff]  }
  0x29   :  { %1709 = vmatpush3.bf16.msra.mxu1 %v1855_v47  ;;  %1688 = vmatprep.subr.bf16.mxu0 %v1856_v48  ;;  %v1911_v47 = vld [vmem:[%s2413_s1 + $0x2b8] sm:$0xff]   ;;  %v22_v48 = vld [vmem:[%s2414_s0 + $0x20] sm:$0xff] }
  0x2a   :  { %1710 = vmatprep.subr.bf16.mxu1 %v1857_v49  ;;  %v30_v49 = vld [vmem:[%s2414_s0 + $0x60] sm:$0x11] }
  0x2c   :  { %1689 = vmatpush3.bf16.msra.mxu0 %v1858_v50  ;;  %v23_v50 = vld [vmem:[%s2414_s0 + $0x28] sm:$0xff] }
  0x2d   :  { %1711 = vmatpush3.bf16.msra.mxu1 %v1859_v51  ;;  %1690 = vmatprep.subr.bf16.mxu0 %v1860_v52  ;;  %v31_v51 = vld [vmem:[%s2414_s0 + $0x68] sm:$0x11]  ;;  %v1502_v52 = vcombine.low %v22_v48, %v30_v49 }
  0x2e   :  { %1712 = vmatprep.subr.bf16.mxu1 %v1861_v53  ;;  %v1503_v53 = vcombine.high %v22_v48, %v30_v49 }
  0x30   :  { %1691 = vmatpush3.bf16.msra.mxu0 %v1862_v54  ;;  %v1504_v54 = vcombine.low %v23_v50, %v31_v51 }
  0x31   :  { %1713 = vmatpush3.bf16.msra.mxu1 %v1863_v55  ;;  %1692 = vmatprep.subr.bf16.mxu0 %v1864_v56  ;;  %v1505_v55 = vcombine.high %v23_v50, %v31_v51  ;;  %v1912_v56 = vld [vmem:[%s2413_s1 + $0x340] sm:$0xff]  }
  0x32   :  { %1714 = vmatprep.subr.bf16.mxu1 %v1865_v57  ;;  %v1913_v57 = vld [vmem:[%s2413_s1 + $0x3c0] sm:$0xff]  }
  0x34   :  { %1693 = vmatpush3.bf16.msra.mxu0 %v1866_v58  ;;  %v1914_v58 = vld [vmem:[%s2413_s1 + $0x300] sm:$0xff]  }
  0x35   :  { %1715 = vmatpush3.bf16.msra.mxu1 %v1867_v59  ;;  %1694 = vmatprep.subr.bf16.mxu0 %v1868_v60  ;;  %v1915_v59 = vld [vmem:[%s2413_s1 + $0x380] sm:$0xff]   ;;  %v1916_v60 = vld [vmem:[%s2413_s1 + $0x348] sm:$0xff]  }
  0x36   :  { %1716 = vmatprep.subr.bf16.mxu1 %v1869_v61  ;;  %v1917_v61 = vld [vmem:[%s2413_s1 + $0x3c8] sm:$0xff]  }
  0x38   :  { %1695 = vmatpush3.bf16.msra.mxu0 %v1870_v62  ;;  %v1918_v62 = vld [vmem:[%s2413_s1 + $0x308] sm:$0xff]  }
  0x39   :  { %1717 = vmatpush3.bf16.msra.mxu1 %v1871_v63  ;;  %1696 = vmatprep.subr.bf16.mxu0 %v1872_v0  ;;  %v1919_v63 = vld [vmem:[%s2413_s1 + $0x388] sm:$0xff]   ;;  %v1920_v0 = vld [vmem:[%s2413_s1 + $0x350] sm:$0xff]  }
  0x3a   :  { %1718 = vmatprep.subr.bf16.mxu1 %v1873_v1  ;;  %v1921_v1 = vld [vmem:[%s2413_s1 + $0x3d0] sm:$0xff]  }
  0x3c   :  { %1697 = vmatpush3.bf16.msra.mxu0 %v1874_v2  ;;  %v1922_v2 = vld [vmem:[%s2413_s1 + $0x310] sm:$0xff]  }
  0x3d   :  { %1719 = vmatpush3.bf16.msra.mxu1 %v1875_v3  ;;  %1698 = vmatprep.subr.bf16.mxu0 %v1876_v4  ;;  %v1923_v3 = vld [vmem:[%s2413_s1 + $0x390] sm:$0xff]   ;;  %v1924_v4 = vld [vmem:[%s2413_s1 + $0x358] sm:$0xff]  }
  0x3e   :  { %1720 = vmatprep.subr.bf16.mxu1 %v1877_v5  ;;  %v1925_v5 = vld [vmem:[%s2413_s1 + $0x3d8] sm:$0xff]  }
  0x40   :  { %1699 = vmatpush3.bf16.msra.mxu0 %v1878_v6  ;;  %v1926_v6 = vld [vmem:[%s2413_s1 + $0x318] sm:$0xff]  }
  0x41   :  { %1721 = vmatpush3.bf16.msra.mxu1 %v1879_v7  ;;  %1728 = vmatprep.subr.bf16.mxu0 %v1880_v16  ;;  %v1927_v7 = vld [vmem:[%s2413_s1 + $0x398] sm:$0xff]   ;;  %v1936_v16 = vld [vmem:[%s2413_s1 + $0x370] sm:$0xff]  }
  0x42   :  { %1750 = vmatprep.subr.bf16.mxu1 %v1881_v17  ;;  %v1937_v17 = vld [vmem:[%s2413_s1 + $0x3f0] sm:$0xff]  }
  0x43   :  { %1253 = vmatmul.mubr.bf16.vlgmr.msra.gmra.mrb[4].mxu0 %v1498_v10  ;;  %v1930_v10 = vld [vmem:[%s2413_s1 + $0x320] sm:$0xff]  }
  0x44   :  { %1294 = vmatmul.mubr.bf16.vlgmr.msra.gmra.mrb[4].mxu1 %v1500_v14  ;;  %1729 = vmatpush3.bf16.msra.mxu0 %v1882_v18  ;;  %v1934_v14 = vld [vmem:[%s2413_s1 + $0x328] sm:$0xff]   ;;  %v1938_v18 = vld [vmem:[%s2413_s1 + $0x330] sm:$0xff]  }
  0x45   :  { %1751 = vmatpush3.bf16.msra.mxu1 %v1883_v19  ;;  %1730 = vmatprep.subr.bf16.mxu0 %v1884_v20  ;;  %v1939_v19 = vld [vmem:[%s2413_s1 + $0x3b0] sm:$0xff]   ;;  %v1940_v20 = vld [vmem:[%s2413_s1 + $0x378] sm:$0xff]  }
  0x46   :  { %1752 = vmatprep.subr.bf16.mxu1 %v1885_v21  ;;  %1334 = vmatprep.mubr.bf16.mxu0 %v1503_v53  ;;  %v1941_v21 = vld [vmem:[%s2413_s1 + $0x3f8] sm:$0xff]  }
  0x47   :  { %1375 = vmatprep.mubr.bf16.mxu1 %v1505_v55 }
  0x48   :  { %1731 = vmatpush3.bf16.msra.mxu0 %v1886_v22  ;;  %v1942_v22 = vld [vmem:[%s2413_s1 + $0x338] sm:$0xff]  }
  0x49   :  { %1753 = vmatpush3.bf16.msra.mxu1 %v1887_v23  ;;  %1732 = vmatprep.subr.bf16.mxu0 %v1888_v24  ;;  %v1943_v23 = vld [vmem:[%s2413_s1 + $0x3b8] sm:$0xff]   ;;  %v24_v24 = vld [vmem:[%s2414_s0 + $0x30] sm:$0xff] }
  0x4a   :  { %1754 = vmatprep.subr.bf16.mxu1 %v1889_v25  ;;  %v32_v25 = vld [vmem:[%s2414_s0 + $0x70] sm:$0x11] }
  0x4c   :  { %1733 = vmatpush3.bf16.msra.mxu0 %v1890_v26  ;;  %v25_v26 = vld [vmem:[%s2414_s0 + $0x38] sm:$0xff] }
  0x4d   :  { %1755 = vmatpush3.bf16.msra.mxu1 %v1891_v27  ;;  %1734 = vmatprep.subr.bf16.mxu0 %v1892_v28  ;;  %v1506_v27 = vcombine.low %v24_v24, %v32_v25  ;;  %v1507_v28 = vcombine.high %v24_v24, %v32_v25 }
  0x4e   :  { %1756 = vmatprep.subr.bf16.mxu1 %v1893_v29  ;;  %v33_v29 = vld [vmem:[%s2414_s0 + $0x78] sm:$0x11] }
  0x50   :  { %1735 = vmatpush3.bf16.msra.mxu0 %v1894_v30  ;;  %v1508_v30 = vcombine.low %v25_v26, %v33_v29 }
  0x51   :  { %1757 = vmatpush3.bf16.msra.mxu1 %v1895_v31  ;;  %1736 = vmatprep.subr.bf16.mxu0 %v1896_v32  ;;  %v1509_v31 = vcombine.high %v25_v26, %v33_v29  ;;  %v1638_v26 = vld [vmem:[%s2415_s2] ss:$0 sm:$0xff] }
  0x52   :  { %1758 = vmatprep.subr.bf16.mxu1 %v1897_v33 }
  0x54   :  { %1737 = vmatpush3.bf16.msra.mxu0 %v1898_v34 }
  0x55   :  { %1759 = vmatpush3.bf16.msra.mxu1 %v1899_v35  ;;  %1738 = vmatprep.subr.bf16.mxu0 %v1900_v36 }
  0x56   :  { %1760 = vmatprep.subr.bf16.mxu1 %v1901_v37 }
  0x58   :  { %1739 = vmatpush3.bf16.msra.mxu0 %v1902_v38 }
  0x59   :  { %1761 = vmatpush3.bf16.msra.mxu1 %v1903_v39  ;;  %1740 = vmatprep.subr.bf16.mxu0 %v1904_v40 }
  0x5a   :  { %1762 = vmatprep.subr.bf16.mxu1 %v1905_v41 }
  0x5c   :  { %1741 = vmatpush3.bf16.msra.mxu0 %v1906_v42 }
  0x5d   :  { %1763 = vmatpush3.bf16.msra.mxu1 %v1907_v43  ;;  %1742 = vmatprep.subr.bf16.mxu0 %v1908_v44 }
  0x5e   :  { %1764 = vmatprep.subr.bf16.mxu1 %v1909_v45 }
  0x60   :  { %1743 = vmatpush3.bf16.msra.mxu0 %v1910_v46 }
  0x61   :  { %1765 = vmatpush3.bf16.msra.mxu1 %v1911_v47  ;;  %1772 = vmatprep.subr.bf16.mxu0 %v1912_v56 }
  0x62   :  { %1794 = vmatprep.subr.bf16.mxu1 %v1913_v57 }
  0x63   :  { %1335 = vmatmul.mubr.bf16.vlgmr.msra.gmra.mrb[8].mxu0 %v1502_v52 }
  0x64   :  { %1376 = vmatmul.mubr.bf16.vlgmr.msra.gmra.mrb[8].mxu1 %v1504_v54  ;;  %1773 = vmatpush3.bf16.msra.mxu0 %v1914_v58 }
  0x65   :  { %1795 = vmatpush3.bf16.msra.mxu1 %v1915_v59  ;;  %1774 = vmatprep.subr.bf16.mxu0 %v1916_v60 }
  0x66   :  { %1796 = vmatprep.subr.bf16.mxu1 %v1917_v61  ;;  %1416 = vmatprep.mubr.bf16.mxu0 %v1507_v28 }
  0x67   :  { %1457 = vmatprep.mubr.bf16.mxu1 %v1509_v31 }
  0x68   :  { %1775 = vmatpush3.bf16.msra.mxu0 %v1918_v62 }
  0x69   :  { %1797 = vmatpush3.bf16.msra.mxu1 %v1919_v63  ;;  %1776 = vmatprep.subr.bf16.mxu0 %v1920_v0 }
  0x6a   :  { %1798 = vmatprep.subr.bf16.mxu1 %v1921_v1 }
  0x6c   :  { %1777 = vmatpush3.bf16.msra.mxu0 %v1922_v2 }
  0x6d   :  { %1799 = vmatpush3.bf16.msra.mxu1 %v1923_v3  ;;  %1778 = vmatprep.subr.bf16.mxu0 %v1924_v4 }
  0x6e   :  { %1800 = vmatprep.subr.bf16.mxu1 %v1925_v5 }
  0x70   :  { %1779 = vmatpush3.bf16.msra.mxu0 %v1926_v6 }
  0x71   :  { %1801 = vmatpush3.bf16.msra.mxu1 %v1927_v7  ;;  %1780 = vmatprep.subr.bf16.mxu0 %v1928_v8 }
  0x72   :  { %1802 = vmatprep.subr.bf16.mxu1 %v1929_v9 }
  0x74   :  { %1781 = vmatpush3.bf16.msra.mxu0 %v1930_v10 }
  0x75   :  { %1803 = vmatpush3.bf16.msra.mxu1 %v1931_v11  ;;  %1782 = vmatprep.subr.bf16.mxu0 %v1932_v12 }
  0x76   :  { %1804 = vmatprep.subr.bf16.mxu1 %v1933_v13 }
  0x78   :  { %1783 = vmatpush3.bf16.msra.mxu0 %v1934_v14 }
  0x79   :  { %1805 = vmatpush3.bf16.msra.mxu1 %v1935_v15  ;;  %1784 = vmatprep.subr.bf16.mxu0 %v1936_v16 }
  0x7a   :  { %1806 = vmatprep.subr.bf16.mxu1 %v1937_v17 }
  0x7c   :  { %1785 = vmatpush3.bf16.msra.mxu0 %v1938_v18 }
  0x7d   :  { %1807 = vmatpush3.bf16.msra.mxu1 %v1939_v19  ;;  %1786 = vmatprep.subr.bf16.mxu0 %v1940_v20 }
  0x7e   :  { %1808 = vmatprep.subr.bf16.mxu1 %v1941_v21 }
  0x80   :  { %1787 = vmatpush3.bf16.msra.mxu0 %v1942_v22 }
  0x81   :  { %1809 = vmatpush3.bf16.msra.mxu1 %v1943_v23 }
  0x83   :  { %1417 = vmatmul.mubr.bf16.vlgmr.msra.gmra.mrb[12].mxu0 %v1506_v27 }
  0x84   :  { %1458 = vmatmul.mubr.bf16.vlgmr.msra.gmra.mrb[12].mxu1 %v1508_v30  ;;  %v1639_v30 = vld [vmem:[%s2416_s3] ss:$0 sm:$0xff] }
  0xf6   :  { %v1656_v32 = vpop.f32.mrb[0].mxu0 }
  0xf7   :  { %v1678_v33 = vpop.f32.mrb[0].mxu1  ;;  %v1657_v34 = vpop.f32.mrb[1].mxu0 }
  0xf8   :  { %v1658_v35 = vadd.f32 %v1657_v34, %v1656_v32  ;;  %v1679_v36 = vpop.f32.mrb[1].mxu1  ;;  %v1659_v37 = vpop.f32.mrb[2].mxu0 }
  0xf9   :  { %v1680_v38 = vadd.f32 %v1679_v36, %v1678_v33  ;;  %v1681_v39 = vpop.f32.mrb[2].mxu1  ;;  %v1660_v40 = vpop.f32.mrb[3].mxu0 }
  0xfa   :  { %v1661_v41 = vadd.f32 %v1660_v40, %v1659_v37  ;;  %v1682_v42 = vpop.f32.mrb[3].mxu1 }
  0xfb   :  { %v1214_v43 = vadd.f32 %v1680_v38, %v1658_v35  ;;  %v1683_v44 = vadd.f32 %v1682_v42, %v1681_v39 }
  0xfd   :  { %v1217_v45 = vadd.f32 %v1683_v44, %v1661_v41 }
 0x116   :  { %v1700_v46 = vpop.f32.mrb[4].mxu0 }
 0x117   :  { %v1722_v47 = vpop.f32.mrb[4].mxu1  ;;  %v1701_v48 = vpop.f32.mrb[5].mxu0 }
 0x118   :  { %v1702_v49 = vadd.f32 %v1701_v48, %v1700_v46  ;;  %v1723_v50 = vpop.f32.mrb[5].mxu1  ;;  %v1703_v51 = vpop.f32.mrb[6].mxu0 }
 0x119   :  { %v1724_v52 = vadd.f32 %v1723_v50, %v1722_v47  ;;  %v1725_v53 = vpop.f32.mrb[6].mxu1  ;;  %v1704_v54 = vpop.f32.mrb[7].mxu0 }
 0x11a   :  { %v1255_v55 = vadd.f32 %v1702_v49, %v1214_v43  ;;  %v1705_v56 = vadd.f32 %v1704_v54, %v1703_v51  ;;  %v1726_v57 = vpop.f32.mrb[7].mxu1 }
 0x11b   :  { %v1727_v58 = vadd.f32 %v1726_v57, %v1725_v53 }
 0x11c   :  { %v1296_v59 = vadd.f32 %v1724_v52, %v1255_v55  ;;  %v1258_v60 = vadd.f32 %v1705_v56, %v1217_v45 }
 0x11e   :  { %v1299_v61 = vadd.f32 %v1727_v58, %v1258_v60 }
 0x136   :  { %v1744_v62 = vpop.f32.mrb[8].mxu0 }
 0x137   :  { %v1766_v63 = vpop.f32.mrb[8].mxu1  ;;  %v1745_v0 = vpop.f32.mrb[9].mxu0 }
 0x138   :  { %v1767_v1 = vpop.f32.mrb[9].mxu1  ;;  %v1746_v2 = vadd.f32 %v1745_v0, %v1744_v62  ;;  %v1747_v4 = vpop.f32.mrb[10].mxu0 }
 0x139   :  { %v1768_v3 = vadd.f32 %v1767_v1, %v1766_v63  ;;  %v1769_v5 = vpop.f32.mrb[10].mxu1  ;;  %v1748_v6 = vpop.f32.mrb[11].mxu0 }
 0x13a   :  { %v1770_v7 = vpop.f32.mrb[11].mxu1  ;;  %v1337_v8 = vadd.f32 %v1746_v2, %v1296_v59  ;;  %v1749_v9 = vadd.f32 %v1748_v6, %v1747_v4 }
 0x13b   :  { %v1771_v10 = vadd.f32 %v1770_v7, %v1769_v5 }
 0x13c   :  { %v1378_v11 = vadd.f32 %v1768_v3, %v1337_v8  ;;  %v1340_v12 = vadd.f32 %v1749_v9, %v1299_v61 }
 0x13e   :  { %v1381_v13 = vadd.f32 %v1771_v10, %v1340_v12 }
 0x156   :  { %v1788_v14 = vpop.f32.mrb[12].mxu0 }
 0x157   :  { %v1810_v15 = vpop.f32.mrb[12].mxu1  ;;  %v1789_v16 = vpop.f32.mrb[13].mxu0 }
 0x158   :  { %v1790_v17 = vadd.f32 %v1789_v16, %v1788_v14  ;;  %v1811_v18 = vpop.f32.mrb[13].mxu1  ;;  %v1791_v19 = vpop.f32.mrb[14].mxu0 }
 0x159   :  { %v1812_v20 = vadd.f32 %v1811_v18, %v1810_v15  ;;  %v1813_v21 = vpop.f32.mrb[14].mxu1  ;;  %v1792_v22 = vpop.f32.mrb[15].mxu0 }
 0x15a   :  { %v1419_v23 = vadd.f32 %v1790_v17, %v1378_v11  ;;  %v1793_v24 = vadd.f32 %v1792_v22, %v1791_v19  ;;  %v1814_v25 = vpop.f32.mrb[15].mxu1 }
 0x15b   :  { %v1815_v27 = vadd.f32 %v1814_v25, %v1813_v21 }
 0x15c   :  { %v1460_v28 = vadd.f32 %v1812_v20, %v1419_v23  ;;  %v1422_v29 = vadd.f32 %v1793_v24, %v1381_v13 }
 0x15e   :  { %v1473_v31 = vmul.f32 %v1638_v26, %v1460_v28  ;;  %v1463_v32 = vadd.f32 %v1815_v27, %v1422_v29 }
 0x160   :  { %v1482_v33 = vadd.f32 %v1639_v30, %v1473_v31  ;;  %v1474_v34 = vmul.f32 %v1638_v26, %v1463_v32 }
 0x162   :  { %v1484_v35 = vmax.f32 %v1482_v33, 0.0  ;;  %v1483_v36 = vadd.f32 %v1639_v30, %v1474_v34 }
 0x164   :  { %1487 = vst.msk [vmem:[%s2417_s4] sm:$0xff] %vm1486_vm0, %v1484_v35  ;;  %v1485_v37 = vmax.f32 %v1483_v36, 0.0 }
 0x166   :  { %1489 = vst.msk [vmem:[%s2417_s4 + $0x8] sm:$0x3] %vm1488_vm1, %v1485_v37 }

// kernel: transformer_forward.19
= control target key start
LH: loop header
LB: loop body
LE: loop exit
PB: predicated region body
PF: predicated region fallthrough
CT: control target
= control target key end

     0   :  { %vm1486_vm0 = vcmask 523264   ;;  %vm1488_vm1 = vcmask 521216   ;;  %s2413_s1 = inlined_call_operand.vmem [shape: bf16[2048,64], index: 1, kind: input, shape index: {}]   ;;  %s2414_s0 = inlined_call_operand.vmem [shape: bf16[14,2048], index: 0, kind: input, shape index: {}]   ;;  %s2415_s2 = inlined_call_operand.vmem [shape: f32[1,64], index: 2, kind: input, shape index: {}]   ;;  %s2416_s3 = inlined_call_operand.vmem [shape: f32[1,64], index: 3, kind: input, shape index: {}]   ;;  %s2417_s4 = inlined_call_operand.vmem [shape: f32[14,64], index: 4, kind: output, shape index: {}]  }
   0x1   :  { %v1816_v0 = vld [vmem:[%s2413_s1 + $0x40] sm:$0xff]   ;;  %v1820_v4 = vld [vmem:[%s2413_s1 + $0x48] sm:$0xff]   ;;  %v1824_v8 = vld [vmem:[%s2413_s1 + $0x50] sm:$0xff]  }
   0x2   :  { %v1817_v1 = vld [vmem:[%s2413_s1 + $0xc0] sm:$0xff]   ;;  %1640 = vmatprep.subr.bf16.mxu0 %v1816_v0  ;;  %v1821_v5 = vld [vmem:[%s2413_s1 + $0xc8] sm:$0xff]   ;;  %v1825_v9 = vld [vmem:[%s2413_s1 + $0xd0] sm:$0xff]  }
   0x3   :  { %v1818_v2 = vld [vmem:[%s2413_s1] sm:$0xff]   ;;  %1662 = vmatprep.subr.bf16.mxu1 %v1817_v1  ;;  %v1822_v6 = vld [vmem:[%s2413_s1 + $0x8] sm:$0xff]   ;;  %v1826_v10 = vld [vmem:[%s2413_s1 + $0x10] sm:$0xff]  }
   0x4   :  { %v1819_v3 = vld [vmem:[%s2413_s1 + $0x80] sm:$0xff]   ;;  %1641 = vmatpush3.bf16.msra.mxu0 %v1818_v2  ;;  %v1823_v7 = vld [vmem:[%s2413_s1 + $0x88] sm:$0xff]   ;;  %v1827_v11 = vld [vmem:[%s2413_s1 + $0x90] sm:$0xff]  }
   0x5   :  { %1663 = vmatpush3.bf16.msra.mxu1 %v1819_v3  ;;  %1642 = vmatprep.subr.bf16.mxu0 %v1820_v4  ;;  %v1828_v12 = vld [vmem:[%s2413_s1 + $0x58] sm:$0xff]   ;;  %v1832_v16 = vld [vmem:[%s2413_s1 + $0x60] sm:$0xff]   ;;  %v1836_v20 = vld [vmem:[%s2413_s1 + $0x68] sm:$0xff]  }
   0x6   :  { %1664 = vmatprep.subr.bf16.mxu1 %v1821_v5  ;;  %v1829_v13 = vld [vmem:[%s2413_s1 + $0xd8] sm:$0xff]   ;;  %v1833_v17 = vld [vmem:[%s2413_s1 + $0xe0] sm:$0xff]   ;;  %v1837_v21 = vld [vmem:[%s2413_s1 + $0xe8] sm:$0xff]  }
   0x7   :  { %v1830_v14 = vld [vmem:[%s2413_s1 + $0x18] sm:$0xff]   ;;  %v1834_v18 = vld [vmem:[%s2413_s1 + $0x20] sm:$0xff]   ;;  %v1838_v22 = vld [vmem:[%s2413_s1 + $0x28] sm:$0xff]  }
   0x8   :  { %1643 = vmatpush3.bf16.msra.mxu0 %v1822_v6  ;;  %v1831_v15 = vld [vmem:[%s2413_s1 + $0x98] sm:$0xff]   ;;  %v1835_v19 = vld [vmem:[%s2413_s1 + $0xa0] sm:$0xff]   ;;  %v1839_v23 = vld [vmem:[%s2413_s1 + $0xa8] sm:$0xff]  }
   0x9   :  { %1665 = vmatpush3.bf16.msra.mxu1 %v1823_v7  ;;  %1644 = vmatprep.subr.bf16.mxu0 %v1824_v8  ;;  %v1840_v24 = vld [vmem:[%s2413_s1 + $0x70] sm:$0xff]   ;;  %v1844_v28 = vld [vmem:[%s2413_s1 + $0x78] sm:$0xff]   ;;  %v18_v32 = vld [vmem:[%s2414_s0] sm:$0xff] }
   0xa   :  { %1666 = vmatprep.subr.bf16.mxu1 %v1825_v9  ;;  %v1841_v25 = vld [vmem:[%s2413_s1 + $0xf0] sm:$0xff]   ;;  %v1845_v29 = vld [vmem:[%s2413_s1 + $0xf8] sm:$0xff]   ;;  %v26_v33 = vld [vmem:[%s2414_s0 + $0x40] sm:$0x77] }
   0xb   :  { %v1842_v26 = vld [vmem:[%s2413_s1 + $0x30] sm:$0xff]   ;;  %v1846_v30 = vld [vmem:[%s2413_s1 + $0x38] sm:$0xff]   ;;  %v19_v34 = vld [vmem:[%s2414_s0 + $0x8] sm:$0xff]  ;;  %v1494_v35 = vcombine.low %v18_v32, %v26_v33  ;;  %v1495_v36 = vcombine.high %v18_v32, %v26_v33 }
   0xc   :  { %1645 = vmatpush3.bf16.msra.mxu0 %v1826_v10  ;;  %v1843_v27 = vld [vmem:[%s2413_s1 + $0xb0] sm:$0xff]   ;;  %v1847_v31 = vld [vmem:[%s2413_s1 + $0xb8] sm:$0xff]   ;;  %v27_v37 = vld [vmem:[%s2414_s0 + $0x48] sm:$0x77] }
   0xd   :  { %1667 = vmatpush3.bf16.msra.mxu1 %v1827_v11  ;;  %1646 = vmatprep.subr.bf16.mxu0 %v1828_v12  ;;  %v1496_v38 = vcombine.low %v19_v34, %v27_v37  ;;  %v1497_v39 = vcombine.high %v19_v34, %v27_v37  ;;  %v1848_v40 = vld [vmem:[%s2413_s1 + $0x140] sm:$0xff]   ;;  %v1852_v44 = vld [vmem:[%s2413_s1 + $0x148] sm:$0xff]   ;;  %v1856_v48 = vld [vmem:[%s2413_s1 + $0x150] sm:$0xff]  }
   0xe   :  { %1668 = vmatprep.subr.bf16.mxu1 %v1829_v13  ;;  %1170 = vmatprep.mubr.bf16.mxu0 %v1495_v36  ;;  %v1849_v41 = vld [vmem:[%s2413_s1 + $0x1c0] sm:$0xff]   ;;  %v1853_v45 = vld [vmem:[%s2413_s1 + $0x1c8] sm:$0xff]   ;;  %v1857_v49 = vld [vmem:[%s2413_s1 + $0x1d0] sm:$0xff]  }
   0xf   :  { %1211 = vmatprep.mubr.bf16.mxu1 %v1497_v39  ;;  %v1850_v42 = vld [vmem:[%s2413_s1 + $0x100] sm:$0xff]   ;;  %v1854_v46 = vld [vmem:[%s2413_s1 + $0x108] sm:$0xff]   ;;  %v1858_v50 = vld [vmem:[%s2413_s1 + $0x110] sm:$0xff]  }
  0x10   :  { %1647 = vmatpush3.bf16.msra.mxu0 %v1830_v14  ;;  %v1851_v43 = vld [vmem:[%s2413_s1 + $0x180] sm:$0xff]   ;;  %v1855_v47 = vld [vmem:[%s2413_s1 + $0x188] sm:$0xff]   ;;  %v1859_v51 = vld [vmem:[%s2413_s1 + $0x190] sm:$0xff]  }
  0x11   :  { %1669 = vmatpush3.bf16.msra.mxu1 %v1831_v15  ;;  %1648 = vmatprep.subr.bf16.mxu0 %v1832_v16  ;;  %v1860_v52 = vld [vmem:[%s2413_s1 + $0x158] sm:$0xff]   ;;  %v1864_v56 = vld [vmem:[%s2413_s1 + $0x160] sm:$0xff]   ;;  %v1868_v60 = vld [vmem:[%s2413_s1 + $0x168] sm:$0xff]  }
  0x12   :  { %1670 = vmatprep.subr.bf16.mxu1 %v1833_v17  ;;  %v1861_v53 = vld [vmem:[%s2413_s1 + $0x1d8] sm:$0xff]   ;;  %v1865_v57 = vld [vmem:[%s2413_s1 + $0x1e0] sm:$0xff]   ;;  %v1869_v61 = vld [vmem:[%s2413_s1 + $0x1e8] sm:$0xff]  }
  0x13   :  { %v1862_v54 = vld [vmem:[%s2413_s1 + $0x118] sm:$0xff]   ;;  %v1866_v58 = vld [vmem:[%s2413_s1 + $0x120] sm:$0xff]   ;;  %v1870_v62 = vld [vmem:[%s2413_s1 + $0x128] sm:$0xff]  }
  0x14   :  { %1649 = vmatpush3.bf16.msra.mxu0 %v1834_v18  ;;  %v1863_v55 = vld [vmem:[%s2413_s1 + $0x198] sm:$0xff]   ;;  %v1867_v59 = vld [vmem:[%s2413_s1 + $0x1a0] sm:$0xff]   ;;  %v1871_v63 = vld [vmem:[%s2413_s1 + $0x1a8] sm:$0xff]  }
  0x15   :  { %1671 = vmatpush3.bf16.msra.mxu1 %v1835_v19  ;;  %1650 = vmatprep.subr.bf16.mxu0 %v1836_v20  ;;  %v1872_v0 = vld [vmem:[%s2413_s1 + $0x170] sm:$0xff]   ;;  %v1876_v4 = vld [vmem:[%s2413_s1 + $0x178] sm:$0xff]   ;;  %v1880_v16 = vld [vmem:[%s2413_s1 + $0x240] sm:$0xff]  }
  0x16   :  { %1672 = vmatprep.subr.bf16.mxu1 %v1837_v21  ;;  %v1873_v1 = vld [vmem:[%s2413_s1 + $0x1f0] sm:$0xff]   ;;  %v1877_v5 = vld [vmem:[%s2413_s1 + $0x1f8] sm:$0xff]   ;;  %v1881_v17 = vld [vmem:[%s2413_s1 + $0x2c0] sm:$0xff]  }
  0x17   :  { %v1874_v2 = vld [vmem:[%s2413_s1 + $0x130] sm:$0xff]   ;;  %v1878_v6 = vld [vmem:[%s2413_s1 + $0x138] sm:$0xff]   ;;  %v1882_v18 = vld [vmem:[%s2413_s1 + $0x200] sm:$0xff]  }
  0x18   :  { %1651 = vmatpush3.bf16.msra.mxu0 %v1838_v22  ;;  %v1875_v3 = vld [vmem:[%s2413_s1 + $0x1b0] sm:$0xff]   ;;  %v1879_v7 = vld [vmem:[%s2413_s1 + $0x1b8] sm:$0xff]   ;;  %v1883_v19 = vld [vmem:[%s2413_s1 + $0x280] sm:$0xff]  }
  0x19   :  { %1673 = vmatpush3.bf16.msra.mxu1 %v1839_v23  ;;  %1652 = vmatprep.subr.bf16.mxu0 %v1840_v24  ;;  %v20_v8 = vld [vmem:[%s2414_s0 + $0x10] sm:$0xff]  ;;  %v21_v12 = vld [vmem:[%s2414_s0 + $0x18] sm:$0xff]  ;;  %v1884_v20 = vld [vmem:[%s2413_s1 + $0x248] sm:$0xff]  }
  0x1a   :  { %1674 = vmatprep.subr.bf16.mxu1 %v1841_v25  ;;  %v28_v9 = vld [vmem:[%s2414_s0 + $0x50] sm:$0x77]  ;;  %v29_v13 = vld [vmem:[%s2414_s0 + $0x58] sm:$0x77]  ;;  %v1885_v21 = vld [vmem:[%s2413_s1 + $0x2c8] sm:$0xff]  }
  0x1b   :  { %v1498_v10 = vcombine.low %v20_v8, %v28_v9  ;;  %v1499_v11 = vcombine.high %v20_v8, %v28_v9  ;;  %v1500_v14 = vcombine.low %v21_v12, %v29_v13  ;;  %v1501_v15 = vcombine.high %v21_v12, %v29_v13  ;;  %v1886_v22 = vld [vmem:[%s2413_s1 + $0x208] sm:$0xff]   ;;  %v1888_v24 = vld [vmem:[%s2413_s1 + $0x250] sm:$0xff]   ;;  %v1896_v32 = vld [vmem:[%s2413_s1 + $0x260] sm:$0xff]  }
  0x1c   :  { %1653 = vmatpush3.bf16.msra.mxu0 %v1842_v26  ;;  %v1887_v23 = vld [vmem:[%s2413_s1 + $0x288] sm:$0xff]   ;;  %v1889_v25 = vld [vmem:[%s2413_s1 + $0x2d0] sm:$0xff]   ;;  %v1897_v33 = vld [vmem:[%s2413_s1 + $0x2e0] sm:$0xff]  }
  0x1d   :  { %1675 = vmatpush3.bf16.msra.mxu1 %v1843_v27  ;;  %1654 = vmatprep.subr.bf16.mxu0 %v1844_v28  ;;  %v1890_v26 = vld [vmem:[%s2413_s1 + $0x210] sm:$0xff]   ;;  %v1892_v28 = vld [vmem:[%s2413_s1 + $0x258] sm:$0xff]   ;;  %v1898_v34 = vld [vmem:[%s2413_s1 + $0x220] sm:$0xff]  }
  0x1e   :  { %1676 = vmatprep.subr.bf16.mxu1 %v1845_v29  ;;  %v1891_v27 = vld [vmem:[%s2413_s1 + $0x290] sm:$0xff]   ;;  %v1893_v29 = vld [vmem:[%s2413_s1 + $0x2d8] sm:$0xff]   ;;  %v1900_v36 = vld [vmem:[%s2413_s1 + $0x268] sm:$0xff]  }
  0x1f   :  { %v1901_v37 = vld [vmem:[%s2413_s1 + $0x2e8] sm:$0xff]   ;;  %v1928_v8 = vld [vmem:[%s2413_s1 + $0x360] sm:$0xff]  }
  0x20   :  { %1655 = vmatpush3.bf16.msra.mxu0 %v1846_v30  ;;  %v1894_v30 = vld [vmem:[%s2413_s1 + $0x218] sm:$0xff]   ;;  %v1903_v39 = vld [vmem:[%s2413_s1 + $0x2a8] sm:$0xff]   ;;  %v1929_v9 = vld [vmem:[%s2413_s1 + $0x3e0] sm:$0xff]  }
  0x21   :  { %1677 = vmatpush3.bf16.msra.mxu1 %v1847_v31  ;;  %1684 = vmatprep.subr.bf16.mxu0 %v1848_v40  ;;  %v1895_v31 = vld [vmem:[%s2413_s1 + $0x298] sm:$0xff]   ;;  %v1904_v40 = vld [vmem:[%s2413_s1 + $0x270] sm:$0xff]   ;;  %v1932_v12 = vld [vmem:[%s2413_s1 + $0x368] sm:$0xff]  }
  0x22   :  { %1706 = vmatprep.subr.bf16.mxu1 %v1849_v41  ;;  %v1905_v41 = vld [vmem:[%s2413_s1 + $0x2f0] sm:$0xff]   ;;  %v1933_v13 = vld [vmem:[%s2413_s1 + $0x3e8] sm:$0xff]  }
  0x23   :  { %1171 = vmatmul.mubr.bf16.vlgmr.msra.gmra.mrb[0].mxu0 %v1494_v35  ;;  %v1899_v35 = vld [vmem:[%s2413_s1 + $0x2a0] sm:$0xff]  }
  0x24   :  { %1212 = vmatmul.mubr.bf16.vlgmr.msra.gmra.mrb[0].mxu1 %v1496_v38  ;;  %1685 = vmatpush3.bf16.msra.mxu0 %v1850_v42  ;;  %v1902_v38 = vld [vmem:[%s2413_s1 + $0x228] sm:$0xff]   ;;  %v1906_v42 = vld [vmem:[%s2413_s1 + $0x230] sm:$0xff]  }
  0x25   :  { %1707 = vmatpush3.bf16.msra.mxu1 %v1851_v43  ;;  %1686 = vmatprep.subr.bf16.mxu0 %v1852_v44  ;;  %v1907_v43 = vld [vmem:[%s2413_s1 + $0x2b0] sm:$0xff]   ;;  %v1908_v44 = vld [vmem:[%s2413_s1 + $0x278] sm:$0xff]  }
  0x26   :  { %1708 = vmatprep.subr.bf16.mxu1 %v1853_v45  ;;  %1252 = vmatprep.mubr.bf16.mxu0 %v1499_v11  ;;  %v1909_v45 = vld [vmem:[%s2413_s1 + $0x2f8] sm:$0xff]   ;;  %v1931_v11 = vld [vmem:[%s2413_s1 + $0x3a0] sm:$0xff]  }
  0x27   :  { %1293 = vmatprep.mubr.bf16.mxu1 %v1501_v15  ;;  %v1935_v15 = vld [vmem:[%s2413_s1 + $0x3a8] sm:$0xff]  }
  0x28   :  { %1687 = vmatpush3.bf16.msra.mxu0 %v1854_v46  ;;  %v1910_v46 = vld [vmem:[%s2413_s1 + $0x238] sm:$0xff]  }
  0x29   :  { %1709 = vmatpush3.bf16.msra.mxu1 %v1855_v47  ;;  %1688 = vmatprep.subr.bf16.mxu0 %v1856_v48  ;;  %v1911_v47 = vld [vmem:[%s2413_s1 + $0x2b8] sm:$0xff]   ;;  %v22_v48 = vld [vmem:[%s2414_s0 + $0x20] sm:$0xff] }
  0x2a   :  { %1710 = vmatprep.subr.bf16.mxu1 %v1857_v49  ;;  %v30_v49 = vld [vmem:[%s2414_s0 + $0x60] sm:$0x77] }
  0x2c   :  { %1689 = vmatpush3.bf16.msra.mxu0 %v1858_v50  ;;  %v23_v50 = vld [vmem:[%s2414_s0 + $0x28] sm:$0xff] }
  0x2d   :  { %1711 = vmatpush3.bf16.msra.mxu1 %v1859_v51  ;;  %1690 = vmatprep.subr.bf16.mxu0 %v1860_v52  ;;  %v31_v51 = vld [vmem:[%s2414_s0 + $0x68] sm:$0x77]  ;;  %v1502_v52 = vcombine.low %v22_v48, %v30_v49 }
  0x2e   :  { %1712 = vmatprep.subr.bf16.mxu1 %v1861_v53  ;;  %v1503_v53 = vcombine.high %v22_v48, %v30_v49 }
  0x30   :  { %1691 = vmatpush3.bf16.msra.mxu0 %v1862_v54  ;;  %v1504_v54 = vcombine.low %v23_v50, %v31_v51 }
  0x31   :  { %1713 = vmatpush3.bf16.msra.mxu1 %v1863_v55  ;;  %1692 = vmatprep.subr.bf16.mxu0 %v1864_v56  ;;  %v1505_v55 = vcombine.high %v23_v50, %v31_v51  ;;  %v1912_v56 = vld [vmem:[%s2413_s1 + $0x340] sm:$0xff]  }
  0x32   :  { %1714 = vmatprep.subr.bf16.mxu1 %v1865_v57  ;;  %v1913_v57 = vld [vmem:[%s2413_s1 + $0x3c0] sm:$0xff]  }
  0x34   :  { %1693 = vmatpush3.bf16.msra.mxu0 %v1866_v58  ;;  %v1914_v58 = vld [vmem:[%s2413_s1 + $0x300] sm:$0xff]  }
  0x35   :  { %1715 = vmatpush3.bf16.msra.mxu1 %v1867_v59  ;;  %1694 = vmatprep.subr.bf16.mxu0 %v1868_v60  ;;  %v1915_v59 = vld [vmem:[%s2413_s1 + $0x380] sm:$0xff]   ;;  %v1916_v60 = vld [vmem:[%s2413_s1 + $0x348] sm:$0xff]  }
  0x36   :  { %1716 = vmatprep.subr.bf16.mxu1 %v1869_v61  ;;  %v1917_v61 = vld [vmem:[%s2413_s1 + $0x3c8] sm:$0xff]  }
  0x38   :  { %1695 = vmatpush3.bf16.msra.mxu0 %v1870_v62  ;;  %v1918_v62 = vld [vmem:[%s2413_s1 + $0x308] sm:$0xff]  }
  0x39   :  { %1717 = vmatpush3.bf16.msra.mxu1 %v1871_v63  ;;  %1696 = vmatprep.subr.bf16.mxu0 %v1872_v0  ;;  %v1919_v63 = vld [vmem:[%s2413_s1 + $0x388] sm:$0xff]   ;;  %v1920_v0 = vld [vmem:[%s2413_s1 + $0x350] sm:$0xff]  }
  0x3a   :  { %1718 = vmatprep.subr.bf16.mxu1 %v1873_v1  ;;  %v1921_v1 = vld [vmem:[%s2413_s1 + $0x3d0] sm:$0xff]  }
  0x3c   :  { %1697 = vmatpush3.bf16.msra.mxu0 %v1874_v2  ;;  %v1922_v2 = vld [vmem:[%s2413_s1 + $0x310] sm:$0xff]  }
  0x3d   :  { %1719 = vmatpush3.bf16.msra.mxu1 %v1875_v3  ;;  %1698 = vmatprep.subr.bf16.mxu0 %v1876_v4  ;;  %v1923_v3 = vld [vmem:[%s2413_s1 + $0x390] sm:$0xff]   ;;  %v1924_v4 = vld [vmem:[%s2413_s1 + $0x358] sm:$0xff]  }
  0x3e   :  { %1720 = vmatprep.subr.bf16.mxu1 %v1877_v5  ;;  %v1925_v5 = vld [vmem:[%s2413_s1 + $0x3d8] sm:$0xff]  }
  0x40   :  { %1699 = vmatpush3.bf16.msra.mxu0 %v1878_v6  ;;  %v1926_v6 = vld [vmem:[%s2413_s1 + $0x318] sm:$0xff]  }
  0x41   :  { %1721 = vmatpush3.bf16.msra.mxu1 %v1879_v7  ;;  %1728 = vmatprep.subr.bf16.mxu0 %v1880_v16  ;;  %v1927_v7 = vld [vmem:[%s2413_s1 + $0x398] sm:$0xff]   ;;  %v1936_v16 = vld [vmem:[%s2413_s1 + $0x370] sm:$0xff]  }
  0x42   :  { %1750 = vmatprep.subr.bf16.mxu1 %v1881_v17  ;;  %v1937_v17 = vld [vmem:[%s2413_s1 + $0x3f0] sm:$0xff]  }
  0x43   :  { %1253 = vmatmul.mubr.bf16.vlgmr.msra.gmra.mrb[4].mxu0 %v1498_v10  ;;  %v1930_v10 = vld [vmem:[%s2413_s1 + $0x320] sm:$0xff]  }
  0x44   :  { %1294 = vmatmul.mubr.bf16.vlgmr.msra.gmra.mrb[4].mxu1 %v1500_v14  ;;  %1729 = vmatpush3.bf16.msra.mxu0 %v1882_v18  ;;  %v1934_v14 = vld [vmem:[%s2413_s1 + $0x328] sm:$0xff]   ;;  %v1938_v18 = vld [vmem:[%s2413_s1 + $0x330] sm:$0xff]  }
  0x45   :  { %1751 = vmatpush3.bf16.msra.mxu1 %v1883_v19  ;;  %1730 = vmatprep.subr.bf16.mxu0 %v1884_v20  ;;  %v1939_v19 = vld [vmem:[%s2413_s1 + $0x3b0] sm:$0xff]   ;;  %v1940_v20 = vld [vmem:[%s2413_s1 + $0x378] sm:$0xff]  }
  0x46   :  { %1752 = vmatprep.subr.bf16.mxu1 %v1885_v21  ;;  %1334 = vmatprep.mubr.bf16.mxu0 %v1503_v53  ;;  %v1941_v21 = vld [vmem:[%s2413_s1 + $0x3f8] sm:$0xff]  }
  0x47   :  { %1375 = vmatprep.mubr.bf16.mxu1 %v1505_v55 }
  0x48   :  { %1731 = vmatpush3.bf16.msra.mxu0 %v1886_v22  ;;  %v1942_v22 = vld [vmem:[%s2413_s1 + $0x338] sm:$0xff]  }
  0x49   :  { %1753 = vmatpush3.bf16.msra.mxu1 %v1887_v23  ;;  %1732 = vmatprep.subr.bf16.mxu0 %v1888_v24  ;;  %v1943_v23 = vld [vmem:[%s2413_s1 + $0x3b8] sm:$0xff]   ;;  %v24_v24 = vld [vmem:[%s2414_s0 + $0x30] sm:$0xff] }
  0x4a   :  { %1754 = vmatprep.subr.bf16.mxu1 %v1889_v25  ;;  %v32_v25 = vld [vmem:[%s2414_s0 + $0x70] sm:$0x77] }
  0x4c   :  { %1733 = vmatpush3.bf16.msra.mxu0 %v1890_v26  ;;  %v25_v26 = vld [vmem:[%s2414_s0 + $0x38] sm:$0xff] }
  0x4d   :  { %1755 = vmatpush3.bf16.msra.mxu1 %v1891_v27  ;;  %1734 = vmatprep.subr.bf16.mxu0 %v1892_v28  ;;  %v1506_v27 = vcombine.low %v24_v24, %v32_v25  ;;  %v1507_v28 = vcombine.high %v24_v24, %v32_v25 }
  0x4e   :  { %1756 = vmatprep.subr.bf16.mxu1 %v1893_v29  ;;  %v33_v29 = vld [vmem:[%s2414_s0 + $0x78] sm:$0x77] }
  0x50   :  { %1735 = vmatpush3.bf16.msra.mxu0 %v1894_v30  ;;  %v1508_v30 = vcombine.low %v25_v26, %v33_v29 }
  0x51   :  { %1757 = vmatpush3.bf16.msra.mxu1 %v1895_v31  ;;  %1736 = vmatprep.subr.bf16.mxu0 %v1896_v32  ;;  %v1509_v31 = vcombine.high %v25_v26, %v33_v29  ;;  %v1638_v26 = vld [vmem:[%s2415_s2] ss:$0 sm:$0xff] }
  0x52   :  { %1758 = vmatprep.subr.bf16.mxu1 %v1897_v33 }
  0x54   :  { %1737 = vmatpush3.bf16.msra.mxu0 %v1898_v34 }
  0x55   :  { %1759 = vmatpush3.bf16.msra.mxu1 %v1899_v35  ;;  %1738 = vmatprep.subr.bf16.mxu0 %v1900_v36 }
  0x56   :  { %1760 = vmatprep.subr.bf16.mxu1 %v1901_v37 }
  0x58   :  { %1739 = vmatpush3.bf16.msra.mxu0 %v1902_v38 }
  0x59   :  { %1761 = vmatpush3.bf16.msra.mxu1 %v1903_v39  ;;  %1740 = vmatprep.subr.bf16.mxu0 %v1904_v40 }
  0x5a   :  { %1762 = vmatprep.subr.bf16.mxu1 %v1905_v41 }
  0x5c   :  { %1741 = vmatpush3.bf16.msra.mxu0 %v1906_v42 }
  0x5d   :  { %1763 = vmatpush3.bf16.msra.mxu1 %v1907_v43  ;;  %1742 = vmatprep.subr.bf16.mxu0 %v1908_v44 }
  0x5e   :  { %1764 = vmatprep.subr.bf16.mxu1 %v1909_v45 }
  0x60   :  { %1743 = vmatpush3.bf16.msra.mxu0 %v1910_v46 }
  0x61   :  { %1765 = vmatpush3.bf16.msra.mxu1 %v1911_v47  ;;  %1772 = vmatprep.subr.bf16.mxu0 %v1912_v56 }
  0x62   :  { %1794 = vmatprep.subr.bf16.mxu1 %v1913_v57 }
  0x63   :  { %1335 = vmatmul.mubr.bf16.vlgmr.msra.gmra.mrb[8].mxu0 %v1502_v52 }
  0x64   :  { %1376 = vmatmul.mubr.bf16.vlgmr.msra.gmra.mrb[8].mxu1 %v1504_v54  ;;  %1773 = vmatpush3.bf16.msra.mxu0 %v1914_v58 }
  0x65   :  { %1795 = vmatpush3.bf16.msra.mxu1 %v1915_v59  ;;  %1774 = vmatprep.subr.bf16.mxu0 %v1916_v60 }
  0x66   :  { %1796 = vmatprep.subr.bf16.mxu1 %v1917_v61  ;;  %1416 = vmatprep.mubr.bf16.mxu0 %v1507_v28 }
  0x67   :  { %1457 = vmatprep.mubr.bf16.mxu1 %v1509_v31 }
  0x68   :  { %1775 = vmatpush3.bf16.msra.mxu0 %v1918_v62 }
  0x69   :  { %1797 = vmatpush3.bf16.msra.mxu1 %v1919_v63  ;;  %1776 = vmatprep.subr.bf16.mxu0 %v1920_v0 }
  0x6a   :  { %1798 = vmatprep.subr.bf16.mxu1 %v1921_v1 }
  0x6c   :  { %1777 = vmatpush3.bf16.msra.mxu0 %v1922_v2 }
  0x6d   :  { %1799 = vmatpush3.bf16.msra.mxu1 %v1923_v3  ;;  %1778 = vmatprep.subr.bf16.mxu0 %v1924_v4 }
  0x6e   :  { %1800 = vmatprep.subr.bf16.mxu1 %v1925_v5 }
  0x70   :  { %1779 = vmatpush3.bf16.msra.mxu0 %v1926_v6 }
  0x71   :  { %1801 = vmatpush3.bf16.msra.mxu1 %v1927_v7  ;;  %1780 = vmatprep.subr.bf16.mxu0 %v1928_v8 }
  0x72   :  { %1802 = vmatprep.subr.bf16.mxu1 %v1929_v9 }
  0x74   :  { %1781 = vmatpush3.bf16.msra.mxu0 %v1930_v10 }
  0x75   :  { %1803 = vmatpush3.bf16.msra.mxu1 %v1931_v11  ;;  %1782 = vmatprep.subr.bf16.mxu0 %v1932_v12 }
  0x76   :  { %1804 = vmatprep.subr.bf16.mxu1 %v1933_v13 }
  0x78   :  { %1783 = vmatpush3.bf16.msra.mxu0 %v1934_v14 }
  0x79   :  { %1805 = vmatpush3.bf16.msra.mxu1 %v1935_v15  ;;  %1784 = vmatprep.subr.bf16.mxu0 %v1936_v16 }
  0x7a   :  { %1806 = vmatprep.subr.bf16.mxu1 %v1937_v17 }
  0x7c   :  { %1785 = vmatpush3.bf16.msra.mxu0 %v1938_v18 }
  0x7d   :  { %1807 = vmatpush3.bf16.msra.mxu1 %v1939_v19  ;;  %1786 = vmatprep.subr.bf16.mxu0 %v1940_v20 }
  0x7e   :  { %1808 = vmatprep.subr.bf16.mxu1 %v1941_v21 }
  0x80   :  { %1787 = vmatpush3.bf16.msra.mxu0 %v1942_v22 }
  0x81   :  { %1809 = vmatpush3.bf16.msra.mxu1 %v1943_v23 }
  0x83   :  { %1417 = vmatmul.mubr.bf16.vlgmr.msra.gmra.mrb[12].mxu0 %v1506_v27 }
  0x84   :  { %1458 = vmatmul.mubr.bf16.vlgmr.msra.gmra.mrb[12].mxu1 %v1508_v30  ;;  %v1639_v30 = vld [vmem:[%s2416_s3] ss:$0 sm:$0xff] }
  0xf6   :  { %v1656_v32 = vpop.f32.mrb[0].mxu0 }
  0xf7   :  { %v1678_v33 = vpop.f32.mrb[0].mxu1  ;;  %v1657_v34 = vpop.f32.mrb[1].mxu0 }
  0xf8   :  { %v1658_v35 = vadd.f32 %v1657_v34, %v1656_v32  ;;  %v1679_v36 = vpop.f32.mrb[1].mxu1  ;;  %v1659_v37 = vpop.f32.mrb[2].mxu0 }
  0xf9   :  { %v1680_v38 = vadd.f32 %v1679_v36, %v1678_v33  ;;  %v1681_v39 = vpop.f32.mrb[2].mxu1  ;;  %v1660_v40 = vpop.f32.mrb[3].mxu0 }
  0xfa   :  { %v1661_v41 = vadd.f32 %v1660_v40, %v1659_v37  ;;  %v1682_v42 = vpop.f32.mrb[3].mxu1 }
  0xfb   :  { %v1214_v43 = vadd.f32 %v1680_v38, %v1658_v35  ;;  %v1683_v44 = vadd.f32 %v1682_v42, %v1681_v39 }
  0xfd   :  { %v1217_v45 = vadd.f32 %v1683_v44, %v1661_v41 }
 0x116   :  { %v1700_v46 = vpop.f32.mrb[4].mxu0 }
 0x117   :  { %v1722_v47 = vpop.f32.mrb[4].mxu1  ;;  %v1701_v48 = vpop.f32.mrb[5].mxu0 }
 0x118   :  { %v1702_v49 = vadd.f32 %v1701_v48, %v1700_v46  ;;  %v1723_v50 = vpop.f32.mrb[5].mxu1  ;;  %v1703_v51 = vpop.f32.mrb[6].mxu0 }
 0x119   :  { %v1724_v52 = vadd.f32 %v1723_v50, %v1722_v47  ;;  %v1725_v53 = vpop.f32.mrb[6].mxu1  ;;  %v1704_v54 = vpop.f32.mrb[7].mxu0 }
 0x11a   :  { %v1255_v55 = vadd.f32 %v1702_v49, %v1214_v43  ;;  %v1705_v56 = vadd.f32 %v1704_v54, %v1703_v51  ;;  %v1726_v57 = vpop.f32.mrb[7].mxu1 }
 0x11b   :  { %v1727_v58 = vadd.f32 %v1726_v57, %v1725_v53 }
 0x11c   :  { %v1296_v59 = vadd.f32 %v1724_v52, %v1255_v55  ;;  %v1258_v60 = vadd.f32 %v1705_v56, %v1217_v45 }
 0x11e   :  { %v1299_v61 = vadd.f32 %v1727_v58, %v1258_v60 }
 0x136   :  { %v1744_v62 = vpop.f32.mrb[8].mxu0 }
 0x137   :  { %v1766_v63 = vpop.f32.mrb[8].mxu1  ;;  %v1745_v0 = vpop.f32.mrb[9].mxu0 }
 0x138   :  { %v1767_v1 = vpop.f32.mrb[9].mxu1  ;;  %v1746_v2 = vadd.f32 %v1745_v0, %v1744_v62  ;;  %v1747_v4 = vpop.f32.mrb[10].mxu0 }
 0x139   :  { %v1768_v3 = vadd.f32 %v1767_v1, %v1766_v63  ;;  %v1769_v5 = vpop.f32.mrb[10].mxu1  ;;  %v1748_v6 = vpop.f32.mrb[11].mxu0 }
 0x13a   :  { %v1770_v7 = vpop.f32.mrb[11].mxu1  ;;  %v1337_v8 = vadd.f32 %v1746_v2, %v1296_v59  ;;  %v1749_v9 = vadd.f32 %v1748_v6, %v1747_v4 }
 0x13b   :  { %v1771_v10 = vadd.f32 %v1770_v7, %v1769_v5 }
 0x13c   :  { %v1378_v11 = vadd.f32 %v1768_v3, %v1337_v8  ;;  %v1340_v12 = vadd.f32 %v1749_v9, %v1299_v61 }
 0x13e   :  { %v1381_v13 = vadd.f32 %v1771_v10, %v1340_v12 }
 0x156   :  { %v1788_v14 = vpop.f32.mrb[12].mxu0 }
 0x157   :  { %v1810_v15 = vpop.f32.mrb[12].mxu1  ;;  %v1789_v16 = vpop.f32.mrb[13].mxu0 }
 0x158   :  { %v1790_v17 = vadd.f32 %v1789_v16, %v1788_v14  ;;  %v1811_v18 = vpop.f32.mrb[13].mxu1  ;;  %v1791_v19 = vpop.f32.mrb[14].mxu0 }
 0x159   :  { %v1812_v20 = vadd.f32 %v1811_v18, %v1810_v15  ;;  %v1813_v21 = vpop.f32.mrb[14].mxu1  ;;  %v1792_v22 = vpop.f32.mrb[15].mxu0 }
 0x15a   :  { %v1419_v23 = vadd.f32 %v1790_v17, %v1378_v11  ;;  %v1793_v24 = vadd.f32 %v1792_v22, %v1791_v19  ;;  %v1814_v25 = vpop.f32.mrb[15].mxu1 }
 0x15b   :  { %v1815_v27 = vadd.f32 %v1814_v25, %v1813_v21 }
 0x15c   :  { %v1460_v28 = vadd.f32 %v1812_v20, %v1419_v23  ;;  %v1422_v29 = vadd.f32 %v1793_v24, %v1381_v13 }
 0x15e   :  { %v1473_v31 = vmul.f32 %v1638_v26, %v1460_v28  ;;  %v1463_v32 = vadd.f32 %v1815_v27, %v1422_v29 }
 0x160   :  { %v1482_v33 = vadd.f32 %v1639_v30, %v1473_v31  ;;  %v1474_v34 = vmul.f32 %v1638_v26, %v1463_v32 }
 0x162   :  { %v1484_v35 = vmax.f32 %v1482_v33, 0.0  ;;  %v1483_v36 = vadd.f32 %v1639_v30, %v1474_v34 }
 0x164   :  { %1487 = vst.msk [vmem:[%s2417_s4] sm:$0xff] %vm1486_vm0, %v1484_v35  ;;  %v1485_v37 = vmax.f32 %v1483_v36, 0.0 }
 0x166   :  { %1489 = vst.msk [vmem:[%s2417_s4 + $0x8] sm:$0x3f] %vm1488_vm1, %v1485_v37 }

// kernel: transformer_forward.21
= control target key start
LH: loop header
LB: loop body
LE: loop exit
PB: predicated region body
PF: predicated region fallthrough
CT: control target
= control target key end

     0   :  { %vm1609_vm0 = vcmask 523264   ;;  %vm1612_vm1 = vcmask 517120   ;;  %s2644_s1 = inlined_call_operand.vmem [shape: bf16[2048,64], index: 1, kind: input, shape index: {}]   ;;  %s2645_s0 = inlined_call_operand.vmem [shape: bf16[18,2048], index: 0, kind: input, shape index: {}]   ;;  %s2646_s2 = inlined_call_operand.vmem [shape: f32[1,64], index: 2, kind: input, shape index: {}]   ;;  %s2647_s3 = inlined_call_operand.vmem [shape: f32[1,64], index: 3, kind: input, shape index: {}]   ;;  %s2648_s4 = inlined_call_operand.vmem [shape: f32[18,64], index: 4, kind: output, shape index: {}]  }
   0x1   :  { %v2004_v0 = vld [vmem:[%s2644_s1 + $0x40] sm:$0xff]   ;;  %v2008_v4 = vld [vmem:[%s2644_s1 + $0x48] sm:$0xff]   ;;  %v2012_v8 = vld [vmem:[%s2644_s1 + $0x50] sm:$0xff]  }
   0x2   :  { %v2005_v1 = vld [vmem:[%s2644_s1 + $0xc0] sm:$0xff]   ;;  %1780 = vmatprep.subr.bf16.mxu0 %v2004_v0  ;;  %v2009_v5 = vld [vmem:[%s2644_s1 + $0xc8] sm:$0xff]   ;;  %v2013_v9 = vld [vmem:[%s2644_s1 + $0xd0] sm:$0xff]  }
   0x3   :  { %v2006_v2 = vld [vmem:[%s2644_s1] sm:$0xff]   ;;  %1808 = vmatprep.subr.bf16.mxu1 %v2005_v1  ;;  %v2010_v6 = vld [vmem:[%s2644_s1 + $0x8] sm:$0xff]   ;;  %v2014_v10 = vld [vmem:[%s2644_s1 + $0x10] sm:$0xff]  }
   0x4   :  { %v2007_v3 = vld [vmem:[%s2644_s1 + $0x80] sm:$0xff]   ;;  %1781 = vmatpush3.bf16.msra.mxu0 %v2006_v2  ;;  %v2011_v7 = vld [vmem:[%s2644_s1 + $0x88] sm:$0xff]   ;;  %v2015_v11 = vld [vmem:[%s2644_s1 + $0x90] sm:$0xff]  }
   0x5   :  { %1809 = vmatpush3.bf16.msra.mxu1 %v2007_v3  ;;  %1782 = vmatprep.subr.bf16.mxu0 %v2008_v4  ;;  %v2016_v12 = vld [vmem:[%s2644_s1 + $0x58] sm:$0xff]   ;;  %v2020_v16 = vld [vmem:[%s2644_s1 + $0x60] sm:$0xff]   ;;  %v2024_v20 = vld [vmem:[%s2644_s1 + $0x68] sm:$0xff]  }
   0x6   :  { %1810 = vmatprep.subr.bf16.mxu1 %v2009_v5  ;;  %v2017_v13 = vld [vmem:[%s2644_s1 + $0xd8] sm:$0xff]   ;;  %v2021_v17 = vld [vmem:[%s2644_s1 + $0xe0] sm:$0xff]   ;;  %v2025_v21 = vld [vmem:[%s2644_s1 + $0xe8] sm:$0xff]  }
   0x7   :  { %v2018_v14 = vld [vmem:[%s2644_s1 + $0x18] sm:$0xff]   ;;  %v2022_v18 = vld [vmem:[%s2644_s1 + $0x20] sm:$0xff]   ;;  %v2026_v22 = vld [vmem:[%s2644_s1 + $0x28] sm:$0xff]  }
   0x8   :  { %1783 = vmatpush3.bf16.msra.mxu0 %v2010_v6  ;;  %v2019_v15 = vld [vmem:[%s2644_s1 + $0x98] sm:$0xff]   ;;  %v2023_v19 = vld [vmem:[%s2644_s1 + $0xa0] sm:$0xff]   ;;  %v2027_v23 = vld [vmem:[%s2644_s1 + $0xa8] sm:$0xff]  }
   0x9   :  { %1811 = vmatpush3.bf16.msra.mxu1 %v2011_v7  ;;  %1784 = vmatprep.subr.bf16.mxu0 %v2012_v8  ;;  %v2028_v24 = vld [vmem:[%s2644_s1 + $0x70] sm:$0xff]   ;;  %v2032_v28 = vld [vmem:[%s2644_s1 + $0x78] sm:$0xff]   ;;  %v18_v32 = vld [vmem:[%s2645_s0] sm:$0xff] }
   0xa   :  { %1812 = vmatprep.subr.bf16.mxu1 %v2013_v9  ;;  %v2029_v25 = vld [vmem:[%s2644_s1 + $0xf0] sm:$0xff]   ;;  %v2033_v29 = vld [vmem:[%s2644_s1 + $0xf8] sm:$0xff]   ;;  %v26_v33 = vld [vmem:[%s2645_s0 + $0x40] sm:$0xff] }
   0xb   :  { %v2030_v26 = vld [vmem:[%s2644_s1 + $0x30] sm:$0xff]   ;;  %v2034_v30 = vld [vmem:[%s2644_s1 + $0x38] sm:$0xff]   ;;  %v19_v34 = vld [vmem:[%s2645_s0 + $0x8] sm:$0xff]  ;;  %v1618_v35 = vcombine.low %v18_v32, %v26_v33  ;;  %v1619_v36 = vcombine.high %v18_v32, %v26_v33 }
   0xc   :  { %1785 = vmatpush3.bf16.msra.mxu0 %v2014_v10  ;;  %v2031_v27 = vld [vmem:[%s2644_s1 + $0xb0] sm:$0xff]   ;;  %v2035_v31 = vld [vmem:[%s2644_s1 + $0xb8] sm:$0xff]   ;;  %v27_v37 = vld [vmem:[%s2645_s0 + $0x48] sm:$0xff] }
   0xd   :  { %1813 = vmatpush3.bf16.msra.mxu1 %v2015_v11  ;;  %1786 = vmatprep.subr.bf16.mxu0 %v2016_v12  ;;  %v1620_v38 = vcombine.low %v19_v34, %v27_v37  ;;  %v1621_v39 = vcombine.high %v19_v34, %v27_v37  ;;  %v2036_v40 = vld [vmem:[%s2644_s1 + $0x140] sm:$0xff]   ;;  %v2040_v44 = vld [vmem:[%s2644_s1 + $0x148] sm:$0xff]   ;;  %v2044_v48 = vld [vmem:[%s2644_s1 + $0x150] sm:$0xff]  }
   0xe   :  { %1814 = vmatprep.subr.bf16.mxu1 %v2017_v13  ;;  %1234 = vmatprep.mubr.bf16.mxu0 %v1619_v36  ;;  %v2037_v41 = vld [vmem:[%s2644_s1 + $0x1c0] sm:$0xff]   ;;  %v2041_v45 = vld [vmem:[%s2644_s1 + $0x1c8] sm:$0xff]   ;;  %v2045_v49 = vld [vmem:[%s2644_s1 + $0x1d0] sm:$0xff]  }
   0xf   :  { %1282 = vmatprep.mubr.bf16.mxu1 %v1621_v39  ;;  %v2038_v42 = vld [vmem:[%s2644_s1 + $0x100] sm:$0xff]   ;;  %v2042_v46 = vld [vmem:[%s2644_s1 + $0x108] sm:$0xff]   ;;  %v2046_v50 = vld [vmem:[%s2644_s1 + $0x110] sm:$0xff]  }
  0x10   :  { %1787 = vmatpush3.bf16.msra.mxu0 %v2018_v14  ;;  %v2039_v43 = vld [vmem:[%s2644_s1 + $0x180] sm:$0xff]   ;;  %v2043_v47 = vld [vmem:[%s2644_s1 + $0x188] sm:$0xff]   ;;  %v2047_v51 = vld [vmem:[%s2644_s1 + $0x190] sm:$0xff]  }
  0x11   :  { %1815 = vmatpush3.bf16.msra.mxu1 %v2019_v15  ;;  %1788 = vmatprep.subr.bf16.mxu0 %v2020_v16  ;;  %v2048_v52 = vld [vmem:[%s2644_s1 + $0x158] sm:$0xff]   ;;  %v2052_v56 = vld [vmem:[%s2644_s1 + $0x160] sm:$0xff]   ;;  %v2056_v60 = vld [vmem:[%s2644_s1 + $0x168] sm:$0xff]  }
  0x12   :  { %1816 = vmatprep.subr.bf16.mxu1 %v2021_v17  ;;  %v2049_v53 = vld [vmem:[%s2644_s1 + $0x1d8] sm:$0xff]   ;;  %v2053_v57 = vld [vmem:[%s2644_s1 + $0x1e0] sm:$0xff]   ;;  %v2057_v61 = vld [vmem:[%s2644_s1 + $0x1e8] sm:$0xff]  }
  0x13   :  { %v2050_v54 = vld [vmem:[%s2644_s1 + $0x118] sm:$0xff]   ;;  %v2054_v58 = vld [vmem:[%s2644_s1 + $0x120] sm:$0xff]   ;;  %v2059_v0 = vld [vmem:[%s2644_s1 + $0x128] sm:$0xff]  }
  0x14   :  { %1789 = vmatpush3.bf16.msra.mxu0 %v2022_v18  ;;  %v2051_v55 = vld [vmem:[%s2644_s1 + $0x198] sm:$0xff]   ;;  %v2055_v59 = vld [vmem:[%s2644_s1 + $0x1a0] sm:$0xff]   ;;  %v2060_v2 = vld [vmem:[%s2644_s1 + $0x1a8] sm:$0xff]  }
  0x15   :  { %1817 = vmatpush3.bf16.msra.mxu1 %v2023_v19  ;;  %1790 = vmatprep.subr.bf16.mxu0 %v2024_v20  ;;  %v34_v62 = vld [vmem:[%s2645_s0 + $0x80] sm:$0x11]  ;;  %v35_v3 = vld [vmem:[%s2645_s0 + $0x88] sm:$0x11]  ;;  %v2064_v6 = vld [vmem:[%s2644_s1 + $0x170] sm:$0xff]  }
  0x16   :  { %1818 = vmatprep.subr.bf16.mxu1 %v2025_v21  ;;  %v1635_v63 = vcombine.high %v34_v62, %v34_v62  ;;  %v1634_v1 = vcombine.low %v34_v62, %v34_v62  ;;  %v1637_v4 = vcombine.high %v35_v3, %v35_v3  ;;  %v1636_v5 = vcombine.low %v35_v3, %v35_v3  ;;  %v2065_v7 = vld [vmem:[%s2644_s1 + $0x1f0] sm:$0xff]   ;;  %v2068_v10 = vld [vmem:[%s2644_s1 + $0x178] sm:$0xff]   ;;  %v23_v62 = vld [vmem:[%s2645_s0 + $0x28] sm:$0xff] }
  0x17   :  { %v2066_v8 = vld [vmem:[%s2644_s1 + $0x130] sm:$0xff]   ;;  %v2069_v11 = vld [vmem:[%s2644_s1 + $0x1f8] sm:$0xff]  }
  0x18   :  { %1791 = vmatpush3.bf16.msra.mxu0 %v2026_v22  ;;  %v2067_v9 = vld [vmem:[%s2644_s1 + $0x1b0] sm:$0xff]   ;;  %v2070_v12 = vld [vmem:[%s2644_s1 + $0x138] sm:$0xff]   ;;  %v2072_v22 = vld [vmem:[%s2644_s1 + $0x240] sm:$0xff]  }
  0x19   :  { %1819 = vmatpush3.bf16.msra.mxu1 %v2027_v23  ;;  %1792 = vmatprep.subr.bf16.mxu0 %v2028_v24  ;;  %v2071_v13 = vld [vmem:[%s2644_s1 + $0x1b8] sm:$0xff]   ;;  %v20_v14 = vld [vmem:[%s2645_s0 + $0x10] sm:$0xff]  ;;  %v2073_v23 = vld [vmem:[%s2644_s1 + $0x2c0] sm:$0xff]  }
  0x1a   :  { %1820 = vmatprep.subr.bf16.mxu1 %v2029_v25  ;;  %v28_v15 = vld [vmem:[%s2645_s0 + $0x50] sm:$0xff]  ;;  %v21_v16 = vld [vmem:[%s2645_s0 + $0x18] sm:$0xff]  ;;  %v2074_v24 = vld [vmem:[%s2644_s1 + $0x200] sm:$0xff]  }
  0x1b   :  { %v1622_v17 = vcombine.low %v20_v14, %v28_v15  ;;  %v1623_v18 = vcombine.high %v20_v14, %v28_v15  ;;  %v29_v19 = vld [vmem:[%s2645_s0 + $0x58] sm:$0xff]  ;;  %v2075_v25 = vld [vmem:[%s2644_s1 + $0x280] sm:$0xff]   ;;  %v2082_v33 = vld [vmem:[%s2644_s1 + $0x250] sm:$0xff]  }
  0x1c   :  { %1793 = vmatpush3.bf16.msra.mxu0 %v2030_v26  ;;  %v1624_v20 = vcombine.low %v21_v16, %v29_v19  ;;  %v1625_v21 = vcombine.high %v21_v16, %v29_v19  ;;  %v2076_v26 = vld [vmem:[%s2644_s1 + $0x248] sm:$0xff]   ;;  %v2083_v34 = vld [vmem:[%s2644_s1 + $0x2d0] sm:$0xff]  }
  0x1d   :  { %1821 = vmatpush3.bf16.msra.mxu1 %v2031_v27  ;;  %1794 = vmatprep.subr.bf16.mxu0 %v2032_v28  ;;  %v2077_v27 = vld [vmem:[%s2644_s1 + $0x2c8] sm:$0xff]   ;;  %v2085_v37 = vld [vmem:[%s2644_s1 + $0x210] sm:$0xff]  }
  0x1e   :  { %1822 = vmatprep.subr.bf16.mxu1 %v2033_v29  ;;  %v2078_v28 = vld [vmem:[%s2644_s1 + $0x208] sm:$0xff]   ;;  %v2086_v39 = vld [vmem:[%s2644_s1 + $0x290] sm:$0xff]  }
  0x1f   :  { %v2079_v29 = vld [vmem:[%s2644_s1 + $0x288] sm:$0xff]   ;;  %v2118_v15 = vld [vmem:[%s2644_s1 + $0x350] sm:$0xff]  }
  0x20   :  { %1795 = vmatpush3.bf16.msra.mxu0 %v2034_v30  ;;  %v36_v30 = vld [vmem:[%s2645_s0 + $0x90] sm:$0x11] }
  0x21   :  { %1823 = vmatpush3.bf16.msra.mxu1 %v2035_v31  ;;  %1836 = vmatprep.subr.bf16.mxu0 %v2036_v40  ;;  %v1639_v31 = vcombine.high %v36_v30, %v36_v30  ;;  %v1638_v32 = vcombine.low %v36_v30, %v36_v30  ;;  %v2088_v40 = vld [vmem:[%s2644_s1 + $0x258] sm:$0xff]   ;;  %v2119_v16 = vld [vmem:[%s2644_s1 + $0x3d0] sm:$0xff]   ;;  %v2132_v30 = vld [vmem:[%s2644_s1 + $0x368] sm:$0xff]  }
  0x22   :  { %1864 = vmatprep.subr.bf16.mxu1 %v2037_v41  ;;  %v2089_v41 = vld [vmem:[%s2644_s1 + $0x2d8] sm:$0xff]   ;;  %v2121_v19 = vld [vmem:[%s2644_s1 + $0x310] sm:$0xff]  }
  0x23   :  { %1235 = vmatmul.mubr.bf16.vlgmr.msra.gmra.mrb[0].mxu0 %v1618_v35  ;;  %v37_v35 = vld [vmem:[%s2645_s0 + $0x98] sm:$0x11] }
  0x24   :  { %1283 = vmatmul.mubr.bf16.vlgmr.msra.gmra.mrb[0].mxu1 %v1620_v38  ;;  %1837 = vmatpush3.bf16.msra.mxu0 %v2038_v42  ;;  %v1641_v36 = vcombine.high %v37_v35, %v37_v35  ;;  %v1640_v38 = vcombine.low %v37_v35, %v37_v35  ;;  %v2090_v42 = vld [vmem:[%s2644_s1 + $0x218] sm:$0xff]   ;;  %v2137_v35 = vld [vmem:[%s2644_s1 + $0x3f0] sm:$0xff]  }
  0x25   :  { %1865 = vmatpush3.bf16.msra.mxu1 %v2039_v43  ;;  %1838 = vmatprep.subr.bf16.mxu0 %v2040_v44  ;;  %v2091_v43 = vld [vmem:[%s2644_s1 + $0x298] sm:$0xff]   ;;  %v2092_v44 = vld [vmem:[%s2644_s1 + $0x260] sm:$0xff]  }
  0x26   :  { %1866 = vmatprep.subr.bf16.mxu1 %v2041_v45  ;;  %1242 = vmatprep.mubr.bf16.mxu0 %v1635_v63  ;;  %v2093_v45 = vld [vmem:[%s2644_s1 + $0x2e0] sm:$0xff]  }
  0x27   :  { %1290 = vmatprep.mubr.bf16.mxu1 %v1637_v4  ;;  %v2108_v4 = vld [vmem:[%s2644_s1 + $0x340] sm:$0xff]  }
  0x28   :  { %1839 = vmatpush3.bf16.msra.mxu0 %v2042_v46  ;;  %v2094_v46 = vld [vmem:[%s2644_s1 + $0x220] sm:$0xff]  }
  0x29   :  { %1867 = vmatpush3.bf16.msra.mxu1 %v2043_v47  ;;  %1840 = vmatprep.subr.bf16.mxu0 %v2044_v48  ;;  %v2095_v47 = vld [vmem:[%s2644_s1 + $0x2a0] sm:$0xff]   ;;  %v2096_v48 = vld [vmem:[%s2644_s1 + $0x268] sm:$0xff]  }
  0x2a   :  { %1868 = vmatprep.subr.bf16.mxu1 %v2045_v49  ;;  %v2097_v49 = vld [vmem:[%s2644_s1 + $0x2e8] sm:$0xff]  }
  0x2b   :  { %1243 = vmatmul.mubr.bf16.gmra.mrb[4].mxu0 %v1634_v1  ;;  %v31_v1 = vld [vmem:[%s2645_s0 + $0x68] sm:$0xff] }
  0x2c   :  { %1841 = vmatpush3.bf16.msra.mxu0 %v2046_v50  ;;  %1291 = vmatmul.mubr.bf16.gmra.mrb[4].mxu1 %v1636_v5  ;;  %v2098_v50 = vld [vmem:[%s2644_s1 + $0x228] sm:$0xff]   ;;  %v1629_v3 = vcombine.high %v23_v62, %v31_v1  ;;  %v2109_v5 = vld [vmem:[%s2644_s1 + $0x3c0] sm:$0xff]  }
  0x2d   :  { %1869 = vmatpush3.bf16.msra.mxu1 %v2047_v51  ;;  %1842 = vmatprep.subr.bf16.mxu0 %v2048_v52  ;;  %v2099_v51 = vld [vmem:[%s2644_s1 + $0x2a8] sm:$0xff]   ;;  %v2100_v52 = vld [vmem:[%s2644_s1 + $0x270] sm:$0xff]  }
  0x2e   :  { %1870 = vmatprep.subr.bf16.mxu1 %v2049_v53  ;;  %1330 = vmatprep.mubr.bf16.mxu0 %v1623_v18  ;;  %v2101_v53 = vld [vmem:[%s2644_s1 + $0x2f0] sm:$0xff]  }
  0x2f   :  { %1378 = vmatprep.mubr.bf16.mxu1 %v1625_v21  ;;  %v2122_v21 = vld [vmem:[%s2644_s1 + $0x390] sm:$0xff]  }
  0x30   :  { %1843 = vmatpush3.bf16.msra.mxu0 %v2050_v54  ;;  %v2102_v54 = vld [vmem:[%s2644_s1 + $0x230] sm:$0xff]  }
  0x31   :  { %1871 = vmatpush3.bf16.msra.mxu1 %v2051_v55  ;;  %1844 = vmatprep.subr.bf16.mxu0 %v2052_v56  ;;  %v2103_v55 = vld [vmem:[%s2644_s1 + $0x2b0] sm:$0xff]   ;;  %v2104_v56 = vld [vmem:[%s2644_s1 + $0x278] sm:$0xff]  }
  0x32   :  { %1872 = vmatprep.subr.bf16.mxu1 %v2053_v57  ;;  %v2105_v57 = vld [vmem:[%s2644_s1 + $0x2f8] sm:$0xff]  }
  0x34   :  { %1845 = vmatpush3.bf16.msra.mxu0 %v2054_v58  ;;  %v2106_v58 = vld [vmem:[%s2644_s1 + $0x238] sm:$0xff]  }
  0x35   :  { %1873 = vmatpush3.bf16.msra.mxu1 %v2055_v59  ;;  %1846 = vmatprep.subr.bf16.mxu0 %v2056_v60  ;;  %v2107_v59 = vld [vmem:[%s2644_s1 + $0x2b8] sm:$0xff]   ;;  %v22_v60 = vld [vmem:[%s2645_s0 + $0x20] sm:$0xff] }
  0x36   :  { %1874 = vmatprep.subr.bf16.mxu1 %v2057_v61  ;;  %v30_v61 = vld [vmem:[%s2645_s0 + $0x60] sm:$0xff] }
  0x37   :  { %v1626_v63 = vcombine.low %v22_v60, %v30_v61 }
  0x38   :  { %1847 = vmatpush3.bf16.msra.mxu0 %v2059_v0  ;;  %v1627_v0 = vcombine.high %v22_v60, %v30_v61 }
  0x39   :  { %1875 = vmatpush3.bf16.msra.mxu1 %v2060_v2  ;;  %1848 = vmatprep.subr.bf16.mxu0 %v2064_v6  ;;  %v1628_v2 = vcombine.low %v23_v62, %v31_v1  ;;  %v2110_v6 = vld [vmem:[%s2644_s1 + $0x300] sm:$0xff]  }
  0x3a   :  { %1876 = vmatprep.subr.bf16.mxu1 %v2065_v7  ;;  %v2111_v7 = vld [vmem:[%s2644_s1 + $0x380] sm:$0xff]  }
  0x3c   :  { %1849 = vmatpush3.bf16.msra.mxu0 %v2066_v8  ;;  %v2112_v8 = vld [vmem:[%s2644_s1 + $0x348] sm:$0xff]  }
  0x3d   :  { %1877 = vmatpush3.bf16.msra.mxu1 %v2067_v9  ;;  %1850 = vmatprep.subr.bf16.mxu0 %v2068_v10  ;;  %v2113_v9 = vld [vmem:[%s2644_s1 + $0x3c8] sm:$0xff]  }
  0x3e   :  { %1878 = vmatprep.subr.bf16.mxu1 %v2069_v11  ;;  %v2114_v10 = vld [vmem:[%s2644_s1 + $0x308] sm:$0xff]  }
  0x3f   :  { %v2115_v11 = vld [vmem:[%s2644_s1 + $0x388] sm:$0xff]  }
  0x40   :  { %1851 = vmatpush3.bf16.msra.mxu0 %v2070_v12  ;;  %v38_v12 = vld [vmem:[%s2645_s0 + $0xa0] sm:$0x11] }
  0x41   :  { %1879 = vmatpush3.bf16.msra.mxu1 %v2071_v13  ;;  %1892 = vmatprep.subr.bf16.mxu0 %v2072_v22  ;;  %v1643_v13 = vcombine.high %v38_v12, %v38_v12  ;;  %v1642_v14 = vcombine.low %v38_v12, %v38_v12  ;;  %v2124_v22 = vld [vmem:[%s2644_s1 + $0x358] sm:$0xff]  }
  0x42   :  { %1920 = vmatprep.subr.bf16.mxu1 %v2073_v23  ;;  %v2125_v23 = vld [vmem:[%s2644_s1 + $0x3d8] sm:$0xff]  }
  0x43   :  { %1331 = vmatmul.mubr.bf16.vlgmr.msra.gmra.mrb[8].mxu0 %v1622_v17  ;;  %v39_v17 = vld [vmem:[%s2645_s0 + $0xa8] sm:$0x11] }
  0x44   :  { %1379 = vmatmul.mubr.bf16.vlgmr.msra.gmra.mrb[8].mxu1 %v1624_v20  ;;  %1893 = vmatpush3.bf16.msra.mxu0 %v2074_v24  ;;  %v1645_v18 = vcombine.high %v39_v17, %v39_v17  ;;  %v1644_v20 = vcombine.low %v39_v17, %v39_v17  ;;  %v2126_v24 = vld [vmem:[%s2644_s1 + $0x318] sm:$0xff]  }
  0x45   :  { %1921 = vmatpush3.bf16.msra.mxu1 %v2075_v25  ;;  %1894 = vmatprep.subr.bf16.mxu0 %v2076_v26  ;;  %v2127_v25 = vld [vmem:[%s2644_s1 + $0x398] sm:$0xff]   ;;  %v2128_v26 = vld [vmem:[%s2644_s1 + $0x360] sm:$0xff]  }
  0x46   :  { %1922 = vmatprep.subr.bf16.mxu1 %v2077_v27  ;;  %1338 = vmatprep.mubr.bf16.mxu0 %v1639_v31  ;;  %v2129_v27 = vld [vmem:[%s2644_s1 + $0x3e0] sm:$0xff]   ;;  %v2133_v31 = vld [vmem:[%s2644_s1 + $0x3e8] sm:$0xff]  }
  0x47   :  { %1386 = vmatprep.mubr.bf16.mxu1 %v1641_v36  ;;  %v2138_v36 = vld [vmem:[%s2644_s1 + $0x330] sm:$0xff]  }
  0x48   :  { %1895 = vmatpush3.bf16.msra.mxu0 %v2078_v28  ;;  %v2130_v28 = vld [vmem:[%s2644_s1 + $0x320] sm:$0xff]  }
  0x49   :  { %1923 = vmatpush3.bf16.msra.mxu1 %v2079_v29  ;;  %1896 = vmatprep.subr.bf16.mxu0 %v2082_v33  ;;  %v2131_v29 = vld [vmem:[%s2644_s1 + $0x3a0] sm:$0xff]   ;;  %v2135_v33 = vld [vmem:[%s2644_s1 + $0x3a8] sm:$0xff]  }
  0x4a   :  { %1924 = vmatprep.subr.bf16.mxu1 %v2083_v34  ;;  %v2136_v34 = vld [vmem:[%s2644_s1 + $0x370] sm:$0xff]  }
  0x4b   :  { %1339 = vmatmul.mubr.bf16.gmra.mrb[12].mxu0 %v1638_v32  ;;  %v2134_v32 = vld [vmem:[%s2644_s1 + $0x328] sm:$0xff]  }
  0x4c   :  { %1897 = vmatpush3.bf16.msra.mxu0 %v2085_v37  ;;  %1387 = vmatmul.mubr.bf16.gmra.mrb[12].mxu1 %v1640_v38  ;;  %v2139_v37 = vld [vmem:[%s2644_s1 + $0x3b0] sm:$0xff]   ;;  %v2140_v38 = vld [vmem:[%s2644_s1 + $0x378] sm:$0xff]  }
  0x4d   :  { %1925 = vmatpush3.bf16.msra.mxu1 %v2086_v39  ;;  %1898 = vmatprep.subr.bf16.mxu0 %v2088_v40  ;;  %v2141_v39 = vld [vmem:[%s2644_s1 + $0x3f8] sm:$0xff]  }
  0x4e   :  { %1926 = vmatprep.subr.bf16.mxu1 %v2089_v41  ;;  %1426 = vmatprep.mubr.bf16.mxu0 %v1627_v0  ;;  %v2142_v40 = vld [vmem:[%s2644_s1 + $0x338] sm:$0xff]  }
  0x4f   :  { %1474 = vmatprep.mubr.bf16.mxu1 %v1629_v3  ;;  %v2143_v41 = vld [vmem:[%s2644_s1 + $0x3b8] sm:$0xff]  }
  0x50   :  { %1899 = vmatpush3.bf16.msra.mxu0 %v2090_v42  ;;  %v24_v42 = vld [vmem:[%s2645_s0 + $0x30] sm:$0xff] }
  0x51   :  { %1927 = vmatpush3.bf16.msra.mxu1 %v2091_v43  ;;  %1900 = vmatprep.subr.bf16.mxu0 %v2092_v44  ;;  %v32_v43 = vld [vmem:[%s2645_s0 + $0x70] sm:$0xff]  ;;  %v25_v44 = vld [vmem:[%s2645_s0 + $0x38] sm:$0xff] }
  0x52   :  { %1928 = vmatprep.subr.bf16.mxu1 %v2093_v45  ;;  %v1630_v45 = vcombine.low %v24_v42, %v32_v43 }
  0x54   :  { %1901 = vmatpush3.bf16.msra.mxu0 %v2094_v46  ;;  %v1631_v46 = vcombine.high %v24_v42, %v32_v43 }
  0x55   :  { %1929 = vmatpush3.bf16.msra.mxu1 %v2095_v47  ;;  %1902 = vmatprep.subr.bf16.mxu0 %v2096_v48  ;;  %v33_v47 = vld [vmem:[%s2645_s0 + $0x78] sm:$0xff]  ;;  %v40_v48 = vld [vmem:[%s2645_s0 + $0xb0] sm:$0x11] }
  0x56   :  { %1930 = vmatprep.subr.bf16.mxu1 %v2097_v49  ;;  %v41_v49 = vld [vmem:[%s2645_s0 + $0xb8] sm:$0x11] }
  0x58   :  { %1903 = vmatpush3.bf16.msra.mxu0 %v2098_v50  ;;  %v1632_v50 = vcombine.low %v25_v44, %v33_v47 }
  0x59   :  { %1931 = vmatpush3.bf16.msra.mxu1 %v2099_v51  ;;  %1904 = vmatprep.subr.bf16.mxu0 %v2100_v52  ;;  %v1633_v51 = vcombine.high %v25_v44, %v33_v47  ;;  %v1647_v52 = vcombine.high %v40_v48, %v40_v48 }
  0x5a   :  { %1932 = vmatprep.subr.bf16.mxu1 %v2101_v53  ;;  %v1649_v53 = vcombine.high %v41_v49, %v41_v49 }
  0x5c   :  { %1905 = vmatpush3.bf16.msra.mxu0 %v2102_v54  ;;  %v1646_v54 = vcombine.low %v40_v48, %v40_v48 }
  0x5d   :  { %1933 = vmatpush3.bf16.msra.mxu1 %v2103_v55  ;;  %1906 = vmatprep.subr.bf16.mxu0 %v2104_v56  ;;  %v1648_v55 = vcombine.low %v41_v49, %v41_v49 }
  0x5e   :  { %1934 = vmatprep.subr.bf16.mxu1 %v2105_v57 }
  0x60   :  { %1907 = vmatpush3.bf16.msra.mxu0 %v2106_v58 }
  0x61   :  { %1935 = vmatpush3.bf16.msra.mxu1 %v2107_v59  ;;  %1948 = vmatprep.subr.bf16.mxu0 %v2108_v4 }
  0x62   :  { %1976 = vmatprep.subr.bf16.mxu1 %v2109_v5 }
  0x63   :  { %1427 = vmatmul.mubr.bf16.vlgmr.msra.gmra.mrb[16].mxu0 %v1626_v63 }
  0x64   :  { %1475 = vmatmul.mubr.bf16.vlgmr.msra.gmra.mrb[16].mxu1 %v1628_v2  ;;  %1949 = vmatpush3.bf16.msra.mxu0 %v2110_v6 }
  0x65   :  { %1977 = vmatpush3.bf16.msra.mxu1 %v2111_v7  ;;  %1950 = vmatprep.subr.bf16.mxu0 %v2112_v8 }
  0x66   :  { %1978 = vmatprep.subr.bf16.mxu1 %v2113_v9  ;;  %1434 = vmatprep.mubr.bf16.mxu0 %v1643_v13 }
  0x67   :  { %1482 = vmatprep.mubr.bf16.mxu1 %v1645_v18 }
  0x68   :  { %1951 = vmatpush3.bf16.msra.mxu0 %v2114_v10 }
  0x69   :  { %1979 = vmatpush3.bf16.msra.mxu1 %v2115_v11  ;;  %1952 = vmatprep.subr.bf16.mxu0 %v2118_v15 }
  0x6a   :  { %1980 = vmatprep.subr.bf16.mxu1 %v2119_v16 }
  0x6b   :  { %1435 = vmatmul.mubr.bf16.gmra.mrb[20].mxu0 %v1642_v14 }
  0x6c   :  { %1953 = vmatpush3.bf16.msra.mxu0 %v2121_v19  ;;  %1483 = vmatmul.mubr.bf16.gmra.mrb[20].mxu1 %v1644_v20 }
  0x6d   :  { %1981 = vmatpush3.bf16.msra.mxu1 %v2122_v21  ;;  %1954 = vmatprep.subr.bf16.mxu0 %v2124_v22 }
  0x6e   :  { %1982 = vmatprep.subr.bf16.mxu1 %v2125_v23  ;;  %1522 = vmatprep.mubr.bf16.mxu0 %v1631_v46 }
  0x6f   :  { %1570 = vmatprep.mubr.bf16.mxu1 %v1633_v51 }
  0x70   :  { %1955 = vmatpush3.bf16.msra.mxu0 %v2126_v24 }
  0x71   :  { %1983 = vmatpush3.bf16.msra.mxu1 %v2127_v25  ;;  %1956 = vmatprep.subr.bf16.mxu0 %v2128_v26 }
  0x72   :  { %1984 = vmatprep.subr.bf16.mxu1 %v2129_v27 }
  0x74   :  { %1957 = vmatpush3.bf16.msra.mxu0 %v2130_v28 }
  0x75   :  { %1985 = vmatpush3.bf16.msra.mxu1 %v2131_v29  ;;  %1958 = vmatprep.subr.bf16.mxu0 %v2132_v30 }
  0x76   :  { %1986 = vmatprep.subr.bf16.mxu1 %v2133_v31 }
  0x78   :  { %1959 = vmatpush3.bf16.msra.mxu0 %v2134_v32 }
  0x79   :  { %1987 = vmatpush3.bf16.msra.mxu1 %v2135_v33  ;;  %1960 = vmatprep.subr.bf16.mxu0 %v2136_v34 }
  0x7a   :  { %1988 = vmatprep.subr.bf16.mxu1 %v2137_v35 }
  0x7c   :  { %1961 = vmatpush3.bf16.msra.mxu0 %v2138_v36 }
  0x7d   :  { %1989 = vmatpush3.bf16.msra.mxu1 %v2139_v37  ;;  %1962 = vmatprep.subr.bf16.mxu0 %v2140_v38 }
  0x7e   :  { %1990 = vmatprep.subr.bf16.mxu1 %v2141_v39 }
  0x80   :  { %1963 = vmatpush3.bf16.msra.mxu0 %v2142_v40 }
  0x81   :  { %1991 = vmatpush3.bf16.msra.mxu1 %v2143_v41 }
  0x83   :  { %1523 = vmatmul.mubr.bf16.vlgmr.msra.gmra.mrb[24].mxu0 %v1630_v45 }
  0x84   :  { %1571 = vmatmul.mubr.bf16.vlgmr.msra.gmra.mrb[24].mxu1 %v1632_v50  ;;  %1530 = vmatprep.mubr.bf16.mxu0 %v1647_v52 }
  0x85   :  { %1578 = vmatprep.mubr.bf16.mxu1 %v1649_v53 }
  0x8b   :  { %1531 = vmatmul.mubr.bf16.gmra.mrb[28].mxu0 %v1646_v54 }
  0x8c   :  { %1579 = vmatmul.mubr.bf16.gmra.mrb[28].mxu1 %v1648_v55 }
  0xf6   :  { %v1796_v56 = vpop.f32.mrb[0].mxu0 }
  0xf7   :  { %v1824_v57 = vpop.f32.mrb[0].mxu1  ;;  %v1797_v58 = vpop.f32.mrb[1].mxu0 }
  0xf8   :  { %v1798_v59 = vadd.f32 %v1797_v58, %v1796_v56  ;;  %v1825_v60 = vpop.f32.mrb[1].mxu1  ;;  %v1799_v61 = vpop.f32.mrb[2].mxu0 }
  0xf9   :  { %v1826_v62 = vadd.f32 %v1825_v60, %v1824_v57  ;;  %v1827_v63 = vpop.f32.mrb[2].mxu1  ;;  %v1800_v0 = vpop.f32.mrb[3].mxu0 }
  0xfa   :  { %v1801_v1 = vadd.f32 %v1800_v0, %v1799_v61  ;;  %v1828_v2 = vpop.f32.mrb[3].mxu1 }
  0xfb   :  { %v1285_v3 = vadd.f32 %v1826_v62, %v1798_v59  ;;  %v1829_v4 = vadd.f32 %v1828_v2, %v1827_v63 }
  0xfd   :  { %v1288_v5 = vadd.f32 %v1829_v4, %v1801_v1 }
  0xfe   :  { %v1802_v6 = vpop.f32.mrb[4].mxu0 }
  0xff   :  { %v1803_v7 = vpop.f32.mrb[5].mxu0  ;;  %v1830_v10 = vpop.f32.mrb[4].mxu1 }
 0x100   :  { %v1804_v8 = vadd.f32 %v1803_v7, %v1802_v6  ;;  %v1805_v9 = vpop.f32.mrb[6].mxu0  ;;  %v1831_v12 = vpop.f32.mrb[5].mxu1 }
 0x101   :  { %v1806_v11 = vpop.f32.mrb[7].mxu0  ;;  %v1832_v13 = vadd.f32 %v1831_v12, %v1830_v10  ;;  %v1833_v14 = vpop.f32.mrb[6].mxu1 }
 0x102   :  { %v1834_v15 = vpop.f32.mrb[7].mxu1 }
 0x103   :  { %v1293_v16 = vadd.f32 %v1832_v13, %v1804_v8 }
 0x116   :  { %v1852_v17 = vpop.f32.mrb[8].mxu0 }
 0x117   :  { %v1880_v18 = vpop.f32.mrb[8].mxu1  ;;  %v1853_v19 = vpop.f32.mrb[9].mxu0 }
 0x118   :  { %v1854_v20 = vadd.f32 %v1853_v19, %v1852_v17  ;;  %v1881_v21 = vpop.f32.mrb[9].mxu1  ;;  %v1855_v22 = vpop.f32.mrb[10].mxu0 }
 0x119   :  { %v1882_v23 = vadd.f32 %v1881_v21, %v1880_v18  ;;  %v1883_v24 = vpop.f32.mrb[10].mxu1  ;;  %v1856_v25 = vpop.f32.mrb[11].mxu0  ;;  %v1778_v21 = vld [vmem:[%s2646_s2] ss:$0 sm:$0xff] }
 0x11a   :  { %v1333_v26 = vadd.f32 %v1854_v20, %v1285_v3  ;;  %v1857_v27 = vadd.f32 %v1856_v25, %v1855_v22  ;;  %v1884_v28 = vpop.f32.mrb[11].mxu1  ;;  %v1779_v25 = vld [vmem:[%s2647_s3] ss:$0 sm:$0xff] }
 0x11b   :  { %v1885_v29 = vadd.f32 %v1884_v28, %v1883_v24 }
 0x11c   :  { %v1381_v30 = vadd.f32 %v1882_v23, %v1333_v26  ;;  %v1336_v31 = vadd.f32 %v1857_v27, %v1288_v5 }
 0x11e   :  { %v1384_v32 = vadd.f32 %v1885_v29, %v1336_v31  ;;  %v1858_v33 = vpop.f32.mrb[12].mxu0 }
 0x11f   :  { %v1859_v34 = vpop.f32.mrb[13].mxu0  ;;  %v1886_v37 = vpop.f32.mrb[12].mxu1 }
 0x120   :  { %v1860_v35 = vadd.f32 %v1859_v34, %v1858_v33  ;;  %v1861_v36 = vpop.f32.mrb[14].mxu0  ;;  %v1887_v40 = vpop.f32.mrb[13].mxu1 }
 0x121   :  { %v1862_v38 = vpop.f32.mrb[15].mxu0  ;;  %v1888_v41 = vadd.f32 %v1887_v40, %v1886_v37  ;;  %v1889_v42 = vpop.f32.mrb[14].mxu1 }
 0x122   :  { %v1341_v39 = vadd.f32 %v1860_v35, %v1293_v16  ;;  %v1890_v43 = vpop.f32.mrb[15].mxu1 }
 0x124   :  { %v1389_v44 = vadd.f32 %v1888_v41, %v1341_v39 }
 0x136   :  { %v1908_v45 = vpop.f32.mrb[16].mxu0 }
 0x137   :  { %v1936_v46 = vpop.f32.mrb[16].mxu1  ;;  %v1909_v47 = vpop.f32.mrb[17].mxu0 }
 0x138   :  { %v1910_v48 = vadd.f32 %v1909_v47, %v1908_v45  ;;  %v1937_v49 = vpop.f32.mrb[17].mxu1  ;;  %v1911_v50 = vpop.f32.mrb[18].mxu0 }
 0x139   :  { %v1938_v51 = vadd.f32 %v1937_v49, %v1936_v46  ;;  %v1939_v52 = vpop.f32.mrb[18].mxu1  ;;  %v1912_v53 = vpop.f32.mrb[19].mxu0 }
 0x13a   :  { %v1429_v54 = vadd.f32 %v1910_v48, %v1381_v30  ;;  %v1913_v55 = vadd.f32 %v1912_v53, %v1911_v50  ;;  %v1940_v56 = vpop.f32.mrb[19].mxu1 }
 0x13b   :  { %v1941_v57 = vadd.f32 %v1940_v56, %v1939_v52 }
 0x13c   :  { %v1477_v58 = vadd.f32 %v1938_v51, %v1429_v54  ;;  %v1432_v59 = vadd.f32 %v1913_v55, %v1384_v32 }
 0x13e   :  { %v1480_v60 = vadd.f32 %v1941_v57, %v1432_v59  ;;  %v1914_v61 = vpop.f32.mrb[20].mxu0 }
 0x13f   :  { %v1915_v62 = vpop.f32.mrb[21].mxu0  ;;  %v1942_v1 = vpop.f32.mrb[20].mxu1 }
 0x140   :  { %v1916_v63 = vadd.f32 %v1915_v62, %v1914_v61  ;;  %v1917_v0 = vpop.f32.mrb[22].mxu0  ;;  %v1943_v4 = vpop.f32.mrb[21].mxu1 }
 0x141   :  { %v1918_v2 = vpop.f32.mrb[23].mxu0  ;;  %v1944_v5 = vadd.f32 %v1943_v4, %v1942_v1  ;;  %v1945_v6 = vpop.f32.mrb[22].mxu1 }
 0x142   :  { %v1437_v3 = vadd.f32 %v1916_v63, %v1389_v44  ;;  %v1946_v7 = vpop.f32.mrb[23].mxu1 }
 0x144   :  { %v1485_v8 = vadd.f32 %v1944_v5, %v1437_v3 }
 0x156   :  { %v1964_v9 = vpop.f32.mrb[24].mxu0 }
 0x157   :  { %v1992_v10 = vpop.f32.mrb[24].mxu1  ;;  %v1965_v11 = vpop.f32.mrb[25].mxu0 }
 0x158   :  { %v1966_v12 = vadd.f32 %v1965_v11, %v1964_v9  ;;  %v1993_v13 = vpop.f32.mrb[25].mxu1  ;;  %v1967_v14 = vpop.f32.mrb[26].mxu0 }
 0x159   :  { %v1994_v15 = vadd.f32 %v1993_v13, %v1992_v10  ;;  %v1995_v16 = vpop.f32.mrb[26].mxu1  ;;  %v1968_v17 = vpop.f32.mrb[27].mxu0 }
 0x15a   :  { %v1525_v18 = vadd.f32 %v1966_v12, %v1477_v58  ;;  %v1969_v19 = vadd.f32 %v1968_v17, %v1967_v14  ;;  %v1996_v20 = vpop.f32.mrb[27].mxu1 }
 0x15b   :  { %v1997_v22 = vadd.f32 %v1996_v20, %v1995_v16 }
 0x15c   :  { %v1573_v23 = vadd.f32 %v1994_v15, %v1525_v18  ;;  %v1528_v24 = vadd.f32 %v1969_v19, %v1480_v60 }
 0x15e   :  { %v1593_v26 = vmul.f32 %v1778_v21, %v1573_v23  ;;  %v1576_v27 = vadd.f32 %v1997_v22, %v1528_v24  ;;  %v1970_v28 = vpop.f32.mrb[28].mxu0 }
 0x15f   :  { %v1998_v29 = vpop.f32.mrb[28].mxu1  ;;  %v1971_v30 = vpop.f32.mrb[29].mxu0 }
 0x160   :  { %v1603_v31 = vadd.f32 %v1779_v25, %v1593_v26  ;;  %v1594_v32 = vmul.f32 %v1778_v21, %v1576_v27  ;;  %v1972_v33 = vadd.f32 %v1971_v30, %v1970_v28  ;;  %v1999_v34 = vpop.f32.mrb[29].mxu1  ;;  %v1973_v35 = vpop.f32.mrb[30].mxu0 }
 0x161   :  { %v2000_v36 = vadd.f32 %v1999_v34, %v1998_v29  ;;  %v2001_v37 = vpop.f32.mrb[30].mxu1  ;;  %v1974_v38 = vpop.f32.mrb[31].mxu0 }
 0x162   :  { %v1606_v39 = vmax.f32 %v1603_v31, 0.0  ;;  %v1604_v40 = vadd.f32 %v1779_v25, %v1594_v32  ;;  %v1533_v41 = vadd.f32 %v1972_v33, %v1485_v8  ;;  %v2002_v42 = vpop.f32.mrb[31].mxu1 }
 0x164   :  { %1610 = vst.msk [vmem:[%s2648_s4] sm:$0xff] %vm1609_vm0, %v1606_v39  ;;  %v1607_v43 = vmax.f32 %v1604_v40, 0.0  ;;  %v1581_v44 = vadd.f32 %v2000_v36, %v1533_v41 }
 0x166   :  { %1611 = vst.msk [vmem:[%s2648_s4 + $0x8] sm:$0xff] %vm1609_vm0, %v1607_v43  ;;  %v1595_v45 = vmul.f32 %v1778_v21, %v1581_v44 }
 0x168   :  { %v1605_v46 = vadd.f32 %v1779_v25, %v1595_v45 }
 0x16a   :  { %v1608_v47 = vmax.f32 %v1605_v46, 0.0 }
 0x16c   :  { %1613 = vst.msk [vmem:[%s2648_s4 + $0x10] sm:$0x3] %vm1612_vm1, %v1608_v47 }

// kernel: transformer_forward.20
= control target key start
LH: loop header
LB: loop body
LE: loop exit
PB: predicated region body
PF: predicated region fallthrough
CT: control target
= control target key end

     0   :  { %vm1486_vm0 = vcmask 523264   ;;  %s2412_s1 = inlined_call_operand.vmem [shape: bf16[2048,64], index: 1, kind: input, shape index: {}]   ;;  %s2413_s0 = inlined_call_operand.vmem [shape: bf16[16,2048], index: 0, kind: input, shape index: {}]   ;;  %s2414_s2 = inlined_call_operand.vmem [shape: f32[1,64], index: 2, kind: input, shape index: {}]   ;;  %s2415_s3 = inlined_call_operand.vmem [shape: f32[1,64], index: 3, kind: input, shape index: {}]   ;;  %s2416_s4 = inlined_call_operand.vmem [shape: f32[16,64], index: 4, kind: output, shape index: {}]  }
   0x1   :  { %v1815_v0 = vld [vmem:[%s2412_s1 + $0x40] sm:$0xff]   ;;  %v1819_v4 = vld [vmem:[%s2412_s1 + $0x48] sm:$0xff]   ;;  %v1823_v8 = vld [vmem:[%s2412_s1 + $0x50] sm:$0xff]  }
   0x2   :  { %v1816_v1 = vld [vmem:[%s2412_s1 + $0xc0] sm:$0xff]   ;;  %1639 = vmatprep.subr.bf16.mxu0 %v1815_v0  ;;  %v1820_v5 = vld [vmem:[%s2412_s1 + $0xc8] sm:$0xff]   ;;  %v1824_v9 = vld [vmem:[%s2412_s1 + $0xd0] sm:$0xff]  }
   0x3   :  { %v1817_v2 = vld [vmem:[%s2412_s1] sm:$0xff]   ;;  %1661 = vmatprep.subr.bf16.mxu1 %v1816_v1  ;;  %v1821_v6 = vld [vmem:[%s2412_s1 + $0x8] sm:$0xff]   ;;  %v1825_v10 = vld [vmem:[%s2412_s1 + $0x10] sm:$0xff]  }
   0x4   :  { %v1818_v3 = vld [vmem:[%s2412_s1 + $0x80] sm:$0xff]   ;;  %1640 = vmatpush3.bf16.msra.mxu0 %v1817_v2  ;;  %v1822_v7 = vld [vmem:[%s2412_s1 + $0x88] sm:$0xff]   ;;  %v1826_v11 = vld [vmem:[%s2412_s1 + $0x90] sm:$0xff]  }
   0x5   :  { %1662 = vmatpush3.bf16.msra.mxu1 %v1818_v3  ;;  %1641 = vmatprep.subr.bf16.mxu0 %v1819_v4  ;;  %v1827_v12 = vld [vmem:[%s2412_s1 + $0x58] sm:$0xff]   ;;  %v1831_v16 = vld [vmem:[%s2412_s1 + $0x60] sm:$0xff]   ;;  %v1835_v20 = vld [vmem:[%s2412_s1 + $0x68] sm:$0xff]  }
   0x6   :  { %1663 = vmatprep.subr.bf16.mxu1 %v1820_v5  ;;  %v1828_v13 = vld [vmem:[%s2412_s1 + $0xd8] sm:$0xff]   ;;  %v1832_v17 = vld [vmem:[%s2412_s1 + $0xe0] sm:$0xff]   ;;  %v1836_v21 = vld [vmem:[%s2412_s1 + $0xe8] sm:$0xff]  }
   0x7   :  { %v1829_v14 = vld [vmem:[%s2412_s1 + $0x18] sm:$0xff]   ;;  %v1833_v18 = vld [vmem:[%s2412_s1 + $0x20] sm:$0xff]   ;;  %v1837_v22 = vld [vmem:[%s2412_s1 + $0x28] sm:$0xff]  }
   0x8   :  { %1642 = vmatpush3.bf16.msra.mxu0 %v1821_v6  ;;  %v1830_v15 = vld [vmem:[%s2412_s1 + $0x98] sm:$0xff]   ;;  %v1834_v19 = vld [vmem:[%s2412_s1 + $0xa0] sm:$0xff]   ;;  %v1838_v23 = vld [vmem:[%s2412_s1 + $0xa8] sm:$0xff]  }
   0x9   :  { %1664 = vmatpush3.bf16.msra.mxu1 %v1822_v7  ;;  %1643 = vmatprep.subr.bf16.mxu0 %v1823_v8  ;;  %v1839_v24 = vld [vmem:[%s2412_s1 + $0x70] sm:$0xff]   ;;  %v1843_v28 = vld [vmem:[%s2412_s1 + $0x78] sm:$0xff]   ;;  %v18_v32 = vld [vmem:[%s2413_s0] sm:$0xff] }
   0xa   :  { %1665 = vmatprep.subr.bf16.mxu1 %v1824_v9  ;;  %v1840_v25 = vld [vmem:[%s2412_s1 + $0xf0] sm:$0xff]   ;;  %v1844_v29 = vld [vmem:[%s2412_s1 + $0xf8] sm:$0xff]   ;;  %v26_v33 = vld [vmem:[%s2413_s0 + $0x40] sm:$0xff] }
   0xb   :  { %v1841_v26 = vld [vmem:[%s2412_s1 + $0x30] sm:$0xff]   ;;  %v1845_v30 = vld [vmem:[%s2412_s1 + $0x38] sm:$0xff]   ;;  %v19_v34 = vld [vmem:[%s2413_s0 + $0x8] sm:$0xff]  ;;  %v1493_v35 = vcombine.low %v18_v32, %v26_v33  ;;  %v1494_v36 = vcombine.high %v18_v32, %v26_v33 }
   0xc   :  { %1644 = vmatpush3.bf16.msra.mxu0 %v1825_v10  ;;  %v1842_v27 = vld [vmem:[%s2412_s1 + $0xb0] sm:$0xff]   ;;  %v1846_v31 = vld [vmem:[%s2412_s1 + $0xb8] sm:$0xff]   ;;  %v27_v37 = vld [vmem:[%s2413_s0 + $0x48] sm:$0xff] }
   0xd   :  { %1666 = vmatpush3.bf16.msra.mxu1 %v1826_v11  ;;  %1645 = vmatprep.subr.bf16.mxu0 %v1827_v12  ;;  %v1495_v38 = vcombine.low %v19_v34, %v27_v37  ;;  %v1496_v39 = vcombine.high %v19_v34, %v27_v37  ;;  %v1847_v40 = vld [vmem:[%s2412_s1 + $0x140] sm:$0xff]   ;;  %v1851_v44 = vld [vmem:[%s2412_s1 + $0x148] sm:$0xff]   ;;  %v1855_v48 = vld [vmem:[%s2412_s1 + $0x150] sm:$0xff]  }
   0xe   :  { %1667 = vmatprep.subr.bf16.mxu1 %v1828_v13  ;;  %1170 = vmatprep.mubr.bf16.mxu0 %v1494_v36  ;;  %v1848_v41 = vld [vmem:[%s2412_s1 + $0x1c0] sm:$0xff]   ;;  %v1852_v45 = vld [vmem:[%s2412_s1 + $0x1c8] sm:$0xff]   ;;  %v1856_v49 = vld [vmem:[%s2412_s1 + $0x1d0] sm:$0xff]  }
   0xf   :  { %1211 = vmatprep.mubr.bf16.mxu1 %v1496_v39  ;;  %v1849_v42 = vld [vmem:[%s2412_s1 + $0x100] sm:$0xff]   ;;  %v1853_v46 = vld [vmem:[%s2412_s1 + $0x108] sm:$0xff]   ;;  %v1857_v50 = vld [vmem:[%s2412_s1 + $0x110] sm:$0xff]  }
  0x10   :  { %1646 = vmatpush3.bf16.msra.mxu0 %v1829_v14  ;;  %v1850_v43 = vld [vmem:[%s2412_s1 + $0x180] sm:$0xff]   ;;  %v1854_v47 = vld [vmem:[%s2412_s1 + $0x188] sm:$0xff]   ;;  %v1858_v51 = vld [vmem:[%s2412_s1 + $0x190] sm:$0xff]  }
  0x11   :  { %1668 = vmatpush3.bf16.msra.mxu1 %v1830_v15  ;;  %1647 = vmatprep.subr.bf16.mxu0 %v1831_v16  ;;  %v1859_v52 = vld [vmem:[%s2412_s1 + $0x158] sm:$0xff]   ;;  %v1863_v56 = vld [vmem:[%s2412_s1 + $0x160] sm:$0xff]   ;;  %v1867_v60 = vld [vmem:[%s2412_s1 + $0x168] sm:$0xff]  }
  0x12   :  { %1669 = vmatprep.subr.bf16.mxu1 %v1832_v17  ;;  %v1860_v53 = vld [vmem:[%s2412_s1 + $0x1d8] sm:$0xff]   ;;  %v1864_v57 = vld [vmem:[%s2412_s1 + $0x1e0] sm:$0xff]   ;;  %v1868_v61 = vld [vmem:[%s2412_s1 + $0x1e8] sm:$0xff]  }
  0x13   :  { %v1861_v54 = vld [vmem:[%s2412_s1 + $0x118] sm:$0xff]   ;;  %v1865_v58 = vld [vmem:[%s2412_s1 + $0x120] sm:$0xff]   ;;  %v1869_v62 = vld [vmem:[%s2412_s1 + $0x128] sm:$0xff]  }
  0x14   :  { %1648 = vmatpush3.bf16.msra.mxu0 %v1833_v18  ;;  %v1862_v55 = vld [vmem:[%s2412_s1 + $0x198] sm:$0xff]   ;;  %v1866_v59 = vld [vmem:[%s2412_s1 + $0x1a0] sm:$0xff]   ;;  %v1870_v63 = vld [vmem:[%s2412_s1 + $0x1a8] sm:$0xff]  }
  0x15   :  { %1670 = vmatpush3.bf16.msra.mxu1 %v1834_v19  ;;  %1649 = vmatprep.subr.bf16.mxu0 %v1835_v20  ;;  %v1871_v0 = vld [vmem:[%s2412_s1 + $0x170] sm:$0xff]   ;;  %v1875_v4 = vld [vmem:[%s2412_s1 + $0x178] sm:$0xff]   ;;  %v1879_v16 = vld [vmem:[%s2412_s1 + $0x240] sm:$0xff]  }
  0x16   :  { %1671 = vmatprep.subr.bf16.mxu1 %v1836_v21  ;;  %v1872_v1 = vld [vmem:[%s2412_s1 + $0x1f0] sm:$0xff]   ;;  %v1876_v5 = vld [vmem:[%s2412_s1 + $0x1f8] sm:$0xff]   ;;  %v1880_v17 = vld [vmem:[%s2412_s1 + $0x2c0] sm:$0xff]  }
  0x17   :  { %v1873_v2 = vld [vmem:[%s2412_s1 + $0x130] sm:$0xff]   ;;  %v1877_v6 = vld [vmem:[%s2412_s1 + $0x138] sm:$0xff]   ;;  %v1881_v18 = vld [vmem:[%s2412_s1 + $0x200] sm:$0xff]  }
  0x18   :  { %1650 = vmatpush3.bf16.msra.mxu0 %v1837_v22  ;;  %v1874_v3 = vld [vmem:[%s2412_s1 + $0x1b0] sm:$0xff]   ;;  %v1878_v7 = vld [vmem:[%s2412_s1 + $0x1b8] sm:$0xff]   ;;  %v1882_v19 = vld [vmem:[%s2412_s1 + $0x280] sm:$0xff]  }
  0x19   :  { %1672 = vmatpush3.bf16.msra.mxu1 %v1838_v23  ;;  %1651 = vmatprep.subr.bf16.mxu0 %v1839_v24  ;;  %v20_v8 = vld [vmem:[%s2413_s0 + $0x10] sm:$0xff]  ;;  %v21_v12 = vld [vmem:[%s2413_s0 + $0x18] sm:$0xff]  ;;  %v1883_v20 = vld [vmem:[%s2412_s1 + $0x248] sm:$0xff]  }
  0x1a   :  { %1673 = vmatprep.subr.bf16.mxu1 %v1840_v25  ;;  %v28_v9 = vld [vmem:[%s2413_s0 + $0x50] sm:$0xff]  ;;  %v29_v13 = vld [vmem:[%s2413_s0 + $0x58] sm:$0xff]  ;;  %v1884_v21 = vld [vmem:[%s2412_s1 + $0x2c8] sm:$0xff]  }
  0x1b   :  { %v1497_v10 = vcombine.low %v20_v8, %v28_v9  ;;  %v1498_v11 = vcombine.high %v20_v8, %v28_v9  ;;  %v1499_v14 = vcombine.low %v21_v12, %v29_v13  ;;  %v1500_v15 = vcombine.high %v21_v12, %v29_v13  ;;  %v1885_v22 = vld [vmem:[%s2412_s1 + $0x208] sm:$0xff]   ;;  %v1887_v24 = vld [vmem:[%s2412_s1 + $0x250] sm:$0xff]   ;;  %v1895_v32 = vld [vmem:[%s2412_s1 + $0x260] sm:$0xff]  }
  0x1c   :  { %1652 = vmatpush3.bf16.msra.mxu0 %v1841_v26  ;;  %v1886_v23 = vld [vmem:[%s2412_s1 + $0x288] sm:$0xff]   ;;  %v1888_v25 = vld [vmem:[%s2412_s1 + $0x2d0] sm:$0xff]   ;;  %v1896_v33 = vld [vmem:[%s2412_s1 + $0x2e0] sm:$0xff]  }
  0x1d   :  { %1674 = vmatpush3.bf16.msra.mxu1 %v1842_v27  ;;  %1653 = vmatprep.subr.bf16.mxu0 %v1843_v28  ;;  %v1889_v26 = vld [vmem:[%s2412_s1 + $0x210] sm:$0xff]   ;;  %v1891_v28 = vld [vmem:[%s2412_s1 + $0x258] sm:$0xff]   ;;  %v1897_v34 = vld [vmem:[%s2412_s1 + $0x220] sm:$0xff]  }
  0x1e   :  { %1675 = vmatprep.subr.bf16.mxu1 %v1844_v29  ;;  %v1890_v27 = vld [vmem:[%s2412_s1 + $0x290] sm:$0xff]   ;;  %v1892_v29 = vld [vmem:[%s2412_s1 + $0x2d8] sm:$0xff]   ;;  %v1899_v36 = vld [vmem:[%s2412_s1 + $0x268] sm:$0xff]  }
  0x1f   :  { %v1900_v37 = vld [vmem:[%s2412_s1 + $0x2e8] sm:$0xff]   ;;  %v1927_v8 = vld [vmem:[%s2412_s1 + $0x360] sm:$0xff]  }
  0x20   :  { %1654 = vmatpush3.bf16.msra.mxu0 %v1845_v30  ;;  %v1893_v30 = vld [vmem:[%s2412_s1 + $0x218] sm:$0xff]   ;;  %v1902_v39 = vld [vmem:[%s2412_s1 + $0x2a8] sm:$0xff]   ;;  %v1928_v9 = vld [vmem:[%s2412_s1 + $0x3e0] sm:$0xff]  }
  0x21   :  { %1676 = vmatpush3.bf16.msra.mxu1 %v1846_v31  ;;  %1683 = vmatprep.subr.bf16.mxu0 %v1847_v40  ;;  %v1894_v31 = vld [vmem:[%s2412_s1 + $0x298] sm:$0xff]   ;;  %v1903_v40 = vld [vmem:[%s2412_s1 + $0x270] sm:$0xff]   ;;  %v1931_v12 = vld [vmem:[%s2412_s1 + $0x368] sm:$0xff]  }
  0x22   :  { %1705 = vmatprep.subr.bf16.mxu1 %v1848_v41  ;;  %v1904_v41 = vld [vmem:[%s2412_s1 + $0x2f0] sm:$0xff]   ;;  %v1932_v13 = vld [vmem:[%s2412_s1 + $0x3e8] sm:$0xff]  }
  0x23   :  { %1171 = vmatmul.mubr.bf16.vlgmr.msra.gmra.mrb[0].mxu0 %v1493_v35  ;;  %v1898_v35 = vld [vmem:[%s2412_s1 + $0x2a0] sm:$0xff]  }
  0x24   :  { %1212 = vmatmul.mubr.bf16.vlgmr.msra.gmra.mrb[0].mxu1 %v1495_v38  ;;  %1684 = vmatpush3.bf16.msra.mxu0 %v1849_v42  ;;  %v1901_v38 = vld [vmem:[%s2412_s1 + $0x228] sm:$0xff]   ;;  %v1905_v42 = vld [vmem:[%s2412_s1 + $0x230] sm:$0xff]  }
  0x25   :  { %1706 = vmatpush3.bf16.msra.mxu1 %v1850_v43  ;;  %1685 = vmatprep.subr.bf16.mxu0 %v1851_v44  ;;  %v1906_v43 = vld [vmem:[%s2412_s1 + $0x2b0] sm:$0xff]   ;;  %v1907_v44 = vld [vmem:[%s2412_s1 + $0x278] sm:$0xff]  }
  0x26   :  { %1707 = vmatprep.subr.bf16.mxu1 %v1852_v45  ;;  %1252 = vmatprep.mubr.bf16.mxu0 %v1498_v11  ;;  %v1908_v45 = vld [vmem:[%s2412_s1 + $0x2f8] sm:$0xff]   ;;  %v1930_v11 = vld [vmem:[%s2412_s1 + $0x3a0] sm:$0xff]  }
  0x27   :  { %1293 = vmatprep.mubr.bf16.mxu1 %v1500_v15  ;;  %v1934_v15 = vld [vmem:[%s2412_s1 + $0x3a8] sm:$0xff]  }
  0x28   :  { %1686 = vmatpush3.bf16.msra.mxu0 %v1853_v46  ;;  %v1909_v46 = vld [vmem:[%s2412_s1 + $0x238] sm:$0xff]  }
  0x29   :  { %1708 = vmatpush3.bf16.msra.mxu1 %v1854_v47  ;;  %1687 = vmatprep.subr.bf16.mxu0 %v1855_v48  ;;  %v1910_v47 = vld [vmem:[%s2412_s1 + $0x2b8] sm:$0xff]   ;;  %v22_v48 = vld [vmem:[%s2413_s0 + $0x20] sm:$0xff] }
  0x2a   :  { %1709 = vmatprep.subr.bf16.mxu1 %v1856_v49  ;;  %v30_v49 = vld [vmem:[%s2413_s0 + $0x60] sm:$0xff] }
  0x2c   :  { %1688 = vmatpush3.bf16.msra.mxu0 %v1857_v50  ;;  %v23_v50 = vld [vmem:[%s2413_s0 + $0x28] sm:$0xff] }
  0x2d   :  { %1710 = vmatpush3.bf16.msra.mxu1 %v1858_v51  ;;  %1689 = vmatprep.subr.bf16.mxu0 %v1859_v52  ;;  %v31_v51 = vld [vmem:[%s2413_s0 + $0x68] sm:$0xff]  ;;  %v1501_v52 = vcombine.low %v22_v48, %v30_v49 }
  0x2e   :  { %1711 = vmatprep.subr.bf16.mxu1 %v1860_v53  ;;  %v1502_v53 = vcombine.high %v22_v48, %v30_v49 }
  0x30   :  { %1690 = vmatpush3.bf16.msra.mxu0 %v1861_v54  ;;  %v1503_v54 = vcombine.low %v23_v50, %v31_v51 }
  0x31   :  { %1712 = vmatpush3.bf16.msra.mxu1 %v1862_v55  ;;  %1691 = vmatprep.subr.bf16.mxu0 %v1863_v56  ;;  %v1504_v55 = vcombine.high %v23_v50, %v31_v51  ;;  %v1911_v56 = vld [vmem:[%s2412_s1 + $0x340] sm:$0xff]  }
  0x32   :  { %1713 = vmatprep.subr.bf16.mxu1 %v1864_v57  ;;  %v1912_v57 = vld [vmem:[%s2412_s1 + $0x3c0] sm:$0xff]  }
  0x34   :  { %1692 = vmatpush3.bf16.msra.mxu0 %v1865_v58  ;;  %v1913_v58 = vld [vmem:[%s2412_s1 + $0x300] sm:$0xff]  }
  0x35   :  { %1714 = vmatpush3.bf16.msra.mxu1 %v1866_v59  ;;  %1693 = vmatprep.subr.bf16.mxu0 %v1867_v60  ;;  %v1914_v59 = vld [vmem:[%s2412_s1 + $0x380] sm:$0xff]   ;;  %v1915_v60 = vld [vmem:[%s2412_s1 + $0x348] sm:$0xff]  }
  0x36   :  { %1715 = vmatprep.subr.bf16.mxu1 %v1868_v61  ;;  %v1916_v61 = vld [vmem:[%s2412_s1 + $0x3c8] sm:$0xff]  }
  0x38   :  { %1694 = vmatpush3.bf16.msra.mxu0 %v1869_v62  ;;  %v1917_v62 = vld [vmem:[%s2412_s1 + $0x308] sm:$0xff]  }
  0x39   :  { %1716 = vmatpush3.bf16.msra.mxu1 %v1870_v63  ;;  %1695 = vmatprep.subr.bf16.mxu0 %v1871_v0  ;;  %v1918_v63 = vld [vmem:[%s2412_s1 + $0x388] sm:$0xff]   ;;  %v1919_v0 = vld [vmem:[%s2412_s1 + $0x350] sm:$0xff]  }
  0x3a   :  { %1717 = vmatprep.subr.bf16.mxu1 %v1872_v1  ;;  %v1920_v1 = vld [vmem:[%s2412_s1 + $0x3d0] sm:$0xff]  }
  0x3c   :  { %1696 = vmatpush3.bf16.msra.mxu0 %v1873_v2  ;;  %v1921_v2 = vld [vmem:[%s2412_s1 + $0x310] sm:$0xff]  }
  0x3d   :  { %1718 = vmatpush3.bf16.msra.mxu1 %v1874_v3  ;;  %1697 = vmatprep.subr.bf16.mxu0 %v1875_v4  ;;  %v1922_v3 = vld [vmem:[%s2412_s1 + $0x390] sm:$0xff]   ;;  %v1923_v4 = vld [vmem:[%s2412_s1 + $0x358] sm:$0xff]  }
  0x3e   :  { %1719 = vmatprep.subr.bf16.mxu1 %v1876_v5  ;;  %v1924_v5 = vld [vmem:[%s2412_s1 + $0x3d8] sm:$0xff]  }
  0x40   :  { %1698 = vmatpush3.bf16.msra.mxu0 %v1877_v6  ;;  %v1925_v6 = vld [vmem:[%s2412_s1 + $0x318] sm:$0xff]  }
  0x41   :  { %1720 = vmatpush3.bf16.msra.mxu1 %v1878_v7  ;;  %1727 = vmatprep.subr.bf16.mxu0 %v1879_v16  ;;  %v1926_v7 = vld [vmem:[%s2412_s1 + $0x398] sm:$0xff]   ;;  %v1935_v16 = vld [vmem:[%s2412_s1 + $0x370] sm:$0xff]  }
  0x42   :  { %1749 = vmatprep.subr.bf16.mxu1 %v1880_v17  ;;  %v1936_v17 = vld [vmem:[%s2412_s1 + $0x3f0] sm:$0xff]  }
  0x43   :  { %1253 = vmatmul.mubr.bf16.vlgmr.msra.gmra.mrb[4].mxu0 %v1497_v10  ;;  %v1929_v10 = vld [vmem:[%s2412_s1 + $0x320] sm:$0xff]  }
  0x44   :  { %1294 = vmatmul.mubr.bf16.vlgmr.msra.gmra.mrb[4].mxu1 %v1499_v14  ;;  %1728 = vmatpush3.bf16.msra.mxu0 %v1881_v18  ;;  %v1933_v14 = vld [vmem:[%s2412_s1 + $0x328] sm:$0xff]   ;;  %v1937_v18 = vld [vmem:[%s2412_s1 + $0x330] sm:$0xff]  }
  0x45   :  { %1750 = vmatpush3.bf16.msra.mxu1 %v1882_v19  ;;  %1729 = vmatprep.subr.bf16.mxu0 %v1883_v20  ;;  %v1938_v19 = vld [vmem:[%s2412_s1 + $0x3b0] sm:$0xff]   ;;  %v1939_v20 = vld [vmem:[%s2412_s1 + $0x378] sm:$0xff]  }
  0x46   :  { %1751 = vmatprep.subr.bf16.mxu1 %v1884_v21  ;;  %1334 = vmatprep.mubr.bf16.mxu0 %v1502_v53  ;;  %v1940_v21 = vld [vmem:[%s2412_s1 + $0x3f8] sm:$0xff]  }
  0x47   :  { %1375 = vmatprep.mubr.bf16.mxu1 %v1504_v55 }
  0x48   :  { %1730 = vmatpush3.bf16.msra.mxu0 %v1885_v22  ;;  %v1941_v22 = vld [vmem:[%s2412_s1 + $0x338] sm:$0xff]  }
  0x49   :  { %1752 = vmatpush3.bf16.msra.mxu1 %v1886_v23  ;;  %1731 = vmatprep.subr.bf16.mxu0 %v1887_v24  ;;  %v1942_v23 = vld [vmem:[%s2412_s1 + $0x3b8] sm:$0xff]   ;;  %v24_v24 = vld [vmem:[%s2413_s0 + $0x30] sm:$0xff] }
  0x4a   :  { %1753 = vmatprep.subr.bf16.mxu1 %v1888_v25  ;;  %v32_v25 = vld [vmem:[%s2413_s0 + $0x70] sm:$0xff] }
  0x4c   :  { %1732 = vmatpush3.bf16.msra.mxu0 %v1889_v26  ;;  %v25_v26 = vld [vmem:[%s2413_s0 + $0x38] sm:$0xff] }
  0x4d   :  { %1754 = vmatpush3.bf16.msra.mxu1 %v1890_v27  ;;  %1733 = vmatprep.subr.bf16.mxu0 %v1891_v28  ;;  %v1505_v27 = vcombine.low %v24_v24, %v32_v25  ;;  %v1506_v28 = vcombine.high %v24_v24, %v32_v25 }
  0x4e   :  { %1755 = vmatprep.subr.bf16.mxu1 %v1892_v29  ;;  %v33_v29 = vld [vmem:[%s2413_s0 + $0x78] sm:$0xff] }
  0x50   :  { %1734 = vmatpush3.bf16.msra.mxu0 %v1893_v30  ;;  %v1507_v30 = vcombine.low %v25_v26, %v33_v29 }
  0x51   :  { %1756 = vmatpush3.bf16.msra.mxu1 %v1894_v31  ;;  %1735 = vmatprep.subr.bf16.mxu0 %v1895_v32  ;;  %v1508_v31 = vcombine.high %v25_v26, %v33_v29  ;;  %v1637_v26 = vld [vmem:[%s2414_s2] ss:$0 sm:$0xff] }
  0x52   :  { %1757 = vmatprep.subr.bf16.mxu1 %v1896_v33 }
  0x54   :  { %1736 = vmatpush3.bf16.msra.mxu0 %v1897_v34 }
  0x55   :  { %1758 = vmatpush3.bf16.msra.mxu1 %v1898_v35  ;;  %1737 = vmatprep.subr.bf16.mxu0 %v1899_v36 }
  0x56   :  { %1759 = vmatprep.subr.bf16.mxu1 %v1900_v37 }
  0x58   :  { %1738 = vmatpush3.bf16.msra.mxu0 %v1901_v38 }
  0x59   :  { %1760 = vmatpush3.bf16.msra.mxu1 %v1902_v39  ;;  %1739 = vmatprep.subr.bf16.mxu0 %v1903_v40 }
  0x5a   :  { %1761 = vmatprep.subr.bf16.mxu1 %v1904_v41 }
  0x5c   :  { %1740 = vmatpush3.bf16.msra.mxu0 %v1905_v42 }
  0x5d   :  { %1762 = vmatpush3.bf16.msra.mxu1 %v1906_v43  ;;  %1741 = vmatprep.subr.bf16.mxu0 %v1907_v44 }
  0x5e   :  { %1763 = vmatprep.subr.bf16.mxu1 %v1908_v45 }
  0x60   :  { %1742 = vmatpush3.bf16.msra.mxu0 %v1909_v46 }
  0x61   :  { %1764 = vmatpush3.bf16.msra.mxu1 %v1910_v47  ;;  %1771 = vmatprep.subr.bf16.mxu0 %v1911_v56 }
  0x62   :  { %1793 = vmatprep.subr.bf16.mxu1 %v1912_v57 }
  0x63   :  { %1335 = vmatmul.mubr.bf16.vlgmr.msra.gmra.mrb[8].mxu0 %v1501_v52 }
  0x64   :  { %1376 = vmatmul.mubr.bf16.vlgmr.msra.gmra.mrb[8].mxu1 %v1503_v54  ;;  %1772 = vmatpush3.bf16.msra.mxu0 %v1913_v58 }
  0x65   :  { %1794 = vmatpush3.bf16.msra.mxu1 %v1914_v59  ;;  %1773 = vmatprep.subr.bf16.mxu0 %v1915_v60 }
  0x66   :  { %1795 = vmatprep.subr.bf16.mxu1 %v1916_v61  ;;  %1416 = vmatprep.mubr.bf16.mxu0 %v1506_v28 }
  0x67   :  { %1457 = vmatprep.mubr.bf16.mxu1 %v1508_v31 }
  0x68   :  { %1774 = vmatpush3.bf16.msra.mxu0 %v1917_v62 }
  0x69   :  { %1796 = vmatpush3.bf16.msra.mxu1 %v1918_v63  ;;  %1775 = vmatprep.subr.bf16.mxu0 %v1919_v0 }
  0x6a   :  { %1797 = vmatprep.subr.bf16.mxu1 %v1920_v1 }
  0x6c   :  { %1776 = vmatpush3.bf16.msra.mxu0 %v1921_v2 }
  0x6d   :  { %1798 = vmatpush3.bf16.msra.mxu1 %v1922_v3  ;;  %1777 = vmatprep.subr.bf16.mxu0 %v1923_v4 }
  0x6e   :  { %1799 = vmatprep.subr.bf16.mxu1 %v1924_v5 }
  0x70   :  { %1778 = vmatpush3.bf16.msra.mxu0 %v1925_v6 }
  0x71   :  { %1800 = vmatpush3.bf16.msra.mxu1 %v1926_v7  ;;  %1779 = vmatprep.subr.bf16.mxu0 %v1927_v8 }
  0x72   :  { %1801 = vmatprep.subr.bf16.mxu1 %v1928_v9 }
  0x74   :  { %1780 = vmatpush3.bf16.msra.mxu0 %v1929_v10 }
  0x75   :  { %1802 = vmatpush3.bf16.msra.mxu1 %v1930_v11  ;;  %1781 = vmatprep.subr.bf16.mxu0 %v1931_v12 }
  0x76   :  { %1803 = vmatprep.subr.bf16.mxu1 %v1932_v13 }
  0x78   :  { %1782 = vmatpush3.bf16.msra.mxu0 %v1933_v14 }
  0x79   :  { %1804 = vmatpush3.bf16.msra.mxu1 %v1934_v15  ;;  %1783 = vmatprep.subr.bf16.mxu0 %v1935_v16 }
  0x7a   :  { %1805 = vmatprep.subr.bf16.mxu1 %v1936_v17 }
  0x7c   :  { %1784 = vmatpush3.bf16.msra.mxu0 %v1937_v18 }
  0x7d   :  { %1806 = vmatpush3.bf16.msra.mxu1 %v1938_v19  ;;  %1785 = vmatprep.subr.bf16.mxu0 %v1939_v20 }
  0x7e   :  { %1807 = vmatprep.subr.bf16.mxu1 %v1940_v21 }
  0x80   :  { %1786 = vmatpush3.bf16.msra.mxu0 %v1941_v22 }
  0x81   :  { %1808 = vmatpush3.bf16.msra.mxu1 %v1942_v23 }
  0x83   :  { %1417 = vmatmul.mubr.bf16.vlgmr.msra.gmra.mrb[12].mxu0 %v1505_v27 }
  0x84   :  { %1458 = vmatmul.mubr.bf16.vlgmr.msra.gmra.mrb[12].mxu1 %v1507_v30  ;;  %v1638_v30 = vld [vmem:[%s2415_s3] ss:$0 sm:$0xff] }
  0xf6   :  { %v1655_v32 = vpop.f32.mrb[0].mxu0 }
  0xf7   :  { %v1677_v33 = vpop.f32.mrb[0].mxu1  ;;  %v1656_v34 = vpop.f32.mrb[1].mxu0 }
  0xf8   :  { %v1657_v35 = vadd.f32 %v1656_v34, %v1655_v32  ;;  %v1678_v36 = vpop.f32.mrb[1].mxu1  ;;  %v1658_v37 = vpop.f32.mrb[2].mxu0 }
  0xf9   :  { %v1679_v38 = vadd.f32 %v1678_v36, %v1677_v33  ;;  %v1680_v39 = vpop.f32.mrb[2].mxu1  ;;  %v1659_v40 = vpop.f32.mrb[3].mxu0 }
  0xfa   :  { %v1660_v41 = vadd.f32 %v1659_v40, %v1658_v37  ;;  %v1681_v42 = vpop.f32.mrb[3].mxu1 }
  0xfb   :  { %v1214_v43 = vadd.f32 %v1679_v38, %v1657_v35  ;;  %v1682_v44 = vadd.f32 %v1681_v42, %v1680_v39 }
  0xfd   :  { %v1217_v45 = vadd.f32 %v1682_v44, %v1660_v41 }
 0x116   :  { %v1699_v46 = vpop.f32.mrb[4].mxu0 }
 0x117   :  { %v1721_v47 = vpop.f32.mrb[4].mxu1  ;;  %v1700_v48 = vpop.f32.mrb[5].mxu0 }
 0x118   :  { %v1701_v49 = vadd.f32 %v1700_v48, %v1699_v46  ;;  %v1722_v50 = vpop.f32.mrb[5].mxu1  ;;  %v1702_v51 = vpop.f32.mrb[6].mxu0 }
 0x119   :  { %v1723_v52 = vadd.f32 %v1722_v50, %v1721_v47  ;;  %v1724_v53 = vpop.f32.mrb[6].mxu1  ;;  %v1703_v54 = vpop.f32.mrb[7].mxu0 }
 0x11a   :  { %v1255_v55 = vadd.f32 %v1701_v49, %v1214_v43  ;;  %v1704_v56 = vadd.f32 %v1703_v54, %v1702_v51  ;;  %v1725_v57 = vpop.f32.mrb[7].mxu1 }
 0x11b   :  { %v1726_v58 = vadd.f32 %v1725_v57, %v1724_v53 }
 0x11c   :  { %v1296_v59 = vadd.f32 %v1723_v52, %v1255_v55  ;;  %v1258_v60 = vadd.f32 %v1704_v56, %v1217_v45 }
 0x11e   :  { %v1299_v61 = vadd.f32 %v1726_v58, %v1258_v60 }
 0x136   :  { %v1743_v62 = vpop.f32.mrb[8].mxu0 }
 0x137   :  { %v1765_v63 = vpop.f32.mrb[8].mxu1  ;;  %v1744_v0 = vpop.f32.mrb[9].mxu0 }
 0x138   :  { %v1766_v1 = vpop.f32.mrb[9].mxu1  ;;  %v1745_v2 = vadd.f32 %v1744_v0, %v1743_v62  ;;  %v1746_v4 = vpop.f32.mrb[10].mxu0 }
 0x139   :  { %v1767_v3 = vadd.f32 %v1766_v1, %v1765_v63  ;;  %v1768_v5 = vpop.f32.mrb[10].mxu1  ;;  %v1747_v6 = vpop.f32.mrb[11].mxu0 }
 0x13a   :  { %v1769_v7 = vpop.f32.mrb[11].mxu1  ;;  %v1337_v8 = vadd.f32 %v1745_v2, %v1296_v59  ;;  %v1748_v9 = vadd.f32 %v1747_v6, %v1746_v4 }
 0x13b   :  { %v1770_v10 = vadd.f32 %v1769_v7, %v1768_v5 }
 0x13c   :  { %v1378_v11 = vadd.f32 %v1767_v3, %v1337_v8  ;;  %v1340_v12 = vadd.f32 %v1748_v9, %v1299_v61 }
 0x13e   :  { %v1381_v13 = vadd.f32 %v1770_v10, %v1340_v12 }
 0x156   :  { %v1787_v14 = vpop.f32.mrb[12].mxu0 }
 0x157   :  { %v1809_v15 = vpop.f32.mrb[12].mxu1  ;;  %v1788_v16 = vpop.f32.mrb[13].mxu0 }
 0x158   :  { %v1789_v17 = vadd.f32 %v1788_v16, %v1787_v14  ;;  %v1810_v18 = vpop.f32.mrb[13].mxu1  ;;  %v1790_v19 = vpop.f32.mrb[14].mxu0 }
 0x159   :  { %v1811_v20 = vadd.f32 %v1810_v18, %v1809_v15  ;;  %v1812_v21 = vpop.f32.mrb[14].mxu1  ;;  %v1791_v22 = vpop.f32.mrb[15].mxu0 }
 0x15a   :  { %v1419_v23 = vadd.f32 %v1789_v17, %v1378_v11  ;;  %v1792_v24 = vadd.f32 %v1791_v22, %v1790_v19  ;;  %v1813_v25 = vpop.f32.mrb[15].mxu1 }
 0x15b   :  { %v1814_v27 = vadd.f32 %v1813_v25, %v1812_v21 }
 0x15c   :  { %v1460_v28 = vadd.f32 %v1811_v20, %v1419_v23  ;;  %v1422_v29 = vadd.f32 %v1792_v24, %v1381_v13 }
 0x15e   :  { %v1473_v31 = vmul.f32 %v1637_v26, %v1460_v28  ;;  %v1463_v32 = vadd.f32 %v1814_v27, %v1422_v29 }
 0x160   :  { %v1482_v33 = vadd.f32 %v1638_v30, %v1473_v31  ;;  %v1474_v34 = vmul.f32 %v1637_v26, %v1463_v32 }
 0x162   :  { %v1484_v35 = vmax.f32 %v1482_v33, 0.0  ;;  %v1483_v36 = vadd.f32 %v1638_v30, %v1474_v34 }
 0x164   :  { %1487 = vst.msk [vmem:[%s2416_s4] sm:$0xff] %vm1486_vm0, %v1484_v35  ;;  %v1485_v37 = vmax.f32 %v1483_v36, 0.0 }
 0x166   :  { %1488 = vst.msk [vmem:[%s2416_s4 + $0x8] sm:$0xff] %vm1486_vm0, %v1485_v37 }

// kernel: transformer_forward.25
= control target key start
LH: loop header
LB: loop body
LE: loop exit
PB: predicated region body
PF: predicated region fallthrough
CT: control target
= control target key end

     0   :  { %vm39_vm0 = vcmask 523264   ;;  %vm46_vm1 = vcmask 519168   ;;  %s807_s0 = inlined_call_operand.vmem [shape: f32[20,64], index: 0, kind: input, shape index: {}]   ;;  %s808_s1 = inlined_call_operand.vmem [shape: f32[2,20], index: 1, kind: input, shape index: {}]   ;;  %s809_s2 = inlined_call_operand.vmem [shape: f32[1,64], index: 2, kind: input, shape index: {}]   ;;  %s810_s3 = inlined_call_operand.vmem [shape: f32[1,64], index: 3, kind: input, shape index: {}]   ;;  %s811_s4 = inlined_call_operand.vmem [shape: f32[64,64], index: 4, kind: input, shape index: {}]   ;;  %s812_s5 = inlined_call_operand.vmem [shape: f32[1,64], index: 5, kind: input, shape index: {}]   ;;  %s813_s6 = inlined_call_operand.vmem [shape: f32[64,32], index: 6, kind: input, shape index: {}]   ;;  %s814_s7 = inlined_call_operand.vmem [shape: f32[1,32], index: 7, kind: input, shape index: {}]   ;;  %s815_s8 = inlined_call_operand.vmem [shape: f32[32,2], index: 8, kind: input, shape index: {}]   ;;  %s816_s9 = inlined_call_operand.vmem [shape: f32[1,2], index: 9, kind: input, shape index: {}]   ;;  %s817_s10 = inlined_call_operand.hbm [shape: f32[2,2], index: 10, kind: output, shape index: {}]  }
   0x1   :  { %v36_v0 = vld [vmem:[%s807_s0] sm:$0xff]  ;;  %v38_v1 = vld [vmem:[%s807_s0 + $0x10] sm:$0xf]  ;;  %v37_v2 = vld [vmem:[%s807_s0 + $0x8] sm:$0xff] }
   0x2   :  { %v40_v3 = vsel %vm39_vm0, %v36_v0, 0.0  ;;  %v47_v4 = vsel %vm46_vm1, %v38_v1, 0.0 }
   0x3   :  { %15 = vsyncpa [#allocation3], 0  ;;  %41 = vadd.xlane.f32.xlu0 %v40_v3  ;;  %48 = vadd.xlane.f32.xlu1 %v47_v4  ;;  %v43_v5 = vsel %vm39_vm0, %v37_v2, 0.0  ;;  %v621_v21 = vmov 0.0|0.0   ;;  %vm622_vm2 = vmmov 0   ;;  %v623_v22 = vmov 0.0  }
   0x4   :  { %554 = vmatprep.subr.bf16.mxu0 %v621_v21  ;;  %557 = vmatprep.subr.bf16.mxu1 %v621_v21  ;;  %v180_v23 = vld [vmem:[%s811_s4] sm:$0xff]  ;;  %v181_v24 = vld [vmem:[%s811_s4 + $0x8] sm:$0xff]  ;;  %v182_v25 = vld [vmem:[%s811_s4 + $0x10] sm:$0xff]  ;;  %vm106_vm3 = vcmask 1043456   ;;  %vm102_vm4 = vcmask 162816   ;;  %vm369_vm5 = vcmask 261120  }
   0x5   :  { %502 = vmatprep.mubr.msk.f32.mxu0 %vm622_vm2, %v623_v22  ;;  %521 = vmatprep.mubr.msk.f32.mxu1 %vm622_vm2, %v623_v22  ;;  %v558_v26 = vpack.c.bf16 %v181_v24, %v180_v23  ;;  %v183_v27 = vld [vmem:[%s811_s4 + $0x18] sm:$0xff]  ;;  %v184_v29 = vld [vmem:[%s811_s4 + $0x20] sm:$0xff]  ;;  %v185_v30 = vld [vmem:[%s811_s4 + $0x28] sm:$0xff]  ;;  %s624_s19 = smov [#allocation2]   ;;  %vm443_vm6 = vcmask 9216  }
   0x6   :  { %v561_v28 = vpack.c.bf16 %v183_v27, %v182_v25  ;;  %v564_v31 = vpack.c.bf16 %v185_v30, %v184_v29  ;;  %v186_v32 = vld [vmem:[%s811_s4 + $0x30] sm:$0xff]  ;;  %v187_v33 = vld [vmem:[%s811_s4 + $0x38] sm:$0xff]  ;;  %v459_v46 = vld [vmem:[%s809_s2] ss:$0 sm:$0xff]  ;;  %s451_s20 = sshll.u32 %s624_s19, 4  ;;  %s452_s20 = int_to_ptr.vmem [resolvable:$true] %s451_s20 }
   0x7   :  { %44 = vadd.xlane.f32.xlu0 %v43_v5  ;;  %559 = vmatpush3.bf16.msra.mxu1 %v558_v26  ;;  %v567_v34 = vpack.c.bf16 %v187_v33, %v186_v32  ;;  %v460_v51 = vld [vmem:[%s810_s3] ss:$0 sm:$0xff]  ;;  %v270_v61 = vld [vmem:[%s813_s6 + $0x8] sm:$0xff]  ;;  %v271_v62 = vld [vmem:[%s813_s6 + $0x10] sm:$0xff]  ;;  %p602_p1 = scmp.lt.s32.totalorder %s452_s20, %s452_s20 }
   0x8   :  { %560 = vmatprep.subr.bf16.mxu1 %v621_v21  ;;  %v101_v59 = vld [vmem:[%s808_s1] sm:$0x3]  ;;  %v274_v3 = vld [vmem:[%s813_s6 + $0x28] sm:$0xff] }
   0x9   :  { %v269_v60 = vld [vmem:[%s813_s6] sm:$0xff] }
   0xa   :  { %v570_v63 = vpack.c.bf16 %v270_v61, %v269_v60  ;;  %v467_v26 = vld [vmem:[%s816_s9] ss:$0 sm:$0xff] }
   0xb   :  { %562 = vmatpush3.bf16.msra.mxu1 %v561_v28 }
   0xc   :  { %563 = vmatprep.subr.bf16.mxu1 %v621_v21 }
   0xf   :  { %565 = vmatpush3.bf16.msra.mxu1 %v564_v31 }
  0x10   :  { %566 = vmatprep.subr.bf16.mxu1 %v621_v21 }
  0x13   :  { %568 = vmatpush3.bf16.msra.mxu1 %v567_v34 }
  0x14   :  { %581 = vmatprep.subr.bf16.mxu1 %v621_v21 }
  0x90   :  { %v42_v6 = vpop.xlane.xlu0 %41  ;;  %v49_v7 = vpop.xlane.xlu1 %48 }
  0x91   :  { %v51_v8 = vmul.f32 0.015625, %v42_v6  ;;  %v53_v9 = vmul.f32 0.015625, %v49_v7  ;;  %v275_v7 = vld [vmem:[%s813_s6 + $0x30] sm:$0xff] }
  0x93   :  { %v54_v10 = vsub.f32 %v36_v0, %v51_v8  ;;  %v56_v11 = vsub.f32 %v38_v1, %v53_v9  ;;  %v272_v0 = vld [vmem:[%s813_s6 + $0x18] sm:$0xff] }
  0x94   :  { %v45_v12 = vpop.xlane.xlu0 %44  ;;  %v573_v1 = vpack.c.bf16 %v272_v0, %v271_v62  ;;  %v276_v8 = vld [vmem:[%s813_s6 + $0x38] sm:$0xff] }
  0x95   :  { %v52_v13 = vmul.f32 0.015625, %v45_v12  ;;  %v57_v14 = vmul.f32 %v54_v10, %v54_v10  ;;  %v59_v15 = vmul.f32 %v56_v11, %v56_v11  ;;  %v579_v9 = vpack.c.bf16 %v276_v8, %v275_v7 }
  0x97   :  { %v55_v16 = vsub.f32 %v37_v2, %v52_v13  ;;  %v60_v17 = vsel %vm39_vm0, %v57_v14, 0.0  ;;  %v66_v18 = vsel %vm46_vm1, %v59_v15, 0.0  ;;  %v273_v2 = vld [vmem:[%s813_s6 + $0x20] sm:$0xff] }
  0x98   :  { %61 = vadd.xlane.f32.xlu1 %v60_v17  ;;  %v576_v4 = vpack.c.bf16 %v274_v3, %v273_v2  ;;  %v463_v13 = vld [vmem:[%s812_s5] ss:$0 sm:$0xff] }
  0x99   :  { %v58_v19 = vmul.f32 %v55_v16, %v55_v16 }
  0x9b   :  { %v63_v20 = vsel %vm39_vm0, %v58_v19, 0.0  ;;  %v361_v19 = vld [vmem:[%s815_s8 + $0x18] sm:$0xff] }
  0x9c   :  { %67 = vadd.xlane.f32.xlu1 %v66_v18  ;;  %64 = vadd.xlane.f32.xlu0 %v63_v20  ;;  %v360_v18 = vld [vmem:[%s815_s8 + $0x10] sm:$0xff] }
  0x9d   :  { %v585_v20 = vpack.c.bf16 %v361_v19, %v360_v18 }
 0x125   :  { %v62_v35 = vpop.xlane.xlu1 %61 }
 0x126   :  { %v69_v36 = vmul.f32 0.015625, %v62_v35 }
 0x128   :  { %v72_v37 = vadd.f32 1e-05, %v69_v36 }
 0x129   :  { %v68_v38 = vpop.xlane.xlu1 %67  ;;  %v65_v39 = vpop.xlane.xlu0 %64 }
 0x12a   :  { %591 = vrsqrt.f32 %v72_v37  ;;  %v71_v40 = vmul.f32 0.015625, %v68_v38  ;;  %v70_v41 = vmul.f32 0.015625, %v65_v39 }
 0x12c   :  { %v74_v42 = vadd.f32 1e-05, %v71_v40  ;;  %v73_v43 = vadd.f32 1e-05, %v70_v41 }
 0x12e   :  { %593 = vrsqrt.f32 %v74_v42 }
 0x12f   :  { %595 = vrsqrt.f32 %v73_v43 }
 0x134   :  { %v592_v44 = vpop.eup %591 }
 0x135   :  { %v78_v45 = vmul.f32 %v592_v44, %v54_v10  ;;  %v358_v10 = vld [vmem:[%s815_s8] sm:$0xff] }
 0x137   :  { %v88_v50 = vmul.f32 %v459_v46, %v78_v45 }
 0x138   :  { %v594_v47 = vpop.eup %593 }
 0x139   :  { %v596_v48 = vpop.eup %595  ;;  %v80_v53 = vmul.f32 %v594_v47, %v56_v11  ;;  %v98_v54 = vadd.f32 %v460_v51, %v88_v50  ;;  %v359_v11 = vld [vmem:[%s815_s8 + $0x8] sm:$0xff]  ;;  %s597_s8 = scalar_lea.vmem %s452_s20, 32 }
 0x13a   :  { %v79_v49 = vmul.f32 %v596_v48, %v55_v16  ;;  %v582_v12 = vpack.c.bf16 %v359_v11, %v358_v10  ;;  %p598_p0 = scmp.ne.s32.totalorder %s452_s20, %s597_s8  ;;  %p603_p2 = scmp.lt.s32.totalorder %s597_s8, %s597_s8 }
 0x13b   :  { %v90_v57 = vmul.f32 %v459_v46, %v80_v53 }
 0x13c   :  { %v89_v52 = vmul.f32 %v459_v46, %v79_v49  ;;  %p604_p3 = por %p603_p2, %p602_p1 }
 0x13d   :  { %v100_v58 = vadd.f32 %v460_v51, %v90_v57 }
 0x13e   :  { %v99_v55 = vadd.f32 %v460_v51, %v89_v52  ;;  %p605_p4 = pnand %p604_p3, %p598_p0 }
 0x140   :  { %v555_v56 = vpack.c.bf16 %v99_v55, %v98_v54 }
 0x142   :  { %556 = vmatpush3.bf16.msra.mxu0 %v555_v56 }
 0x143   :  { %500 = vmatprep.subr.mxu0 %v623_v22 }
 0x146   :  { %501 = vmatpush3.msk.msra.mxu0 %vm106_vm3, %v100_v58 }
 0x147   :  { %503 = vmatmul.mubr.msk.f32.vlgmr.msra.gmra.mrb[0].mxu0 %vm102_vm4, %v101_v59  ;;  %569 = vmatprep.subr.bf16.mxu0 %v621_v21 }
 0x148   :  { %540 = vmatprep.mubr.msk.f32.mxu0 %vm622_vm2, %v623_v22  ;;  %571 = vmatpush3.bf16.msra.mxu0 %v570_v63 }
 0x149   :  { %572 = vmatprep.subr.bf16.mxu0 %v621_v21 }
 0x14c   :  { %574 = vmatpush3.bf16.msra.mxu0 %v573_v1 }
 0x14d   :  { %575 = vmatprep.subr.bf16.mxu0 %v621_v21 }
 0x150   :  { %577 = vmatpush3.bf16.msra.mxu0 %v576_v4 }
 0x151   :  { %578 = vmatprep.subr.bf16.mxu0 %v621_v21 }
 0x154   :  { %580 = vmatpush3.bf16.msra.mxu0 %v579_v9 }
 0x21a   :  { %v176_v5 = vpop.f32.mrb[0].mxu0 }
 0x21b   :  { %v504_v6 = vpop.f32.mrb[1].mxu0  ;;  %522 = vmatmul.mubr.msk.f32.vlgmr.msra.gmra.mrb[0].mxu1 %vm39_vm0, %v176_v5 }
 0x21c   :  { %551 = vmatprep.mubr.msk.f32.mxu1 %vm622_vm2, %v623_v22  ;;  %583 = vmatpush3.bf16.msra.mxu1 %v582_v12 }
 0x21d   :  { %584 = vmatprep.subr.bf16.mxu1 %v621_v21  ;;  %v465_v21 = vld [vmem:[%s814_s7] ss:$0 sm:$0xff] }
 0x220   :  { %586 = vmatpush3.bf16.msra.mxu1 %v585_v20 }
 0x2ee   :  { %v264_v14 = vpop.f32.mrb[0].mxu1 }
 0x2ef   :  { %v265_v15 = vadd.f32 %v463_v13, %v264_v14  ;;  %v523_v16 = vpop.f32.mrb[1].mxu1 }
 0x2f1   :  { %v268_v17 = vmax.f32 %v265_v15, 0.0 }
 0x2f3   :  { %541 = vmatmul.mubr.msk.f32.vlgmr.msra.gmra.mrb[2].mxu0 %vm39_vm0, %v268_v17 }
 0x3c6   :  { %v353_v22 = vpop.f32.mrb[2].mxu0 }
 0x3c7   :  { %v354_v23 = vadd.f32 %v465_v21, %v353_v22  ;;  %v542_v24 = vpop.f32.mrb[3].mxu0 }
 0x3c9   :  { %v357_v25 = vmax.f32 %v354_v23, 0.0 }
 0x3cb   :  { %552 = vmatmul.mubr.msk.f32.vlgmr.msra.gmra.mrb[2].mxu1 %vm369_vm5, %v357_v25 }
 0x49e   :  { %v439_v27 = vpop.f32.mrb[2].mxu1 }
 0x49f   :  { %v440_v28 = vadd.f32 %v467_v26, %v439_v27  ;;  %v553_v29 = vpop.f32.mrb[3].mxu1 }
 0x4a1   :  { %444 = vst.msk [vmem:[#allocation2] sm:$0x3] %vm443_vm6, %v440_v28 }
 0x4a2   :  { %608 = shalt.err (!%p605_p4)
}
 0x4a3   :  { %s609_s1 = scalar_lea.hbm %s817_s10, 32 }
 0x4a4   :  { %p610_p5 = scmp.ne.s32.totalorder %s817_s10, %s609_s1  ;;  %p613_p6 = scmp.lt.u32.totalorder %s609_s1, %s817_s10 }
 0x4a6   :  { %p615_p7 = pnand %p613_p6, %p610_p5 }
 0x4a8   :  { %618 = shalt.err (!%p615_p7)
}
 0x4a9   :  { %454 = dma.vmem_to_hbm [thread:$0]  %s452_s20, 32, %s817_s10, [#allocation3]  }
 0x4aa   :  { %619 = dma.done.wait [#allocation3], 32  }
 0x4ab   :  { %620 = vsyncadd [#allocation3], 4294967264 }
 0x4ac   :  { %458 = vsyncpa [#allocation3], 1 }

// kernel: transformer_forward.23
= control target key start
LH: loop header
LB: loop body
LE: loop exit
PB: predicated region body
PF: predicated region fallthrough
CT: control target
= control target key end

     0   :  { %vm104_vm0 = vcmask 523264   ;;  %v1297_v13 = vmov 0.0|0.0   ;;  %vm1298_vm1 = vmmov 0   ;;  %v1299_v14 = vmov 0.0   ;;  %s1613_s2 = inlined_call_operand.vmem [shape: bf16[64,64], index: 2, kind: input, shape index: {}]   ;;  %s1614_s0 = inlined_call_operand.vmem [shape: f32[20,64], index: 0, kind: input, shape index: {}]   ;;  %s1615_s4 = inlined_call_operand.vmem [shape: bf16[64,64], index: 4, kind: input, shape index: {}]   ;;  %s1616_s5 = inlined_call_operand.vmem [shape: f32[1,64], index: 5, kind: input, shape index: {}]   ;;  %s1617_s3 = inlined_call_operand.vmem [shape: f32[1,64], index: 3, kind: input, shape index: {}]   ;;  %s1618_s6 = inlined_call_operand.vmem [shape: bf16[64,64], index: 6, kind: input, shape index: {}]   ;;  %s1619_s1 = inlined_call_operand.vmem [shape: f32[20,20], index: 1, kind: input, shape index: {}]   ;;  %s1620_s7 = inlined_call_operand.vmem [shape: f32[1,64], index: 7, kind: input, shape index: {}]   ;;  %s1621_s8 = inlined_call_operand.vmem [shape: bf16[64,64], index: 8, kind: input, shape index: {}]   ;;  %s1622_s9 = inlined_call_operand.vmem [shape: f32[1,64], index: 9, kind: input, shape index: {}]   ;;  %s1623_s12 = inlined_call_operand.vmem [shape: bf16[64,128], index: 12, kind: input, shape index: {}]   ;;  %s1624_s14 = inlined_call_operand.vmem [shape: bf16[128,64], index: 14, kind: input, shape index: {}]   ;;  %s1625_s10 = inlined_call_operand.vmem [shape: f32[1,64], index: 10, kind: input, shape index: {}]   ;;  %s1626_s11 = inlined_call_operand.vmem [shape: f32[1,64], index: 11, kind: input, shape index: {}]   ;;  %s1627_s13 = inlined_call_operand.vmem [shape: f32[1,128], index: 13, kind: input, shape index: {}]   ;;  %s1628_s15 = inlined_call_operand.vmem [shape: f32[1,64], index: 15, kind: input, shape index: {}]   ;;  %s1629_s16 = inlined_call_operand.vmem [shape: f32[1,64], index: 16, kind: input, shape index: {}]   ;;  %s1630_s17 = inlined_call_operand.vmem [shape: f32[1,64], index: 17, kind: input, shape index: {}]   ;;  %s1631_s18 = inlined_call_operand.vmem [shape: f32[20,64], index: 18, kind: output, shape index: {}]  }
   0x1   :  { %1635 = sst [smem:[#allocation2_spill]] %s1613_s2  ;;  %1235 = vmatprep.subr.bf16.mxu1 %v1297_v13  ;;  %1167 = vmatprep.mubr.msk.f32.mxu1 %vm1298_vm1, %v1299_v14  ;;  %v1022_v20 = vld [vmem:[%s1616_s5] ss:$0 sm:$0xff]  ;;  %vm1237_vm2 = vmpackc.low %vm104_vm0, %vm104_vm0  ;;  %v1254_v33 = vld [vmem:[%s1618_s6 + $0x8] sm:$0xff]   ;;  %vm440_vm3 = vcmask 162816   ;;  %vm447_vm4 = vcmask 158720  }
   0x2   :  { %1636 = sst [smem:[#allocation3_spill]] %s1614_s0  ;;  %s1638_s29 = sld [smem:[#allocation2_spill]]  ;;  %v1015_v27 = vld [vmem:[%s1617_s3] ss:$0 sm:$0xff]  ;;  %v1255_v34 = vld [vmem:[%s1618_s6 + $0x10] sm:$0xff]   ;;  %v1256_v35 = vld [vmem:[%s1618_s6 + $0x18] sm:$0xff]  }
   0x3   :  { %1637 = sst [smem:[#allocation4_spill]] %s1615_s4  ;;  %s1639_s22 = sld [smem:[#allocation3_spill]]  ;;  %v1253_v32 = vld [vmem:[%s1618_s6] sm:$0xff]   ;;  %v435_v42 = vld [vmem:[%s1619_s1 + $0x8] sm:$0xff]  ;;  %v436_v48 = vld [vmem:[%s1619_s1 + $0x10] sm:$0xf] }
   0x4   :  { %s1640_s2 = sld [smem:[#allocation4_spill]]  ;;  %v434_v37 = vld [vmem:[%s1619_s1] sm:$0xff]  ;;  %vm484_vm5 = vcmask 1043456   ;;  %vm672_vm6 = vcmask 519168  }
   0x5   :  { %v1029_v54 = vld [vmem:[%s1620_s7] ss:$0 sm:$0xff] }
   0x8   :  { %v1245_v0 = vld [vmem:[%s1638_s29] sm:$0xff]   ;;  %v1246_v1 = vld [vmem:[%s1638_s29 + $0x8] sm:$0xff]   ;;  %v1247_v2 = vld [vmem:[%s1638_s29 + $0x10] sm:$0xff]  }
   0x9   :  { %1125 = vmatprep.subr.bf16.mxu0 %v1245_v0  ;;  %v1407_v3 = vld [vmem:[%s1639_s22] sm:$0xff]  ;;  %v1412_v4 = vld [vmem:[%s1639_s22 + $0x8] sm:$0xff]  ;;  %v1248_v6 = vld [vmem:[%s1638_s29 + $0x18] sm:$0xff]  }
   0xa   :  { %1126 = vmatpush3.bf16.msra.mxu0 %v1245_v0  ;;  %v63_v5 = vpack.c.bf16 %v1412_v4, %v1407_v3  ;;  %v1423_v7 = vld [vmem:[%s1639_s22 + $0x10] sm:$0xf]  ;;  %v1249_v8 = vld [vmem:[%s1640_s2] sm:$0xff]   ;;  %v1250_v10 = vld [vmem:[%s1640_s2 + $0x8] sm:$0xff]  }
   0xb   :  { %1127 = vmatprep.subr.bf16.mxu0 %v1246_v1  ;;  %v1430_v9 = vpack.c.bf16 %v1423_v7, %v1423_v7  ;;  %v1251_v11 = vld [vmem:[%s1640_s2 + $0x10] sm:$0xff]   ;;  %v1252_v12 = vld [vmem:[%s1640_s2 + $0x18] sm:$0xff]  }
   0xc   :  { %1133 = vmatprep.mubr.msk.bf16.mxu0 %vm104_vm0, %v63_v5 }
   0xe   :  { %1128 = vmatpush3.bf16.msra.mxu0 %v1246_v1 }
   0xf   :  { %1129 = vmatprep.subr.bf16.mxu0 %v1247_v2 }
  0x12   :  { %1130 = vmatpush3.bf16.msra.mxu0 %v1247_v2 }
  0x13   :  { %1131 = vmatprep.subr.bf16.mxu0 %v1248_v6 }
  0x16   :  { %1132 = vmatpush3.bf16.msra.mxu0 %v1248_v6 }
  0x17   :  { %1137 = vmatprep.subr.bf16.mxu0 %v1249_v8 }
  0x19   :  { %1134 = vmatmul.mubr.msk.bf16.vlgmr.msra.gmra.mrb[0].mxu0 %vm104_vm0, %v1430_v9 }
  0x1a   :  { %1138 = vmatpush3.bf16.msra.mxu0 %v1249_v8  ;;  %1145 = vmatprep.mubr.msk.bf16.mxu0 %vm104_vm0, %v63_v5 }
  0x1b   :  { %1139 = vmatprep.subr.bf16.mxu0 %v1250_v10 }
  0x1e   :  { %1140 = vmatpush3.bf16.msra.mxu0 %v1250_v10 }
  0x1f   :  { %1141 = vmatprep.subr.bf16.mxu0 %v1251_v11 }
  0x22   :  { %1142 = vmatpush3.bf16.msra.mxu0 %v1251_v11 }
  0x23   :  { %1143 = vmatprep.subr.bf16.mxu0 %v1252_v12 }
  0x26   :  { %1144 = vmatpush3.bf16.msra.mxu0 %v1252_v12 }
  0x27   :  { %1149 = vmatprep.subr.bf16.mxu0 %v1253_v32 }
  0x29   :  { %1146 = vmatmul.mubr.msk.bf16.vlgmr.msra.gmra.mrb[4].mxu0 %vm104_vm0, %v1430_v9 }
  0x2a   :  { %1157 = vmatprep.mubr.msk.bf16.mxu0 %vm104_vm0, %v63_v5  ;;  %1150 = vmatpush3.bf16.msra.mxu0 %v1253_v32 }
  0x2b   :  { %1151 = vmatprep.subr.bf16.mxu0 %v1254_v33 }
  0x2e   :  { %1152 = vmatpush3.bf16.msra.mxu0 %v1254_v33 }
  0x2f   :  { %1153 = vmatprep.subr.bf16.mxu0 %v1255_v34 }
  0x32   :  { %1154 = vmatpush3.bf16.msra.mxu0 %v1255_v34 }
  0x33   :  { %1155 = vmatprep.subr.bf16.mxu0 %v1256_v35 }
  0x36   :  { %1156 = vmatpush3.bf16.msra.mxu0 %v1256_v35 }
  0x37   :  { %1239 = vmatprep.subr.bf16.mxu0 %v1297_v13 }
  0x39   :  { %1158 = vmatmul.mubr.msk.bf16.vlgmr.msra.gmra.mrb[8].mxu0 %vm104_vm0, %v1430_v9 }
  0x3a   :  { %1182 = vmatprep.mubr.msk.f32.mxu0 %vm1298_vm1, %v1299_v14 }
  0xec   :  { %v1135_v15 = vpop.f32.mrb[0].mxu0 }
  0xed   :  { %v145_v16 = vpop.f32.mrb[1].mxu0  ;;  %v154_v31 = vadd.f32 %v1135_v15, %v1015_v27 }
  0xee   :  { %v1136_v17 = vpop.f32.mrb[2].mxu0  ;;  %v146_v29 = vadd.f32 %v1015_v27, %v145_v16 }
  0xef   :  { %v148_v18 = vpop.f32.mrb[3].mxu0 }
  0xf0   :  { %v149_v30 = vadd.f32 %v1015_v27, %v148_v18  ;;  %v1257_v18 = vld [vmem:[%s1621_s8] sm:$0xff]  }
  0xfc   :  { %v1147_v19 = vpop.f32.mrb[4].mxu0 }
  0xfd   :  { %v232_v21 = vpop.f32.mrb[5].mxu0  ;;  %v241_v28 = vadd.f32 %v1147_v19, %v1022_v20  ;;  %v1258_v19 = vld [vmem:[%s1621_s8 + $0x8] sm:$0xff]  }
  0xfe   :  { %v1148_v22 = vpop.f32.mrb[6].mxu0  ;;  %v233_v24 = vadd.f32 %v1022_v20, %v232_v21 }
  0xff   :  { %v235_v23 = vpop.f32.mrb[7].mxu0 }
 0x100   :  { %v236_v25 = vadd.f32 %v1022_v20, %v235_v23 }
 0x102   :  { %v1236_v26 = vpack.c.bf16 %v236_v25, %v233_v24 }
 0x104   :  { %1238 = vmatpush3.bf16.xpose.msk.msra.mxu1 %vm1237_vm2, %v1236_v26 }
 0x105   :  { %1165 = vmatprep.subr.mxu1 %v1299_v14 }
 0x10c   :  { %1166 = vmatpush3.xpose.msk.msra.mxu1 %vm104_vm0, %v241_v28  ;;  %v1159_v55 = vpop.f32.mrb[8].mxu0 }
 0x10d   :  { %v319_v56 = vpop.f32.mrb[9].mxu0  ;;  %v328_v17 = vadd.f32 %v1159_v55, %v1029_v54  ;;  %1191 = vmatprep.subr.bf16.mxu1 %v1257_v18 }
 0x10e   :  { %v320_v57 = vadd.f32 %v1029_v54, %v319_v56  ;;  %v1160_v58 = vpop.f32.mrb[10].mxu0 }
 0x10f   :  { %1168 = vmatmul.mubr.msk.f32.vlgmr.msra.gmra.mrb[0].mxu1 %vm104_vm0, %v146_v29  ;;  %v322_v59 = vpop.f32.mrb[11].mxu0  ;;  %v1259_v29 = vld [vmem:[%s1621_s8 + $0x10] sm:$0xff]  }
 0x110   :  { %1170 = vmatprep.mubr.msk.f32.mxu1 %vm1298_vm1, %v1299_v14  ;;  %v323_v60 = vadd.f32 %v1029_v54, %v322_v59  ;;  %1192 = vmatpush3.bf16.msra.mxu1 %v1257_v18 }
 0x111   :  { %1193 = vmatprep.subr.bf16.mxu1 %v1258_v19 }
 0x112   :  { %v1240_v61 = vpack.c.bf16 %v323_v60, %v320_v57 }
 0x113   :  { %1171 = vmatmul.mubr.msk.f32.gmra.mrb[2].mxu1 %vm104_vm0, %v149_v30  ;;  %v1260_v30 = vld [vmem:[%s1621_s8 + $0x18] sm:$0xff]  }
 0x114   :  { %1173 = vmatprep.mubr.msk.f32.mxu1 %vm1298_vm1, %v1299_v14  ;;  %1241 = vmatpush3.bf16.msra.mxu0 %v1240_v61 }
 0x115   :  { %1180 = vmatprep.subr.mxu0 %v1299_v14  ;;  %1194 = vmatpush3.bf16.msra.mxu1 %v1258_v19 }
 0x116   :  { %1195 = vmatprep.subr.bf16.mxu1 %v1259_v29 }
 0x117   :  { %1174 = vmatmul.mubr.msk.f32.gmra.mrb[4].mxu1 %vm104_vm0, %v154_v31 }
 0x118   :  { %1181 = vmatpush3.msk.msra.mxu0 %vm484_vm5, %v328_v17 }
 0x119   :  { %1196 = vmatpush3.bf16.msra.mxu1 %v1259_v29 }
 0x11a   :  { %1197 = vmatprep.subr.bf16.mxu1 %v1260_v30 }
 0x11d   :  { %1198 = vmatpush3.bf16.msra.mxu1 %v1260_v30  ;;  %v1054_v30 = vld [vmem:[%s1626_s11] ss:$0 sm:$0xff] }
 0x1e2   :  { %v417_v36 = vpop.f32.mrb[0].mxu1 }
 0x1e3   :  { %v431_v38 = vmul.f32 0.125, %v417_v36  ;;  %v1169_v39 = vpop.f32.mrb[1].mxu1 }
 0x1e5   :  { %v437_v40 = vadd.f32 %v434_v37, %v431_v38  ;;  %v1046_v38 = vld [vmem:[%s1622_s9] ss:$0 sm:$0xff] }
 0x1e6   :  { %v422_v41 = vpop.f32.mrb[2].mxu1 }
 0x1e7   :  { %v432_v43 = vmul.f32 0.125, %v422_v41  ;;  %v1172_v44 = vpop.f32.mrb[3].mxu1  ;;  %v441_v45 = vsel %vm440_vm3, %v437_v40, -inf }
 0x1e8   :  { %442 = vmax.xlane.f32.xlu0 %v441_v45 }
 0x1e9   :  { %v438_v46 = vadd.f32 %v435_v42, %v432_v43 }
 0x1ea   :  { %v427_v47 = vpop.f32.mrb[4].mxu1 }
 0x1eb   :  { %v433_v49 = vmul.f32 0.125, %v427_v47  ;;  %v1175_v50 = vpop.f32.mrb[5].mxu1  ;;  %v444_v51 = vsel %vm440_vm3, %v438_v46, -inf }
 0x1ec   :  { %445 = vmax.xlane.f32.xlu0 %v444_v51 }
 0x1ed   :  { %v439_v52 = vadd.f32 %v436_v48, %v433_v49 }
 0x1ef   :  { %v448_v53 = vsel %vm447_vm4, %v439_v52, -inf }
 0x1f0   :  { %449 = vmax.xlane.f32.xlu1 %v448_v53 }
 0x275   :  { %v443_v62 = vpop.xlane.xlu0 %442 }
 0x276   :  { %v451_v63 = vsub.f32 %v437_v40, %v443_v62 }
 0x278   :  { %v454_v0 = vmul.f32 1.442695, %v451_v63 }
 0x279   :  { %v446_v1 = vpop.xlane.xlu0 %445 }
 0x27a   :  { %1273 = vpow2.f32 %v454_v0  ;;  %v452_v2 = vsub.f32 %v438_v46, %v446_v1  ;;  %v1261_v0 = vld [vmem:[%s1623_s12] sm:$0xff]   ;;  %v1262_v1 = vld [vmem:[%s1623_s12 + $0x8] sm:$0xff]  }
 0x27b   :  { %1203 = vmatprep.subr.bf16.mxu0 %v1261_v0 }
 0x27c   :  { %v456_v5 = vmul.f32 1.442695, %v452_v2  ;;  %v1263_v2 = vld [vmem:[%s1623_s12 + $0x10] sm:$0xff]  }
 0x27d   :  { %v450_v6 = vpop.xlane.xlu1 %449 }
 0x27e   :  { %1275 = vpow2.f32 %v456_v5  ;;  %v453_v8 = vsub.f32 %v439_v52, %v450_v6  ;;  %v1264_v5 = vld [vmem:[%s1623_s12 + $0x18] sm:$0xff]   ;;  %v1265_v6 = vld [vmem:[%s1624_s14] sm:$0xff]  }
 0x27f   :  { %1215 = vmatprep.subr.bf16.mxu1 %v1265_v6 }
 0x280   :  { %v458_v9 = vmul.f32 1.442695, %v453_v8  ;;  %v1266_v8 = vld [vmem:[%s1624_s14 + $0x8] sm:$0xff]  }
 0x282   :  { %1277 = vpow2.f32 %v458_v9  ;;  %v1267_v9 = vld [vmem:[%s1624_s14 + $0x10] sm:$0xff]  }
 0x284   :  { %v1274_v10 = vpop.eup %1273 }
 0x285   :  { %v460_v11 = vsel %vm440_vm3, %v1274_v10, 0.0 }
 0x286   :  { %461 = vadd.xlane.f32.xlu1 %v460_v11  ;;  %v1269_v11 = vld [vmem:[%s1624_s14 + $0x20] sm:$0xff]  }
 0x288   :  { %v1276_v12 = vpop.eup %1275 }
 0x289   :  { %v463_v13 = vsel %vm440_vm3, %v1276_v12, 0.0 }
 0x28a   :  { %464 = vadd.xlane.f32.xlu0 %v463_v13 }
 0x28c   :  { %v1278_v15 = vpop.eup %1277 }
 0x28d   :  { %v466_v16 = vsel %vm447_vm4, %v1278_v15, 0.0 }
 0x28e   :  { %467 = vadd.xlane.f32.xlu1 %v466_v16 }
 0x313   :  { %v462_v20 = vpop.xlane.xlu1 %461 }
 0x314   :  { %1279 = vrcp.f32 %v462_v20 }
 0x317   :  { %v465_v21 = vpop.xlane.xlu0 %464 }
 0x318   :  { %1281 = vrcp.f32 %v465_v21 }
 0x31b   :  { %v468_v22 = vpop.xlane.xlu1 %467 }
 0x31c   :  { %1283 = vrcp.f32 %v468_v22 }
 0x31e   :  { %v1280_v23 = vpop.eup %1279 }
 0x31f   :  { %v472_v24 = vmul.f32 %v1280_v23, %v1274_v10  ;;  %v1268_v10 = vld [vmem:[%s1624_s14 + $0x18] sm:$0xff]  }
 0x321   :  { %1183 = vmatmul.mubr.msk.f32.vlgmr.msra.gmra.mrb[12].mxu0 %vm440_vm3, %v472_v24  ;;  %v1053_v24 = vld [vmem:[%s1625_s10] ss:$0 sm:$0xff] }
 0x322   :  { %v1282_v25 = vpop.eup %1281  ;;  %1185 = vmatprep.mubr.msk.f32.mxu0 %vm1298_vm1, %v1299_v14  ;;  %1204 = vmatpush3.bf16.msra.mxu0 %v1261_v0 }
 0x323   :  { %v473_v26 = vmul.f32 %v1282_v25, %v1276_v12  ;;  %1205 = vmatprep.subr.bf16.mxu0 %v1262_v1  ;;  %v1270_v12 = vld [vmem:[%s1624_s14 + $0x28] sm:$0xff]  }
 0x325   :  { %1186 = vmatmul.mubr.msk.f32.gmra.mrb[14].mxu0 %vm440_vm3, %v473_v26 }
 0x326   :  { %v1284_v27 = vpop.eup %1283  ;;  %1188 = vmatprep.mubr.msk.f32.mxu0 %vm1298_vm1, %v1299_v14  ;;  %1206 = vmatpush3.bf16.msra.mxu0 %v1262_v1 }
 0x327   :  { %v474_v28 = vmul.f32 %v1284_v27, %v1278_v15  ;;  %1207 = vmatprep.subr.bf16.mxu0 %v1263_v2 }
 0x329   :  { %1189 = vmatmul.mubr.msk.f32.gmra.mrb[16].mxu0 %vm440_vm3, %v474_v28 }
 0x32a   :  { %1208 = vmatpush3.bf16.msra.mxu0 %v1263_v2 }
 0x32b   :  { %1209 = vmatprep.subr.bf16.mxu0 %v1264_v5 }
 0x32e   :  { %1210 = vmatpush3.bf16.msra.mxu0 %v1264_v5 }
 0x3f4   :  { %v554_v31 = vpop.f32.mrb[12].mxu0 }
 0x3f5   :  { %v1184_v32 = vpop.f32.mrb[13].mxu0 }
 0x3f8   :  { %v559_v33 = vpop.f32.mrb[14].mxu0 }
 0x3f9   :  { %v568_v34 = vpack.c.bf16 %v559_v33, %v554_v31  ;;  %v1187_v14 = vpop.f32.mrb[15].mxu0 }
 0x3fb   :  { %1199 = vmatprep.mubr.msk.bf16.mxu1 %vm104_vm0, %v568_v34 }
 0x3fc   :  { %v564_v35 = vpop.f32.mrb[16].mxu0 }
 0x3fd   :  { %v569_v36 = vpack.c.bf16 %v564_v35, %v564_v35  ;;  %v1190_v37 = vpop.f32.mrb[17].mxu0 }
 0x3ff   :  { %1200 = vmatmul.mubr.msk.bf16.vlgmr.msra.gmra.mrb[8].mxu1 %vm104_vm0, %v569_v36 }
 0x400   :  { %1216 = vmatpush3.bf16.msra.mxu1 %v1265_v6 }
 0x401   :  { %1217 = vmatprep.subr.bf16.mxu1 %v1266_v8 }
 0x404   :  { %1218 = vmatpush3.bf16.msra.mxu1 %v1266_v8 }
 0x405   :  { %1219 = vmatprep.subr.bf16.mxu1 %v1267_v9 }
 0x408   :  { %1220 = vmatpush3.bf16.msra.mxu1 %v1267_v9 }
 0x409   :  { %1221 = vmatprep.subr.bf16.mxu1 %v1268_v10 }
 0x40c   :  { %1222 = vmatpush3.bf16.msra.mxu1 %v1268_v10 }
 0x40d   :  { %1223 = vmatprep.subr.bf16.mxu1 %v1269_v11 }
 0x410   :  { %1224 = vmatpush3.bf16.msra.mxu1 %v1269_v11 }
 0x411   :  { %1225 = vmatprep.subr.bf16.mxu1 %v1270_v12 }
 0x414   :  { %1226 = vmatpush3.bf16.msra.mxu1 %v1270_v12 }
 0x4d2   :  { %v1201_v39 = vpop.f32.mrb[8].mxu1 }
 0x4d3   :  { %v649_v40 = vpop.f32.mrb[9].mxu1  ;;  %v658_v41 = vadd.f32 %v1201_v39, %v1046_v38  ;;  %v1272_v39 = vld [vmem:[%s1624_s14 + $0x38] sm:$0xff]  }
 0x4d4   :  { %v650_v42 = vadd.f32 %v1046_v38, %v649_v40  ;;  %v1202_v43 = vpop.f32.mrb[10].mxu1  ;;  %v1055_v40 = vld [vmem:[%s1627_s13] ss:$0 sm:$0xff] }
 0x4d5   :  { %v652_v44 = vpop.f32.mrb[11].mxu1  ;;  %v665_v49 = vadd.f32 %v658_v41, %v1423_v7 }
 0x4d6   :  { %v653_v45 = vadd.f32 %v1046_v38, %v652_v44  ;;  %v663_v46 = vadd.f32 %v650_v42, %v1407_v3  ;;  %v1271_v38 = vld [vmem:[%s1624_s14 + $0x30] sm:$0xff]  }
 0x4d7   :  { %v673_v51 = vsel %vm672_vm6, %v665_v49, 0.0  ;;  %1227 = vmatprep.subr.bf16.mxu1 %v1271_v38 }
 0x4d8   :  { %v666_v47 = vsel %vm104_vm0, %v663_v46, 0.0  ;;  %v664_v48 = vadd.f32 %v653_v45, %v1412_v4  ;;  %1228 = vmatpush3.bf16.msra.mxu1 %v1271_v38 }
 0x4d9   :  { %667 = vadd.xlane.f32.xlu0 %v666_v47  ;;  %1229 = vmatprep.subr.bf16.mxu1 %v1272_v39 }
 0x4da   :  { %v669_v50 = vsel %vm104_vm0, %v664_v48, 0.0 }
 0x4db   :  { %670 = vadd.xlane.f32.xlu1 %v669_v50 }
 0x4dc   :  { %1230 = vmatpush3.bf16.msra.mxu1 %v1272_v39 }
 0x4dd   :  { %674 = vadd.xlane.f32.xlu0 %v673_v51 }
 0x566   :  { %v668_v52 = vpop.xlane.xlu0 %667 }
 0x567   :  { %v677_v53 = vmul.f32 0.015625, %v668_v52 }
 0x568   :  { %v671_v54 = vpop.xlane.xlu1 %670 }
 0x569   :  { %v680_v55 = vsub.f32 %v663_v46, %v677_v53  ;;  %v678_v56 = vmul.f32 0.015625, %v671_v54  ;;  %v1062_v53 = vld [vmem:[%s1628_s15] ss:$0 sm:$0xff] }
 0x56a   :  { %v675_v3 = vpop.xlane.xlu0 %674 }
 0x56b   :  { %v681_v57 = vsub.f32 %v664_v48, %v678_v56  ;;  %v679_v58 = vmul.f32 0.015625, %v675_v3  ;;  %v683_v59 = vmul.f32 %v680_v55, %v680_v55 }
 0x56d   :  { %v1531_v4 = vsub.f32 %v665_v49, %v679_v58  ;;  %v686_v7 = vsel %vm104_vm0, %v683_v59, 0.0  ;;  %v684_v60 = vmul.f32 %v681_v57, %v681_v57 }
 0x56e   :  { %687 = vadd.xlane.f32.xlu1 %v686_v7 }
 0x56f   :  { %v689_v61 = vsel %vm104_vm0, %v684_v60, 0.0  ;;  %v685_v62 = vmul.f32 %v1531_v4, %v1531_v4 }
 0x570   :  { %690 = vadd.xlane.f32.xlu0 %v689_v61 }
 0x571   :  { %v692_v63 = vsel %vm672_vm6, %v685_v62, 0.0 }
 0x572   :  { %693 = vadd.xlane.f32.xlu1 %v692_v63 }
 0x5fb   :  { %v688_v13 = vpop.xlane.xlu1 %687 }
 0x5fc   :  { %v695_v15 = vmul.f32 0.015625, %v688_v13 }
 0x5fd   :  { %v691_v16 = vpop.xlane.xlu0 %690 }
 0x5fe   :  { %v698_v17 = vadd.f32 1e-05, %v695_v15  ;;  %v696_v18 = vmul.f32 0.015625, %v691_v16 }
 0x5ff   :  { %v694_v19 = vpop.xlane.xlu1 %693 }
 0x600   :  { %1285 = vrsqrt.f32 %v698_v17  ;;  %v699_v20 = vadd.f32 1e-05, %v696_v18  ;;  %v697_v21 = vmul.f32 0.015625, %v694_v19 }
 0x602   :  { %1287 = vrsqrt.f32 %v699_v20  ;;  %v700_v22 = vadd.f32 1e-05, %v697_v21 }
 0x604   :  { %1289 = vrsqrt.f32 %v700_v22 }
 0x60a   :  { %v1286_v23 = vpop.eup %1285 }
 0x60b   :  { %v704_v25 = vmul.f32 %v1286_v23, %v680_v55 }
 0x60c   :  { %v1288_v26 = vpop.eup %1287 }
 0x60d   :  { %v705_v27 = vmul.f32 %v1288_v26, %v681_v57  ;;  %v714_v28 = vmul.f32 %v1053_v24, %v704_v25 }
 0x60e   :  { %v1290_v29 = vpop.eup %1289 }
 0x60f   :  { %v706_v31 = vmul.f32 %v1290_v29, %v1531_v4  ;;  %v715_v32 = vmul.f32 %v1053_v24, %v705_v27  ;;  %v724_v34 = vadd.f32 %v1054_v30, %v714_v28  ;;  %v1071_v29 = vld [vmem:[%s1629_s16] ss:$0 sm:$0xff] }
 0x611   :  { %v716_v33 = vmul.f32 %v1053_v24, %v706_v31  ;;  %v725_v14 = vadd.f32 %v1054_v30, %v715_v32  ;;  %v1072_v32 = vld [vmem:[%s1630_s17] ss:$0 sm:$0xff] }
 0x613   :  { %v726_v35 = vadd.f32 %v1054_v30, %v716_v33  ;;  %v727_v36 = vpack.c.bf16 %v725_v14, %v724_v34 }
 0x615   :  { %v728_v37 = vpack.c.bf16 %v726_v35, %v726_v35  ;;  %1211 = vmatprep.mubr.msk.bf16.mxu0 %vm104_vm0, %v727_v36 }
 0x617   :  { %1212 = vmatmul.mubr.msk.bf16.vlgmr.msra.gmra.mrb[20].mxu0 %vm104_vm0, %v728_v37 }
 0x6ea   :  { %v1213_v41 = vpop.f32.mrb[20].mxu0 }
 0x6eb   :  { %v817_v42 = vadd.f32 %v1213_v41, %v1055_v40  ;;  %v808_v43 = vpop.f32.mrb[21].mxu0 }
 0x6ec   :  { %v809_v44 = vadd.f32 %v1055_v40, %v808_v43  ;;  %v1214_v45 = vpop.f32.mrb[22].mxu0 }
 0x6ed   :  { %v811_v46 = vpop.f32.mrb[23].mxu0  ;;  %v824_v48 = vmax.f32 %v817_v42, 0.0 }
 0x6ee   :  { %v812_v47 = vadd.f32 %v1055_v40, %v811_v46  ;;  %v822_v49 = vmax.f32 %v809_v44, 0.0 }
 0x6ef   :  { %v826_v52 = vpack.c.bf16 %v824_v48, %v824_v48 }
 0x6f0   :  { %v823_v50 = vmax.f32 %v812_v47, 0.0 }
 0x6f2   :  { %v825_v51 = vpack.c.bf16 %v823_v50, %v822_v49 }
 0x6f4   :  { %1231 = vmatprep.mubr.bf16.mxu1 %v825_v51 }
 0x6f5   :  { %1232 = vmatmul.mubr.bf16.vlgmr.msra.gmra.mrb[12].mxu1 %v826_v52 }
 0x7c8   :  { %v1233_v54 = vpop.f32.mrb[12].mxu1 }
 0x7c9   :  { %v932_v55 = vpop.f32.mrb[13].mxu1  ;;  %v941_v56 = vadd.f32 %v1233_v54, %v1062_v53 }
 0x7ca   :  { %v933_v3 = vadd.f32 %v1062_v53, %v932_v55  ;;  %v1234_v57 = vpop.f32.mrb[14].mxu1 }
 0x7cb   :  { %v935_v58 = vpop.f32.mrb[15].mxu1  ;;  %v948_v61 = vadd.f32 %v941_v56, %v726_v35 }
 0x7cc   :  { %v936_v59 = vadd.f32 %v1062_v53, %v935_v58  ;;  %v946_v4 = vadd.f32 %v933_v3, %v724_v34 }
 0x7cd   :  { %v955_v63 = vsel %vm672_vm6, %v948_v61, 0.0 }
 0x7ce   :  { %v949_v7 = vsel %vm104_vm0, %v946_v4, 0.0  ;;  %v947_v60 = vadd.f32 %v936_v59, %v725_v14 }
 0x7cf   :  { %950 = vadd.xlane.f32.xlu0 %v949_v7 }
 0x7d0   :  { %v952_v62 = vsel %vm104_vm0, %v947_v60, 0.0 }
 0x7d1   :  { %953 = vadd.xlane.f32.xlu1 %v952_v62 }
 0x7d3   :  { %956 = vadd.xlane.f32.xlu0 %v955_v63 }
 0x85c   :  { %v951_v0 = vpop.xlane.xlu0 %950 }
 0x85d   :  { %v958_v1 = vmul.f32 0.015625, %v951_v0 }
 0x85e   :  { %v954_v2 = vpop.xlane.xlu1 %953 }
 0x85f   :  { %v961_v5 = vsub.f32 %v946_v4, %v958_v1  ;;  %v959_v6 = vmul.f32 0.015625, %v954_v2 }
 0x860   :  { %v957_v8 = vpop.xlane.xlu0 %956 }
 0x861   :  { %v962_v9 = vsub.f32 %v947_v60, %v959_v6  ;;  %v960_v10 = vmul.f32 0.015625, %v957_v8  ;;  %v964_v11 = vmul.f32 %v961_v5, %v961_v5 }
 0x863   :  { %v963_v12 = vsub.f32 %v948_v61, %v960_v10  ;;  %v967_v13 = vsel %vm104_vm0, %v964_v11, 0.0  ;;  %v965_v15 = vmul.f32 %v962_v9, %v962_v9 }
 0x864   :  { %968 = vadd.xlane.f32.xlu1 %v967_v13 }
 0x865   :  { %v970_v16 = vsel %vm104_vm0, %v965_v15, 0.0  ;;  %v966_v17 = vmul.f32 %v963_v12, %v963_v12 }
 0x866   :  { %971 = vadd.xlane.f32.xlu0 %v970_v16 }
 0x867   :  { %v973_v18 = vsel %vm672_vm6, %v966_v17, 0.0 }
 0x868   :  { %974 = vadd.xlane.f32.xlu1 %v973_v18 }
 0x8f1   :  { %v969_v19 = vpop.xlane.xlu1 %968 }
 0x8f2   :  { %v976_v20 = vmul.f32 0.015625, %v969_v19 }
 0x8f3   :  { %v972_v21 = vpop.xlane.xlu0 %971 }
 0x8f4   :  { %v979_v22 = vadd.f32 1e-05, %v976_v20  ;;  %v977_v23 = vmul.f32 0.015625, %v972_v21 }
 0x8f5   :  { %v975_v24 = vpop.xlane.xlu1 %974 }
 0x8f6   :  { %1291 = vrsqrt.f32 %v979_v22  ;;  %v980_v25 = vadd.f32 1e-05, %v977_v23  ;;  %v978_v26 = vmul.f32 0.015625, %v975_v24 }
 0x8f8   :  { %1293 = vrsqrt.f32 %v980_v25  ;;  %v981_v27 = vadd.f32 1e-05, %v978_v26 }
 0x8fa   :  { %1295 = vrsqrt.f32 %v981_v27 }
 0x900   :  { %v1292_v28 = vpop.eup %1291 }
 0x901   :  { %v985_v30 = vmul.f32 %v1292_v28, %v961_v5 }
 0x902   :  { %v1294_v31 = vpop.eup %1293 }
 0x903   :  { %v995_v33 = vmul.f32 %v1071_v29, %v985_v30  ;;  %v986_v34 = vmul.f32 %v1294_v31, %v962_v9 }
 0x904   :  { %v1296_v14 = vpop.eup %1295 }
 0x905   :  { %v1005_v35 = vadd.f32 %v1072_v32, %v995_v33  ;;  %v996_v36 = vmul.f32 %v1071_v29, %v986_v34  ;;  %v987_v37 = vmul.f32 %v1296_v14, %v963_v12 }
 0x907   :  { %1008 = vst.msk [vmem:[%s1631_s18] sm:$0xff] %vm104_vm0, %v1005_v35  ;;  %v1006_v38 = vadd.f32 %v1072_v32, %v996_v36  ;;  %v997_v39 = vmul.f32 %v1071_v29, %v987_v37 }
 0x909   :  { %1009 = vst.msk [vmem:[%s1631_s18 + $0x8] sm:$0xff] %vm104_vm0, %v1006_v38  ;;  %v1007_v40 = vadd.f32 %v1072_v32, %v997_v39 }
 0x90b   :  { %1010 = vst.msk [vmem:[%s1631_s18 + $0x10] sm:$0xf] %vm672_vm6, %v1007_v40 }

// kernel: transformer_forward.22
= control target key start
LH: loop header
LB: loop body
LE: loop exit
PB: predicated region body
PF: predicated region fallthrough
CT: control target
= control target key end

     0   :  { %vm1609_vm0 = vcmask 523264   ;;  %vm1612_vm1 = vcmask 519168   ;;  %s2644_s1 = inlined_call_operand.vmem [shape: bf16[2048,64], index: 1, kind: input, shape index: {}]   ;;  %s2645_s0 = inlined_call_operand.vmem [shape: bf16[20,2048], index: 0, kind: input, shape index: {}]   ;;  %s2646_s2 = inlined_call_operand.vmem [shape: f32[1,64], index: 2, kind: input, shape index: {}]   ;;  %s2647_s3 = inlined_call_operand.vmem [shape: f32[1,64], index: 3, kind: input, shape index: {}]   ;;  %s2648_s4 = inlined_call_operand.vmem [shape: f32[20,64], index: 4, kind: output, shape index: {}]  }
   0x1   :  { %v2004_v0 = vld [vmem:[%s2644_s1 + $0x40] sm:$0xff]   ;;  %v2008_v4 = vld [vmem:[%s2644_s1 + $0x48] sm:$0xff]   ;;  %v2012_v8 = vld [vmem:[%s2644_s1 + $0x50] sm:$0xff]  }
   0x2   :  { %v2005_v1 = vld [vmem:[%s2644_s1 + $0xc0] sm:$0xff]   ;;  %1780 = vmatprep.subr.bf16.mxu0 %v2004_v0  ;;  %v2009_v5 = vld [vmem:[%s2644_s1 + $0xc8] sm:$0xff]   ;;  %v2013_v9 = vld [vmem:[%s2644_s1 + $0xd0] sm:$0xff]  }
   0x3   :  { %v2006_v2 = vld [vmem:[%s2644_s1] sm:$0xff]   ;;  %1808 = vmatprep.subr.bf16.mxu1 %v2005_v1  ;;  %v2010_v6 = vld [vmem:[%s2644_s1 + $0x8] sm:$0xff]   ;;  %v2014_v10 = vld [vmem:[%s2644_s1 + $0x10] sm:$0xff]  }
   0x4   :  { %v2007_v3 = vld [vmem:[%s2644_s1 + $0x80] sm:$0xff]   ;;  %1781 = vmatpush3.bf16.msra.mxu0 %v2006_v2  ;;  %v2011_v7 = vld [vmem:[%s2644_s1 + $0x88] sm:$0xff]   ;;  %v2015_v11 = vld [vmem:[%s2644_s1 + $0x90] sm:$0xff]  }
   0x5   :  { %1809 = vmatpush3.bf16.msra.mxu1 %v2007_v3  ;;  %1782 = vmatprep.subr.bf16.mxu0 %v2008_v4  ;;  %v2016_v12 = vld [vmem:[%s2644_s1 + $0x58] sm:$0xff]   ;;  %v2020_v16 = vld [vmem:[%s2644_s1 + $0x60] sm:$0xff]   ;;  %v2024_v20 = vld [vmem:[%s2644_s1 + $0x68] sm:$0xff]  }
   0x6   :  { %1810 = vmatprep.subr.bf16.mxu1 %v2009_v5  ;;  %v2017_v13 = vld [vmem:[%s2644_s1 + $0xd8] sm:$0xff]   ;;  %v2021_v17 = vld [vmem:[%s2644_s1 + $0xe0] sm:$0xff]   ;;  %v2025_v21 = vld [vmem:[%s2644_s1 + $0xe8] sm:$0xff]  }
   0x7   :  { %v2018_v14 = vld [vmem:[%s2644_s1 + $0x18] sm:$0xff]   ;;  %v2022_v18 = vld [vmem:[%s2644_s1 + $0x20] sm:$0xff]   ;;  %v2026_v22 = vld [vmem:[%s2644_s1 + $0x28] sm:$0xff]  }
   0x8   :  { %1783 = vmatpush3.bf16.msra.mxu0 %v2010_v6  ;;  %v2019_v15 = vld [vmem:[%s2644_s1 + $0x98] sm:$0xff]   ;;  %v2023_v19 = vld [vmem:[%s2644_s1 + $0xa0] sm:$0xff]   ;;  %v2027_v23 = vld [vmem:[%s2644_s1 + $0xa8] sm:$0xff]  }
   0x9   :  { %1811 = vmatpush3.bf16.msra.mxu1 %v2011_v7  ;;  %1784 = vmatprep.subr.bf16.mxu0 %v2012_v8  ;;  %v2028_v24 = vld [vmem:[%s2644_s1 + $0x70] sm:$0xff]   ;;  %v2032_v28 = vld [vmem:[%s2644_s1 + $0x78] sm:$0xff]   ;;  %v18_v32 = vld [vmem:[%s2645_s0] sm:$0xff] }
   0xa   :  { %1812 = vmatprep.subr.bf16.mxu1 %v2013_v9  ;;  %v2029_v25 = vld [vmem:[%s2644_s1 + $0xf0] sm:$0xff]   ;;  %v2033_v29 = vld [vmem:[%s2644_s1 + $0xf8] sm:$0xff]   ;;  %v26_v33 = vld [vmem:[%s2645_s0 + $0x40] sm:$0xff] }
   0xb   :  { %v2030_v26 = vld [vmem:[%s2644_s1 + $0x30] sm:$0xff]   ;;  %v2034_v30 = vld [vmem:[%s2644_s1 + $0x38] sm:$0xff]   ;;  %v19_v34 = vld [vmem:[%s2645_s0 + $0x8] sm:$0xff]  ;;  %v1618_v35 = vcombine.low %v18_v32, %v26_v33  ;;  %v1619_v36 = vcombine.high %v18_v32, %v26_v33 }
   0xc   :  { %1785 = vmatpush3.bf16.msra.mxu0 %v2014_v10  ;;  %v2031_v27 = vld [vmem:[%s2644_s1 + $0xb0] sm:$0xff]   ;;  %v2035_v31 = vld [vmem:[%s2644_s1 + $0xb8] sm:$0xff]   ;;  %v27_v37 = vld [vmem:[%s2645_s0 + $0x48] sm:$0xff] }
   0xd   :  { %1813 = vmatpush3.bf16.msra.mxu1 %v2015_v11  ;;  %1786 = vmatprep.subr.bf16.mxu0 %v2016_v12  ;;  %v1620_v38 = vcombine.low %v19_v34, %v27_v37  ;;  %v1621_v39 = vcombine.high %v19_v34, %v27_v37  ;;  %v2036_v40 = vld [vmem:[%s2644_s1 + $0x140] sm:$0xff]   ;;  %v2040_v44 = vld [vmem:[%s2644_s1 + $0x148] sm:$0xff]   ;;  %v2044_v48 = vld [vmem:[%s2644_s1 + $0x150] sm:$0xff]  }
   0xe   :  { %1814 = vmatprep.subr.bf16.mxu1 %v2017_v13  ;;  %1234 = vmatprep.mubr.bf16.mxu0 %v1619_v36  ;;  %v2037_v41 = vld [vmem:[%s2644_s1 + $0x1c0] sm:$0xff]   ;;  %v2041_v45 = vld [vmem:[%s2644_s1 + $0x1c8] sm:$0xff]   ;;  %v2045_v49 = vld [vmem:[%s2644_s1 + $0x1d0] sm:$0xff]  }
   0xf   :  { %1282 = vmatprep.mubr.bf16.mxu1 %v1621_v39  ;;  %v2038_v42 = vld [vmem:[%s2644_s1 + $0x100] sm:$0xff]   ;;  %v2042_v46 = vld [vmem:[%s2644_s1 + $0x108] sm:$0xff]   ;;  %v2046_v50 = vld [vmem:[%s2644_s1 + $0x110] sm:$0xff]  }
  0x10   :  { %1787 = vmatpush3.bf16.msra.mxu0 %v2018_v14  ;;  %v2039_v43 = vld [vmem:[%s2644_s1 + $0x180] sm:$0xff]   ;;  %v2043_v47 = vld [vmem:[%s2644_s1 + $0x188] sm:$0xff]   ;;  %v2047_v51 = vld [vmem:[%s2644_s1 + $0x190] sm:$0xff]  }
  0x11   :  { %1815 = vmatpush3.bf16.msra.mxu1 %v2019_v15  ;;  %1788 = vmatprep.subr.bf16.mxu0 %v2020_v16  ;;  %v2048_v52 = vld [vmem:[%s2644_s1 + $0x158] sm:$0xff]   ;;  %v2052_v56 = vld [vmem:[%s2644_s1 + $0x160] sm:$0xff]   ;;  %v2056_v60 = vld [vmem:[%s2644_s1 + $0x168] sm:$0xff]  }
  0x12   :  { %1816 = vmatprep.subr.bf16.mxu1 %v2021_v17  ;;  %v2049_v53 = vld [vmem:[%s2644_s1 + $0x1d8] sm:$0xff]   ;;  %v2053_v57 = vld [vmem:[%s2644_s1 + $0x1e0] sm:$0xff]   ;;  %v2057_v61 = vld [vmem:[%s2644_s1 + $0x1e8] sm:$0xff]  }
  0x13   :  { %v2050_v54 = vld [vmem:[%s2644_s1 + $0x118] sm:$0xff]   ;;  %v2054_v58 = vld [vmem:[%s2644_s1 + $0x120] sm:$0xff]   ;;  %v2059_v0 = vld [vmem:[%s2644_s1 + $0x128] sm:$0xff]  }
  0x14   :  { %1789 = vmatpush3.bf16.msra.mxu0 %v2022_v18  ;;  %v2051_v55 = vld [vmem:[%s2644_s1 + $0x198] sm:$0xff]   ;;  %v2055_v59 = vld [vmem:[%s2644_s1 + $0x1a0] sm:$0xff]   ;;  %v2060_v2 = vld [vmem:[%s2644_s1 + $0x1a8] sm:$0xff]  }
  0x15   :  { %1817 = vmatpush3.bf16.msra.mxu1 %v2023_v19  ;;  %1790 = vmatprep.subr.bf16.mxu0 %v2024_v20  ;;  %v34_v62 = vld [vmem:[%s2645_s0 + $0x80] sm:$0x33]  ;;  %v35_v3 = vld [vmem:[%s2645_s0 + $0x88] sm:$0x33]  ;;  %v2064_v6 = vld [vmem:[%s2644_s1 + $0x170] sm:$0xff]  }
  0x16   :  { %1818 = vmatprep.subr.bf16.mxu1 %v2025_v21  ;;  %v1635_v63 = vcombine.high %v34_v62, %v34_v62  ;;  %v1634_v1 = vcombine.low %v34_v62, %v34_v62  ;;  %v1637_v4 = vcombine.high %v35_v3, %v35_v3  ;;  %v1636_v5 = vcombine.low %v35_v3, %v35_v3  ;;  %v2065_v7 = vld [vmem:[%s2644_s1 + $0x1f0] sm:$0xff]   ;;  %v2068_v10 = vld [vmem:[%s2644_s1 + $0x178] sm:$0xff]   ;;  %v23_v62 = vld [vmem:[%s2645_s0 + $0x28] sm:$0xff] }
  0x17   :  { %v2066_v8 = vld [vmem:[%s2644_s1 + $0x130] sm:$0xff]   ;;  %v2069_v11 = vld [vmem:[%s2644_s1 + $0x1f8] sm:$0xff]  }
  0x18   :  { %1791 = vmatpush3.bf16.msra.mxu0 %v2026_v22  ;;  %v2067_v9 = vld [vmem:[%s2644_s1 + $0x1b0] sm:$0xff]   ;;  %v2070_v12 = vld [vmem:[%s2644_s1 + $0x138] sm:$0xff]   ;;  %v2072_v22 = vld [vmem:[%s2644_s1 + $0x240] sm:$0xff]  }
  0x19   :  { %1819 = vmatpush3.bf16.msra.mxu1 %v2027_v23  ;;  %1792 = vmatprep.subr.bf16.mxu0 %v2028_v24  ;;  %v2071_v13 = vld [vmem:[%s2644_s1 + $0x1b8] sm:$0xff]   ;;  %v20_v14 = vld [vmem:[%s2645_s0 + $0x10] sm:$0xff]  ;;  %v2073_v23 = vld [vmem:[%s2644_s1 + $0x2c0] sm:$0xff]  }
  0x1a   :  { %1820 = vmatprep.subr.bf16.mxu1 %v2029_v25  ;;  %v28_v15 = vld [vmem:[%s2645_s0 + $0x50] sm:$0xff]  ;;  %v21_v16 = vld [vmem:[%s2645_s0 + $0x18] sm:$0xff]  ;;  %v2074_v24 = vld [vmem:[%s2644_s1 + $0x200] sm:$0xff]  }
  0x1b   :  { %v1622_v17 = vcombine.low %v20_v14, %v28_v15  ;;  %v1623_v18 = vcombine.high %v20_v14, %v28_v15  ;;  %v29_v19 = vld [vmem:[%s2645_s0 + $0x58] sm:$0xff]  ;;  %v2075_v25 = vld [vmem:[%s2644_s1 + $0x280] sm:$0xff]   ;;  %v2082_v33 = vld [vmem:[%s2644_s1 + $0x250] sm:$0xff]  }
  0x1c   :  { %1793 = vmatpush3.bf16.msra.mxu0 %v2030_v26  ;;  %v1624_v20 = vcombine.low %v21_v16, %v29_v19  ;;  %v1625_v21 = vcombine.high %v21_v16, %v29_v19  ;;  %v2076_v26 = vld [vmem:[%s2644_s1 + $0x248] sm:$0xff]   ;;  %v2083_v34 = vld [vmem:[%s2644_s1 + $0x2d0] sm:$0xff]  }
  0x1d   :  { %1821 = vmatpush3.bf16.msra.mxu1 %v2031_v27  ;;  %1794 = vmatprep.subr.bf16.mxu0 %v2032_v28  ;;  %v2077_v27 = vld [vmem:[%s2644_s1 + $0x2c8] sm:$0xff]   ;;  %v2085_v37 = vld [vmem:[%s2644_s1 + $0x210] sm:$0xff]  }
  0x1e   :  { %1822 = vmatprep.subr.bf16.mxu1 %v2033_v29  ;;  %v2078_v28 = vld [vmem:[%s2644_s1 + $0x208] sm:$0xff]   ;;  %v2086_v39 = vld [vmem:[%s2644_s1 + $0x290] sm:$0xff]  }
  0x1f   :  { %v2079_v29 = vld [vmem:[%s2644_s1 + $0x288] sm:$0xff]   ;;  %v2118_v15 = vld [vmem:[%s2644_s1 + $0x350] sm:$0xff]  }
  0x20   :  { %1795 = vmatpush3.bf16.msra.mxu0 %v2034_v30  ;;  %v36_v30 = vld [vmem:[%s2645_s0 + $0x90] sm:$0x33] }
  0x21   :  { %1823 = vmatpush3.bf16.msra.mxu1 %v2035_v31  ;;  %1836 = vmatprep.subr.bf16.mxu0 %v2036_v40  ;;  %v1639_v31 = vcombine.high %v36_v30, %v36_v30  ;;  %v1638_v32 = vcombine.low %v36_v30, %v36_v30  ;;  %v2088_v40 = vld [vmem:[%s2644_s1 + $0x258] sm:$0xff]   ;;  %v2119_v16 = vld [vmem:[%s2644_s1 + $0x3d0] sm:$0xff]   ;;  %v2132_v30 = vld [vmem:[%s2644_s1 + $0x368] sm:$0xff]  }
  0x22   :  { %1864 = vmatprep.subr.bf16.mxu1 %v2037_v41  ;;  %v2089_v41 = vld [vmem:[%s2644_s1 + $0x2d8] sm:$0xff]   ;;  %v2121_v19 = vld [vmem:[%s2644_s1 + $0x310] sm:$0xff]  }
  0x23   :  { %1235 = vmatmul.mubr.bf16.vlgmr.msra.gmra.mrb[0].mxu0 %v1618_v35  ;;  %v37_v35 = vld [vmem:[%s2645_s0 + $0x98] sm:$0x33] }
  0x24   :  { %1283 = vmatmul.mubr.bf16.vlgmr.msra.gmra.mrb[0].mxu1 %v1620_v38  ;;  %1837 = vmatpush3.bf16.msra.mxu0 %v2038_v42  ;;  %v1641_v36 = vcombine.high %v37_v35, %v37_v35  ;;  %v1640_v38 = vcombine.low %v37_v35, %v37_v35  ;;  %v2090_v42 = vld [vmem:[%s2644_s1 + $0x218] sm:$0xff]   ;;  %v2137_v35 = vld [vmem:[%s2644_s1 + $0x3f0] sm:$0xff]  }
  0x25   :  { %1865 = vmatpush3.bf16.msra.mxu1 %v2039_v43  ;;  %1838 = vmatprep.subr.bf16.mxu0 %v2040_v44  ;;  %v2091_v43 = vld [vmem:[%s2644_s1 + $0x298] sm:$0xff]   ;;  %v2092_v44 = vld [vmem:[%s2644_s1 + $0x260] sm:$0xff]  }
  0x26   :  { %1866 = vmatprep.subr.bf16.mxu1 %v2041_v45  ;;  %1242 = vmatprep.mubr.bf16.mxu0 %v1635_v63  ;;  %v2093_v45 = vld [vmem:[%s2644_s1 + $0x2e0] sm:$0xff]  }
  0x27   :  { %1290 = vmatprep.mubr.bf16.mxu1 %v1637_v4  ;;  %v2108_v4 = vld [vmem:[%s2644_s1 + $0x340] sm:$0xff]  }
  0x28   :  { %1839 = vmatpush3.bf16.msra.mxu0 %v2042_v46  ;;  %v2094_v46 = vld [vmem:[%s2644_s1 + $0x220] sm:$0xff]  }
  0x29   :  { %1867 = vmatpush3.bf16.msra.mxu1 %v2043_v47  ;;  %1840 = vmatprep.subr.bf16.mxu0 %v2044_v48  ;;  %v2095_v47 = vld [vmem:[%s2644_s1 + $0x2a0] sm:$0xff]   ;;  %v2096_v48 = vld [vmem:[%s2644_s1 + $0x268] sm:$0xff]  }
  0x2a   :  { %1868 = vmatprep.subr.bf16.mxu1 %v2045_v49  ;;  %v2097_v49 = vld [vmem:[%s2644_s1 + $0x2e8] sm:$0xff]  }
  0x2b   :  { %1243 = vmatmul.mubr.bf16.gmra.mrb[4].mxu0 %v1634_v1  ;;  %v31_v1 = vld [vmem:[%s2645_s0 + $0x68] sm:$0xff] }
  0x2c   :  { %1841 = vmatpush3.bf16.msra.mxu0 %v2046_v50  ;;  %1291 = vmatmul.mubr.bf16.gmra.mrb[4].mxu1 %v1636_v5  ;;  %v2098_v50 = vld [vmem:[%s2644_s1 + $0x228] sm:$0xff]   ;;  %v1629_v3 = vcombine.high %v23_v62, %v31_v1  ;;  %v2109_v5 = vld [vmem:[%s2644_s1 + $0x3c0] sm:$0xff]  }
  0x2d   :  { %1869 = vmatpush3.bf16.msra.mxu1 %v2047_v51  ;;  %1842 = vmatprep.subr.bf16.mxu0 %v2048_v52  ;;  %v2099_v51 = vld [vmem:[%s2644_s1 + $0x2a8] sm:$0xff]   ;;  %v2100_v52 = vld [vmem:[%s2644_s1 + $0x270] sm:$0xff]  }
  0x2e   :  { %1870 = vmatprep.subr.bf16.mxu1 %v2049_v53  ;;  %1330 = vmatprep.mubr.bf16.mxu0 %v1623_v18  ;;  %v2101_v53 = vld [vmem:[%s2644_s1 + $0x2f0] sm:$0xff]  }
  0x2f   :  { %1378 = vmatprep.mubr.bf16.mxu1 %v1625_v21  ;;  %v2122_v21 = vld [vmem:[%s2644_s1 + $0x390] sm:$0xff]  }
  0x30   :  { %1843 = vmatpush3.bf16.msra.mxu0 %v2050_v54  ;;  %v2102_v54 = vld [vmem:[%s2644_s1 + $0x230] sm:$0xff]  }
  0x31   :  { %1871 = vmatpush3.bf16.msra.mxu1 %v2051_v55  ;;  %1844 = vmatprep.subr.bf16.mxu0 %v2052_v56  ;;  %v2103_v55 = vld [vmem:[%s2644_s1 + $0x2b0] sm:$0xff]   ;;  %v2104_v56 = vld [vmem:[%s2644_s1 + $0x278] sm:$0xff]  }
  0x32   :  { %1872 = vmatprep.subr.bf16.mxu1 %v2053_v57  ;;  %v2105_v57 = vld [vmem:[%s2644_s1 + $0x2f8] sm:$0xff]  }
  0x34   :  { %1845 = vmatpush3.bf16.msra.mxu0 %v2054_v58  ;;  %v2106_v58 = vld [vmem:[%s2644_s1 + $0x238] sm:$0xff]  }
  0x35   :  { %1873 = vmatpush3.bf16.msra.mxu1 %v2055_v59  ;;  %1846 = vmatprep.subr.bf16.mxu0 %v2056_v60  ;;  %v2107_v59 = vld [vmem:[%s2644_s1 + $0x2b8] sm:$0xff]   ;;  %v22_v60 = vld [vmem:[%s2645_s0 + $0x20] sm:$0xff] }
  0x36   :  { %1874 = vmatprep.subr.bf16.mxu1 %v2057_v61  ;;  %v30_v61 = vld [vmem:[%s2645_s0 + $0x60] sm:$0xff] }
  0x37   :  { %v1626_v63 = vcombine.low %v22_v60, %v30_v61 }
  0x38   :  { %1847 = vmatpush3.bf16.msra.mxu0 %v2059_v0  ;;  %v1627_v0 = vcombine.high %v22_v60, %v30_v61 }
  0x39   :  { %1875 = vmatpush3.bf16.msra.mxu1 %v2060_v2  ;;  %1848 = vmatprep.subr.bf16.mxu0 %v2064_v6  ;;  %v1628_v2 = vcombine.low %v23_v62, %v31_v1  ;;  %v2110_v6 = vld [vmem:[%s2644_s1 + $0x300] sm:$0xff]  }
  0x3a   :  { %1876 = vmatprep.subr.bf16.mxu1 %v2065_v7  ;;  %v2111_v7 = vld [vmem:[%s2644_s1 + $0x380] sm:$0xff]  }
  0x3c   :  { %1849 = vmatpush3.bf16.msra.mxu0 %v2066_v8  ;;  %v2112_v8 = vld [vmem:[%s2644_s1 + $0x348] sm:$0xff]  }
  0x3d   :  { %1877 = vmatpush3.bf16.msra.mxu1 %v2067_v9  ;;  %1850 = vmatprep.subr.bf16.mxu0 %v2068_v10  ;;  %v2113_v9 = vld [vmem:[%s2644_s1 + $0x3c8] sm:$0xff]  }
  0x3e   :  { %1878 = vmatprep.subr.bf16.mxu1 %v2069_v11  ;;  %v2114_v10 = vld [vmem:[%s2644_s1 + $0x308] sm:$0xff]  }
  0x3f   :  { %v2115_v11 = vld [vmem:[%s2644_s1 + $0x388] sm:$0xff]  }
  0x40   :  { %1851 = vmatpush3.bf16.msra.mxu0 %v2070_v12  ;;  %v38_v12 = vld [vmem:[%s2645_s0 + $0xa0] sm:$0x33] }
  0x41   :  { %1879 = vmatpush3.bf16.msra.mxu1 %v2071_v13  ;;  %1892 = vmatprep.subr.bf16.mxu0 %v2072_v22  ;;  %v1643_v13 = vcombine.high %v38_v12, %v38_v12  ;;  %v1642_v14 = vcombine.low %v38_v12, %v38_v12  ;;  %v2124_v22 = vld [vmem:[%s2644_s1 + $0x358] sm:$0xff]  }
  0x42   :  { %1920 = vmatprep.subr.bf16.mxu1 %v2073_v23  ;;  %v2125_v23 = vld [vmem:[%s2644_s1 + $0x3d8] sm:$0xff]  }
  0x43   :  { %1331 = vmatmul.mubr.bf16.vlgmr.msra.gmra.mrb[8].mxu0 %v1622_v17  ;;  %v39_v17 = vld [vmem:[%s2645_s0 + $0xa8] sm:$0x33] }
  0x44   :  { %1379 = vmatmul.mubr.bf16.vlgmr.msra.gmra.mrb[8].mxu1 %v1624_v20  ;;  %1893 = vmatpush3.bf16.msra.mxu0 %v2074_v24  ;;  %v1645_v18 = vcombine.high %v39_v17, %v39_v17  ;;  %v1644_v20 = vcombine.low %v39_v17, %v39_v17  ;;  %v2126_v24 = vld [vmem:[%s2644_s1 + $0x318] sm:$0xff]  }
  0x45   :  { %1921 = vmatpush3.bf16.msra.mxu1 %v2075_v25  ;;  %1894 = vmatprep.subr.bf16.mxu0 %v2076_v26  ;;  %v2127_v25 = vld [vmem:[%s2644_s1 + $0x398] sm:$0xff]   ;;  %v2128_v26 = vld [vmem:[%s2644_s1 + $0x360] sm:$0xff]  }
  0x46   :  { %1922 = vmatprep.subr.bf16.mxu1 %v2077_v27  ;;  %1338 = vmatprep.mubr.bf16.mxu0 %v1639_v31  ;;  %v2129_v27 = vld [vmem:[%s2644_s1 + $0x3e0] sm:$0xff]   ;;  %v2133_v31 = vld [vmem:[%s2644_s1 + $0x3e8] sm:$0xff]  }
  0x47   :  { %1386 = vmatprep.mubr.bf16.mxu1 %v1641_v36  ;;  %v2138_v36 = vld [vmem:[%s2644_s1 + $0x330] sm:$0xff]  }
  0x48   :  { %1895 = vmatpush3.bf16.msra.mxu0 %v2078_v28  ;;  %v2130_v28 = vld [vmem:[%s2644_s1 + $0x320] sm:$0xff]  }
  0x49   :  { %1923 = vmatpush3.bf16.msra.mxu1 %v2079_v29  ;;  %1896 = vmatprep.subr.bf16.mxu0 %v2082_v33  ;;  %v2131_v29 = vld [vmem:[%s2644_s1 + $0x3a0] sm:$0xff]   ;;  %v2135_v33 = vld [vmem:[%s2644_s1 + $0x3a8] sm:$0xff]  }
  0x4a   :  { %1924 = vmatprep.subr.bf16.mxu1 %v2083_v34  ;;  %v2136_v34 = vld [vmem:[%s2644_s1 + $0x370] sm:$0xff]  }
  0x4b   :  { %1339 = vmatmul.mubr.bf16.gmra.mrb[12].mxu0 %v1638_v32  ;;  %v2134_v32 = vld [vmem:[%s2644_s1 + $0x328] sm:$0xff]  }
  0x4c   :  { %1897 = vmatpush3.bf16.msra.mxu0 %v2085_v37  ;;  %1387 = vmatmul.mubr.bf16.gmra.mrb[12].mxu1 %v1640_v38  ;;  %v2139_v37 = vld [vmem:[%s2644_s1 + $0x3b0] sm:$0xff]   ;;  %v2140_v38 = vld [vmem:[%s2644_s1 + $0x378] sm:$0xff]  }
  0x4d   :  { %1925 = vmatpush3.bf16.msra.mxu1 %v2086_v39  ;;  %1898 = vmatprep.subr.bf16.mxu0 %v2088_v40  ;;  %v2141_v39 = vld [vmem:[%s2644_s1 + $0x3f8] sm:$0xff]  }
  0x4e   :  { %1926 = vmatprep.subr.bf16.mxu1 %v2089_v41  ;;  %1426 = vmatprep.mubr.bf16.mxu0 %v1627_v0  ;;  %v2142_v40 = vld [vmem:[%s2644_s1 + $0x338] sm:$0xff]  }
  0x4f   :  { %1474 = vmatprep.mubr.bf16.mxu1 %v1629_v3  ;;  %v2143_v41 = vld [vmem:[%s2644_s1 + $0x3b8] sm:$0xff]  }
  0x50   :  { %1899 = vmatpush3.bf16.msra.mxu0 %v2090_v42  ;;  %v24_v42 = vld [vmem:[%s2645_s0 + $0x30] sm:$0xff] }
  0x51   :  { %1927 = vmatpush3.bf16.msra.mxu1 %v2091_v43  ;;  %1900 = vmatprep.subr.bf16.mxu0 %v2092_v44  ;;  %v32_v43 = vld [vmem:[%s2645_s0 + $0x70] sm:$0xff]  ;;  %v25_v44 = vld [vmem:[%s2645_s0 + $0x38] sm:$0xff] }
  0x52   :  { %1928 = vmatprep.subr.bf16.mxu1 %v2093_v45  ;;  %v1630_v45 = vcombine.low %v24_v42, %v32_v43 }
  0x54   :  { %1901 = vmatpush3.bf16.msra.mxu0 %v2094_v46  ;;  %v1631_v46 = vcombine.high %v24_v42, %v32_v43 }
  0x55   :  { %1929 = vmatpush3.bf16.msra.mxu1 %v2095_v47  ;;  %1902 = vmatprep.subr.bf16.mxu0 %v2096_v48  ;;  %v33_v47 = vld [vmem:[%s2645_s0 + $0x78] sm:$0xff]  ;;  %v40_v48 = vld [vmem:[%s2645_s0 + $0xb0] sm:$0x33] }
  0x56   :  { %1930 = vmatprep.subr.bf16.mxu1 %v2097_v49  ;;  %v41_v49 = vld [vmem:[%s2645_s0 + $0xb8] sm:$0x33] }
  0x58   :  { %1903 = vmatpush3.bf16.msra.mxu0 %v2098_v50  ;;  %v1632_v50 = vcombine.low %v25_v44, %v33_v47 }
  0x59   :  { %1931 = vmatpush3.bf16.msra.mxu1 %v2099_v51  ;;  %1904 = vmatprep.subr.bf16.mxu0 %v2100_v52  ;;  %v1633_v51 = vcombine.high %v25_v44, %v33_v47  ;;  %v1647_v52 = vcombine.high %v40_v48, %v40_v48 }
  0x5a   :  { %1932 = vmatprep.subr.bf16.mxu1 %v2101_v53  ;;  %v1649_v53 = vcombine.high %v41_v49, %v41_v49 }
  0x5c   :  { %1905 = vmatpush3.bf16.msra.mxu0 %v2102_v54  ;;  %v1646_v54 = vcombine.low %v40_v48, %v40_v48 }
  0x5d   :  { %1933 = vmatpush3.bf16.msra.mxu1 %v2103_v55  ;;  %1906 = vmatprep.subr.bf16.mxu0 %v2104_v56  ;;  %v1648_v55 = vcombine.low %v41_v49, %v41_v49 }
  0x5e   :  { %1934 = vmatprep.subr.bf16.mxu1 %v2105_v57 }
  0x60   :  { %1907 = vmatpush3.bf16.msra.mxu0 %v2106_v58 }
  0x61   :  { %1935 = vmatpush3.bf16.msra.mxu1 %v2107_v59  ;;  %1948 = vmatprep.subr.bf16.mxu0 %v2108_v4 }
  0x62   :  { %1976 = vmatprep.subr.bf16.mxu1 %v2109_v5 }
  0x63   :  { %1427 = vmatmul.mubr.bf16.vlgmr.msra.gmra.mrb[16].mxu0 %v1626_v63 }
  0x64   :  { %1475 = vmatmul.mubr.bf16.vlgmr.msra.gmra.mrb[16].mxu1 %v1628_v2  ;;  %1949 = vmatpush3.bf16.msra.mxu0 %v2110_v6 }
  0x65   :  { %1977 = vmatpush3.bf16.msra.mxu1 %v2111_v7  ;;  %1950 = vmatprep.subr.bf16.mxu0 %v2112_v8 }
  0x66   :  { %1978 = vmatprep.subr.bf16.mxu1 %v2113_v9  ;;  %1434 = vmatprep.mubr.bf16.mxu0 %v1643_v13 }
  0x67   :  { %1482 = vmatprep.mubr.bf16.mxu1 %v1645_v18 }
  0x68   :  { %1951 = vmatpush3.bf16.msra.mxu0 %v2114_v10 }
  0x69   :  { %1979 = vmatpush3.bf16.msra.mxu1 %v2115_v11  ;;  %1952 = vmatprep.subr.bf16.mxu0 %v2118_v15 }
  0x6a   :  { %1980 = vmatprep.subr.bf16.mxu1 %v2119_v16 }
  0x6b   :  { %1435 = vmatmul.mubr.bf16.gmra.mrb[20].mxu0 %v1642_v14 }
  0x6c   :  { %1953 = vmatpush3.bf16.msra.mxu0 %v2121_v19  ;;  %1483 = vmatmul.mubr.bf16.gmra.mrb[20].mxu1 %v1644_v20 }
  0x6d   :  { %1981 = vmatpush3.bf16.msra.mxu1 %v2122_v21  ;;  %1954 = vmatprep.subr.bf16.mxu0 %v2124_v22 }
  0x6e   :  { %1982 = vmatprep.subr.bf16.mxu1 %v2125_v23  ;;  %1522 = vmatprep.mubr.bf16.mxu0 %v1631_v46 }
  0x6f   :  { %1570 = vmatprep.mubr.bf16.mxu1 %v1633_v51 }
  0x70   :  { %1955 = vmatpush3.bf16.msra.mxu0 %v2126_v24 }
  0x71   :  { %1983 = vmatpush3.bf16.msra.mxu1 %v2127_v25  ;;  %1956 = vmatprep.subr.bf16.mxu0 %v2128_v26 }
  0x72   :  { %1984 = vmatprep.subr.bf16.mxu1 %v2129_v27 }
  0x74   :  { %1957 = vmatpush3.bf16.msra.mxu0 %v2130_v28 }
  0x75   :  { %1985 = vmatpush3.bf16.msra.mxu1 %v2131_v29  ;;  %1958 = vmatprep.subr.bf16.mxu0 %v2132_v30 }
  0x76   :  { %1986 = vmatprep.subr.bf16.mxu1 %v2133_v31 }
  0x78   :  { %1959 = vmatpush3.bf16.msra.mxu0 %v2134_v32 }
  0x79   :  { %1987 = vmatpush3.bf16.msra.mxu1 %v2135_v33  ;;  %1960 = vmatprep.subr.bf16.mxu0 %v2136_v34 }
  0x7a   :  { %1988 = vmatprep.subr.bf16.mxu1 %v2137_v35 }
  0x7c   :  { %1961 = vmatpush3.bf16.msra.mxu0 %v2138_v36 }
  0x7d   :  { %1989 = vmatpush3.bf16.msra.mxu1 %v2139_v37  ;;  %1962 = vmatprep.subr.bf16.mxu0 %v2140_v38 }
  0x7e   :  { %1990 = vmatprep.subr.bf16.mxu1 %v2141_v39 }
  0x80   :  { %1963 = vmatpush3.bf16.msra.mxu0 %v2142_v40 }
  0x81   :  { %1991 = vmatpush3.bf16.msra.mxu1 %v2143_v41 }
  0x83   :  { %1523 = vmatmul.mubr.bf16.vlgmr.msra.gmra.mrb[24].mxu0 %v1630_v45 }
  0x84   :  { %1571 = vmatmul.mubr.bf16.vlgmr.msra.gmra.mrb[24].mxu1 %v1632_v50  ;;  %1530 = vmatprep.mubr.bf16.mxu0 %v1647_v52 }
  0x85   :  { %1578 = vmatprep.mubr.bf16.mxu1 %v1649_v53 }
  0x8b   :  { %1531 = vmatmul.mubr.bf16.gmra.mrb[28].mxu0 %v1646_v54 }
  0x8c   :  { %1579 = vmatmul.mubr.bf16.gmra.mrb[28].mxu1 %v1648_v55 }
  0xf6   :  { %v1796_v56 = vpop.f32.mrb[0].mxu0 }
  0xf7   :  { %v1824_v57 = vpop.f32.mrb[0].mxu1  ;;  %v1797_v58 = vpop.f32.mrb[1].mxu0 }
  0xf8   :  { %v1798_v59 = vadd.f32 %v1797_v58, %v1796_v56  ;;  %v1825_v60 = vpop.f32.mrb[1].mxu1  ;;  %v1799_v61 = vpop.f32.mrb[2].mxu0 }
  0xf9   :  { %v1826_v62 = vadd.f32 %v1825_v60, %v1824_v57  ;;  %v1827_v63 = vpop.f32.mrb[2].mxu1  ;;  %v1800_v0 = vpop.f32.mrb[3].mxu0 }
  0xfa   :  { %v1801_v1 = vadd.f32 %v1800_v0, %v1799_v61  ;;  %v1828_v2 = vpop.f32.mrb[3].mxu1 }
  0xfb   :  { %v1285_v3 = vadd.f32 %v1826_v62, %v1798_v59  ;;  %v1829_v4 = vadd.f32 %v1828_v2, %v1827_v63 }
  0xfd   :  { %v1288_v5 = vadd.f32 %v1829_v4, %v1801_v1 }
  0xfe   :  { %v1802_v6 = vpop.f32.mrb[4].mxu0 }
  0xff   :  { %v1803_v7 = vpop.f32.mrb[5].mxu0  ;;  %v1830_v10 = vpop.f32.mrb[4].mxu1 }
 0x100   :  { %v1804_v8 = vadd.f32 %v1803_v7, %v1802_v6  ;;  %v1805_v9 = vpop.f32.mrb[6].mxu0  ;;  %v1831_v12 = vpop.f32.mrb[5].mxu1 }
 0x101   :  { %v1806_v11 = vpop.f32.mrb[7].mxu0  ;;  %v1832_v13 = vadd.f32 %v1831_v12, %v1830_v10  ;;  %v1833_v14 = vpop.f32.mrb[6].mxu1 }
 0x102   :  { %v1834_v15 = vpop.f32.mrb[7].mxu1 }
 0x103   :  { %v1293_v16 = vadd.f32 %v1832_v13, %v1804_v8 }
 0x116   :  { %v1852_v17 = vpop.f32.mrb[8].mxu0 }
 0x117   :  { %v1880_v18 = vpop.f32.mrb[8].mxu1  ;;  %v1853_v19 = vpop.f32.mrb[9].mxu0 }
 0x118   :  { %v1854_v20 = vadd.f32 %v1853_v19, %v1852_v17  ;;  %v1881_v21 = vpop.f32.mrb[9].mxu1  ;;  %v1855_v22 = vpop.f32.mrb[10].mxu0 }
 0x119   :  { %v1882_v23 = vadd.f32 %v1881_v21, %v1880_v18  ;;  %v1883_v24 = vpop.f32.mrb[10].mxu1  ;;  %v1856_v25 = vpop.f32.mrb[11].mxu0  ;;  %v1778_v21 = vld [vmem:[%s2646_s2] ss:$0 sm:$0xff] }
 0x11a   :  { %v1333_v26 = vadd.f32 %v1854_v20, %v1285_v3  ;;  %v1857_v27 = vadd.f32 %v1856_v25, %v1855_v22  ;;  %v1884_v28 = vpop.f32.mrb[11].mxu1  ;;  %v1779_v25 = vld [vmem:[%s2647_s3] ss:$0 sm:$0xff] }
 0x11b   :  { %v1885_v29 = vadd.f32 %v1884_v28, %v1883_v24 }
 0x11c   :  { %v1381_v30 = vadd.f32 %v1882_v23, %v1333_v26  ;;  %v1336_v31 = vadd.f32 %v1857_v27, %v1288_v5 }
 0x11e   :  { %v1384_v32 = vadd.f32 %v1885_v29, %v1336_v31  ;;  %v1858_v33 = vpop.f32.mrb[12].mxu0 }
 0x11f   :  { %v1859_v34 = vpop.f32.mrb[13].mxu0  ;;  %v1886_v37 = vpop.f32.mrb[12].mxu1 }
 0x120   :  { %v1860_v35 = vadd.f32 %v1859_v34, %v1858_v33  ;;  %v1861_v36 = vpop.f32.mrb[14].mxu0  ;;  %v1887_v40 = vpop.f32.mrb[13].mxu1 }
 0x121   :  { %v1862_v38 = vpop.f32.mrb[15].mxu0  ;;  %v1888_v41 = vadd.f32 %v1887_v40, %v1886_v37  ;;  %v1889_v42 = vpop.f32.mrb[14].mxu1 }
 0x122   :  { %v1341_v39 = vadd.f32 %v1860_v35, %v1293_v16  ;;  %v1890_v43 = vpop.f32.mrb[15].mxu1 }
 0x124   :  { %v1389_v44 = vadd.f32 %v1888_v41, %v1341_v39 }
 0x136   :  { %v1908_v45 = vpop.f32.mrb[16].mxu0 }
 0x137   :  { %v1936_v46 = vpop.f32.mrb[16].mxu1  ;;  %v1909_v47 = vpop.f32.mrb[17].mxu0 }
 0x138   :  { %v1910_v48 = vadd.f32 %v1909_v47, %v1908_v45  ;;  %v1937_v49 = vpop.f32.mrb[17].mxu1  ;;  %v1911_v50 = vpop.f32.mrb[18].mxu0 }
 0x139   :  { %v1938_v51 = vadd.f32 %v1937_v49, %v1936_v46  ;;  %v1939_v52 = vpop.f32.mrb[18].mxu1  ;;  %v1912_v53 = vpop.f32.mrb[19].mxu0 }
 0x13a   :  { %v1429_v54 = vadd.f32 %v1910_v48, %v1381_v30  ;;  %v1913_v55 = vadd.f32 %v1912_v53, %v1911_v50  ;;  %v1940_v56 = vpop.f32.mrb[19].mxu1 }
 0x13b   :  { %v1941_v57 = vadd.f32 %v1940_v56, %v1939_v52 }
 0x13c   :  { %v1477_v58 = vadd.f32 %v1938_v51, %v1429_v54  ;;  %v1432_v59 = vadd.f32 %v1913_v55, %v1384_v32 }
 0x13e   :  { %v1480_v60 = vadd.f32 %v1941_v57, %v1432_v59  ;;  %v1914_v61 = vpop.f32.mrb[20].mxu0 }
 0x13f   :  { %v1915_v62 = vpop.f32.mrb[21].mxu0  ;;  %v1942_v1 = vpop.f32.mrb[20].mxu1 }
 0x140   :  { %v1916_v63 = vadd.f32 %v1915_v62, %v1914_v61  ;;  %v1917_v0 = vpop.f32.mrb[22].mxu0  ;;  %v1943_v4 = vpop.f32.mrb[21].mxu1 }
 0x141   :  { %v1918_v2 = vpop.f32.mrb[23].mxu0  ;;  %v1944_v5 = vadd.f32 %v1943_v4, %v1942_v1  ;;  %v1945_v6 = vpop.f32.mrb[22].mxu1 }
 0x142   :  { %v1437_v3 = vadd.f32 %v1916_v63, %v1389_v44  ;;  %v1946_v7 = vpop.f32.mrb[23].mxu1 }
 0x144   :  { %v1485_v8 = vadd.f32 %v1944_v5, %v1437_v3 }
 0x156   :  { %v1964_v9 = vpop.f32.mrb[24].mxu0 }
 0x157   :  { %v1992_v10 = vpop.f32.mrb[24].mxu1  ;;  %v1965_v11 = vpop.f32.mrb[25].mxu0 }
 0x158   :  { %v1966_v12 = vadd.f32 %v1965_v11, %v1964_v9  ;;  %v1993_v13 = vpop.f32.mrb[25].mxu1  ;;  %v1967_v14 = vpop.f32.mrb[26].mxu0 }
 0x159   :  { %v1994_v15 = vadd.f32 %v1993_v13, %v1992_v10  ;;  %v1995_v16 = vpop.f32.mrb[26].mxu1  ;;  %v1968_v17 = vpop.f32.mrb[27].mxu0 }
 0x15a   :  { %v1525_v18 = vadd.f32 %v1966_v12, %v1477_v58  ;;  %v1969_v19 = vadd.f32 %v1968_v17, %v1967_v14  ;;  %v1996_v20 = vpop.f32.mrb[27].mxu1 }
 0x15b   :  { %v1997_v22 = vadd.f32 %v1996_v20, %v1995_v16 }
 0x15c   :  { %v1573_v23 = vadd.f32 %v1994_v15, %v1525_v18  ;;  %v1528_v24 = vadd.f32 %v1969_v19, %v1480_v60 }
 0x15e   :  { %v1593_v26 = vmul.f32 %v1778_v21, %v1573_v23  ;;  %v1576_v27 = vadd.f32 %v1997_v22, %v1528_v24  ;;  %v1970_v28 = vpop.f32.mrb[28].mxu0 }
 0x15f   :  { %v1998_v29 = vpop.f32.mrb[28].mxu1  ;;  %v1971_v30 = vpop.f32.mrb[29].mxu0 }
 0x160   :  { %v1603_v31 = vadd.f32 %v1779_v25, %v1593_v26  ;;  %v1594_v32 = vmul.f32 %v1778_v21, %v1576_v27  ;;  %v1972_v33 = vadd.f32 %v1971_v30, %v1970_v28  ;;  %v1999_v34 = vpop.f32.mrb[29].mxu1  ;;  %v1973_v35 = vpop.f32.mrb[30].mxu0 }
 0x161   :  { %v2000_v36 = vadd.f32 %v1999_v34, %v1998_v29  ;;  %v2001_v37 = vpop.f32.mrb[30].mxu1  ;;  %v1974_v38 = vpop.f32.mrb[31].mxu0 }
 0x162   :  { %v1606_v39 = vmax.f32 %v1603_v31, 0.0  ;;  %v1604_v40 = vadd.f32 %v1779_v25, %v1594_v32  ;;  %v1533_v41 = vadd.f32 %v1972_v33, %v1485_v8  ;;  %v2002_v42 = vpop.f32.mrb[31].mxu1 }
 0x164   :  { %1610 = vst.msk [vmem:[%s2648_s4] sm:$0xff] %vm1609_vm0, %v1606_v39  ;;  %v1607_v43 = vmax.f32 %v1604_v40, 0.0  ;;  %v1581_v44 = vadd.f32 %v2000_v36, %v1533_v41 }
 0x166   :  { %1611 = vst.msk [vmem:[%s2648_s4 + $0x8] sm:$0xff] %vm1609_vm0, %v1607_v43  ;;  %v1595_v45 = vmul.f32 %v1778_v21, %v1581_v44 }
 0x168   :  { %v1605_v46 = vadd.f32 %v1779_v25, %v1595_v45 }
 0x16a   :  { %v1608_v47 = vmax.f32 %v1605_v46, 0.0 }
 0x16c   :  { %1613 = vst.msk [vmem:[%s2648_s4 + $0x10] sm:$0xf] %vm1612_vm1, %v1608_v47 }

</bundles_post_ra>
